<compile_context>
chip_gen: v6e
topology: v6e:2x2x1
jax: 0.10.0
libtpu: 0.0.40
codegen_flags: <defaults>
</compile_context>

<pallas_src>
import functools

import jax
import jax.numpy as jnp
from jax.experimental import pallas as pl
from jax.experimental.pallas import tpu as pltpu

# Darknet "leaky" activation; the reference repo builds nn.LeakyReLU(0.1).
LEAKY_SLOPE = 0.1


def _round_up(v, m):
    return (v + m - 1) // m * m


def _pick_row_tile(ho):
    for th in (8, 4, 2, 1):
        if ho % th == 0:
            return th
    return 1


# ----------------------------------------------------------------------------
# Pallas kernels
# ----------------------------------------------------------------------------
def conv_pallas(xe, w3d, shift, ke, ho, wo, leaky, out_dtype, residual=None):
    """Fused conv + bias/BN shift + LeakyReLU (+ optional fused residual add).

    xe       : (N, He, We, Ce) bf16 NHWC activation, already spatially padded
               and (for stride-2 convs) space-to-depth transformed, so the
               conv here is always a stride-1 ke x ke conv, He = Ho + ke - 1.
    w3d      : (ke, ke*Ce, Coutp) bf16 weights; per-ky slice has the kx
               windows stacked along the contraction axis; BN/bias scale is
               pre-folded; Coutp is a multiple of 128 (lane-dense stores).
    shift    : (1, Coutp) f32 additive bias / folded-BN shift.
    residual : optional (N, Ho, Wo, Coutp) bf16 tensor added after activation.
    Returns  : (N*Ho*Wo, Coutp) array of dtype `out_dtype`.
    """
    n, he, we, ce = xe.shape
    ke_w, kce, coutp = w3d.shape
    assert ke_w == ke and kce == ke * ce
    assert he >= ho + ke - 1 and we >= wo + ke - 1
    assert coutp % 128 == 0
    fuse_res = residual is not None
    if fuse_res:
        assert residual.shape == (n, ho, wo, coutp)

    th = _pick_row_tile(ho)
    n_row = ho // th

    def kernel(*refs):
        if fuse_res:
            x_ref, w_ref, s_ref, r_ref, o_ref = refs
        else:
            x_ref, w_ref, s_ref, o_ref = refs
        r0 = pl.multiple_of(pl.program_id(1) * th, th)
        # Output rows [r0, r0+th) need input rows [r0, r0+th+ke-1).
        slab = x_ref[pl.ds(r0, th + ke - 1), :, :]          # (th+ke-1, We, Ce)
        acc = None
        for ky in range(ke):
            rows = slab[ky:ky + th]                          # (th, We, Ce)
            if ke == 1:
                win = rows
            else:
                # In-kernel "im2col" along x only: stack the ke shifted
                # windows on the channel axis -> one dot of depth ke*Ce / ky.
                win = jnp.concatenate(
                    [rows[:, kx:kx + wo, :] for kx in range(ke)], axis=-1)
            win = win.reshape(th * wo, ke * ce)
            d = jnp.dot(win, w_ref[ky], preferred_element_type=jnp.float32)
            acc = d if acc is None else acc + d
        y = acc + s_ref[...]                                 # bias / BN shift
        if leaky:
            y = jnp.where(y > 0, y, LEAKY_SLOPE * y)
        if fuse_res:
            y = y + r_ref[...].astype(jnp.float32)
        o_ref[...] = y.astype(o_ref.dtype)

    in_specs = [
        # Constant along the row axis -> fetched once per image.
        pl.BlockSpec((None, he, we, ce), lambda i, r: (i, 0, 0, 0)),
        pl.BlockSpec((ke, ke * ce, coutp), lambda i, r: (0, 0, 0)),
        pl.BlockSpec((1, coutp), lambda i, r: (0, 0)),
    ]
    args = [xe, w3d, shift]
    if fuse_res:
        in_specs.append(
            pl.BlockSpec((th * wo, coutp), lambda i, r: (i * n_row + r, 0)))
        args.append(residual.reshape(n * ho * wo, coutp))

    return pl.pallas_call(
        kernel,
        out_shape=jax.ShapeDtypeStruct((n * ho * wo, coutp), out_dtype),
        grid=(n, n_row),
        in_specs=in_specs,
        out_specs=pl.BlockSpec((th * wo, coutp), lambda i, r: (i * n_row + r, 0)),
        compiler_params=pltpu.CompilerParams(
            dimension_semantics=("parallel", "parallel"),
            vmem_limit_bytes=32 * 1024 * 1024),
    )(*args)


def _add_kernel(a_ref, b_ref, o_ref):
    o_ref[...] = (a_ref[...].astype(jnp.float32)
                  + b_ref[...].astype(jnp.float32)).astype(o_ref.dtype)


def shortcut_add(a, b):
    """Standalone residual add (only when the add cannot be fused into the
    producing conv).  Channel width is a multiple of 128 -> lane-dense."""
    assert a.shape == b.shape
    n, h, w, c = a.shape
    m = n * h * w
    tm = m
    for cand in (512, 256, 128, 64, 32, 16, 8):
        if m % cand == 0:
            tm = cand
            break
    out = pl.pallas_call(
        _add_kernel,
        out_shape=jax.ShapeDtypeStruct((m, c), a.dtype),
        grid=(m // tm,),
        in_specs=[pl.BlockSpec((tm, c), lambda i: (i, 0)),
                  pl.BlockSpec((tm, c), lambda i: (i, 0))],
        out_specs=pl.BlockSpec((tm, c), lambda i: (i, 0)),
        compiler_params=pltpu.CompilerParams(
            dimension_semantics=("parallel",)),
    )(a.reshape(m, c), b.reshape(m, c))
    return out.reshape(n, h, w, c)


# ----------------------------------------------------------------------------
# Plain-JAX glue (halo pad, space-to-depth, upsample, yolo reshape)
# ----------------------------------------------------------------------------
def conv_layer(x, info, p, residual=None, out_dtype=jnp.bfloat16):
    n, h, w, ce_in = x.shape
    k = int(info['size'])
    s = int(info['stride'])
    pad = (k - 1) // 2
    cout = int(info['filters'])
    coutp = _round_up(cout, 128)

    if x.dtype != jnp.bfloat16:          # network input / f32 sources only
        x = x.astype(jnp.bfloat16)
    if pad:
        x = jnp.pad(x, ((0, 0), (pad, pad), (pad, pad), (0, 0)))
    hp, wp = h + 2 * pad, w + 2 * pad
    ho = (hp - k) // s + 1
    wo = (wp - k) // s + 1

    if s == 1:
        ke, xe = k, x
    else:
        # Space-to-depth: a k x k / stride-s conv becomes a stride-1
        # ceil(k/s) x ceil(k/s) conv over an (s*s*Ce)-channel input.
        assert hp % s == 0 and wp % s == 0
        ke = (k + s - 1) // s
        xe = x.reshape(n, hp // s, s, wp // s, s, ce_in)
        xe = xe.transpose(0, 1, 3, 2, 4, 5).reshape(
            n, hp // s, wp // s, s * s * ce_in)

    if residual is not None and residual.dtype != jnp.bfloat16:
        residual = residual.astype(jnp.bfloat16)

    out2d = conv_pallas(xe, p['w3d'], p['shift'], ke, ho, wo,
                        info['activation'] == 'leaky', out_dtype, residual)
    # Keep the 128-padded channel width between layers (padding lanes stay
    # exactly zero); only the YOLO heads slice back to the real width.
    return out2d.reshape(n, ho, wo, coutp)


def upsample_nearest(x, s):
    n, h, w, c = x.shape
    y = jnp.broadcast_to(x[:, :, None, :, None, :], (n, h, s, w, s, c))
    return y.reshape(n, h * s, w * s, c)


def yolo_view(x_nhwc, info):
    # Yololayer.forward:
    #   x.view(-1, n_anchor, box_attr, lh, lw).permute(0, 1, 3, 4, 2)
    # expressed directly on the NHWC activation (identical output tensor).
    # Pure data movement -> plain JAX / XLA.
    n_anchor = len(info['mask'].split(','))
    box_attr = int(info['classes']) + 5
    n, h, w, c = x_nhwc.shape
    assert c == n_anchor * box_attr
    return x_nhwc.reshape(n, h, w, n_anchor, box_attr).transpose(0, 3, 1, 2, 4)


# ----------------------------------------------------------------------------
# Mini Darknet53-style config (exercises conv/shortcut/route/upsample/yolo)
# ----------------------------------------------------------------------------
MODEL_CFG = [
    {'type': 'convolutional', 'batch_normalize': '1', 'filters': '8',  'size': '3', 'stride': '1', 'activation': 'leaky'},
    {'type': 'convolutional', 'batch_normalize': '1', 'filters': '16', 'size': '3', 'stride': '2', 'activation': 'leaky'},
    {'type': 'convolutional', 'batch_normalize': '1', 'filters': '8',  'size': '1', 'stride': '1', 'activation': 'leaky'},
    {'type': 'convolutional', 'batch_normalize': '1', 'filters': '16', 'size': '3', 'stride': '1', 'activation': 'leaky'},
    {'type': 'shortcut', 'from': '-3', 'activation': 'linear'},
    {'type': 'convolutional', 'batch_normalize': '1', 'filters': '32', 'size': '3', 'stride': '2', 'activation': 'leaky'},
    {'type': 'convolutional', 'batch_normalize': '1', 'filters': '16', 'size': '1', 'stride': '1', 'activation': 'leaky'},
    {'type': 'convolutional', 'batch_normalize': '1', 'filters': '32', 'size': '3', 'stride': '1', 'activation': 'leaky'},
    {'type': 'shortcut', 'from': '-3', 'activation': 'linear'},
    {'type': 'convolutional', 'batch_normalize': '1', 'filters': '32', 'size': '1', 'stride': '1', 'activation': 'leaky'},
    {'type': 'convolutional', 'batch_normalize': '0', 'filters': '21', 'size': '1', 'stride': '1', 'activation': 'linear'},
    {'type': 'yolo', 'mask': '3,4,5', 'anchors': '10,13, 16,30, 33,23, 30,61, 62,45, 59,119',
     'classes': '2', 'ignore_thresh': '0.7'},
    {'type': 'route', 'layers': '-3'},
    {'type': 'convolutional', 'batch_normalize': '1', 'filters': '16', 'size': '1', 'stride': '1', 'activation': 'leaky'},
    {'type': 'upsample', 'stride': '2'},
    {'type': 'route', 'layers': '-1, 4'},
    {'type': 'convolutional', 'batch_normalize': '1', 'filters': '16', 'size': '3', 'stride': '1', 'activation': 'leaky'},
    {'type': 'convolutional', 'batch_normalize': '0', 'filters': '21', 'size': '1', 'stride': '1', 'activation': 'linear'},
    {'type': 'yolo', 'mask': '0,1,2', 'anchors': '10,13, 16,30, 33,23, 30,61, 62,45, 59,119',
     'classes': '2', 'ignore_thresh': '0.7'},
]


# ----------------------------------------------------------------------------
# Parameter preparation (arrays only in the pytrees; statics stay in cfg)
# ----------------------------------------------------------------------------
def prep_conv_weight(weight, scale, k, stride, cin_padded, in_layout, coutp):
    """torch (Cout, Cin, K, K) -> (ke, ke*Ce, Coutp) bf16:
      * BN/bias scale folded in, Cout zero-padded to Coutp (multiple of 128),
      * real Cin rows scattered into the padded-Cin positions of the producing
        layer's channel layout,
      * for stride 2, rearranged for the space-to-depth input,
      * per-ky kx-windows stacked along the contraction axis (kx fold)."""
    cout = weight.shape[0]
    w = jnp.transpose(weight, (2, 3, 1, 0)) * scale[None, None, None, :]
    w = jnp.pad(w, ((0, 0), (0, 0), (0, 0), (0, coutp - cout)))
    wp = jnp.zeros((k, k, cin_padded, coutp), jnp.float32)
    r = 0
    for off, cnt in in_layout:
        wp = wp.at[:, :, off:off + cnt, :].set(w[:, :, r:r + cnt, :])
        r += cnt
    assert r == weight.shape[1]
    if stride == 1:
        ke, ce = k, cin_padded
        we_ = wp
    else:
        ke = (k + stride - 1) // stride
        ce = stride * stride * cin_padded
        we_ = jnp.zeros((ke, ke, stride, stride, cin_padded, coutp),
                        jnp.float32)
        for qy in range(ke):
            for a in range(stride):
                if stride * qy + a >= k:
                    continue
                for qx in range(ke):
                    for b in range(stride):
                        if stride * qx + b >= k:
                            continue
                        we_ = we_.at[qy, qx, a, b].set(
                            wp[stride * qy + a, stride * qx + b])
        we_ = we_.reshape(ke, ke, ce, coutp)
    return we_.reshape(ke, ke * ce, coutp).astype(jnp.bfloat16)


def make_params(cfg, in_channels, key):
    """Deterministic per-conv parameters mirroring nn.Conv2d / BatchNorm2d
    init.  Returns (params, raw): `params` is the arrays-only pytree used by
    the Pallas forward; `raw` holds torch-layout f32 weights for the pure-JAX
    reference."""
    params, raw = {}, {}
    eps = 1e-5
    # Channel bookkeeping of every layer's *stored* (padded) activation.
    prev = dict(real=in_channels, padded=_round_up(in_channels, 16),
                layout=[(0, in_channels)])
    metas = []
    for idx, info in enumerate(cfg):
        t = info['type']
        if t == 'convolutional':
            cin, cin_p, layout = prev['real'], prev['padded'], prev['layout']
            cout = int(info['filters'])
            k = int(info['size'])
            s = int(info['stride'])
            coutp = _round_up(cout, 128)
            key, wkey = jax.random.split(key)
            fan_in = cin * k * k
            bound = (6.0 / fan_in) ** 0.5                    # kaiming_uniform_
            weight = jax.random.uniform(wkey, (cout, cin, k, k), jnp.float32,
                                        -bound, bound)
            bias = jnp.zeros((cout,), jnp.float32)           # constant_(b, 0)
            if info.get('batch_normalize') == '1':           # eval-mode fold
                gamma = jnp.ones((cout,), jnp.float32)
                beta = jnp.zeros((cout,), jnp.float32)
                rmean = jnp.zeros((cout,), jnp.float32)
                rvar = jnp.ones((cout,), jnp.float32)
                scale = gamma / jnp.sqrt(rvar + eps)
                shift = beta + (bias - rmean) * scale
            else:
                scale = jnp.ones((cout,), jnp.float32)
                shift = bias
            params[idx] = dict(
                w3d=prep_conv_weight(weight, scale, k, s, cin_p, layout, coutp),
                shift=jnp.pad(shift, (0, coutp - cout)).reshape(1, coutp))
            raw[idx] = dict(weight=weight, scale=scale, shift=shift)
            cur = dict(real=cout, padded=coutp, layout=[(0, cout)])
        elif t == 'shortcut':
            src = metas[idx + int(info['from'])]
            assert (src['real'] == prev['real']
                    and src['padded'] == prev['padded'])
            cur = prev
        elif t == 'route':
            layers = [int(v) for v in info['layers'].split(',')]
            absi = [(l if l >= 0 else idx + l) for l in layers]
            seg, off, real = [], 0, 0
            for a in absi:
                m = metas[a]
                seg.extend([(off + o, c) for o, c in m['layout']])
                off += m['padded']
                real += m['real']
            cur = dict(real=real, padded=off, layout=seg)
        else:                                                # upsample / yolo
            cur = prev
        metas.append(cur)
        prev = cur
    return params, raw


# ----------------------------------------------------------------------------
# Forward pass (mirrors Darknet53.forward; returns the list of yolo outputs)
# ----------------------------------------------------------------------------
def _referenced_layers(cfg):
    refs = set()
    for i, info in enumerate(cfg):
        if info['type'] == 'route':
            for l in (int(v) for v in info['layers'].split(',')):
                refs.add(l if l >= 0 else i + l)
        elif info['type'] == 'shortcut':
            refs.add(i + int(info['from']))
    return refs


def _fuses_with_next_shortcut(cfg, idx, referenced):
    return (0 <= idx < len(cfg) - 1
            and cfg[idx]['type'] == 'convolutional'
            and cfg[idx + 1]['type'] == 'shortcut'
            and idx not in referenced)


def darknet_forward(cfg, params, x_nchw):
    x = jnp.transpose(x_nchw, (0, 2, 3, 1))                  # NCHW -> NHWC
    cin = x.shape[-1]
    x = jnp.pad(x, ((0, 0), (0, 0), (0, 0),
                    (0, _round_up(cin, 16) - cin))).astype(jnp.bfloat16)
    referenced = _referenced_layers(cfg)
    layer_result, yolo_result = [], []
    for idx, info in enumerate(cfg):
        t = info['type']
        if t == 'convolutional':
            residual = None
            if _fuses_with_next_shortcut(cfg, idx, referenced):
                residual = layer_result[(idx + 1) + int(cfg[idx + 1]['from'])]
            head = idx + 1 < len(cfg) and cfg[idx + 1]['type'] == 'yolo'
            x = conv_layer(x, info, params[idx], residual,
                           out_dtype=jnp.float32 if head else jnp.bfloat16)
            layer_result.append(x)
        elif t == 'shortcut':
            if not _fuses_with_next_shortcut(cfg, idx - 1, referenced):
                x = shortcut_add(x, layer_result[idx + int(info['from'])])
            layer_result.append(x)
        elif t == 'yolo':
            n_real = len(info['mask'].split(',')) * (int(info['classes']) + 5)
            yolo_x = yolo_view(x[..., :n_real].astype(jnp.float32), info)
            layer_result.append(yolo_x)
            yolo_result.append(yolo_x)
        elif t == 'upsample':
            x = upsample_nearest(x, int(info['stride']))
            layer_result.append(x)
        elif t == 'route':
            layers = [int(v) for v in info['layers'].split(',')]
            absi = [(l if l >= 0 else idx + l) for l in layers]
            # channel concat: dim=1 in NCHW == last axis in NHWC
            x = jnp.concatenate([layer_result[a] for a in absi], axis=-1)
            layer_result.append(x)
    return yolo_result


def darknet_forward_ref(cfg, raw, x_nchw):
    """Plain-JAX f32 reference (lax.conv, HIGHEST precision) for tolerance
    checking the Pallas path."""
    x = jnp.transpose(x_nchw, (0, 2, 3, 1))
    layer_result, yolo_result = [], []
    for idx, info in enumerate(cfg):
        t = info['type']
        if t == 'convolutional':
            r = raw[idx]
            k = int(info['size'])
            s = int(info['stride'])
            pad = (k - 1) // 2
            y = jax.lax.conv_general_dilated(
                x, jnp.transpose(r['weight'], (2, 3, 1, 0)),
                window_strides=(s, s), padding=[(pad, pad), (pad, pad)],
                dimension_numbers=('NHWC', 'HWIO', 'NHWC'),
                precision=jax.lax.Precision.HIGHEST)
            y = y * r['scale'] + r['shift']
            if info['activation'] == 'leaky':
                y = jnp.where(y > 0, y, LEAKY_SLOPE * y)
            x = y
        elif t == 'shortcut':
            x = x + layer_result[idx + int(info['from'])]
        elif t == 'yolo':
            x = yolo_view(x, info)
            yolo_result.append(x)
        elif t == 'upsample':
            x = upsample_nearest(x, int(info['stride']))
        elif t == 'route':
            layers = [int(v) for v in info['layers'].split(',')]
            absi = [(l if l >= 0 else idx + l) for l in layers]
            x = jnp.concatenate([layer_result[a] for a in absi], axis=-1)
        layer_result.append(x)
    return yolo_result


if __name__ == "__main__":
    param = {'batch': '2', 'in_channels': '3', 'in_width': '32',
             'in_height': '32', 'classes': '2'}
    batch = int(param['batch'])
    in_ch = int(param['in_channels'])
    in_h = int(param['in_height'])
    in_w = int(param['in_width'])

    params, raw = make_params(MODEL_CFG, in_ch, jax.random.PRNGKey(1))
    x = jax.random.normal(jax.random.PRNGKey(0), (batch, in_ch, in_h, in_w),
                          jnp.float32)

    fwd = jax.jit(functools.partial(darknet_forward, MODEL_CFG))
    outs = jax.block_until_ready(fwd(params, x))

    n_anchor, box_attr = 3, int(param['classes']) + 5
    assert outs[0].shape == (batch, n_anchor, in_h // 4, in_w // 4, box_attr)
    assert outs[1].shape == (batch, n_anchor, in_h // 2, in_w // 2, box_attr)
    assert all(bool(jnp.isfinite(o).all()) for o in outs)

    # Tolerance check vs the plain-JAX f32 reference (Pallas path runs bf16
    # weights/activations through the MXU -> allow a few percent of drift).
    outs_ref = jax.block_until_ready(
        jax.jit(functools.partial(darknet_forward_ref, MODEL_CFG))(raw, x))
    for o, o_ref in zip(outs, outs_ref):
        assert o.shape == o_ref.shape
        assert bool(jnp.allclose(o.astype(jnp.float32), o_ref,
                                 rtol=1.5e-1, atol=1.5e-1))

    print("KERNEL_OK")
</pallas_src>

<mosaic_0001>
module attributes {stable_mosaic.version = 11 : i64} {
  func.func @kernel(%arg0: i32, %arg1: i32, %arg2: memref<1x34x34x16xbf16, #tpu.memory_space<vmem>>, %arg3: memref<3x48x128xbf16, #tpu.memory_space<vmem>>, %arg4: memref<1x128xf32, #tpu.memory_space<vmem>>, %arg5: memref<256x128xbf16, #tpu.memory_space<vmem>>) attributes {dimension_semantics = [#tpu.dimension_semantics<parallel>, #tpu.dimension_semantics<parallel>], iteration_bounds = array<i64: 2, 4>, scalar_prefetch = 0 : i64, scratch_operands = 0 : i64, tpu.core_type = #tpu.core_type<tc>, window_params = [{transform_indices = @transform_0, window_bounds = array<i64: 1, 34, 34, 16>}, {pipeline_mode = #tpu.pipeline_mode<synchronous>, transform_indices = @transform_1, window_bounds = array<i64: 3, 48, 128>}, {pipeline_mode = #tpu.pipeline_mode<synchronous>, transform_indices = @transform_2, window_bounds = array<i64: 1, 128>}, {transform_indices = @transform_3, window_bounds = array<i64: 256, 128>}]} {
    %c8_i32 = arith.constant 8 : i32
    %0 = arith.muli %arg1, %c8_i32 : i32
    %1 = tpu.assume_multiple %0, 8 : i32
    %c0 = arith.constant 0 : index
    %2 = arith.index_cast %1 : i32 to index
    %c0_0 = arith.constant 0 : index
    %c0_1 = arith.constant 0 : index
    %3 = vector.load %arg2[%c0, %2, %c0_0, %c0_1] : memref<1x34x34x16xbf16, #tpu.memory_space<vmem>>, vector<1x10x34x16xbf16>
    %4 = vector.shape_cast %3 : vector<1x10x34x16xbf16> to vector<10x34x16xbf16>
    %5 = vector.extract_strided_slice %4 {offsets = [0, 0, 0], sizes = [8, 34, 16], strides = [1, 1, 1]} : vector<10x34x16xbf16> to vector<8x34x16xbf16>
    %6 = vector.extract_strided_slice %5 {offsets = [0, 0, 0], sizes = [8, 32, 16], strides = [1, 1, 1]} : vector<8x34x16xbf16> to vector<8x32x16xbf16>
    %7 = vector.extract_strided_slice %5 {offsets = [0, 1, 0], sizes = [8, 32, 16], strides = [1, 1, 1]} : vector<8x34x16xbf16> to vector<8x32x16xbf16>
    %8 = vector.extract_strided_slice %5 {offsets = [0, 2, 0], sizes = [8, 32, 16], strides = [1, 1, 1]} : vector<8x34x16xbf16> to vector<8x32x16xbf16>
    %9 = tpu.concatenate %6, %7, %8 in 2 : vector<8x32x16xbf16>, vector<8x32x16xbf16>, vector<8x32x16xbf16> -> vector<8x32x48xbf16>
    %10 = vector.shape_cast %9 : vector<8x32x48xbf16> to vector<256x48xbf16>
    %c0_2 = arith.constant 0 : index
    %c0_3 = arith.constant 0 : index
    %c0_4 = arith.constant 0 : index
    %11 = vector.load %arg3[%c0_2, %c0_3, %c0_4] : memref<3x48x128xbf16, #tpu.memory_space<vmem>>, vector<1x48x128xbf16>
    %12 = vector.shape_cast %11 : vector<1x48x128xbf16> to vector<48x128xbf16>
    %cst = arith.constant dense<0.000000e+00> : vector<256x128xf32>
    %13 = tpu.matmul %10, %12, %cst {dimension_numbers = #tpu.dot_dimension_numbers<[1], [0], [0], [1], [0, 0, 1, 1], [], []>} : vector<256x48xbf16>, vector<48x128xbf16>, vector<256x128xf32> -> vector<256x128xf32>
    %14 = vector.extract_strided_slice %4 {offsets = [1, 0, 0], sizes = [8, 34, 16], strides = [1, 1, 1]} : vector<10x34x16xbf16> to vector<8x34x16xbf16>
    %15 = vector.extract_strided_slice %14 {offsets = [0, 0, 0], sizes = [8, 32, 16], strides = [1, 1, 1]} : vector<8x34x16xbf16> to vector<8x32x16xbf16>
    %16 = vector.extract_strided_slice %14 {offsets = [0, 1, 0], sizes = [8, 32, 16], strides = [1, 1, 1]} : vector<8x34x16xbf16> to vector<8x32x16xbf16>
    %17 = vector.extract_strided_slice %14 {offsets = [0, 2, 0], sizes = [8, 32, 16], strides = [1, 1, 1]} : vector<8x34x16xbf16> to vector<8x32x16xbf16>
    %18 = tpu.concatenate %15, %16, %17 in 2 : vector<8x32x16xbf16>, vector<8x32x16xbf16>, vector<8x32x16xbf16> -> vector<8x32x48xbf16>
    %19 = vector.shape_cast %18 : vector<8x32x48xbf16> to vector<256x48xbf16>
    %c1 = arith.constant 1 : index
    %c0_5 = arith.constant 0 : index
    %c0_6 = arith.constant 0 : index
    %20 = vector.load %arg3[%c1, %c0_5, %c0_6] : memref<3x48x128xbf16, #tpu.memory_space<vmem>>, vector<1x48x128xbf16>
    %21 = vector.shape_cast %20 : vector<1x48x128xbf16> to vector<48x128xbf16>
    %cst_7 = arith.constant dense<0.000000e+00> : vector<256x128xf32>
    %22 = tpu.matmul %19, %21, %cst_7 {dimension_numbers = #tpu.dot_dimension_numbers<[1], [0], [0], [1], [0, 0, 1, 1], [], []>} : vector<256x48xbf16>, vector<48x128xbf16>, vector<256x128xf32> -> vector<256x128xf32>
    %23 = arith.addf %13, %22 : vector<256x128xf32>
    %24 = vector.extract_strided_slice %4 {offsets = [2, 0, 0], sizes = [8, 34, 16], strides = [1, 1, 1]} : vector<10x34x16xbf16> to vector<8x34x16xbf16>
    %25 = vector.extract_strided_slice %24 {offsets = [0, 0, 0], sizes = [8, 32, 16], strides = [1, 1, 1]} : vector<8x34x16xbf16> to vector<8x32x16xbf16>
    %26 = vector.extract_strided_slice %24 {offsets = [0, 1, 0], sizes = [8, 32, 16], strides = [1, 1, 1]} : vector<8x34x16xbf16> to vector<8x32x16xbf16>
    %27 = vector.extract_strided_slice %24 {offsets = [0, 2, 0], sizes = [8, 32, 16], strides = [1, 1, 1]} : vector<8x34x16xbf16> to vector<8x32x16xbf16>
    %28 = tpu.concatenate %25, %26, %27 in 2 : vector<8x32x16xbf16>, vector<8x32x16xbf16>, vector<8x32x16xbf16> -> vector<8x32x48xbf16>
    %29 = vector.shape_cast %28 : vector<8x32x48xbf16> to vector<256x48xbf16>
    %c2 = arith.constant 2 : index
    %c0_8 = arith.constant 0 : index
    %c0_9 = arith.constant 0 : index
    %30 = vector.load %arg3[%c2, %c0_8, %c0_9] : memref<3x48x128xbf16, #tpu.memory_space<vmem>>, vector<1x48x128xbf16>
    %31 = vector.shape_cast %30 : vector<1x48x128xbf16> to vector<48x128xbf16>
    %cst_10 = arith.constant dense<0.000000e+00> : vector<256x128xf32>
    %32 = tpu.matmul %29, %31, %cst_10 {dimension_numbers = #tpu.dot_dimension_numbers<[1], [0], [0], [1], [0, 0, 1, 1], [], []>} : vector<256x48xbf16>, vector<48x128xbf16>, vector<256x128xf32> -> vector<256x128xf32>
    %33 = arith.addf %23, %32 : vector<256x128xf32>
    %c0_11 = arith.constant 0 : index
    %c0_12 = arith.constant 0 : index
    %34 = vector.load %arg4[%c0_11, %c0_12] : memref<1x128xf32, #tpu.memory_space<vmem>>, vector<1x128xf32>
    %35 = vector.broadcast %34 : vector<1x128xf32> to vector<256x128xf32>
    %36 = arith.addf %33, %35 : vector<256x128xf32>
    %cst_13 = arith.constant 0.000000e+00 : f32
    %37 = vector.broadcast %cst_13 : f32 to vector<256x128xf32>
    %38 = arith.cmpf ogt, %36, %37 : vector<256x128xf32>
    %cst_14 = arith.constant 1.000000e-01 : f32
    %39 = vector.broadcast %cst_14 : f32 to vector<256x128xf32>
    %40 = arith.mulf %39, %36 : vector<256x128xf32>
    %41 = arith.select %38, %36, %40 : vector<256x128xi1>, vector<256x128xf32>
    %42 = arith.truncf %41 : vector<256x128xf32> to vector<256x128xbf16>
    %c0_15 = arith.constant 0 : index
    %c0_16 = arith.constant 0 : index
    %43 = vector.load %arg5[%c0_15, %c0_16] : memref<256x128xbf16, #tpu.memory_space<vmem>>, vector<256x128xbf16>
    tpu.vector_store %arg5[%c0_15, %c0_16], %42 {strides = array<i32>} : memref<256x128xbf16, #tpu.memory_space<vmem>>, vector<256x128xbf16>,
    return
  }
  func.func @transform_0(%arg0: i32, %arg1: i32) -> (i32, i32, i32, i32) {
    %c0_i32 = arith.constant 0 : i32
    %c0_i32_0 = arith.constant 0 : i32
    %c0_i32_1 = arith.constant 0 : i32
    %c0_i32_2 = arith.constant 0 : i32
    return %arg0, %c0_i32, %c0_i32_0, %c0_i32_1 : i32, i32, i32, i32
  }
  func.func @transform_1(%arg0: i32, %arg1: i32) -> (i32, i32, i32) {
    %c0_i32 = arith.constant 0 : i32
    %c0_i32_0 = arith.constant 0 : i32
    %c0_i32_1 = arith.constant 0 : i32
    %c0_i32_2 = arith.constant 0 : i32
    return %c0_i32, %c0_i32_0, %c0_i32_1 : i32, i32, i32
  }
  func.func @transform_2(%arg0: i32, %arg1: i32) -> (i32, i32) {
    %c0_i32 = arith.constant 0 : i32
    %c0_i32_0 = arith.constant 0 : i32
    %c0_i32_1 = arith.constant 0 : i32
    return %c0_i32, %c0_i32_0 : i32, i32
  }
  func.func @transform_3(%arg0: i32, %arg1: i32) -> (i32, i32) {
    %c4_i32 = arith.constant 4 : i32
    %0 = arith.muli %arg0, %c4_i32 : i32
    %1 = arith.addi %0, %arg1 : i32
    %c0_i32 = arith.constant 0 : i32
    %c0_i32_0 = arith.constant 0 : i32
    return %1, %c0_i32 : i32, i32
  }
}

module attributes {stable_mosaic.version = 11 : i64} {
  func.func @kernel(%arg0: i32, %arg1: i32, %arg2: memref<1x17x17x512xbf16, #tpu.memory_space<vmem>>, %arg3: memref<2x1024x128xbf16, #tpu.memory_space<vmem>>, %arg4: memref<1x128xf32, #tpu.memory_space<vmem>>, %arg5: memref<128x128xbf16, #tpu.memory_space<vmem>>) attributes {dimension_semantics = [#tpu.dimension_semantics<parallel>, #tpu.dimension_semantics<parallel>], iteration_bounds = array<i64: 2, 2>, scalar_prefetch = 0 : i64, scratch_operands = 0 : i64, tpu.core_type = #tpu.core_type<tc>, window_params = [{transform_indices = @transform_0, window_bounds = array<i64: 1, 17, 17, 512>}, {pipeline_mode = #tpu.pipeline_mode<synchronous>, transform_indices = @transform_1, window_bounds = array<i64: 2, 1024, 128>}, {pipeline_mode = #tpu.pipeline_mode<synchronous>, transform_indices = @transform_2, window_bounds = array<i64: 1, 128>}, {transform_indices = @transform_3, window_bounds = array<i64: 128, 128>}]} {
    %c8_i32 = arith.constant 8 : i32
    %0 = arith.muli %arg1, %c8_i32 : i32
    %1 = tpu.assume_multiple %0, 8 : i32
    %c0 = arith.constant 0 : index
    %2 = arith.index_cast %1 : i32 to index
    %c0_0 = arith.constant 0 : index
    %c0_1 = arith.constant 0 : index
    %3 = vector.load %arg2[%c0, %2, %c0_0, %c0_1] : memref<1x17x17x512xbf16, #tpu.memory_space<vmem>>, vector<1x9x17x512xbf16>
    %4 = vector.shape_cast %3 : vector<1x9x17x512xbf16> to vector<9x17x512xbf16>
    %5 = vector.extract_strided_slice %4 {offsets = [0, 0, 0], sizes = [8, 17, 512], strides = [1, 1, 1]} : vector<9x17x512xbf16> to vector<8x17x512xbf16>
    %6 = vector.extract_strided_slice %5 {offsets = [0, 0, 0], sizes = [8, 16, 512], strides = [1, 1, 1]} : vector<8x17x512xbf16> to vector<8x16x512xbf16>
    %7 = vector.extract_strided_slice %5 {offsets = [0, 1, 0], sizes = [8, 16, 512], strides = [1, 1, 1]} : vector<8x17x512xbf16> to vector<8x16x512xbf16>
    %8 = tpu.concatenate %6, %7 in 2 : vector<8x16x512xbf16>, vector<8x16x512xbf16> -> vector<8x16x1024xbf16>
    %9 = vector.shape_cast %8 : vector<8x16x1024xbf16> to vector<128x1024xbf16>
    %c0_2 = arith.constant 0 : index
    %c0_3 = arith.constant 0 : index
    %c0_4 = arith.constant 0 : index
    %10 = vector.load %arg3[%c0_2, %c0_3, %c0_4] : memref<2x1024x128xbf16, #tpu.memory_space<vmem>>, vector<1x1024x128xbf16>
    %11 = vector.shape_cast %10 : vector<1x1024x128xbf16> to vector<1024x128xbf16>
    %cst = arith.constant dense<0.000000e+00> : vector<128x128xf32>
    %12 = tpu.matmul %9, %11, %cst {dimension_numbers = #tpu.dot_dimension_numbers<[1], [0], [0], [1], [0, 0, 1, 1], [], []>} : vector<128x1024xbf16>, vector<1024x128xbf16>, vector<128x128xf32> -> vector<128x128xf32>
    %13 = vector.extract_strided_slice %4 {offsets = [1, 0, 0], sizes = [8, 17, 512], strides = [1, 1, 1]} : vector<9x17x512xbf16> to vector<8x17x512xbf16>
    %14 = vector.extract_strided_slice %13 {offsets = [0, 0, 0], sizes = [8, 16, 512], strides = [1, 1, 1]} : vector<8x17x512xbf16> to vector<8x16x512xbf16>
    %15 = vector.extract_strided_slice %13 {offsets = [0, 1, 0], sizes = [8, 16, 512], strides = [1, 1, 1]} : vector<8x17x512xbf16> to vector<8x16x512xbf16>
    %16 = tpu.concatenate %14, %15 in 2 : vector<8x16x512xbf16>, vector<8x16x512xbf16> -> vector<8x16x1024xbf16>
    %17 = vector.shape_cast %16 : vector<8x16x1024xbf16> to vector<128x1024xbf16>
    %c1 = arith.constant 1 : index
    %c0_5 = arith.constant 0 : index
    %c0_6 = arith.constant 0 : index
    %18 = vector.load %arg3[%c1, %c0_5, %c0_6] : memref<2x1024x128xbf16, #tpu.memory_space<vmem>>, vector<1x1024x128xbf16>
    %19 = vector.shape_cast %18 : vector<1x1024x128xbf16> to vector<1024x128xbf16>
    %cst_7 = arith.constant dense<0.000000e+00> : vector<128x128xf32>
    %20 = tpu.matmul %17, %19, %cst_7 {dimension_numbers = #tpu.dot_dimension_numbers<[1], [0], [0], [1], [0, 0, 1, 1], [], []>} : vector<128x1024xbf16>, vector<1024x128xbf16>, vector<128x128xf32> -> vector<128x128xf32>
    %21 = arith.addf %12, %20 : vector<128x128xf32>
    %c0_8 = arith.constant 0 : index
    %c0_9 = arith.constant 0 : index
    %22 = vector.load %arg4[%c0_8, %c0_9] : memref<1x128xf32, #tpu.memory_space<vmem>>, vector<1x128xf32>
    %23 = vector.broadcast %22 : vector<1x128xf32> to vector<128x128xf32>
    %24 = arith.addf %21, %23 : vector<128x128xf32>
    %cst_10 = arith.constant 0.000000e+00 : f32
    %25 = vector.broadcast %cst_10 : f32 to vector<128x128xf32>
    %26 = arith.cmpf ogt, %24, %25 : vector<128x128xf32>
    %cst_11 = arith.constant 1.000000e-01 : f32
    %27 = vector.broadcast %cst_11 : f32 to vector<128x128xf32>
    %28 = arith.mulf %27, %24 : vector<128x128xf32>
    %29 = arith.select %26, %24, %28 : vector<128x128xi1>, vector<128x128xf32>
    %30 = arith.truncf %29 : vector<128x128xf32> to vector<128x128xbf16>
    %c0_12 = arith.constant 0 : index
    %c0_13 = arith.constant 0 : index
    %31 = vector.load %arg5[%c0_12, %c0_13] : memref<128x128xbf16, #tpu.memory_space<vmem>>, vector<128x128xbf16>
    tpu.vector_store %arg5[%c0_12, %c0_13], %30 {strides = array<i32>} : memref<128x128xbf16, #tpu.memory_space<vmem>>, vector<128x128xbf16>,
    return
  }
  func.func @transform_0(%arg0: i32, %arg1: i32) -> (i32, i32, i32, i32) {
    %c0_i32 = arith.constant 0 : i32
    %c0_i32_0 = arith.constant 0 : i32
    %c0_i32_1 = arith.constant 0 : i32
    %c0_i32_2 = arith.constant 0 : i32
    return %arg0, %c0_i32, %c0_i32_0, %c0_i32_1 : i32, i32, i32, i32
  }
  func.func @transform_1(%arg0: i32, %arg1: i32) -> (i32, i32, i32) {
    %c0_i32 = arith.constant 0 : i32
    %c0_i32_0 = arith.constant 0 : i32
    %c0_i32_1 = arith.constant 0 : i32
    %c0_i32_2 = arith.constant 0 : i32
    return %c0_i32, %c0_i32_0, %c0_i32_1 : i32, i32, i32
  }
  func.func @transform_2(%arg0: i32, %arg1: i32) -> (i32, i32) {
    %c0_i32 = arith.constant 0 : i32
    %c0_i32_0 = arith.constant 0 : i32
    %c0_i32_1 = arith.constant 0 : i32
    return %c0_i32, %c0_i32_0 : i32, i32
  }
  func.func @transform_3(%arg0: i32, %arg1: i32) -> (i32, i32) {
    %c2_i32 = arith.constant 2 : i32
    %0 = arith.muli %arg0, %c2_i32 : i32
    %1 = arith.addi %0, %arg1 : i32
    %c0_i32 = arith.constant 0 : i32
    %c0_i32_0 = arith.constant 0 : i32
    return %1, %c0_i32 : i32, i32
  }
}

module attributes {stable_mosaic.version = 11 : i64} {
  func.func @kernel(%arg0: i32, %arg1: i32, %arg2: memref<1x16x16x128xbf16, #tpu.memory_space<vmem>>, %arg3: memref<1x128x128xbf16, #tpu.memory_space<vmem>>, %arg4: memref<1x128xf32, #tpu.memory_space<vmem>>, %arg5: memref<128x128xbf16, #tpu.memory_space<vmem>>) attributes {dimension_semantics = [#tpu.dimension_semantics<parallel>, #tpu.dimension_semantics<parallel>], iteration_bounds = array<i64: 2, 2>, scalar_prefetch = 0 : i64, scratch_operands = 0 : i64, tpu.core_type = #tpu.core_type<tc>, window_params = [{transform_indices = @transform_0, window_bounds = array<i64: 1, 16, 16, 128>}, {pipeline_mode = #tpu.pipeline_mode<synchronous>, transform_indices = @transform_1, window_bounds = array<i64: 1, 128, 128>}, {pipeline_mode = #tpu.pipeline_mode<synchronous>, transform_indices = @transform_2, window_bounds = array<i64: 1, 128>}, {transform_indices = @transform_3, window_bounds = array<i64: 128, 128>}]} {
    %c8_i32 = arith.constant 8 : i32
    %0 = arith.muli %arg1, %c8_i32 : i32
    %1 = tpu.assume_multiple %0, 8 : i32
    %c0 = arith.constant 0 : index
    %2 = arith.index_cast %1 : i32 to index
    %c0_0 = arith.constant 0 : index
    %c0_1 = arith.constant 0 : index
    %3 = vector.load %arg2[%c0, %2, %c0_0, %c0_1] : memref<1x16x16x128xbf16, #tpu.memory_space<vmem>>, vector<1x8x16x128xbf16>
    %4 = vector.shape_cast %3 : vector<1x8x16x128xbf16> to vector<8x16x128xbf16>
    %5 = vector.shape_cast %4 : vector<8x16x128xbf16> to vector<128x128xbf16>
    %c0_2 = arith.constant 0 : index
    %c0_3 = arith.constant 0 : index
    %c0_4 = arith.constant 0 : index
    %6 = vector.load %arg3[%c0_2, %c0_3, %c0_4] : memref<1x128x128xbf16, #tpu.memory_space<vmem>>, vector<1x128x128xbf16>
    %7 = vector.shape_cast %6 : vector<1x128x128xbf16> to vector<128x128xbf16>
    %cst = arith.constant dense<0.000000e+00> : vector<128x128xf32>
    %8 = tpu.matmul %5, %7, %cst {dimension_numbers = #tpu.dot_dimension_numbers<[1], [0], [0], [1], [0, 0, 1, 1], [], []>} : vector<128x128xbf16>, vector<128x128xbf16>, vector<128x128xf32> -> vector<128x128xf32>
    %c0_5 = arith.constant 0 : index
    %c0_6 = arith.constant 0 : index
    %9 = vector.load %arg4[%c0_5, %c0_6] : memref<1x128xf32, #tpu.memory_space<vmem>>, vector<1x128xf32>
    %10 = vector.broadcast %9 : vector<1x128xf32> to vector<128x128xf32>
    %11 = arith.addf %8, %10 : vector<128x128xf32>
    %cst_7 = arith.constant 0.000000e+00 : f32
    %12 = vector.broadcast %cst_7 : f32 to vector<128x128xf32>
    %13 = arith.cmpf ogt, %11, %12 : vector<128x128xf32>
    %cst_8 = arith.constant 1.000000e-01 : f32
    %14 = vector.broadcast %cst_8 : f32 to vector<128x128xf32>
    %15 = arith.mulf %14, %11 : vector<128x128xf32>
    %16 = arith.select %13, %11, %15 : vector<128x128xi1>, vector<128x128xf32>
    %17 = arith.truncf %16 : vector<128x128xf32> to vector<128x128xbf16>
    %c0_9 = arith.constant 0 : index
    %c0_10 = arith.constant 0 : index
    %18 = vector.load %arg5[%c0_9, %c0_10] : memref<128x128xbf16, #tpu.memory_space<vmem>>, vector<128x128xbf16>
    tpu.vector_store %arg5[%c0_9, %c0_10], %17 {strides = array<i32>} : memref<128x128xbf16, #tpu.memory_space<vmem>>, vector<128x128xbf16>,
    return
  }
  func.func @transform_0(%arg0: i32, %arg1: i32) -> (i32, i32, i32, i32) {
    %c0_i32 = arith.constant 0 : i32
    %c0_i32_0 = arith.constant 0 : i32
    %c0_i32_1 = arith.constant 0 : i32
    %c0_i32_2 = arith.constant 0 : i32
    return %arg0, %c0_i32, %c0_i32_0, %c0_i32_1 : i32, i32, i32, i32
  }
  func.func @transform_1(%arg0: i32, %arg1: i32) -> (i32, i32, i32) {
    %c0_i32 = arith.constant 0 : i32
    %c0_i32_0 = arith.constant 0 : i32
    %c0_i32_1 = arith.constant 0 : i32
    %c0_i32_2 = arith.constant 0 : i32
    return %c0_i32, %c0_i32_0, %c0_i32_1 : i32, i32, i32
  }
  func.func @transform_2(%arg0: i32, %arg1: i32) -> (i32, i32) {
    %c0_i32 = arith.constant 0 : i32
    %c0_i32_0 = arith.constant 0 : i32
    %c0_i32_1 = arith.constant 0 : i32
    return %c0_i32, %c0_i32_0 : i32, i32
  }
  func.func @transform_3(%arg0: i32, %arg1: i32) -> (i32, i32) {
    %c2_i32 = arith.constant 2 : i32
    %0 = arith.muli %arg0, %c2_i32 : i32
    %1 = arith.addi %0, %arg1 : i32
    %c0_i32 = arith.constant 0 : i32
    %c0_i32_0 = arith.constant 0 : i32
    return %1, %c0_i32 : i32, i32
  }
}

module attributes {stable_mosaic.version = 11 : i64} {
  func.func @kernel(%arg0: i32, %arg1: i32, %arg2: memref<1x18x18x128xbf16, #tpu.memory_space<vmem>>, %arg3: memref<3x384x128xbf16, #tpu.memory_space<vmem>>, %arg4: memref<1x128xf32, #tpu.memory_space<vmem>>, %arg5: memref<128x128xbf16, #tpu.memory_space<vmem>>, %arg6: memref<128x128xbf16, #tpu.memory_space<vmem>>) attributes {dimension_semantics = [#tpu.dimension_semantics<parallel>, #tpu.dimension_semantics<parallel>], iteration_bounds = array<i64: 2, 2>, scalar_prefetch = 0 : i64, scratch_operands = 0 : i64, tpu.core_type = #tpu.core_type<tc>, window_params = [{transform_indices = @transform_0, window_bounds = array<i64: 1, 18, 18, 128>}, {pipeline_mode = #tpu.pipeline_mode<synchronous>, transform_indices = @transform_1, window_bounds = array<i64: 3, 384, 128>}, {pipeline_mode = #tpu.pipeline_mode<synchronous>, transform_indices = @transform_2, window_bounds = array<i64: 1, 128>}, {transform_indices = @transform_3, window_bounds = array<i64: 128, 128>}, {transform_indices = @transform_4, window_bounds = array<i64: 128, 128>}]} {
    %c8_i32 = arith.constant 8 : i32
    %0 = arith.muli %arg1, %c8_i32 : i32
    %1 = tpu.assume_multiple %0, 8 : i32
    %c0 = arith.constant 0 : index
    %2 = arith.index_cast %1 : i32 to index
    %c0_0 = arith.constant 0 : index
    %c0_1 = arith.constant 0 : index
    %3 = vector.load %arg2[%c0, %2, %c0_0, %c0_1] : memref<1x18x18x128xbf16, #tpu.memory_space<vmem>>, vector<1x10x18x128xbf16>
    %4 = vector.shape_cast %3 : vector<1x10x18x128xbf16> to vector<10x18x128xbf16>
    %5 = vector.extract_strided_slice %4 {offsets = [0, 0, 0], sizes = [8, 18, 128], strides = [1, 1, 1]} : vector<10x18x128xbf16> to vector<8x18x128xbf16>
    %6 = vector.extract_strided_slice %5 {offsets = [0, 0, 0], sizes = [8, 16, 128], strides = [1, 1, 1]} : vector<8x18x128xbf16> to vector<8x16x128xbf16>
    %7 = vector.extract_strided_slice %5 {offsets = [0, 1, 0], sizes = [8, 16, 128], strides = [1, 1, 1]} : vector<8x18x128xbf16> to vector<8x16x128xbf16>
    %8 = vector.extract_strided_slice %5 {offsets = [0, 2, 0], sizes = [8, 16, 128], strides = [1, 1, 1]} : vector<8x18x128xbf16> to vector<8x16x128xbf16>
    %9 = tpu.concatenate %6, %7, %8 in 2 : vector<8x16x128xbf16>, vector<8x16x128xbf16>, vector<8x16x128xbf16> -> vector<8x16x384xbf16>
    %10 = vector.shape_cast %9 : vector<8x16x384xbf16> to vector<128x384xbf16>
    %c0_2 = arith.constant 0 : index
    %c0_3 = arith.constant 0 : index
    %c0_4 = arith.constant 0 : index
    %11 = vector.load %arg3[%c0_2, %c0_3, %c0_4] : memref<3x384x128xbf16, #tpu.memory_space<vmem>>, vector<1x384x128xbf16>
    %12 = vector.shape_cast %11 : vector<1x384x128xbf16> to vector<384x128xbf16>
    %cst = arith.constant dense<0.000000e+00> : vector<128x128xf32>
    %13 = tpu.matmul %10, %12, %cst {dimension_numbers = #tpu.dot_dimension_numbers<[1], [0], [0], [1], [0, 0, 1, 1], [], []>} : vector<128x384xbf16>, vector<384x128xbf16>, vector<128x128xf32> -> vector<128x128xf32>
    %14 = vector.extract_strided_slice %4 {offsets = [1, 0, 0], sizes = [8, 18, 128], strides = [1, 1, 1]} : vector<10x18x128xbf16> to vector<8x18x128xbf16>
    %15 = vector.extract_strided_slice %14 {offsets = [0, 0, 0], sizes = [8, 16, 128], strides = [1, 1, 1]} : vector<8x18x128xbf16> to vector<8x16x128xbf16>
    %16 = vector.extract_strided_slice %14 {offsets = [0, 1, 0], sizes = [8, 16, 128], strides = [1, 1, 1]} : vector<8x18x128xbf16> to vector<8x16x128xbf16>
    %17 = vector.extract_strided_slice %14 {offsets = [0, 2, 0], sizes = [8, 16, 128], strides = [1, 1, 1]} : vector<8x18x128xbf16> to vector<8x16x128xbf16>
    %18 = tpu.concatenate %15, %16, %17 in 2 : vector<8x16x128xbf16>, vector<8x16x128xbf16>, vector<8x16x128xbf16> -> vector<8x16x384xbf16>
    %19 = vector.shape_cast %18 : vector<8x16x384xbf16> to vector<128x384xbf16>
    %c1 = arith.constant 1 : index
    %c0_5 = arith.constant 0 : index
    %c0_6 = arith.constant 0 : index
    %20 = vector.load %arg3[%c1, %c0_5, %c0_6] : memref<3x384x128xbf16, #tpu.memory_space<vmem>>, vector<1x384x128xbf16>
    %21 = vector.shape_cast %20 : vector<1x384x128xbf16> to vector<384x128xbf16>
    %cst_7 = arith.constant dense<0.000000e+00> : vector<128x128xf32>
    %22 = tpu.matmul %19, %21, %cst_7 {dimension_numbers = #tpu.dot_dimension_numbers<[1], [0], [0], [1], [0, 0, 1, 1], [], []>} : vector<128x384xbf16>, vector<384x128xbf16>, vector<128x128xf32> -> vector<128x128xf32>
    %23 = arith.addf %13, %22 : vector<128x128xf32>
    %24 = vector.extract_strided_slice %4 {offsets = [2, 0, 0], sizes = [8, 18, 128], strides = [1, 1, 1]} : vector<10x18x128xbf16> to vector<8x18x128xbf16>
    %25 = vector.extract_strided_slice %24 {offsets = [0, 0, 0], sizes = [8, 16, 128], strides = [1, 1, 1]} : vector<8x18x128xbf16> to vector<8x16x128xbf16>
    %26 = vector.extract_strided_slice %24 {offsets = [0, 1, 0], sizes = [8, 16, 128], strides = [1, 1, 1]} : vector<8x18x128xbf16> to vector<8x16x128xbf16>
    %27 = vector.extract_strided_slice %24 {offsets = [0, 2, 0], sizes = [8, 16, 128], strides = [1, 1, 1]} : vector<8x18x128xbf16> to vector<8x16x128xbf16>
    %28 = tpu.concatenate %25, %26, %27 in 2 : vector<8x16x128xbf16>, vector<8x16x128xbf16>, vector<8x16x128xbf16> -> vector<8x16x384xbf16>
    %29 = vector.shape_cast %28 : vector<8x16x384xbf16> to vector<128x384xbf16>
    %c2 = arith.constant 2 : index
    %c0_8 = arith.constant 0 : index
    %c0_9 = arith.constant 0 : index
    %30 = vector.load %arg3[%c2, %c0_8, %c0_9] : memref<3x384x128xbf16, #tpu.memory_space<vmem>>, vector<1x384x128xbf16>
    %31 = vector.shape_cast %30 : vector<1x384x128xbf16> to vector<384x128xbf16>
    %cst_10 = arith.constant dense<0.000000e+00> : vector<128x128xf32>
    %32 = tpu.matmul %29, %31, %cst_10 {dimension_numbers = #tpu.dot_dimension_numbers<[1], [0], [0], [1], [0, 0, 1, 1], [], []>} : vector<128x384xbf16>, vector<384x128xbf16>, vector<128x128xf32> -> vector<128x128xf32>
    %33 = arith.addf %23, %32 : vector<128x128xf32>
    %c0_11 = arith.constant 0 : index
    %c0_12 = arith.constant 0 : index
    %34 = vector.load %arg4[%c0_11, %c0_12] : memref<1x128xf32, #tpu.memory_space<vmem>>, vector<1x128xf32>
    %35 = vector.broadcast %34 : vector<1x128xf32> to vector<128x128xf32>
    %36 = arith.addf %33, %35 : vector<128x128xf32>
    %cst_13 = arith.constant 0.000000e+00 : f32
    %37 = vector.broadcast %cst_13 : f32 to vector<128x128xf32>
    %38 = arith.cmpf ogt, %36, %37 : vector<128x128xf32>
    %cst_14 = arith.constant 1.000000e-01 : f32
    %39 = vector.broadcast %cst_14 : f32 to vector<128x128xf32>
    %40 = arith.mulf %39, %36 : vector<128x128xf32>
    %41 = arith.select %38, %36, %40 : vector<128x128xi1>, vector<128x128xf32>
    %c0_15 = arith.constant 0 : index
    %c0_16 = arith.constant 0 : index
    %42 = vector.load %arg5[%c0_15, %c0_16] : memref<128x128xbf16, #tpu.memory_space<vmem>>, vector<128x128xbf16>
    %43 = arith.extf %42 : vector<128x128xbf16> to vector<128x128xf32>
    %44 = arith.addf %41, %43 : vector<128x128xf32>
    %45 = arith.truncf %44 : vector<128x128xf32> to vector<128x128xbf16>
    %c0_17 = arith.constant 0 : index
    %c0_18 = arith.constant 0 : index
    %46 = vector.load %arg6[%c0_17, %c0_18] : memref<128x128xbf16, #tpu.memory_space<vmem>>, vector<128x128xbf16>
    tpu.vector_store %arg6[%c0_17, %c0_18], %45 {strides = array<i32>} : memref<128x128xbf16, #tpu.memory_space<vmem>>, vector<128x128xbf16>,
    return
  }
  func.func @transform_0(%arg0: i32, %arg1: i32) -> (i32, i32, i32, i32) {
    %c0_i32 = arith.constant 0 : i32
    %c0_i32_0 = arith.constant 0 : i32
    %c0_i32_1 = arith.constant 0 : i32
    %c0_i32_2 = arith.constant 0 : i32
    return %arg0, %c0_i32, %c0_i32_0, %c0_i32_1 : i32, i32, i32, i32
  }
  func.func @transform_1(%arg0: i32, %arg1: i32) -> (i32, i32, i32) {
    %c0_i32 = arith.constant 0 : i32
    %c0_i32_0 = arith.constant 0 : i32
    %c0_i32_1 = arith.constant 0 : i32
    %c0_i32_2 = arith.constant 0 : i32
    return %c0_i32, %c0_i32_0, %c0_i32_1 : i32, i32, i32
  }
  func.func @transform_2(%arg0: i32, %arg1: i32) -> (i32, i32) {
    %c0_i32 = arith.constant 0 : i32
    %c0_i32_0 = arith.constant 0 : i32
    %c0_i32_1 = arith.constant 0 : i32
    return %c0_i32, %c0_i32_0 : i32, i32
  }
  func.func @transform_3(%arg0: i32, %arg1: i32) -> (i32, i32) {
    %c2_i32 = arith.constant 2 : i32
    %0 = arith.muli %arg0, %c2_i32 : i32
    %1 = arith.addi %0, %arg1 : i32
    %c0_i32 = arith.constant 0 : i32
    %c0_i32_0 = arith.constant 0 : i32
    return %1, %c0_i32 : i32, i32
  }
  func.func @transform_4(%arg0: i32, %arg1: i32) -> (i32, i32) {
    %c2_i32 = arith.constant 2 : i32
    %0 = arith.muli %arg0, %c2_i32 : i32
    %1 = arith.addi %0, %arg1 : i32
    %c0_i32 = arith.constant 0 : i32
    %c0_i32_0 = arith.constant 0 : i32
    return %1, %c0_i32 : i32, i32
  }
}

module attributes {stable_mosaic.version = 11 : i64} {
  func.func @kernel(%arg0: i32, %arg1: i32, %arg2: memref<1x9x9x512xbf16, #tpu.memory_space<vmem>>, %arg3: memref<2x1024x128xbf16, #tpu.memory_space<vmem>>, %arg4: memref<1x128xf32, #tpu.memory_space<vmem>>, %arg5: memref<64x128xbf16, #tpu.memory_space<vmem>>) attributes {dimension_semantics = [#tpu.dimension_semantics<parallel>, #tpu.dimension_semantics<parallel>], iteration_bounds = array<i64: 2, 1>, scalar_prefetch = 0 : i64, scratch_operands = 0 : i64, tpu.core_type = #tpu.core_type<tc>, window_params = [{transform_indices = @transform_0, window_bounds = array<i64: 1, 9, 9, 512>}, {pipeline_mode = #tpu.pipeline_mode<synchronous>, transform_indices = @transform_1, window_bounds = array<i64: 2, 1024, 128>}, {pipeline_mode = #tpu.pipeline_mode<synchronous>, transform_indices = @transform_2, window_bounds = array<i64: 1, 128>}, {transform_indices = @transform_3, window_bounds = array<i64: 64, 128>}]} {
    %c8_i32 = arith.constant 8 : i32
    %0 = arith.muli %arg1, %c8_i32 : i32
    %1 = tpu.assume_multiple %0, 8 : i32
    %c0 = arith.constant 0 : index
    %2 = arith.index_cast %1 : i32 to index
    %c0_0 = arith.constant 0 : index
    %c0_1 = arith.constant 0 : index
    %3 = vector.load %arg2[%c0, %2, %c0_0, %c0_1] : memref<1x9x9x512xbf16, #tpu.memory_space<vmem>>, vector<1x9x9x512xbf16>
    %4 = vector.shape_cast %3 : vector<1x9x9x512xbf16> to vector<9x9x512xbf16>
    %5 = vector.extract_strided_slice %4 {offsets = [0, 0, 0], sizes = [8, 9, 512], strides = [1, 1, 1]} : vector<9x9x512xbf16> to vector<8x9x512xbf16>
    %6 = vector.extract_strided_slice %5 {offsets = [0, 0, 0], sizes = [8, 8, 512], strides = [1, 1, 1]} : vector<8x9x512xbf16> to vector<8x8x512xbf16>
    %7 = vector.extract_strided_slice %5 {offsets = [0, 1, 0], sizes = [8, 8, 512], strides = [1, 1, 1]} : vector<8x9x512xbf16> to vector<8x8x512xbf16>
    %8 = tpu.concatenate %6, %7 in 2 : vector<8x8x512xbf16>, vector<8x8x512xbf16> -> vector<8x8x1024xbf16>
    %9 = vector.shape_cast %8 : vector<8x8x1024xbf16> to vector<64x1024xbf16>
    %c0_2 = arith.constant 0 : index
    %c0_3 = arith.constant 0 : index
    %c0_4 = arith.constant 0 : index
    %10 = vector.load %arg3[%c0_2, %c0_3, %c0_4] : memref<2x1024x128xbf16, #tpu.memory_space<vmem>>, vector<1x1024x128xbf16>
    %11 = vector.shape_cast %10 : vector<1x1024x128xbf16> to vector<1024x128xbf16>
    %cst = arith.constant dense<0.000000e+00> : vector<64x128xf32>
    %12 = tpu.matmul %9, %11, %cst {dimension_numbers = #tpu.dot_dimension_numbers<[1], [0], [0], [1], [0, 0, 1, 1], [], []>} : vector<64x1024xbf16>, vector<1024x128xbf16>, vector<64x128xf32> -> vector<64x128xf32>
    %13 = vector.extract_strided_slice %4 {offsets = [1, 0, 0], sizes = [8, 9, 512], strides = [1, 1, 1]} : vector<9x9x512xbf16> to vector<8x9x512xbf16>
    %14 = vector.extract_strided_slice %13 {offsets = [0, 0, 0], sizes = [8, 8, 512], strides = [1, 1, 1]} : vector<8x9x512xbf16> to vector<8x8x512xbf16>
    %15 = vector.extract_strided_slice %13 {offsets = [0, 1, 0], sizes = [8, 8, 512], strides = [1, 1, 1]} : vector<8x9x512xbf16> to vector<8x8x512xbf16>
    %16 = tpu.concatenate %14, %15 in 2 : vector<8x8x512xbf16>, vector<8x8x512xbf16> -> vector<8x8x1024xbf16>
    %17 = vector.shape_cast %16 : vector<8x8x1024xbf16> to vector<64x1024xbf16>
    %c1 = arith.constant 1 : index
    %c0_5 = arith.constant 0 : index
    %c0_6 = arith.constant 0 : index
    %18 = vector.load %arg3[%c1, %c0_5, %c0_6] : memref<2x1024x128xbf16, #tpu.memory_space<vmem>>, vector<1x1024x128xbf16>
    %19 = vector.shape_cast %18 : vector<1x1024x128xbf16> to vector<1024x128xbf16>
    %cst_7 = arith.constant dense<0.000000e+00> : vector<64x128xf32>
    %20 = tpu.matmul %17, %19, %cst_7 {dimension_numbers = #tpu.dot_dimension_numbers<[1], [0], [0], [1], [0, 0, 1, 1], [], []>} : vector<64x1024xbf16>, vector<1024x128xbf16>, vector<64x128xf32> -> vector<64x128xf32>
    %21 = arith.addf %12, %20 : vector<64x128xf32>
    %c0_8 = arith.constant 0 : index
    %c0_9 = arith.constant 0 : index
    %22 = vector.load %arg4[%c0_8, %c0_9] : memref<1x128xf32, #tpu.memory_space<vmem>>, vector<1x128xf32>
    %23 = vector.broadcast %22 : vector<1x128xf32> to vector<64x128xf32>
    %24 = arith.addf %21, %23 : vector<64x128xf32>
    %cst_10 = arith.constant 0.000000e+00 : f32
    %25 = vector.broadcast %cst_10 : f32 to vector<64x128xf32>
    %26 = arith.cmpf ogt, %24, %25 : vector<64x128xf32>
    %cst_11 = arith.constant 1.000000e-01 : f32
    %27 = vector.broadcast %cst_11 : f32 to vector<64x128xf32>
    %28 = arith.mulf %27, %24 : vector<64x128xf32>
    %29 = arith.select %26, %24, %28 : vector<64x128xi1>, vector<64x128xf32>
    %30 = arith.truncf %29 : vector<64x128xf32> to vector<64x128xbf16>
    %c0_12 = arith.constant 0 : index
    %c0_13 = arith.constant 0 : index
    %31 = vector.load %arg5[%c0_12, %c0_13] : memref<64x128xbf16, #tpu.memory_space<vmem>>, vector<64x128xbf16>
    tpu.vector_store %arg5[%c0_12, %c0_13], %30 {strides = array<i32>} : memref<64x128xbf16, #tpu.memory_space<vmem>>, vector<64x128xbf16>,
    return
  }
  func.func @transform_0(%arg0: i32, %arg1: i32) -> (i32, i32, i32, i32) {
    %c0_i32 = arith.constant 0 : i32
    %c0_i32_0 = arith.constant 0 : i32
    %c0_i32_1 = arith.constant 0 : i32
    %c0_i32_2 = arith.constant 0 : i32
    return %arg0, %c0_i32, %c0_i32_0, %c0_i32_1 : i32, i32, i32, i32
  }
  func.func @transform_1(%arg0: i32, %arg1: i32) -> (i32, i32, i32) {
    %c0_i32 = arith.constant 0 : i32
    %c0_i32_0 = arith.constant 0 : i32
    %c0_i32_1 = arith.constant 0 : i32
    %c0_i32_2 = arith.constant 0 : i32
    return %c0_i32, %c0_i32_0, %c0_i32_1 : i32, i32, i32
  }
  func.func @transform_2(%arg0: i32, %arg1: i32) -> (i32, i32) {
    %c0_i32 = arith.constant 0 : i32
    %c0_i32_0 = arith.constant 0 : i32
    %c0_i32_1 = arith.constant 0 : i32
    return %c0_i32, %c0_i32_0 : i32, i32
  }
  func.func @transform_3(%arg0: i32, %arg1: i32) -> (i32, i32) {
    %c1_i32 = arith.constant 1 : i32
    %0 = arith.muli %arg0, %c1_i32 : i32
    %1 = arith.addi %0, %arg1 : i32
    %c0_i32 = arith.constant 0 : i32
    %c0_i32_0 = arith.constant 0 : i32
    return %1, %c0_i32 : i32, i32
  }
}

module attributes {stable_mosaic.version = 11 : i64} {
  func.func @kernel(%arg0: i32, %arg1: i32, %arg2: memref<1x8x8x128xbf16, #tpu.memory_space<vmem>>, %arg3: memref<1x128x128xbf16, #tpu.memory_space<vmem>>, %arg4: memref<1x128xf32, #tpu.memory_space<vmem>>, %arg5: memref<64x128xbf16, #tpu.memory_space<vmem>>) attributes {dimension_semantics = [#tpu.dimension_semantics<parallel>, #tpu.dimension_semantics<parallel>], iteration_bounds = array<i64: 2, 1>, scalar_prefetch = 0 : i64, scratch_operands = 0 : i64, tpu.core_type = #tpu.core_type<tc>, window_params = [{transform_indices = @transform_0, window_bounds = array<i64: 1, 8, 8, 128>}, {pipeline_mode = #tpu.pipeline_mode<synchronous>, transform_indices = @transform_1, window_bounds = array<i64: 1, 128, 128>}, {pipeline_mode = #tpu.pipeline_mode<synchronous>, transform_indices = @transform_2, window_bounds = array<i64: 1, 128>}, {transform_indices = @transform_3, window_bounds = array<i64: 64, 128>}]} {
    %c8_i32 = arith.constant 8 : i32
    %0 = arith.muli %arg1, %c8_i32 : i32
    %1 = tpu.assume_multiple %0, 8 : i32
    %c0 = arith.constant 0 : index
    %2 = arith.index_cast %1 : i32 to index
    %c0_0 = arith.constant 0 : index
    %c0_1 = arith.constant 0 : index
    %3 = vector.load %arg2[%c0, %2, %c0_0, %c0_1] : memref<1x8x8x128xbf16, #tpu.memory_space<vmem>>, vector<1x8x8x128xbf16>
    %4 = vector.shape_cast %3 : vector<1x8x8x128xbf16> to vector<8x8x128xbf16>
    %5 = vector.shape_cast %4 : vector<8x8x128xbf16> to vector<64x128xbf16>
    %c0_2 = arith.constant 0 : index
    %c0_3 = arith.constant 0 : index
    %c0_4 = arith.constant 0 : index
    %6 = vector.load %arg3[%c0_2, %c0_3, %c0_4] : memref<1x128x128xbf16, #tpu.memory_space<vmem>>, vector<1x128x128xbf16>
    %7 = vector.shape_cast %6 : vector<1x128x128xbf16> to vector<128x128xbf16>
    %cst = arith.constant dense<0.000000e+00> : vector<64x128xf32>
    %8 = tpu.matmul %5, %7, %cst {dimension_numbers = #tpu.dot_dimension_numbers<[1], [0], [0], [1], [0, 0, 1, 1], [], []>} : vector<64x128xbf16>, vector<128x128xbf16>, vector<64x128xf32> -> vector<64x128xf32>
    %c0_5 = arith.constant 0 : index
    %c0_6 = arith.constant 0 : index
    %9 = vector.load %arg4[%c0_5, %c0_6] : memref<1x128xf32, #tpu.memory_space<vmem>>, vector<1x128xf32>
    %10 = vector.broadcast %9 : vector<1x128xf32> to vector<64x128xf32>
    %11 = arith.addf %8, %10 : vector<64x128xf32>
    %cst_7 = arith.constant 0.000000e+00 : f32
    %12 = vector.broadcast %cst_7 : f32 to vector<64x128xf32>
    %13 = arith.cmpf ogt, %11, %12 : vector<64x128xf32>
    %cst_8 = arith.constant 1.000000e-01 : f32
    %14 = vector.broadcast %cst_8 : f32 to vector<64x128xf32>
    %15 = arith.mulf %14, %11 : vector<64x128xf32>
    %16 = arith.select %13, %11, %15 : vector<64x128xi1>, vector<64x128xf32>
    %17 = arith.truncf %16 : vector<64x128xf32> to vector<64x128xbf16>
    %c0_9 = arith.constant 0 : index
    %c0_10 = arith.constant 0 : index
    %18 = vector.load %arg5[%c0_9, %c0_10] : memref<64x128xbf16, #tpu.memory_space<vmem>>, vector<64x128xbf16>
    tpu.vector_store %arg5[%c0_9, %c0_10], %17 {strides = array<i32>} : memref<64x128xbf16, #tpu.memory_space<vmem>>, vector<64x128xbf16>,
    return
  }
  func.func @transform_0(%arg0: i32, %arg1: i32) -> (i32, i32, i32, i32) {
    %c0_i32 = arith.constant 0 : i32
    %c0_i32_0 = arith.constant 0 : i32
    %c0_i32_1 = arith.constant 0 : i32
    %c0_i32_2 = arith.constant 0 : i32
    return %arg0, %c0_i32, %c0_i32_0, %c0_i32_1 : i32, i32, i32, i32
  }
  func.func @transform_1(%arg0: i32, %arg1: i32) -> (i32, i32, i32) {
    %c0_i32 = arith.constant 0 : i32
    %c0_i32_0 = arith.constant 0 : i32
    %c0_i32_1 = arith.constant 0 : i32
    %c0_i32_2 = arith.constant 0 : i32
    return %c0_i32, %c0_i32_0, %c0_i32_1 : i32, i32, i32
  }
  func.func @transform_2(%arg0: i32, %arg1: i32) -> (i32, i32) {
    %c0_i32 = arith.constant 0 : i32
    %c0_i32_0 = arith.constant 0 : i32
    %c0_i32_1 = arith.constant 0 : i32
    return %c0_i32, %c0_i32_0 : i32, i32
  }
  func.func @transform_3(%arg0: i32, %arg1: i32) -> (i32, i32) {
    %c1_i32 = arith.constant 1 : i32
    %0 = arith.muli %arg0, %c1_i32 : i32
    %1 = arith.addi %0, %arg1 : i32
    %c0_i32 = arith.constant 0 : i32
    %c0_i32_0 = arith.constant 0 : i32
    return %1, %c0_i32 : i32, i32
  }
}

module attributes {stable_mosaic.version = 11 : i64} {
  func.func @kernel(%arg0: i32, %arg1: i32, %arg2: memref<1x10x10x128xbf16, #tpu.memory_space<vmem>>, %arg3: memref<3x384x128xbf16, #tpu.memory_space<vmem>>, %arg4: memref<1x128xf32, #tpu.memory_space<vmem>>, %arg5: memref<64x128xbf16, #tpu.memory_space<vmem>>, %arg6: memref<64x128xbf16, #tpu.memory_space<vmem>>) attributes {dimension_semantics = [#tpu.dimension_semantics<parallel>, #tpu.dimension_semantics<parallel>], iteration_bounds = array<i64: 2, 1>, scalar_prefetch = 0 : i64, scratch_operands = 0 : i64, tpu.core_type = #tpu.core_type<tc>, window_params = [{transform_indices = @transform_0, window_bounds = array<i64: 1, 10, 10, 128>}, {pipeline_mode = #tpu.pipeline_mode<synchronous>, transform_indices = @transform_1, window_bounds = array<i64: 3, 384, 128>}, {pipeline_mode = #tpu.pipeline_mode<synchronous>, transform_indices = @transform_2, window_bounds = array<i64: 1, 128>}, {transform_indices = @transform_3, window_bounds = array<i64: 64, 128>}, {transform_indices = @transform_4, window_bounds = array<i64: 64, 128>}]} {
    %c8_i32 = arith.constant 8 : i32
    %0 = arith.muli %arg1, %c8_i32 : i32
    %1 = tpu.assume_multiple %0, 8 : i32
    %c0 = arith.constant 0 : index
    %2 = arith.index_cast %1 : i32 to index
    %c0_0 = arith.constant 0 : index
    %c0_1 = arith.constant 0 : index
    %3 = vector.load %arg2[%c0, %2, %c0_0, %c0_1] : memref<1x10x10x128xbf16, #tpu.memory_space<vmem>>, vector<1x10x10x128xbf16>
    %4 = vector.shape_cast %3 : vector<1x10x10x128xbf16> to vector<10x10x128xbf16>
    %5 = vector.extract_strided_slice %4 {offsets = [0, 0, 0], sizes = [8, 10, 128], strides = [1, 1, 1]} : vector<10x10x128xbf16> to vector<8x10x128xbf16>
    %6 = vector.extract_strided_slice %5 {offsets = [0, 0, 0], sizes = [8, 8, 128], strides = [1, 1, 1]} : vector<8x10x128xbf16> to vector<8x8x128xbf16>
    %7 = vector.extract_strided_slice %5 {offsets = [0, 1, 0], sizes = [8, 8, 128], strides = [1, 1, 1]} : vector<8x10x128xbf16> to vector<8x8x128xbf16>
    %8 = vector.extract_strided_slice %5 {offsets = [0, 2, 0], sizes = [8, 8, 128], strides = [1, 1, 1]} : vector<8x10x128xbf16> to vector<8x8x128xbf16>
    %9 = tpu.concatenate %6, %7, %8 in 2 : vector<8x8x128xbf16>, vector<8x8x128xbf16>, vector<8x8x128xbf16> -> vector<8x8x384xbf16>
    %10 = vector.shape_cast %9 : vector<8x8x384xbf16> to vector<64x384xbf16>
    %c0_2 = arith.constant 0 : index
    %c0_3 = arith.constant 0 : index
    %c0_4 = arith.constant 0 : index
    %11 = vector.load %arg3[%c0_2, %c0_3, %c0_4] : memref<3x384x128xbf16, #tpu.memory_space<vmem>>, vector<1x384x128xbf16>
    %12 = vector.shape_cast %11 : vector<1x384x128xbf16> to vector<384x128xbf16>
    %cst = arith.constant dense<0.000000e+00> : vector<64x128xf32>
    %13 = tpu.matmul %10, %12, %cst {dimension_numbers = #tpu.dot_dimension_numbers<[1], [0], [0], [1], [0, 0, 1, 1], [], []>} : vector<64x384xbf16>, vector<384x128xbf16>, vector<64x128xf32> -> vector<64x128xf32>
    %14 = vector.extract_strided_slice %4 {offsets = [1, 0, 0], sizes = [8, 10, 128], strides = [1, 1, 1]} : vector<10x10x128xbf16> to vector<8x10x128xbf16>
    %15 = vector.extract_strided_slice %14 {offsets = [0, 0, 0], sizes = [8, 8, 128], strides = [1, 1, 1]} : vector<8x10x128xbf16> to vector<8x8x128xbf16>
    %16 = vector.extract_strided_slice %14 {offsets = [0, 1, 0], sizes = [8, 8, 128], strides = [1, 1, 1]} : vector<8x10x128xbf16> to vector<8x8x128xbf16>
    %17 = vector.extract_strided_slice %14 {offsets = [0, 2, 0], sizes = [8, 8, 128], strides = [1, 1, 1]} : vector<8x10x128xbf16> to vector<8x8x128xbf16>
    %18 = tpu.concatenate %15, %16, %17 in 2 : vector<8x8x128xbf16>, vector<8x8x128xbf16>, vector<8x8x128xbf16> -> vector<8x8x384xbf16>
    %19 = vector.shape_cast %18 : vector<8x8x384xbf16> to vector<64x384xbf16>
    %c1 = arith.constant 1 : index
    %c0_5 = arith.constant 0 : index
    %c0_6 = arith.constant 0 : index
    %20 = vector.load %arg3[%c1, %c0_5, %c0_6] : memref<3x384x128xbf16, #tpu.memory_space<vmem>>, vector<1x384x128xbf16>
    %21 = vector.shape_cast %20 : vector<1x384x128xbf16> to vector<384x128xbf16>
    %cst_7 = arith.constant dense<0.000000e+00> : vector<64x128xf32>
    %22 = tpu.matmul %19, %21, %cst_7 {dimension_numbers = #tpu.dot_dimension_numbers<[1], [0], [0], [1], [0, 0, 1, 1], [], []>} : vector<64x384xbf16>, vector<384x128xbf16>, vector<64x128xf32> -> vector<64x128xf32>
    %23 = arith.addf %13, %22 : vector<64x128xf32>
    %24 = vector.extract_strided_slice %4 {offsets = [2, 0, 0], sizes = [8, 10, 128], strides = [1, 1, 1]} : vector<10x10x128xbf16> to vector<8x10x128xbf16>
    %25 = vector.extract_strided_slice %24 {offsets = [0, 0, 0], sizes = [8, 8, 128], strides = [1, 1, 1]} : vector<8x10x128xbf16> to vector<8x8x128xbf16>
    %26 = vector.extract_strided_slice %24 {offsets = [0, 1, 0], sizes = [8, 8, 128], strides = [1, 1, 1]} : vector<8x10x128xbf16> to vector<8x8x128xbf16>
    %27 = vector.extract_strided_slice %24 {offsets = [0, 2, 0], sizes = [8, 8, 128], strides = [1, 1, 1]} : vector<8x10x128xbf16> to vector<8x8x128xbf16>
    %28 = tpu.concatenate %25, %26, %27 in 2 : vector<8x8x128xbf16>, vector<8x8x128xbf16>, vector<8x8x128xbf16> -> vector<8x8x384xbf16>
    %29 = vector.shape_cast %28 : vector<8x8x384xbf16> to vector<64x384xbf16>
    %c2 = arith.constant 2 : index
    %c0_8 = arith.constant 0 : index
    %c0_9 = arith.constant 0 : index
    %30 = vector.load %arg3[%c2, %c0_8, %c0_9] : memref<3x384x128xbf16, #tpu.memory_space<vmem>>, vector<1x384x128xbf16>
    %31 = vector.shape_cast %30 : vector<1x384x128xbf16> to vector<384x128xbf16>
    %cst_10 = arith.constant dense<0.000000e+00> : vector<64x128xf32>
    %32 = tpu.matmul %29, %31, %cst_10 {dimension_numbers = #tpu.dot_dimension_numbers<[1], [0], [0], [1], [0, 0, 1, 1], [], []>} : vector<64x384xbf16>, vector<384x128xbf16>, vector<64x128xf32> -> vector<64x128xf32>
    %33 = arith.addf %23, %32 : vector<64x128xf32>
    %c0_11 = arith.constant 0 : index
    %c0_12 = arith.constant 0 : index
    %34 = vector.load %arg4[%c0_11, %c0_12] : memref<1x128xf32, #tpu.memory_space<vmem>>, vector<1x128xf32>
    %35 = vector.broadcast %34 : vector<1x128xf32> to vector<64x128xf32>
    %36 = arith.addf %33, %35 : vector<64x128xf32>
    %cst_13 = arith.constant 0.000000e+00 : f32
    %37 = vector.broadcast %cst_13 : f32 to vector<64x128xf32>
    %38 = arith.cmpf ogt, %36, %37 : vector<64x128xf32>
    %cst_14 = arith.constant 1.000000e-01 : f32
    %39 = vector.broadcast %cst_14 : f32 to vector<64x128xf32>
    %40 = arith.mulf %39, %36 : vector<64x128xf32>
    %41 = arith.select %38, %36, %40 : vector<64x128xi1>, vector<64x128xf32>
    %c0_15 = arith.constant 0 : index
    %c0_16 = arith.constant 0 : index
    %42 = vector.load %arg5[%c0_15, %c0_16] : memref<64x128xbf16, #tpu.memory_space<vmem>>, vector<64x128xbf16>
    %43 = arith.extf %42 : vector<64x128xbf16> to vector<64x128xf32>
    %44 = arith.addf %41, %43 : vector<64x128xf32>
    %45 = arith.truncf %44 : vector<64x128xf32> to vector<64x128xbf16>
    %c0_17 = arith.constant 0 : index
    %c0_18 = arith.constant 0 : index
    %46 = vector.load %arg6[%c0_17, %c0_18] : memref<64x128xbf16, #tpu.memory_space<vmem>>, vector<64x128xbf16>
    tpu.vector_store %arg6[%c0_17, %c0_18], %45 {strides = array<i32>} : memref<64x128xbf16, #tpu.memory_space<vmem>>, vector<64x128xbf16>,
    return
  }
  func.func @transform_0(%arg0: i32, %arg1: i32) -> (i32, i32, i32, i32) {
    %c0_i32 = arith.constant 0 : i32
    %c0_i32_0 = arith.constant 0 : i32
    %c0_i32_1 = arith.constant 0 : i32
    %c0_i32_2 = arith.constant 0 : i32
    return %arg0, %c0_i32, %c0_i32_0, %c0_i32_1 : i32, i32, i32, i32
  }
  func.func @transform_1(%arg0: i32, %arg1: i32) -> (i32, i32, i32) {
    %c0_i32 = arith.constant 0 : i32
    %c0_i32_0 = arith.constant 0 : i32
    %c0_i32_1 = arith.constant 0 : i32
    %c0_i32_2 = arith.constant 0 : i32
    return %c0_i32, %c0_i32_0, %c0_i32_1 : i32, i32, i32
  }
  func.func @transform_2(%arg0: i32, %arg1: i32) -> (i32, i32) {
    %c0_i32 = arith.constant 0 : i32
    %c0_i32_0 = arith.constant 0 : i32
    %c0_i32_1 = arith.constant 0 : i32
    return %c0_i32, %c0_i32_0 : i32, i32
  }
  func.func @transform_3(%arg0: i32, %arg1: i32) -> (i32, i32) {
    %c1_i32 = arith.constant 1 : i32
    %0 = arith.muli %arg0, %c1_i32 : i32
    %1 = arith.addi %0, %arg1 : i32
    %c0_i32 = arith.constant 0 : i32
    %c0_i32_0 = arith.constant 0 : i32
    return %1, %c0_i32 : i32, i32
  }
  func.func @transform_4(%arg0: i32, %arg1: i32) -> (i32, i32) {
    %c1_i32 = arith.constant 1 : i32
    %0 = arith.muli %arg0, %c1_i32 : i32
    %1 = arith.addi %0, %arg1 : i32
    %c0_i32 = arith.constant 0 : i32
    %c0_i32_0 = arith.constant 0 : i32
    return %1, %c0_i32 : i32, i32
  }
}

module attributes {stable_mosaic.version = 11 : i64} {
  func.func @kernel(%arg0: i32, %arg1: i32, %arg2: memref<1x8x8x128xbf16, #tpu.memory_space<vmem>>, %arg3: memref<1x128x128xbf16, #tpu.memory_space<vmem>>, %arg4: memref<1x128xf32, #tpu.memory_space<vmem>>, %arg5: memref<64x128xf32, #tpu.memory_space<vmem>>) attributes {dimension_semantics = [#tpu.dimension_semantics<parallel>, #tpu.dimension_semantics<parallel>], iteration_bounds = array<i64: 2, 1>, scalar_prefetch = 0 : i64, scratch_operands = 0 : i64, tpu.core_type = #tpu.core_type<tc>, window_params = [{transform_indices = @transform_0, window_bounds = array<i64: 1, 8, 8, 128>}, {pipeline_mode = #tpu.pipeline_mode<synchronous>, transform_indices = @transform_1, window_bounds = array<i64: 1, 128, 128>}, {pipeline_mode = #tpu.pipeline_mode<synchronous>, transform_indices = @transform_2, window_bounds = array<i64: 1, 128>}, {transform_indices = @transform_3, window_bounds = array<i64: 64, 128>}]} {
    %c8_i32 = arith.constant 8 : i32
    %0 = arith.muli %arg1, %c8_i32 : i32
    %1 = tpu.assume_multiple %0, 8 : i32
    %c0 = arith.constant 0 : index
    %2 = arith.index_cast %1 : i32 to index
    %c0_0 = arith.constant 0 : index
    %c0_1 = arith.constant 0 : index
    %3 = vector.load %arg2[%c0, %2, %c0_0, %c0_1] : memref<1x8x8x128xbf16, #tpu.memory_space<vmem>>, vector<1x8x8x128xbf16>
    %4 = vector.shape_cast %3 : vector<1x8x8x128xbf16> to vector<8x8x128xbf16>
    %5 = vector.shape_cast %4 : vector<8x8x128xbf16> to vector<64x128xbf16>
    %c0_2 = arith.constant 0 : index
    %c0_3 = arith.constant 0 : index
    %c0_4 = arith.constant 0 : index
    %6 = vector.load %arg3[%c0_2, %c0_3, %c0_4] : memref<1x128x128xbf16, #tpu.memory_space<vmem>>, vector<1x128x128xbf16>
    %7 = vector.shape_cast %6 : vector<1x128x128xbf16> to vector<128x128xbf16>
    %cst = arith.constant dense<0.000000e+00> : vector<64x128xf32>
    %8 = tpu.matmul %5, %7, %cst {dimension_numbers = #tpu.dot_dimension_numbers<[1], [0], [0], [1], [0, 0, 1, 1], [], []>} : vector<64x128xbf16>, vector<128x128xbf16>, vector<64x128xf32> -> vector<64x128xf32>
    %c0_5 = arith.constant 0 : index
    %c0_6 = arith.constant 0 : index
    %9 = vector.load %arg4[%c0_5, %c0_6] : memref<1x128xf32, #tpu.memory_space<vmem>>, vector<1x128xf32>
    %10 = vector.broadcast %9 : vector<1x128xf32> to vector<64x128xf32>
    %11 = arith.addf %8, %10 : vector<64x128xf32>
    %c0_7 = arith.constant 0 : index
    %c0_8 = arith.constant 0 : index
    %12 = vector.load %arg5[%c0_7, %c0_8] : memref<64x128xf32, #tpu.memory_space<vmem>>, vector<64x128xf32>
    tpu.vector_store %arg5[%c0_7, %c0_8], %11 {strides = array<i32>} : memref<64x128xf32, #tpu.memory_space<vmem>>, vector<64x128xf32>,
    return
  }
  func.func @transform_0(%arg0: i32, %arg1: i32) -> (i32, i32, i32, i32) {
    %c0_i32 = arith.constant 0 : i32
    %c0_i32_0 = arith.constant 0 : i32
    %c0_i32_1 = arith.constant 0 : i32
    %c0_i32_2 = arith.constant 0 : i32
    return %arg0, %c0_i32, %c0_i32_0, %c0_i32_1 : i32, i32, i32, i32
  }
  func.func @transform_1(%arg0: i32, %arg1: i32) -> (i32, i32, i32) {
    %c0_i32 = arith.constant 0 : i32
    %c0_i32_0 = arith.constant 0 : i32
    %c0_i32_1 = arith.constant 0 : i32
    %c0_i32_2 = arith.constant 0 : i32
    return %c0_i32, %c0_i32_0, %c0_i32_1 : i32, i32, i32
  }
  func.func @transform_2(%arg0: i32, %arg1: i32) -> (i32, i32) {
    %c0_i32 = arith.constant 0 : i32
    %c0_i32_0 = arith.constant 0 : i32
    %c0_i32_1 = arith.constant 0 : i32
    return %c0_i32, %c0_i32_0 : i32, i32
  }
  func.func @transform_3(%arg0: i32, %arg1: i32) -> (i32, i32) {
    %c1_i32 = arith.constant 1 : i32
    %0 = arith.muli %arg0, %c1_i32 : i32
    %1 = arith.addi %0, %arg1 : i32
    %c0_i32 = arith.constant 0 : i32
    %c0_i32_0 = arith.constant 0 : i32
    return %1, %c0_i32 : i32, i32
  }
}

module attributes {stable_mosaic.version = 11 : i64} {
  func.func @kernel(%arg0: i32, %arg1: i32, %arg2: memref<1x18x18x256xbf16, #tpu.memory_space<vmem>>, %arg3: memref<3x768x128xbf16, #tpu.memory_space<vmem>>, %arg4: memref<1x128xf32, #tpu.memory_space<vmem>>, %arg5: memref<128x128xbf16, #tpu.memory_space<vmem>>) attributes {dimension_semantics = [#tpu.dimension_semantics<parallel>, #tpu.dimension_semantics<parallel>], iteration_bounds = array<i64: 2, 2>, scalar_prefetch = 0 : i64, scratch_operands = 0 : i64, tpu.core_type = #tpu.core_type<tc>, window_params = [{transform_indices = @transform_0, window_bounds = array<i64: 1, 18, 18, 256>}, {pipeline_mode = #tpu.pipeline_mode<synchronous>, transform_indices = @transform_1, window_bounds = array<i64: 3, 768, 128>}, {pipeline_mode = #tpu.pipeline_mode<synchronous>, transform_indices = @transform_2, window_bounds = array<i64: 1, 128>}, {transform_indices = @transform_3, window_bounds = array<i64: 128, 128>}]} {
    %c8_i32 = arith.constant 8 : i32
    %0 = arith.muli %arg1, %c8_i32 : i32
    %1 = tpu.assume_multiple %0, 8 : i32
    %c0 = arith.constant 0 : index
    %2 = arith.index_cast %1 : i32 to index
    %c0_0 = arith.constant 0 : index
    %c0_1 = arith.constant 0 : index
    %3 = vector.load %arg2[%c0, %2, %c0_0, %c0_1] : memref<1x18x18x256xbf16, #tpu.memory_space<vmem>>, vector<1x10x18x256xbf16>
    %4 = vector.shape_cast %3 : vector<1x10x18x256xbf16> to vector<10x18x256xbf16>
    %5 = vector.extract_strided_slice %4 {offsets = [0, 0, 0], sizes = [8, 18, 256], strides = [1, 1, 1]} : vector<10x18x256xbf16> to vector<8x18x256xbf16>
    %6 = vector.extract_strided_slice %5 {offsets = [0, 0, 0], sizes = [8, 16, 256], strides = [1, 1, 1]} : vector<8x18x256xbf16> to vector<8x16x256xbf16>
    %7 = vector.extract_strided_slice %5 {offsets = [0, 1, 0], sizes = [8, 16, 256], strides = [1, 1, 1]} : vector<8x18x256xbf16> to vector<8x16x256xbf16>
    %8 = vector.extract_strided_slice %5 {offsets = [0, 2, 0], sizes = [8, 16, 256], strides = [1, 1, 1]} : vector<8x18x256xbf16> to vector<8x16x256xbf16>
    %9 = tpu.concatenate %6, %7, %8 in 2 : vector<8x16x256xbf16>, vector<8x16x256xbf16>, vector<8x16x256xbf16> -> vector<8x16x768xbf16>
    %10 = vector.shape_cast %9 : vector<8x16x768xbf16> to vector<128x768xbf16>
    %c0_2 = arith.constant 0 : index
    %c0_3 = arith.constant 0 : index
    %c0_4 = arith.constant 0 : index
    %11 = vector.load %arg3[%c0_2, %c0_3, %c0_4] : memref<3x768x128xbf16, #tpu.memory_space<vmem>>, vector<1x768x128xbf16>
    %12 = vector.shape_cast %11 : vector<1x768x128xbf16> to vector<768x128xbf16>
    %cst = arith.constant dense<0.000000e+00> : vector<128x128xf32>
    %13 = tpu.matmul %10, %12, %cst {dimension_numbers = #tpu.dot_dimension_numbers<[1], [0], [0], [1], [0, 0, 1, 1], [], []>} : vector<128x768xbf16>, vector<768x128xbf16>, vector<128x128xf32> -> vector<128x128xf32>
    %14 = vector.extract_strided_slice %4 {offsets = [1, 0, 0], sizes = [8, 18, 256], strides = [1, 1, 1]} : vector<10x18x256xbf16> to vector<8x18x256xbf16>
    %15 = vector.extract_strided_slice %14 {offsets = [0, 0, 0], sizes = [8, 16, 256], strides = [1, 1, 1]} : vector<8x18x256xbf16> to vector<8x16x256xbf16>
    %16 = vector.extract_strided_slice %14 {offsets = [0, 1, 0], sizes = [8, 16, 256], strides = [1, 1, 1]} : vector<8x18x256xbf16> to vector<8x16x256xbf16>
    %17 = vector.extract_strided_slice %14 {offsets = [0, 2, 0], sizes = [8, 16, 256], strides = [1, 1, 1]} : vector<8x18x256xbf16> to vector<8x16x256xbf16>
    %18 = tpu.concatenate %15, %16, %17 in 2 : vector<8x16x256xbf16>, vector<8x16x256xbf16>, vector<8x16x256xbf16> -> vector<8x16x768xbf16>
    %19 = vector.shape_cast %18 : vector<8x16x768xbf16> to vector<128x768xbf16>
    %c1 = arith.constant 1 : index
    %c0_5 = arith.constant 0 : index
    %c0_6 = arith.constant 0 : index
    %20 = vector.load %arg3[%c1, %c0_5, %c0_6] : memref<3x768x128xbf16, #tpu.memory_space<vmem>>, vector<1x768x128xbf16>
    %21 = vector.shape_cast %20 : vector<1x768x128xbf16> to vector<768x128xbf16>
    %cst_7 = arith.constant dense<0.000000e+00> : vector<128x128xf32>
    %22 = tpu.matmul %19, %21, %cst_7 {dimension_numbers = #tpu.dot_dimension_numbers<[1], [0], [0], [1], [0, 0, 1, 1], [], []>} : vector<128x768xbf16>, vector<768x128xbf16>, vector<128x128xf32> -> vector<128x128xf32>
    %23 = arith.addf %13, %22 : vector<128x128xf32>
    %24 = vector.extract_strided_slice %4 {offsets = [2, 0, 0], sizes = [8, 18, 256], strides = [1, 1, 1]} : vector<10x18x256xbf16> to vector<8x18x256xbf16>
    %25 = vector.extract_strided_slice %24 {offsets = [0, 0, 0], sizes = [8, 16, 256], strides = [1, 1, 1]} : vector<8x18x256xbf16> to vector<8x16x256xbf16>
    %26 = vector.extract_strided_slice %24 {offsets = [0, 1, 0], sizes = [8, 16, 256], strides = [1, 1, 1]} : vector<8x18x256xbf16> to vector<8x16x256xbf16>
    %27 = vector.extract_strided_slice %24 {offsets = [0, 2, 0], sizes = [8, 16, 256], strides = [1, 1, 1]} : vector<8x18x256xbf16> to vector<8x16x256xbf16>
    %28 = tpu.concatenate %25, %26, %27 in 2 : vector<8x16x256xbf16>, vector<8x16x256xbf16>, vector<8x16x256xbf16> -> vector<8x16x768xbf16>
    %29 = vector.shape_cast %28 : vector<8x16x768xbf16> to vector<128x768xbf16>
    %c2 = arith.constant 2 : index
    %c0_8 = arith.constant 0 : index
    %c0_9 = arith.constant 0 : index
    %30 = vector.load %arg3[%c2, %c0_8, %c0_9] : memref<3x768x128xbf16, #tpu.memory_space<vmem>>, vector<1x768x128xbf16>
    %31 = vector.shape_cast %30 : vector<1x768x128xbf16> to vector<768x128xbf16>
    %cst_10 = arith.constant dense<0.000000e+00> : vector<128x128xf32>
    %32 = tpu.matmul %29, %31, %cst_10 {dimension_numbers = #tpu.dot_dimension_numbers<[1], [0], [0], [1], [0, 0, 1, 1], [], []>} : vector<128x768xbf16>, vector<768x128xbf16>, vector<128x128xf32> -> vector<128x128xf32>
    %33 = arith.addf %23, %32 : vector<128x128xf32>
    %c0_11 = arith.constant 0 : index
    %c0_12 = arith.constant 0 : index
    %34 = vector.load %arg4[%c0_11, %c0_12] : memref<1x128xf32, #tpu.memory_space<vmem>>, vector<1x128xf32>
    %35 = vector.broadcast %34 : vector<1x128xf32> to vector<128x128xf32>
    %36 = arith.addf %33, %35 : vector<128x128xf32>
    %cst_13 = arith.constant 0.000000e+00 : f32
    %37 = vector.broadcast %cst_13 : f32 to vector<128x128xf32>
    %38 = arith.cmpf ogt, %36, %37 : vector<128x128xf32>
    %cst_14 = arith.constant 1.000000e-01 : f32
    %39 = vector.broadcast %cst_14 : f32 to vector<128x128xf32>
    %40 = arith.mulf %39, %36 : vector<128x128xf32>
    %41 = arith.select %38, %36, %40 : vector<128x128xi1>, vector<128x128xf32>
    %42 = arith.truncf %41 : vector<128x128xf32> to vector<128x128xbf16>
    %c0_15 = arith.constant 0 : index
    %c0_16 = arith.constant 0 : index
    %43 = vector.load %arg5[%c0_15, %c0_16] : memref<128x128xbf16, #tpu.memory_space<vmem>>, vector<128x128xbf16>
    tpu.vector_store %arg5[%c0_15, %c0_16], %42 {strides = array<i32>} : memref<128x128xbf16, #tpu.memory_space<vmem>>, vector<128x128xbf16>,
    return
  }
  func.func @transform_0(%arg0: i32, %arg1: i32) -> (i32, i32, i32, i32) {
    %c0_i32 = arith.constant 0 : i32
    %c0_i32_0 = arith.constant 0 : i32
    %c0_i32_1 = arith.constant 0 : i32
    %c0_i32_2 = arith.constant 0 : i32
    return %arg0, %c0_i32, %c0_i32_0, %c0_i32_1 : i32, i32, i32, i32
  }
  func.func @transform_1(%arg0: i32, %arg1: i32) -> (i32, i32, i32) {
    %c0_i32 = arith.constant 0 : i32
    %c0_i32_0 = arith.constant 0 : i32
    %c0_i32_1 = arith.constant 0 : i32
    %c0_i32_2 = arith.constant 0 : i32
    return %c0_i32, %c0_i32_0, %c0_i32_1 : i32, i32, i32
  }
  func.func @transform_2(%arg0: i32, %arg1: i32) -> (i32, i32) {
    %c0_i32 = arith.constant 0 : i32
    %c0_i32_0 = arith.constant 0 : i32
    %c0_i32_1 = arith.constant 0 : i32
    return %c0_i32, %c0_i32_0 : i32, i32
  }
  func.func @transform_3(%arg0: i32, %arg1: i32) -> (i32, i32) {
    %c2_i32 = arith.constant 2 : i32
    %0 = arith.muli %arg0, %c2_i32 : i32
    %1 = arith.addi %0, %arg1 : i32
    %c0_i32 = arith.constant 0 : i32
    %c0_i32_0 = arith.constant 0 : i32
    return %1, %c0_i32 : i32, i32
  }
}

module attributes {stable_mosaic.version = 11 : i64} {
  func.func @kernel(%arg0: i32, %arg1: i32, %arg2: memref<1x16x16x128xbf16, #tpu.memory_space<vmem>>, %arg3: memref<1x128x128xbf16, #tpu.memory_space<vmem>>, %arg4: memref<1x128xf32, #tpu.memory_space<vmem>>, %arg5: memref<128x128xf32, #tpu.memory_space<vmem>>) attributes {dimension_semantics = [#tpu.dimension_semantics<parallel>, #tpu.dimension_semantics<parallel>], iteration_bounds = array<i64: 2, 2>, scalar_prefetch = 0 : i64, scratch_operands = 0 : i64, tpu.core_type = #tpu.core_type<tc>, window_params = [{transform_indices = @transform_0, window_bounds = array<i64: 1, 16, 16, 128>}, {pipeline_mode = #tpu.pipeline_mode<synchronous>, transform_indices = @transform_1, window_bounds = array<i64: 1, 128, 128>}, {pipeline_mode = #tpu.pipeline_mode<synchronous>, transform_indices = @transform_2, window_bounds = array<i64: 1, 128>}, {transform_indices = @transform_3, window_bounds = array<i64: 128, 128>}]} {
    %c8_i32 = arith.constant 8 : i32
    %0 = arith.muli %arg1, %c8_i32 : i32
    %1 = tpu.assume_multiple %0, 8 : i32
    %c0 = arith.constant 0 : index
    %2 = arith.index_cast %1 : i32 to index
    %c0_0 = arith.constant 0 : index
    %c0_1 = arith.constant 0 : index
    %3 = vector.load %arg2[%c0, %2, %c0_0, %c0_1] : memref<1x16x16x128xbf16, #tpu.memory_space<vmem>>, vector<1x8x16x128xbf16>
    %4 = vector.shape_cast %3 : vector<1x8x16x128xbf16> to vector<8x16x128xbf16>
    %5 = vector.shape_cast %4 : vector<8x16x128xbf16> to vector<128x128xbf16>
    %c0_2 = arith.constant 0 : index
    %c0_3 = arith.constant 0 : index
    %c0_4 = arith.constant 0 : index
    %6 = vector.load %arg3[%c0_2, %c0_3, %c0_4] : memref<1x128x128xbf16, #tpu.memory_space<vmem>>, vector<1x128x128xbf16>
    %7 = vector.shape_cast %6 : vector<1x128x128xbf16> to vector<128x128xbf16>
    %cst = arith.constant dense<0.000000e+00> : vector<128x128xf32>
    %8 = tpu.matmul %5, %7, %cst {dimension_numbers = #tpu.dot_dimension_numbers<[1], [0], [0], [1], [0, 0, 1, 1], [], []>} : vector<128x128xbf16>, vector<128x128xbf16>, vector<128x128xf32> -> vector<128x128xf32>
    %c0_5 = arith.constant 0 : index
    %c0_6 = arith.constant 0 : index
    %9 = vector.load %arg4[%c0_5, %c0_6] : memref<1x128xf32, #tpu.memory_space<vmem>>, vector<1x128xf32>
    %10 = vector.broadcast %9 : vector<1x128xf32> to vector<128x128xf32>
    %11 = arith.addf %8, %10 : vector<128x128xf32>
    %c0_7 = arith.constant 0 : index
    %c0_8 = arith.constant 0 : index
    %12 = vector.load %arg5[%c0_7, %c0_8] : memref<128x128xf32, #tpu.memory_space<vmem>>, vector<128x128xf32>
    tpu.vector_store %arg5[%c0_7, %c0_8], %11 {strides = array<i32>} : memref<128x128xf32, #tpu.memory_space<vmem>>, vector<128x128xf32>,
    return
  }
  func.func @transform_0(%arg0: i32, %arg1: i32) -> (i32, i32, i32, i32) {
    %c0_i32 = arith.constant 0 : i32
    %c0_i32_0 = arith.constant 0 : i32
    %c0_i32_1 = arith.constant 0 : i32
    %c0_i32_2 = arith.constant 0 : i32
    return %arg0, %c0_i32, %c0_i32_0, %c0_i32_1 : i32, i32, i32, i32
  }
  func.func @transform_1(%arg0: i32, %arg1: i32) -> (i32, i32, i32) {
    %c0_i32 = arith.constant 0 : i32
    %c0_i32_0 = arith.constant 0 : i32
    %c0_i32_1 = arith.constant 0 : i32
    %c0_i32_2 = arith.constant 0 : i32
    return %c0_i32, %c0_i32_0, %c0_i32_1 : i32, i32, i32
  }
  func.func @transform_2(%arg0: i32, %arg1: i32) -> (i32, i32) {
    %c0_i32 = arith.constant 0 : i32
    %c0_i32_0 = arith.constant 0 : i32
    %c0_i32_1 = arith.constant 0 : i32
    return %c0_i32, %c0_i32_0 : i32, i32
  }
  func.func @transform_3(%arg0: i32, %arg1: i32) -> (i32, i32) {
    %c2_i32 = arith.constant 2 : i32
    %0 = arith.muli %arg0, %c2_i32 : i32
    %1 = arith.addi %0, %arg1 : i32
    %c0_i32 = arith.constant 0 : i32
    %c0_i32_0 = arith.constant 0 : i32
    return %1, %c0_i32 : i32, i32
  }
}

</mosaic_0001>

<bundles_post_ra>
// kernel: darknet_forward.12
= control target key start
LH: loop header
LB: loop body
LE: loop exit
PB: predicated region body
PF: predicated region fallthrough
CT: control target
= control target key end

     0   :  { %s2391_s12 = smov 0   ;;  %s2393_s13 = smov 0   ;;  %s3017_s0 = inlined_call_operand.vmem [shape: bf16[2,34,34,16], index: 0, kind: input, shape index: {}]   ;;  %s3018_s1 = inlined_call_operand.vmem [shape: bf16[3,48,128], index: 1, kind: input, shape index: {}]   ;;  %s3019_s2 = inlined_call_operand.vmem [shape: f32[1,128], index: 2, kind: input, shape index: {}]   ;;  %s3020_s3 = inlined_call_operand.vmem [shape: bf16[2048,128], index: 3, kind: output, shape index: {}]  }
   0x1   :  { %s2395_s14 = smov 0   ;;  %s2397_s15 = smov 0  }
   0x2   :  { %s2399_s16 = smov 0  }
   0x3 LB: > { %s22_s17 = sadd.s32 1, %s2359_s14  ;;  %s25_s18 = sadd.s32 1, %s2363_s15  ;;  %s2367_s16 = sphi %s2399_s16, %s13_s16   ;;  %s2363_s15 = sphi %s2397_s15, %s3024_s15   ;;  %s2359_s14 = sphi %s2395_s14, %s3023_s14   ;;  %s2355_s13 = sphi %s2393_s13, %s3022_s13   ;;  %s2351_s12 = sphi %s2391_s12, %s3021_s12  }
   0x4   : > { %p23_p0 = scmp.ge.s32.totalorder %s22_s17, 4  ;;  %p1800_p1 = scmp.ge.s32.totalorder %s2367_s16, 1 }
   0x5   : > { %p153_p2 = scmp.lt.s32.totalorder %s2367_s16, 9 }
   0x6   : > { %s3026_s17 = smov (%p23_p0, %s22_s17), 0  ;;  %s3028_s18 = smov (!%p23_p0, %s25_s18), %s2363_s15 }
   0x7   : > { %p154_p3 = pnand %p1800_p1, %p153_p2  ;;  %p27_p4 = scmp.ge.s32.totalorder %s3028_s18, 2 }
   0x8   : > { %p179_p5 = scmp.lt.s32.totalorder (!%p154_p3), %s2355_s13, 1  ;;  %s1942_s19 = smul.u32 (!%p154_p3), 160, %s2351_s12 }
   0x9   : > { %s3030_s18 = smov (%p27_p4, %s3028_s18), 0  ;;  %157 = sbr.rel (%p154_p3) target bundleno = 476 (0x1dc), region = 32 }
   0xa   : > { %s2369_s30 = smov (!%p154_p3), 32   ;;  %s2370_s4 = smov (!%p154_p3), 16  }
   0xb   : > { %s1802_s26 = sshll.u32 (!%p154_p3), %s2355_s13, 2 }
   0xc   : > { %s185_s27 = sadd.s32 (!%p154_p3), %s2351_s12, %s1802_s26 }
   0xe   : > { %s180_s20 = scalar_select %p179_p5, %s2355_s13, 1  ;;  %v2317_v0 = vld [vmem:[%s3018_s1 + $0x28] sm:$0xff]   ;;  %vm546_vm0 = vcmask 1046528   ;;  %v2321_v1 = vld [vmem:[%s3018_s1 + $0x20] sm:$0xff]   ;;  %vm353_vm1 = vsmask.f32 7424 }
   0xf   : > { %2127 = vmatprep.subr.bf16.mxu0 %v2317_v0  ;;  %2241 = vmatprep.subr.bf16.mxu1 %v2317_v0  ;;  %vm619_vm2 = vcmask 130048   ;;  %vm652_vm3 = vcmask 261120   ;;  %vm770_vm4 = vcmask 392192  }
  0x10   : > { %s2247_s23 = smul.u32 680, %s180_s20  ;;  %2128 = vmatpush3.bf16.msra.mxu0 %v2317_v0  ;;  %2244 = vmatpush3.bf16.msra.mxu1 %v2317_v0 }
  0x11   : > { %2129 = vmatprep.subr.bf16.mxu0 %v2321_v1  ;;  %2242 = vmatprep.subr.bf16.mxu1 %v2321_v1 }
  0x12   : > { %s183_s28 = scalar_lea.vmem %s3017_s0, %s2247_s23 }
  0x13   : > { %s2437_s29 = scalar_lea.vmem %s183_s28, %s1942_s19  ;;  %s1803_s28 = sshll.u32 %s185_s27, 5 }
  0x14   : > { %v2440_v2 = vld [vmem:[%s2437_s29 + $0x6c] sm:$0xff]   ;;  %v2291_v3 = vld [vmem:[%s2437_s29 + $0x74] ss:$0 sps:$4 sm:$0x11]   ;;  %2130 = vmatpush3.bf16.msra.mxu0 %v2321_v1  ;;  %2245 = vmatpush3.bf16.msra.mxu1 %v2321_v1  ;;  %v2444_v4 = vld [vmem:[%s2437_s29 + $0x64] sm:$0xff]   ;;  %p187_p6 = scmp.lt.s32.totalorder %s1803_s28, 255 }
  0x15   : > { %v573_v5 = vrot.slane %v2440_v2, 1  ;;  %v575_v6 = vrot.slane %v2291_v3, 1  ;;  %v572_v7 = vrot.slane %v2444_v4, 1  ;;  %v2449_v8 = vld [vmem:[%s2437_s29 + $0x1c] sm:$0xff]   ;;  %v2453_v10 = vld [vmem:[%s2437_s29 + $0x14] sm:$0xff]   ;;  %v455_v12 = vshrl.u32 %v2444_v4, 16 }
  0x16   : > { %v2294_v9 = vld [vmem:[%s2437_s29 + $0x24] ss:$0 sps:$4 sm:$0x11]   ;;  %v457_v13 = vshll.u32 %v2444_v4, 16  ;;  %v553_v15 = vrot.slane %v2449_v8, 1  ;;  %v552_v17 = vrot.slane %v2453_v10, 1 }
  0x17   : > { %v576_v11 = vsel %vm546_vm0, %v573_v5, %v575_v6  ;;  %v574_v14 = vsel %vm546_vm0, %v572_v7, %v573_v5  ;;  %v555_v16 = vrot.slane %v2294_v9, 1  ;;  %v2463_v18 = vld [vmem:[%s2437_s29 + $0x78] sm:$0xff]   ;;  %v462_v20 = vshll.u32 %v2440_v2, 16  ;;  %v2474_v31 = vld [vmem:[%s2437_s29 + $0x80] sm:$0xff]   ;;  %v2485_v45 = vld [vmem:[%s2437_s29 + $0x28] sm:$0xff]   ;;  %s3032_s28 = smov (!%p187_p6, %s1803_s28), 255 }
  0x18   : > { %609 = vrot.lane.b32.xlu0 %v576_v11, %s2369_s30  ;;  %607 = vrot.lane.b32.xlu1 %v574_v14, %s2369_s30  ;;  %v459_v19 = vrot.slane %v457_v13, 1  ;;  %v375_v21 = vshrl.u32 %v2453_v10, 16  ;;  %v377_v22 = vshll.u32 %v2453_v10, 16  ;;  %v554_v24 = vsel %vm546_vm0, %v552_v17, %v553_v15  ;;  %v2298_v40 = vld [vmem:[%s2437_s29 + $0x88] ss:$0 sps:$4 sm:$0x11]  }
  0x19   : > { %v556_v23 = vsel %vm546_vm0, %v553_v15, %v555_v16  ;;  %v382_v25 = vshll.u32 %v2449_v8, 16  ;;  %v466_v26 = vshrl.u32 %v2440_v2, 16  ;;  %v464_v28 = vrot.slane %v462_v20, 1  ;;  %v2490_v49 = vld [vmem:[%s2437_s29 + $0x30] sm:$0xff]   ;;  %s1804_s12 = sshll.u32 %s3032_s28, 2 }
  0x1a   : > { %v460_v27 = vor.u32 %v459_v19, %v455_v12  ;;  %v379_v29 = vrot.slane %v377_v22, 1  ;;  %v470_v30 = vshll.u32 %v2291_v3, 16  ;;  %v386_v33 = vshrl.u32 %v2449_v8, 16  ;;  %v2301_v60 = vld [vmem:[%s2437_s29 + $0x38] ss:$0 sps:$4 sm:$0x11]   ;;  %s2924_s5 = scalar_lea.vmem %s3020_s3, %s1804_s12 }
  0x1b   : > { %v384_v32 = vrot.slane %v382_v25, 1  ;;  %v390_v34 = vshll.u32 %v2294_v9, 16  ;;  %v475_v35 = vshrl.u32 %v2463_v18, 16  ;;  %v468_v38 = vor.u32 %v466_v26, %v464_v28  ;;  %v2502_v62 = vld [vmem:[%s2437_s29 + $0x8c] sm:$0xff]   ;;  %v2510_v5 = vld [vmem:[%s2437_s29 + $0x94] sm:$0xff]  }
  0x1c   : > { %591 = vrot.lane.b32.xlu0 %v554_v24, %s2369_s30  ;;  %593 = vrot.lane.b32.xlu1 %v556_v23, %s2369_s30  ;;  %v465_v36 = vsel %vm353_vm1, %v460_v27, %v464_v28  ;;  %v380_v37 = vor.u32 %v379_v29, %v375_v21  ;;  %v472_v39 = vrot.slane %v470_v30, 1  ;;  %v477_v43 = vshll.u32 %v2463_v18, 16  ;;  %v2519_v16 = vld [vmem:[%s2437_s29 + $0x9c] ss:$0 sps:$4 sm:$0x11]  }
  0x1d   : > { %v388_v41 = vor.u32 %v386_v33, %v384_v32  ;;  %v392_v42 = vrot.slane %v390_v34, 1  ;;  %v482_v44 = vshll.u32 %v2474_v31, 16  ;;  %v486_v47 = vshrl.u32 %v2474_v31, 16  ;;  %v2523_v21 = vld [vmem:[%s2437_s29 + $0x3c] sm:$0xff]   ;;  %v2535_v33 = vld [vmem:[%s2437_s29 + $0x44] sm:$0xff]  }
  0x1e   : > { %v385_v46 = vsel %vm353_vm1, %v380_v37, %v384_v32  ;;  %v490_v48 = vshll.u32 %v2298_v40, 16  ;;  %v479_v50 = vrot.slane %v477_v43, 1  ;;  %v473_v52 = vsel %vm353_vm1, %v468_v38, %v472_v39 }
  0x1f   : > { %v484_v51 = vrot.slane %v482_v44, 1  ;;  %v393_v53 = vsel %vm353_vm1, %v388_v41, %v392_v42  ;;  %v397_v55 = vshll.u32 %v2485_v45, 16  ;;  %v395_v58 = vshrl.u32 %v2485_v45, 16  ;;  %v2322_v44 = vld [vmem:[%s3018_s1 + $0x18] sm:$0xff]  }
  0x20   : > { %534 = vrot.lane.b32.xlu0 %v465_v36, %s2370_s4  ;;  %518 = vrot.lane.b32.xlu1 %v385_v46, %s2370_s4  ;;  %v492_v54 = vrot.slane %v490_v48, 1  ;;  %v480_v56 = vor.u32 %v479_v50, %v475_v35  ;;  %v402_v59 = vshll.u32 %v2490_v49, 16  ;;  %v577_v0 = vrot.slane %v2463_v18, 1  ;;  %v2539_v35 = vld [vmem:[%s2437_s29 + $0x4c] ss:$0 sps:$4 sm:$0x11]  }
  0x21   : > { %v488_v57 = vor.u32 %v486_v47, %v484_v51  ;;  %v399_v61 = vrot.slane %v397_v55, 1  ;;  %v578_v1 = vrot.slane %v2474_v31, 1  ;;  %v406_v3 = vshrl.u32 %v2490_v49, 16  ;;  %v2552_v47 = vld [vmem:[%s2437_s29 + $0xa0] sm:$0xff]   ;;  %v2557_v48 = vld [vmem:[%s3018_s1 + $0x10] sm:$0xff]   ;;  %2131 = vmatprep.subr.bf16.mxu0 %v2322_v44  ;;  %2243 = vmatprep.subr.bf16.mxu1 %v2322_v44 }
  0x22   : > { %v485_v63 = vsel %vm353_vm1, %v480_v56, %v484_v51  ;;  %v404_v9 = vrot.slane %v402_v59, 1  ;;  %v410_v11 = vshll.u32 %v2301_v60, 16  ;;  %v580_v12 = vrot.slane %v2298_v40, 1  ;;  %v2562_v51 = vld [vmem:[%s2437_s29 + $0xa8] sm:$0xff]   ;;  %2132 = vmatpush3.bf16.msra.mxu0 %v2322_v44  ;;  %2246 = vmatpush3.bf16.msra.mxu1 %v2322_v44 }
  0x23   : > { %v493_v6 = vsel %vm353_vm1, %v488_v57, %v492_v54  ;;  %v400_v7 = vor.u32 %v399_v61, %v395_v58  ;;  %v497_v13 = vshll.u32 %v2502_v62, 16  ;;  %v579_v14 = vsel %vm546_vm0, %v577_v0, %v578_v1  ;;  %v2580_v0 = vld [vmem:[%s2437_s29 + $0x10] ss:$0 sps:$4 sm:$0x11]   ;;  %2165 = vmatprep.subr.bf16.mxu1 %v2557_v48 }
  0x24   : > { %536 = vrot.lane.b32.xlu0 %v473_v52, %s2370_s4  ;;  %520 = vrot.lane.b32.xlu1 %v393_v53, %s2370_s4  ;;  %v502_v15 = vshll.u32 %v2510_v5, 16  ;;  %v408_v19 = vor.u32 %v406_v3, %v404_v9  ;;  %v412_v20 = vrot.slane %v410_v11, 1  ;;  %v581_v22 = vsel %vm546_vm0, %v578_v1, %v580_v12  ;;  %v2567_v52 = vld [vmem:[%s3018_s1 + $0x40] sm:$0xff]  }
  0x25   : > { %v405_v17 = vsel %vm353_vm1, %v400_v7, %v404_v9  ;;  %v557_v23 = vrot.slane %v2485_v45, 1  ;;  %v558_v24 = vrot.slane %v2490_v49, 1  ;;  %v560_v25 = vrot.slane %v2301_v60, 1  ;;  %2203 = vmatprep.subr.bf16.mxu0 %v2567_v52  ;;  %v2587_v3 = vld [vmem:[%s2437_s29 + $0xbc] sm:$0xff]  }
  0x26   : > { %v495_v26 = vshrl.u32 %v2502_v62, 16  ;;  %v499_v27 = vrot.slane %v497_v13, 1  ;;  %v504_v28 = vrot.slane %v502_v15, 1  ;;  %v413_v29 = vsel %vm353_vm1, %v408_v19, %v412_v20  ;;  %v2592_v9 = vld [vmem:[%s2437_s29 + $0xb0] ss:$0 sps:$4 sm:$0x11]  }
  0x27   : > { %v506_v30 = vshrl.u32 %v2510_v5, 16  ;;  %v510_v32 = vshll.u32 %v2519_v16, 16  ;;  %v417_v34 = vshll.u32 %v2523_v21, 16  ;;  %v559_v36 = vsel %vm546_vm0, %v557_v23, %v558_v24  ;;  %v2597_v13 = vld [vmem:[%s2437_s29 + $0x50] sm:$0xff]   ;;  %v2607_v23 = vld [vmem:[%s2437_s29 + $0x58] sm:$0xff]  }
  0x28   : > { %538 = vrot.lane.b32.xlu0 %v485_v63, %s2370_s4  ;;  %540 = vrot.lane.b32.xlu1 %v493_v6, %s2370_s4  ;;  %v561_v37 = vsel %vm546_vm0, %v558_v24, %v560_v25  ;;  %v500_v38 = vor.u32 %v499_v27, %v495_v26  ;;  %v415_v39 = vshrl.u32 %v2523_v21, 16  ;;  %v422_v43 = vshll.u32 %v2535_v33, 16  ;;  %v2577_v63 = vld [vmem:[%s2437_s29 + $0x8] sm:$0xff]  }
  0x29   : > { %v508_v40 = vor.u32 %v506_v30, %v504_v28  ;;  %v512_v41 = vrot.slane %v510_v32, 1  ;;  %v419_v42 = vrot.slane %v417_v34, 1  ;;  %v430_v46 = vshll.u32 %v2539_v35, 16 }
  0x2a   : > { %v582_v50 = vrot.slane %v2502_v62, 1  ;;  %v505_v53 = vsel %vm353_vm1, %v500_v38, %v504_v28  ;;  %v583_v54 = vrot.slane %v2510_v5, 1  ;;  %v426_v55 = vshrl.u32 %v2535_v33, 16 }
  0x2b   : > { %v513_v56 = vsel %vm353_vm1, %v508_v40, %v512_v41  ;;  %v420_v57 = vor.u32 %v419_v42, %v415_v39  ;;  %v424_v58 = vrot.slane %v422_v43, 1  ;;  %v585_v59 = vrot.slane %v2519_v16, 1 }
  0x2c   : > { %611 = vrot.lane.b32.xlu0 %v579_v14, %s2369_s30  ;;  %522 = vrot.lane.b32.xlu1 %v405_v17, %s2370_s4  ;;  %v432_v60 = vrot.slane %v430_v46, 1  ;;  %v707_v61 = vshll.u32 %v2552_v47, 16  ;;  %v712_v1 = vshll.u32 %v2562_v51, 16  ;;  %v584_v6 = vsel %vm546_vm0, %v582_v50, %v583_v54 }
  0x2d   : > { %v428_v7 = vor.u32 %v426_v55, %v424_v58  ;;  %v548_v11 = vrot.slane %v2577_v63, 1  ;;  %v425_v12 = vsel %vm353_vm1, %v420_v57, %v424_v58  ;;  %v550_v14 = vrot.slane %v2580_v0, 1 }
  0x2e   : > { %v586_v15 = vsel %vm546_vm0, %v583_v54, %v585_v59  ;;  %v562_v16 = vrot.slane %v2523_v21, 1  ;;  %v563_v17 = vrot.slane %v2535_v33, 1  ;;  %v565_v19 = vrot.slane %v2539_v35, 1 }
  0x2f   : > { %v705_v20 = vshrl.u32 %v2552_v47, 16  ;;  %v2612_v24 = vsel %vm546_vm0, %v548_v11, %v550_v14  ;;  %v1168_v25 = vshll.u32 %v2587_v3, 16  ;;  %v433_v26 = vsel %vm353_vm1, %v428_v7, %v432_v60 }
  0x30   : > { %613 = vrot.lane.b32.xlu0 %v581_v22, %s2369_s30  ;;  %524 = vrot.lane.b32.xlu1 %v413_v29, %s2370_s4  ;;  %v709_v22 = vrot.slane %v707_v61, 1  ;;  %v714_v27 = vrot.slane %v712_v1, 1  ;;  %v716_v28 = vshrl.u32 %v2562_v51, 16  ;;  %v2320_v29 = vld [vmem:[%s2437_s29 + $0xc4] ss:$0 sps:$4 sm:$0x11]   ;;  %v564_v39 = vsel %vm546_vm0, %v562_v16, %v563_v17 }
  0x31   : > { %v1172_v30 = vshrl.u32 %v2587_v3, 16  ;;  %v720_v32 = vshll.u32 %v2592_v9, 16  ;;  %v437_v34 = vshll.u32 %v2597_v13, 16  ;;  %v2622_v35 = vrot.slane %v1168_v25, 1  ;;  %v2646_v1 = vld [vmem:[%s2437_s29] sm:$0xff]  }
  0x32   : > { %v1187_v38 = vrot.slane %v2320_v29, 1  ;;  %v566_v40 = vsel %vm546_vm0, %v563_v17, %v565_v19  ;;  %v710_v42 = vor.u32 %v709_v22, %v705_v20  ;;  %v435_v43 = vshrl.u32 %v2597_v13, 16 }
  0x33   : > { %v1174_v41 = vor.u32 %v1172_v30, %v2622_v35  ;;  %v718_v50 = vor.u32 %v716_v28, %v714_v27  ;;  %v439_v54 = vrot.slane %v437_v34, 1  ;;  %v442_v55 = vshll.u32 %v2607_v23, 16 }
  0x34   : > { %595 = vrot.lane.b32.xlu0 %v559_v36, %s2369_s30  ;;  %597 = vrot.lane.b32.xlu1 %v561_v37, %s2369_s30  ;;  %v1185_v36 = vrot.slane %v2587_v3, 1  ;;  %v1176_v37 = vshll.u32 %v2320_v29, 16  ;;  %v715_v58 = vsel %vm353_vm1, %v710_v42, %v714_v27  ;;  %v728_v59 = vrot.slane %v2552_v47, 1 }
  0x35   : > { %v729_v60 = vrot.slane %v2562_v51, 1  ;;  %v446_v61 = vshrl.u32 %v2607_v23, 16  ;;  %v440_v7 = vor.u32 %v439_v54, %v435_v43  ;;  %v357_v17 = vshll.u32 %v2646_v1, 16 }
  0x36   : > { %v1178_v44 = vrot.slane %v1176_v37, 1  ;;  %v2634_v46 = vsel %vm546_vm0, %v1185_v36, %v1187_v38  ;;  %v362_v25 = vshll.u32 %v2577_v63, 16  ;;  %v567_v27 = vrot.slane %v2597_v13, 1 }
  0x37   : > { %v730_v16 = vsel %vm546_vm0, %v728_v59, %v729_v60  ;;  %v355_v29 = vshrl.u32 %v2646_v1, 16  ;;  %v359_v30 = vrot.slane %v357_v17, 1  ;;  %v366_v38 = vshrl.u32 %v2577_v63, 16 }
  0x38   : > { %542 = vrot.lane.b32.xlu0 %v505_v53, %s2370_s4  ;;  %544 = vrot.lane.b32.xlu1 %v513_v56, %s2370_s4  ;;  %v722_v53 = vrot.slane %v720_v32, 1  ;;  %v2313_v56 = vld [vmem:[%s2437_s29 + $0x60] ss:$0 sps:$4 sm:$0x11]   ;;  %v1179_v57 = vsel %vm353_vm1, %v1174_v41, %v1178_v44  ;;  %v2663_v32 = vld [vmem:[%s2437_s29 + $0xb4] sm:$0xff]   ;;  %v364_v37 = vrot.slane %v362_v25, 1 }
  0x39   : > { %v450_v14 = vshll.u32 %v2313_v56, 16  ;;  %v570_v28 = vrot.slane %v2313_v56, 1  ;;  %v360_v41 = vor.u32 %v359_v30, %v355_v29  ;;  %v1163_v42 = vshll.u32 %v2663_v32, 16 }
  0x3a   : > { %v368_v44 = vor.u32 %v366_v38, %v364_v37  ;;  %v1161_v54 = vshrl.u32 %v2663_v32, 16 }
  0x3b   : > { %v452_v22 = vrot.slane %v450_v14, 1 }
  0x3c   : > { %615 = vrot.lane.b32.xlu0 %v584_v6, %s2369_s30  ;;  %526 = vrot.lane.b32.xlu1 %v425_v12, %s2370_s4  ;;  %v723_v6 = vsel %vm353_vm1, %v718_v50, %v722_v53  ;;  %v444_v12 = vrot.slane %v442_v55, 1  ;;  %v365_v53 = vsel %vm353_vm1, %v360_v41, %v364_v37  ;;  %v1165_v55 = vrot.slane %v1163_v42, 1 }
  0x3e   : > { %v445_v19 = vsel %vm353_vm1, %v440_v7, %v444_v12  ;;  %v448_v20 = vor.u32 %v446_v61, %v444_v12  ;;  %v1166_v59 = vor.u32 %v1165_v55, %v1161_v54  ;;  %v1184_v61 = vrot.slane %v2663_v32, 1 }
  0x40   : > { %617 = vrot.lane.b32.xlu0 %v586_v15, %s2369_s30  ;;  %528 = vrot.lane.b32.xlu1 %v433_v26, %s2370_s4  ;;  %v731_v15 = vrot.slane %v2592_v9, 1  ;;  %v568_v9 = vrot.slane %v2607_v23, 1  ;;  %v453_v34 = vsel %vm353_vm1, %v448_v20, %v452_v22  ;;  %v2326_v22 = vld [vmem:[%s3018_s1 + $0x38] sm:$0xff]  }
  0x42   : > { %v732_v26 = vsel %vm546_vm0, %v729_v60, %v731_v15  ;;  %v571_v43 = vsel %vm546_vm0, %v568_v9, %v570_v28  ;;  %v1171_v60 = vsel %vm353_vm1, %v1166_v59, %v2622_v35 }
  0x44   : > { %599 = vrot.lane.b32.xlu0 %v564_v39, %s2369_s30  ;;  %601 = vrot.lane.b32.xlu1 %v566_v40, %s2369_s30  ;;  %v370_v39 = vshll.u32 %v2580_v0, 16  ;;  %v569_v40 = vsel %vm546_vm0, %v567_v27, %v568_v9  ;;  %v547_v0 = vrot.slane %v2646_v1, 1  ;;  %v2328_v27 = vld [vmem:[%s3018_s1 + $0x30] sm:$0xff]  }
  0x46   : > { %v372_v50 = vrot.slane %v370_v39, 1 }
  0x48   : > { %724 = vrot.lane.b32.xlu0 %v715_v58, %s2370_s4  ;;  %726 = vrot.lane.b32.xlu1 %v723_v6, %s2370_s4  ;;  %v373_v56 = vsel %vm353_vm1, %v368_v44, %v372_v50  ;;  %v549_v58 = vsel %vm546_vm0, %v547_v0, %v548_v11  ;;  %v1186_v6 = vsel %vm546_vm0, %v1184_v61, %v1185_v36 }
  0x4c   : > { %733 = vrot.lane.b32.xlu0 %v730_v16, %s2369_s30  ;;  %530 = vrot.lane.b32.xlu1 %v445_v19, %s2370_s4 }
  0x50   : > { %735 = vrot.lane.b32.xlu0 %v732_v26, %s2369_s30  ;;  %532 = vrot.lane.b32.xlu1 %v453_v34, %s2370_s4  ;;  %v2327_v26 = vld [vmem:[%s3018_s1] sm:$0xff]  }
  0x54   : > { %603 = vrot.lane.b32.xlu0 %v569_v40, %s2369_s30  ;;  %605 = vrot.lane.b32.xlu1 %v571_v43, %s2369_s30 }
  0x58   : > { %514 = vrot.lane.b32.xlu0 %v365_v53, %s2370_s4  ;;  %516 = vrot.lane.b32.xlu1 %v373_v56, %s2370_s4 }
  0x5c   : > { %587 = vrot.lane.b32.xlu0 %v549_v58, %s2369_s30  ;;  %589 = vrot.lane.b32.xlu1 %v2612_v24, %s2369_s30 }
  0x60   : > { %1180 = vrot.lane.b32.xlu0 %v1171_v60, %s2370_s4  ;;  %1182 = vrot.lane.b32.xlu1 %v1179_v57, %s2370_s4 }
  0x64   : > { %1189 = vrot.lane.b32.xlu0 %v1186_v6, %s2369_s30  ;;  %1191 = vrot.lane.b32.xlu1 %v2634_v46, %s2369_s30 }
  0x8a   : > { %v610_v11 = vpop.permute.xlu0 %609  ;;  %v608_v24 = vpop.permute.xlu1 %607 }
  0x8e   : > { %v592_v7 = vpop.permute.xlu0 %591  ;;  %v594_v12 = vpop.permute.xlu1 %593 }
  0x92   : > { %v535_v35 = vpop.permute.xlu0 %534  ;;  %v519_v14 = vpop.permute.xlu1 %518 }
  0x93   : > { %v641_v57 = vsel %vm619_vm2, %v2444_v4, %v535_v35  ;;  %v625_v36 = vsel %vm619_vm2, %v2453_v10, %v519_v14  ;;  %v2325_v10 = vld [vmem:[%s3018_s1 + $0x8] sm:$0xff]  }
  0x94   : > { %v2703_v15 = vsel %vm652_vm3, %v641_v57, %v608_v24  ;;  %v2706_v46 = vsel %vm652_vm3, %v625_v36, %v592_v7 }
  0x95   : > { %2149 = vmatprep.mubr.msk.bf16.mxu1 %vm770_vm4, %v2703_v15  ;;  %2133 = vmatprep.mubr.msk.bf16.mxu0 %vm770_vm4, %v2706_v46 }
  0x96   : > { %v537_v16 = vpop.permute.xlu0 %536  ;;  %v521_v17 = vpop.permute.xlu1 %520 }
  0x97   : > { %v643_v4 = vsel %vm619_vm2, %v2440_v2, %v537_v16  ;;  %v627_v19 = vsel %vm619_vm2, %v2449_v8, %v521_v17 }
  0x98   : > { %v2720_v20 = vsel %vm652_vm3, %v643_v4, %v610_v11  ;;  %v2726_v25 = vsel %vm652_vm3, %v627_v19, %v594_v12 }
  0x99   : > { %2150 = vmatmul.mubr.msk.bf16.vlgmr.msra.gmra.mxu1 %vm770_vm4, %v2720_v20  ;;  %2134 = vmatmul.mubr.msk.bf16.vlgmr.msra.gmra.mxu0 %vm770_vm4, %v2726_v25 }
  0x9a   : > { %v539_v2 = vpop.permute.xlu0 %538  ;;  %2166 = vmatpush3.bf16.msra.mxu1 %v2557_v48  ;;  %v541_v8 = vpop.permute.xlu1 %540  ;;  %2204 = vmatpush3.bf16.msra.mxu0 %v2567_v52 }
  0x9b   : > { %2167 = vmatprep.subr.bf16.mxu1 %v2325_v10  ;;  %2205 = vmatprep.subr.bf16.mxu0 %v2326_v22  ;;  %v645_v9 = vsel %vm619_vm2, %v2463_v18, %v539_v2  ;;  %v647_v52 = vsel %vm619_vm2, %v2474_v31, %v541_v8 }
  0x9e   : > { %v612_v28 = vpop.permute.xlu0 %611  ;;  %2168 = vmatpush3.bf16.msra.mxu1 %v2325_v10  ;;  %v523_v29 = vpop.permute.xlu1 %522  ;;  %2206 = vmatpush3.bf16.msra.mxu0 %v2326_v22 }
  0x9f   : > { %v2743_v48 = vsel %vm652_vm3, %v645_v9, %v612_v28  ;;  %2169 = vmatprep.subr.bf16.mxu1 %v2327_v26  ;;  %2207 = vmatprep.subr.bf16.mxu0 %v2328_v27  ;;  %v629_v37 = vsel %vm619_vm2, %v2485_v45, %v523_v29 }
  0xa0   : > { %2153 = vmatprep.mubr.msk.bf16.mxu1 %vm770_vm4, %v2743_v48 }
  0xa2   : > { %v614_v30 = vpop.permute.xlu0 %613  ;;  %2170 = vmatpush3.bf16.msra.mxu1 %v2327_v26  ;;  %v525_v18 = vpop.permute.xlu1 %524  ;;  %2208 = vmatpush3.bf16.msra.mxu0 %v2328_v27 }
  0xa3   : > { %v2750_v34 = vsel %vm652_vm3, %v647_v52, %v614_v30  ;;  %v631_v39 = vsel %vm619_vm2, %v2490_v49, %v525_v18 }
  0xa4   : > { %2154 = vmatmul.mubr.msk.bf16.gmra.mxu1 %vm770_vm4, %v2750_v34 }
  0xa6   : > { %v596_v38 = vpop.permute.xlu0 %595  ;;  %v598_v31 = vpop.permute.xlu1 %597 }
  0xa7   : > { %v662_v40 = vsel %vm652_vm3, %v629_v37, %v596_v38  ;;  %v664_v41 = vsel %vm652_vm3, %v631_v39, %v598_v31 }
  0xa8   : > { %2137 = vmatprep.mubr.msk.bf16.mxu0 %vm770_vm4, %v662_v40 }
  0xa9   : > { %2138 = vmatmul.mubr.msk.bf16.gmra.mxu0 %vm770_vm4, %v664_v41 }
  0xaa   : > { %v543_v42 = vpop.permute.xlu0 %542  ;;  %v545_v43 = vpop.permute.xlu1 %544 }
  0xab   : > { %v649_v44 = vsel %vm619_vm2, %v2502_v62, %v543_v42  ;;  %v651_v49 = vsel %vm619_vm2, %v2510_v5, %v545_v43 }
  0xae   : > { %v616_v50 = vpop.permute.xlu0 %615  ;;  %v527_v53 = vpop.permute.xlu1 %526 }
  0xaf   : > { %v2765_v45 = vsel %vm652_vm3, %v649_v44, %v616_v50  ;;  %v633_v62 = vsel %vm619_vm2, %v2523_v21, %v527_v53 }
  0xb0   : > { %2157 = vmatprep.mubr.msk.bf16.mxu1 %vm770_vm4, %v2765_v45 }
  0xb2   : > { %v618_v0 = vpop.permute.xlu0 %617  ;;  %v529_v55 = vpop.permute.xlu1 %528 }
  0xb3   : > { %v2772_v54 = vsel %vm652_vm3, %v651_v49, %v618_v0  ;;  %v635_v58 = vsel %vm619_vm2, %v2535_v33, %v529_v55 }
  0xb4   : > { %2158 = vmatmul.mubr.msk.bf16.gmra.mxu1 %vm770_vm4, %v2772_v54 }
  0xb6   : > { %v600_v56 = vpop.permute.xlu0 %599  ;;  %v602_v60 = vpop.permute.xlu1 %601 }
  0xb7   : > { %v666_v59 = vsel %vm652_vm3, %v633_v62, %v600_v56  ;;  %v668_v5 = vsel %vm652_vm3, %v635_v58, %v602_v60 }
  0xb8   : > { %2141 = vmatprep.mubr.msk.bf16.mxu0 %vm770_vm4, %v666_v59 }
  0xb9   : > { %2142 = vmatmul.mubr.msk.bf16.gmra.mxu0 %vm770_vm4, %v668_v5 }
  0xba   : > { %v725_v61 = vpop.permute.xlu0 %724  ;;  %v727_v6 = vpop.permute.xlu1 %726 }
  0xbb   : > { %v738_v11 = vsel %vm619_vm2, %v2552_v47, %v725_v61  ;;  %v740_v33 = vsel %vm619_vm2, %v2562_v51, %v727_v6 }
  0xbe   : > { %v734_v24 = vpop.permute.xlu0 %733  ;;  %v531_v7 = vpop.permute.xlu1 %530 }
  0xbf   : > { %v742_v21 = vsel %vm652_vm3, %v738_v11, %v734_v24  ;;  %v637_v14 = vsel %vm619_vm2, %v2597_v13, %v531_v7  ;;  %v2915_v24 = vld [vmem:[%s3019_s2] ss:$0 sm:$0xff] }
  0xc0   : > { %2161 = vmatprep.mubr.msk.bf16.mxu1 %vm770_vm4, %v742_v21 }
  0xc2   : > { %v736_v12 = vpop.permute.xlu0 %735  ;;  %v533_v57 = vpop.permute.xlu1 %532 }
  0xc3   : > { %v744_v35 = vsel %vm652_vm3, %v740_v33, %v736_v12  ;;  %v639_v47 = vsel %vm619_vm2, %v2607_v23, %v533_v57 }
  0xc4   : > { %2162 = vmatmul.mubr.msk.bf16.gmra.mxu1 %vm770_vm4, %v744_v35 }
  0xc6   : > { %v604_v36 = vpop.permute.xlu0 %603  ;;  %v606_v4 = vpop.permute.xlu1 %605 }
  0xc7   : > { %v670_v16 = vsel %vm652_vm3, %v637_v14, %v604_v36  ;;  %v672_v17 = vsel %vm652_vm3, %v639_v47, %v606_v4 }
  0xc8   : > { %2145 = vmatprep.mubr.msk.bf16.mxu0 %vm770_vm4, %v670_v16 }
  0xc9   : > { %2146 = vmatmul.mubr.msk.bf16.gmra.mxu0 %vm770_vm4, %v672_v17 }
  0xca   : > { %2209 = vmatprep.mubr.msk.bf16.mxu0 %vm770_vm4, %v662_v40  ;;  %v515_v51 = vpop.permute.xlu0 %514  ;;  %v517_v10 = vpop.permute.xlu1 %516 }
  0xcb   : > { %v621_v13 = vsel %vm619_vm2, %v2646_v1, %v515_v51  ;;  %v623_v23 = vsel %vm619_vm2, %v2577_v63, %v517_v10 }
  0xce   : > { %v588_v19 = vpop.permute.xlu0 %587  ;;  %v590_v22 = vpop.permute.xlu1 %589 }
  0xcf   : > { %v654_v2 = vsel %vm652_vm3, %v621_v13, %v588_v19  ;;  %v656_v8 = vsel %vm652_vm3, %v623_v23, %v590_v22 }
  0xd0   : > { %2171 = vmatprep.mubr.msk.bf16.mxu1 %vm770_vm4, %v654_v2 }
  0xd1   : > { %2172 = vmatmul.mubr.msk.bf16.vlgmr.msra.gmra.mxu1 %vm770_vm4, %v656_v8  ;;  %2210 = vmatmul.mubr.msk.bf16.vlgmr.msra.gmra.mxu0 %vm770_vm4, %v664_v41 }
  0xd2   : > { %2175 = vmatprep.mubr.msk.bf16.mxu1 %vm770_vm4, %v2706_v46  ;;  %2213 = vmatprep.mubr.msk.bf16.mxu0 %vm770_vm4, %v666_v59  ;;  %v1181_v63 = vpop.permute.xlu0 %1180 }
  0xd3   : > { %v1194_v1 = vsel %vm619_vm2, %v2663_v32, %v1181_v63 }
  0xd6   : > { %v1190_v46 = vpop.permute.xlu0 %1189 }
  0xd9   : > { %2176 = vmatmul.mubr.msk.bf16.gmra.mxu1 %vm770_vm4, %v2726_v25  ;;  %2214 = vmatmul.mubr.msk.bf16.gmra.mxu0 %vm770_vm4, %v668_v5  ;;  %v1198_v25 = vsel %vm652_vm3, %v1194_v1, %v1190_v46 }
  0xda   : > { %2179 = vmatprep.mubr.msk.bf16.mxu1 %vm770_vm4, %v662_v40  ;;  %2217 = vmatprep.mubr.msk.bf16.mxu0 %vm770_vm4, %v670_v16 }
  0xe1   : > { %2180 = vmatmul.mubr.msk.bf16.gmra.mxu1 %vm770_vm4, %v664_v41  ;;  %2218 = vmatmul.mubr.msk.bf16.gmra.mxu0 %vm770_vm4, %v672_v17 }
  0xe2   : > { %2183 = vmatprep.mubr.msk.bf16.mxu1 %vm770_vm4, %v666_v59  ;;  %2221 = vmatprep.mubr.msk.bf16.mxu0 %vm770_vm4, %v2703_v15 }
  0xe9   : > { %2184 = vmatmul.mubr.msk.bf16.gmra.mxu1 %vm770_vm4, %v668_v5  ;;  %2222 = vmatmul.mubr.msk.bf16.gmra.mxu0 %vm770_vm4, %v2720_v20 }
  0xea   : > { %2187 = vmatprep.mubr.msk.bf16.mxu1 %vm770_vm4, %v670_v16  ;;  %2225 = vmatprep.mubr.msk.bf16.mxu0 %vm770_vm4, %v2743_v48 }
  0xf1   : > { %2188 = vmatmul.mubr.msk.bf16.gmra.mxu1 %vm770_vm4, %v672_v17  ;;  %2226 = vmatmul.mubr.msk.bf16.gmra.mxu0 %vm770_vm4, %v2750_v34 }
  0xf2   : > { %2191 = vmatprep.mubr.msk.bf16.mxu1 %vm770_vm4, %v2703_v15  ;;  %2229 = vmatprep.mubr.msk.bf16.mxu0 %vm770_vm4, %v2765_v45  ;;  %v1183_v15 = vpop.permute.xlu1 %1182 }
  0xf6   : > { %v1192_v26 = vpop.permute.xlu1 %1191 }
  0xf9   : > { %2192 = vmatmul.mubr.msk.bf16.gmra.mxu1 %vm770_vm4, %v2720_v20  ;;  %2230 = vmatmul.mubr.msk.bf16.gmra.mxu0 %vm770_vm4, %v2772_v54  ;;  %v1196_v20 = vsel %vm619_vm2, %v2587_v3, %v1183_v15 }
  0xfa   : > { %2195 = vmatprep.mubr.msk.bf16.mxu1 %vm770_vm4, %v2743_v48  ;;  %2233 = vmatprep.mubr.msk.bf16.mxu0 %vm770_vm4, %v742_v21  ;;  %v1200_v32 = vsel %vm652_vm3, %v1196_v20, %v1192_v26 }
 0x101   : > { %2196 = vmatmul.mubr.msk.bf16.gmra.mxu1 %vm770_vm4, %v2750_v34  ;;  %2234 = vmatmul.mubr.msk.bf16.gmra.mxu0 %vm770_vm4, %v744_v35 }
 0x102   : > { %2199 = vmatprep.mubr.msk.bf16.mxu1 %vm770_vm4, %v2765_v45  ;;  %2237 = vmatprep.mubr.msk.bf16.mxu0 %vm770_vm4, %v1198_v25 }
 0x109   : > { %2200 = vmatmul.mubr.msk.bf16.gmra.mxu1 %vm770_vm4, %v2772_v54  ;;  %2238 = vmatmul.mubr.msk.bf16.gmra.mxu0 %vm770_vm4, %v1200_v32 }
 0x159   : > { %v2858_v27 = vpop.f32.mrf.mxu1  ;;  %v2135_v28 = vpop.f32.mrf.mxu0 }
 0x15b   : > { %v2860_v9 = vpop.f32.mrf.mxu1  ;;  %v837_v29 = vpop.f32.mrf.mxu0 }
 0x15d   : > { %v2862_v48 = vpop.f32.mrf.mxu1  ;;  %v2136_v30 = vpop.f32.mrf.mxu0 }
 0x15f   : > { %v2864_v52 = vpop.f32.mrf.mxu1  ;;  %v840_v34 = vpop.f32.mrf.mxu0 }
 0x164   : > { %v2866_v3 = vpop.f32.mrf.mxu1 }
 0x166   : > { %v2868_v18 = vpop.f32.mrf.mxu1 }
 0x168   : > { %v2870_v38 = vpop.f32.mrf.mxu1 }
 0x169   : > { %v2139_v37 = vpop.f32.mrf.mxu0 }
 0x16a   : > { %v2872_v40 = vpop.f32.mrf.mxu1 }
 0x16b   : > { %v853_v39 = vpop.f32.mrf.mxu0 }
 0x16d   : > { %v2874_v31 = vpop.f32.mrf.mxu0 }
 0x16f   : > { %v2878_v42 = vpop.f32.mrf.mxu0 }
 0x174   : > { %v2876_v41 = vpop.f32.mrf.mxu1 }
 0x176   : > { %v2880_v43 = vpop.f32.mrf.mxu1 }
 0x178   : > { %v2884_v50 = vpop.f32.mrf.mxu1 }
 0x179   : > { %v2882_v44 = vpop.f32.mrf.mxu0 }
 0x17a   : > { %v2888_v53 = vpop.f32.mrf.mxu1 }
 0x17b   : > { %v2886_v45 = vpop.f32.mrf.mxu0 }
 0x17d   : > { %v2890_v49 = vpop.f32.mrf.mxu0 }
 0x17f   : > { %v2894_v54 = vpop.f32.mrf.mxu0 }
 0x184   : > { %v2892_v0 = vpop.f32.mrf.mxu1 }
 0x186   : > { %v2896_v55 = vpop.f32.mrf.mxu1 }
 0x188   : > { %v2901_v56 = vpop.f32.mrf.mxu1 }
 0x189   : > { %v2898_v62 = vpop.f32.mrf.mxu0 }
 0x18a   : > { %v2908_v60 = vpop.f32.mrf.mxu1 }
 0x18b   : > { %v2903_v58 = vpop.f32.mrf.mxu0 }
 0x18d   : > { %v2905_v59 = vpop.f32.mrf.mxu0 }
 0x18f   : > { %v2910_v5 = vpop.f32.mrf.mxu0 }
 0x191   : > { %v2173_v61 = vpop.f32.mrf.mxu1  ;;  %v2211_v6 = vpop.f32.mrf.mxu0 }
 0x192   : > { %v1029_v11 = vadd.f32 %v2173_v61, %v2135_v28 }
 0x193   : > { %v1020_v21 = vpop.f32.mrf.mxu1  ;;  %v1264_v7 = vpop.f32.mrf.mxu0 }
 0x194   : > { %v1393_v33 = vadd.f32 %v2211_v6, %v1029_v11  ;;  %v1021_v12 = vadd.f32 %v1020_v21, %v837_v29 }
 0x195   : > { %v2174_v35 = vpop.f32.mrf.mxu1  ;;  %v2212_v57 = vpop.f32.mrf.mxu0 }
 0x196   : > { %v1432_v14 = vadd.f32 %v2915_v24, %v1393_v33  ;;  %v1391_v36 = vadd.f32 %v1264_v7, %v1021_v12  ;;  %v1032_v47 = vadd.f32 %v2174_v35, %v2136_v30 }
 0x197   : > { %v1023_v16 = vpop.f32.mrf.mxu1  ;;  %v1267_v4 = vpop.f32.mrf.mxu0 }
 0x198   : > { %v1394_v17 = vadd.f32 %v2212_v57, %v1032_v47  ;;  %v1496_v51 = vmul.f32 0.1, %v1432_v14  ;;  %v1430_v10 = vadd.f32 %v2915_v24, %v1391_v36  ;;  %v1024_v13 = vadd.f32 %v1023_v16, %v840_v34 }
 0x199   : > { %v2177_v19 = vpop.f32.mrf.mxu1  ;;  %v2215_v23 = vpop.f32.mrf.mxu0  ;;  %vm1464_vm5 = vcmp.gt.f32.partialorder %v1432_v14, 0.0 }
 0x19a   : > { %v1433_v22 = vadd.f32 %v2915_v24, %v1394_v17  ;;  %v1392_v2 = vadd.f32 %v1267_v4, %v1024_v13  ;;  %v1045_v8 = vadd.f32 %v2177_v19, %v2139_v37  ;;  %v1528_v25 = vsel %vm1464_vm5, %v1432_v14, %v1496_v51 }
 0x19b   : > { %v1036_v63 = vpop.f32.mrf.mxu1  ;;  %v1280_v1 = vpop.f32.mrf.mxu0  ;;  %v1494_v20 = vmul.f32 0.1, %v1430_v10  ;;  %vm1462_vm7 = vcmp.gt.f32.partialorder %v1430_v10, 0.0 }
 0x19c   : > { %vm1465_vm6 = vcmp.gt.f32.partialorder %v1433_v22, 0.0  ;;  %v1497_v46 = vmul.f32 0.1, %v1433_v22  ;;  %v1037_v15 = vadd.f32 %v1036_v63, %v853_v39  ;;  %v1431_v26 = vadd.f32 %v2915_v24, %v1392_v2 }
 0x19d   : > { %v1397_v32 = vadd.f32 %v2215_v23, %v1045_v8  ;;  %v2178_v28 = vpop.f32.mrf.mxu1  ;;  %v2216_v29 = vpop.f32.mrf.mxu0  ;;  %v1526_v12 = vsel %vm1462_vm7, %v1430_v10, %v1494_v20 }
 0x19e   : > { %v1529_v30 = vsel %vm1465_vm6, %v1433_v22, %v1497_v46  ;;  %v1395_v34 = vadd.f32 %v1280_v1, %v1037_v15  ;;  %v1048_v37 = vadd.f32 %v2178_v28, %v2874_v31  ;;  %vm1463_vm8 = vcmp.gt.f32.partialorder %v1431_v26, 0.0 }
 0x19f   : > { %v1983_v61 = vpack.c.bf16 %v1529_v30, %v1528_v25  ;;  %v1495_v39 = vmul.f32 0.1, %v1431_v26  ;;  %v1436_v6 = vadd.f32 %v2915_v24, %v1397_v32  ;;  %v1039_v11 = vpop.f32.mrf.mxu1  ;;  %v1283_v21 = vpop.f32.mrf.mxu0 }
 0x1a0   : > { %v1398_v7 = vadd.f32 %v2216_v29, %v1048_v37  ;;  %v1040_v33 = vadd.f32 %v1039_v11, %v2878_v42  ;;  %v1434_v57 = vadd.f32 %v2915_v24, %v1395_v34 }
 0x1a1   : > { %2055 = vst [vmem:[%s2924_s5 + $0x8] sm:$0xff] %v1983_v61   ;;  %v1527_v35 = vsel %vm1463_vm8, %v1431_v26, %v1495_v39  ;;  %v2181_v14 = vpop.f32.mrf.mxu1  ;;  %v2219_v36 = vpop.f32.mrf.mxu0  ;;  %v1500_v31 = vmul.f32 0.1, %v1436_v6  ;;  %vm1468_vm9 = vcmp.gt.f32.partialorder %v1436_v6, 0.0 }
 0x1a2   : > { %v1978_v47 = vpack.c.bf16 %v1527_v35, %v1526_v12  ;;  %v1437_v16 = vadd.f32 %v2915_v24, %v1398_v7  ;;  %v1396_v4 = vadd.f32 %v1283_v21, %v1040_v33  ;;  %v1061_v17 = vadd.f32 %v2181_v14, %v2882_v44 }
 0x1a3   : > { %v1052_v51 = vpop.f32.mrf.mxu1  ;;  %v1296_v13 = vpop.f32.mrf.mxu0  ;;  %vm1466_vm11 = vcmp.gt.f32.partialorder %v1434_v57, 0.0  ;;  %v1498_v19 = vmul.f32 0.1, %v1434_v57  ;;  %v1532_v63 = vsel %vm1468_vm9, %v1436_v6, %v1500_v31 }
 0x1a4   : > { %1979 = vst [vmem:[%s2924_s5] sm:$0xff] %v1978_v47   ;;  %vm1469_vm10 = vcmp.gt.f32.partialorder %v1437_v16, 0.0  ;;  %v1501_v42 = vmul.f32 0.1, %v1437_v16  ;;  %v1053_v10 = vadd.f32 %v1052_v51, %v2886_v45  ;;  %v1435_v23 = vadd.f32 %v2915_v24, %v1396_v4 }
 0x1a5   : > { %v1401_v22 = vadd.f32 %v2219_v36, %v1061_v17  ;;  %v2182_v2 = vpop.f32.mrf.mxu1  ;;  %v2220_v8 = vpop.f32.mrf.mxu0  ;;  %v1530_v29 = vsel %vm1466_vm11, %v1434_v57, %v1498_v19 }
 0x1a6   : > { %v1533_v1 = vsel %vm1469_vm10, %v1437_v16, %v1501_v42  ;;  %v1399_v46 = vadd.f32 %v1296_v13, %v1053_v10  ;;  %v1064_v44 = vadd.f32 %v2182_v2, %v2890_v49  ;;  %vm1467_vm12 = vcmp.gt.f32.partialorder %v1435_v23, 0.0 }
 0x1a7   : > { %v1993_v15 = vpack.c.bf16 %v1533_v1, %v1532_v63  ;;  %v1499_v25 = vmul.f32 0.1, %v1435_v23  ;;  %v1440_v20 = vadd.f32 %v2915_v24, %v1401_v22  ;;  %v1055_v26 = vpop.f32.mrf.mxu1  ;;  %v1299_v45 = vpop.f32.mrf.mxu0 }
 0x1a8   : > { %v1402_v32 = vadd.f32 %v2220_v8, %v1064_v44  ;;  %v1056_v28 = vadd.f32 %v1055_v26, %v2894_v54  ;;  %v1438_v34 = vadd.f32 %v2915_v24, %v1399_v46 }
 0x1a9   : > { %2057 = vst [vmem:[%s2924_s5 + $0x18] sm:$0xff] %v1993_v15   ;;  %v1531_v30 = vsel %vm1467_vm12, %v1435_v23, %v1499_v25  ;;  %v2185_v37 = vpop.f32.mrf.mxu1  ;;  %v2223_v61 = vpop.f32.mrf.mxu0  ;;  %v1504_v39 = vmul.f32 0.1, %v1440_v20  ;;  %vm1472_vm13 = vcmp.gt.f32.partialorder %v1440_v20, 0.0 }
 0x1aa   : > { %v1988_v49 = vpack.c.bf16 %v1531_v30, %v1530_v29  ;;  %v1441_v6 = vadd.f32 %v2915_v24, %v1402_v32  ;;  %v1400_v11 = vadd.f32 %v1299_v45, %v1056_v28  ;;  %v1077_v21 = vadd.f32 %v2185_v37, %v2898_v62 }
 0x1ab   : > { %v1068_v7 = vpop.f32.mrf.mxu1  ;;  %v1312_v33 = vpop.f32.mrf.mxu0  ;;  %vm1470_vm15 = vcmp.gt.f32.partialorder %v1438_v34, 0.0  ;;  %v1502_v35 = vmul.f32 0.1, %v1438_v34  ;;  %v1536_v31 = vsel %vm1472_vm13, %v1440_v20, %v1504_v39 }
 0x1ac   : > { %2056 = vst [vmem:[%s2924_s5 + $0x10] sm:$0xff] %v1988_v49   ;;  %vm1473_vm14 = vcmp.gt.f32.partialorder %v1441_v6, 0.0  ;;  %v1505_v54 = vmul.f32 0.1, %v1441_v6  ;;  %v1069_v12 = vadd.f32 %v1068_v7, %v2903_v58  ;;  %v1439_v57 = vadd.f32 %v2915_v24, %v1400_v11 }
 0x1ad   : > { %v1405_v14 = vadd.f32 %v2223_v61, %v1077_v21  ;;  %v2186_v36 = vpop.f32.mrf.mxu1  ;;  %v2224_v47 = vpop.f32.mrf.mxu0  ;;  %v1534_v23 = vsel %vm1470_vm15, %v1438_v34, %v1502_v35 }
 0x1ae   : > { %v1537_v16 = vsel %vm1473_vm14, %v1441_v6, %v1505_v54  ;;  %v1403_v4 = vadd.f32 %v1312_v33, %v1069_v12  ;;  %v1080_v62 = vadd.f32 %v2186_v36, %v2905_v59  ;;  %vm1471_vm0 = vcmp.gt.f32.partialorder %v1439_v57, 0.0 }
 0x1af   : > { %v2003_v17 = vpack.c.bf16 %v1537_v16, %v1536_v31  ;;  %v1503_v51 = vmul.f32 0.1, %v1439_v57  ;;  %v1444_v13 = vadd.f32 %v2915_v24, %v1405_v14  ;;  %v1071_v42 = vpop.f32.mrf.mxu1  ;;  %v1315_v58 = vpop.f32.mrf.mxu0 }
 0x1b0   : > { %v1406_v10 = vadd.f32 %v2224_v47, %v1080_v62  ;;  %v1072_v19 = vadd.f32 %v1071_v42, %v2910_v5  ;;  %v1442_v2 = vadd.f32 %v2915_v24, %v1403_v4 }
 0x1b1   : > { %2059 = vst [vmem:[%s2924_s5 + $0x28] sm:$0xff] %v2003_v17   ;;  %v1535_v22 = vsel %vm1471_vm0, %v1439_v57, %v1503_v51  ;;  %v2189_v8 = vpop.f32.mrf.mxu1  ;;  %v2227_v63 = vpop.f32.mrf.mxu0  ;;  %v1508_v1 = vmul.f32 0.1, %v1444_v13  ;;  %vm1476_vm1 = vcmp.gt.f32.partialorder %v1444_v13, 0.0 }
 0x1b2   : > { %v1998_v59 = vpack.c.bf16 %v1535_v22, %v1534_v23  ;;  %v1445_v46 = vadd.f32 %v2915_v24, %v1406_v10  ;;  %v1404_v44 = vadd.f32 %v1315_v58, %v1072_v19  ;;  %v1093_v15 = vadd.f32 %v2189_v8, %v2858_v27 }
 0x1b3   : > { %v1084_v25 = vpop.f32.mrf.mxu1  ;;  %v1328_v20 = vpop.f32.mrf.mxu0  ;;  %vm1474_vm3 = vcmp.gt.f32.partialorder %v1442_v2, 0.0  ;;  %v1506_v45 = vmul.f32 0.1, %v1442_v2  ;;  %v1540_v34 = vsel %vm1476_vm1, %v1444_v13, %v1508_v1 }
 0x1b4   : > { %2058 = vst [vmem:[%s2924_s5 + $0x20] sm:$0xff] %v1998_v59   ;;  %vm1477_vm2 = vcmp.gt.f32.partialorder %v1445_v46, 0.0  ;;  %v1509_v5 = vmul.f32 0.1, %v1445_v46  ;;  %v1085_v26 = vadd.f32 %v1084_v25, %v2860_v9  ;;  %v1443_v32 = vadd.f32 %v2915_v24, %v1404_v44 }
 0x1b5   : > { %v1409_v28 = vadd.f32 %v2227_v63, %v1093_v15  ;;  %v2190_v29 = vpop.f32.mrf.mxu1  ;;  %v2228_v30 = vpop.f32.mrf.mxu0  ;;  %v1538_v33 = vsel %vm1474_vm3, %v1442_v2, %v1506_v45 }
 0x1b6   : > { %v1541_v37 = vsel %vm1477_vm2, %v1445_v46, %v1509_v5  ;;  %v1407_v61 = vadd.f32 %v1328_v20, %v1085_v26  ;;  %v1096_v27 = vadd.f32 %v2190_v29, %v2862_v48  ;;  %vm1475_vm4 = vcmp.gt.f32.partialorder %v1443_v32, 0.0 }
 0x1b7   : > { %v2013_v49 = vpack.c.bf16 %v1541_v37, %v1540_v34  ;;  %v1507_v39 = vmul.f32 0.1, %v1443_v32  ;;  %v1448_v6 = vadd.f32 %v2915_v24, %v1409_v28  ;;  %v1087_v11 = vpop.f32.mrf.mxu1  ;;  %v1331_v9 = vpop.f32.mrf.mxu0 }
 0x1b8   : > { %v1410_v21 = vadd.f32 %v2228_v30, %v1096_v27  ;;  %v1088_v7 = vadd.f32 %v1087_v11, %v2864_v52  ;;  %v1446_v12 = vadd.f32 %v2915_v24, %v1407_v61 }
 0x1b9   : > { %2061 = vst [vmem:[%s2924_s5 + $0x38] sm:$0xff] %v2013_v49   ;;  %v1539_v54 = vsel %vm1475_vm4, %v1443_v32, %v1507_v39  ;;  %v2193_v35 = vpop.f32.mrf.mxu1  ;;  %v2231_v57 = vpop.f32.mrf.mxu0  ;;  %v1512_v14 = vmul.f32 0.1, %v1448_v6  ;;  %vm1480_vm5 = vcmp.gt.f32.partialorder %v1448_v6, 0.0 }
 0x1ba   : > { %v2008_v48 = vpack.c.bf16 %v1539_v54, %v1538_v33  ;;  %v1449_v36 = vadd.f32 %v2915_v24, %v1410_v21  ;;  %v1408_v47 = vadd.f32 %v1331_v9, %v1088_v7  ;;  %v1109_v31 = vadd.f32 %v2193_v35, %v2866_v3 }
 0x1bb   : > { %v1100_v16 = vpop.f32.mrf.mxu1  ;;  %v1344_v4 = vpop.f32.mrf.mxu0  ;;  %vm1478_vm7 = vcmp.gt.f32.partialorder %v1446_v12, 0.0  ;;  %v1510_v17 = vmul.f32 0.1, %v1446_v12  ;;  %v1544_v10 = vsel %vm1480_vm5, %v1448_v6, %v1512_v14 }
 0x1bc   : > { %2060 = vst [vmem:[%s2924_s5 + $0x30] sm:$0xff] %v2008_v48   ;;  %vm1481_vm6 = vcmp.gt.f32.partialorder %v1449_v36, 0.0  ;;  %v1513_v52 = vmul.f32 0.1, %v1449_v36  ;;  %v1101_v62 = vadd.f32 %v1100_v16, %v2868_v18  ;;  %v1447_v51 = vadd.f32 %v2915_v24, %v1408_v47 }
 0x1bd   : > { %v1413_v13 = vadd.f32 %v2231_v57, %v1109_v31  ;;  %v2194_v42 = vpop.f32.mrf.mxu1  ;;  %v2232_v58 = vpop.f32.mrf.mxu0  ;;  %v1542_v46 = vsel %vm1478_vm7, %v1446_v12, %v1510_v17 }
 0x1be   : > { %v1545_v19 = vsel %vm1481_vm6, %v1449_v36, %v1513_v52  ;;  %v1411_v23 = vadd.f32 %v1344_v4, %v1101_v62  ;;  %v1112_v3 = vadd.f32 %v2194_v42, %v2870_v38  ;;  %vm1479_vm8 = vcmp.gt.f32.partialorder %v1447_v51, 0.0 }
 0x1bf   : > { %v2023_v22 = vpack.c.bf16 %v1545_v19, %v1544_v10  ;;  %v1511_v2 = vmul.f32 0.1, %v1447_v51  ;;  %v1452_v8 = vadd.f32 %v2915_v24, %v1413_v13  ;;  %v1103_v63 = vpop.f32.mrf.mxu1  ;;  %v1347_v18 = vpop.f32.mrf.mxu0 }
 0x1c0   : > { %v1414_v59 = vadd.f32 %v2232_v58, %v1112_v3  ;;  %v1104_v1 = vadd.f32 %v1103_v63, %v2872_v40  ;;  %v1450_v15 = vadd.f32 %v2915_v24, %v1411_v23 }
 0x1c1   : > { %2063 = vst [vmem:[%s2924_s5 + $0x48] sm:$0xff] %v2023_v22   ;;  %v1543_v44 = vsel %vm1479_vm8, %v1447_v51, %v1511_v2  ;;  %v2197_v25 = vpop.f32.mrf.mxu1  ;;  %v2235_v20 = vpop.f32.mrf.mxu0  ;;  %v1516_v5 = vmul.f32 0.1, %v1452_v8  ;;  %vm1484_vm9 = vcmp.gt.f32.partialorder %v1452_v8, 0.0 }
 0x1c2   : > { %v2018_v38 = vpack.c.bf16 %v1543_v44, %v1542_v46  ;;  %v1453_v26 = vadd.f32 %v2915_v24, %v1414_v59  ;;  %v1412_v45 = vadd.f32 %v1347_v18, %v1104_v1  ;;  %v1125_v32 = vadd.f32 %v2197_v25, %v2876_v41 }
 0x1c3   : > { %v1116_v28 = vpop.f32.mrf.mxu1  ;;  %v1360_v29 = vpop.f32.mrf.mxu0  ;;  %vm1482_vm11 = vcmp.gt.f32.partialorder %v1450_v15, 0.0  ;;  %v1514_v34 = vmul.f32 0.1, %v1450_v15  ;;  %v1548_v39 = vsel %vm1484_vm9, %v1452_v8, %v1516_v5 }
 0x1c4   : > { %2062 = vst [vmem:[%s2924_s5 + $0x40] sm:$0xff] %v2018_v38   ;;  %vm1485_vm10 = vcmp.gt.f32.partialorder %v1453_v26, 0.0  ;;  %v1517_v40 = vmul.f32 0.1, %v1453_v26  ;;  %v1117_v30 = vadd.f32 %v1116_v28, %v2880_v43  ;;  %v1451_v37 = vadd.f32 %v2915_v24, %v1412_v45 }
 0x1c5   : > { %v1417_v61 = vadd.f32 %v2235_v20, %v1125_v32  ;;  %v2198_v27 = vpop.f32.mrf.mxu1  ;;  %v2236_v49 = vpop.f32.mrf.mxu0  ;;  %v1546_v35 = vsel %vm1482_vm11, %v1450_v15, %v1514_v34 }
 0x1c6   : > { %v1549_v6 = vsel %vm1485_vm10, %v1453_v26, %v1517_v40  ;;  %v1415_v11 = vadd.f32 %v1360_v29, %v1117_v30  ;;  %v1128_v41 = vadd.f32 %v2198_v27, %v2884_v50  ;;  %vm1483_vm12 = vcmp.gt.f32.partialorder %v1451_v37, 0.0 }
 0x1c7   : > { %v2033_v9 = vpack.c.bf16 %v1549_v6, %v1548_v39  ;;  %v1515_v21 = vmul.f32 0.1, %v1451_v37  ;;  %v1456_v7 = vadd.f32 %v2915_v24, %v1417_v61  ;;  %v1119_v33 = vpop.f32.mrf.mxu1  ;;  %v1363_v43 = vpop.f32.mrf.mxu0 }
 0x1c8   : > { %v1418_v54 = vadd.f32 %v2236_v49, %v1128_v41  ;;  %v1120_v12 = vadd.f32 %v1119_v33, %v2888_v53  ;;  %v1454_v48 = vadd.f32 %v2915_v24, %v1415_v11 }
 0x1c9   : > { %2065 = vst [vmem:[%s2924_s5 + $0x58] sm:$0xff] %v2033_v9   ;;  %v1547_v57 = vsel %vm1483_vm12, %v1451_v37, %v1515_v21  ;;  %v2201_v14 = vpop.f32.mrf.mxu1  ;;  %v2239_v36 = vpop.f32.mrf.mxu0  ;;  %v1520_v47 = vmul.f32 0.1, %v1456_v7  ;;  %vm1488_vm13 = vcmp.gt.f32.partialorder %v1456_v7, 0.0 }
 0x1ca   : > { %v2028_v50 = vpack.c.bf16 %v1547_v57, %v1546_v35  ;;  %v1457_v31 = vadd.f32 %v2915_v24, %v1418_v54  ;;  %v1416_v16 = vadd.f32 %v1363_v43, %v1120_v12  ;;  %v1141_v4 = vadd.f32 %v2201_v14, %v2892_v0 }
 0x1cb   : > { %v1132_v52 = vpop.f32.mrf.mxu1  ;;  %v1376_v62 = vpop.f32.mrf.mxu0  ;;  %vm1486_vm15 = vcmp.gt.f32.partialorder %v1454_v48, 0.0  ;;  %v1518_v51 = vmul.f32 0.1, %v1454_v48  ;;  %v1552_v10 = vsel %vm1488_vm13, %v1456_v7, %v1520_v47 }
 0x1cc   : > { %2064 = vst [vmem:[%s2924_s5 + $0x50] sm:$0xff] %v2028_v50   ;;  %vm1489_vm14 = vcmp.gt.f32.partialorder %v1457_v31, 0.0  ;;  %v1521_v53 = vmul.f32 0.1, %v1457_v31  ;;  %v1133_v17 = vadd.f32 %v1132_v52, %v2896_v55  ;;  %v1455_v13 = vadd.f32 %v2915_v24, %v1416_v16 }
 0x1cd   : > { %v1421_v42 = vadd.f32 %v2239_v36, %v1141_v4  ;;  %v2202_v58 = vpop.f32.mrf.mxu1  ;;  %v2240_v0 = vpop.f32.mrf.mxu0  ;;  %v1550_v59 = vsel %vm1486_vm15, %v1454_v48, %v1518_v51 }
 0x1ce   : > { %v1553_v19 = vsel %vm1489_vm14, %v1457_v31, %v1521_v53  ;;  %v1419_v23 = vadd.f32 %v1376_v62, %v1133_v17  ;;  %v1144_v3 = vadd.f32 %v2202_v58, %v2901_v56  ;;  %vm1487_vm0 = vcmp.gt.f32.partialorder %v1455_v13, 0.0 }
 0x1cf   : > { %v2043_v22 = vpack.c.bf16 %v1553_v19, %v1552_v10  ;;  %v1519_v2 = vmul.f32 0.1, %v1455_v13  ;;  %v1460_v8 = vadd.f32 %v2915_v24, %v1421_v42  ;;  %v1135_v55 = vpop.f32.mrf.mxu1  ;;  %v1379_v25 = vpop.f32.mrf.mxu0 }
 0x1d0   : > { %v1422_v63 = vadd.f32 %v2240_v0, %v1144_v3  ;;  %v1136_v18 = vadd.f32 %v1135_v55, %v2908_v60  ;;  %v1458_v46 = vadd.f32 %v2915_v24, %v1419_v23 }
 0x1d1   : > { %2067 = vst [vmem:[%s2924_s5 + $0x68] sm:$0xff] %v2043_v22   ;;  %v1551_v1 = vsel %vm1487_vm0, %v1455_v13, %v1519_v2  ;;  %v1524_v15 = vmul.f32 0.1, %v1460_v8  ;;  %vm1492_vm1 = vcmp.gt.f32.partialorder %v1460_v8, 0.0 }
 0x1d2   : > { %v2038_v44 = vpack.c.bf16 %v1551_v1, %v1550_v59  ;;  %v1461_v56 = vadd.f32 %v2915_v24, %v1422_v63  ;;  %v1420_v20 = vadd.f32 %v1379_v25, %v1136_v18  ;;  %v1522_v5 = vmul.f32 0.1, %v1458_v46 }
 0x1d3   : > { %v1556_v26 = vsel %vm1492_vm1, %v1460_v8, %v1524_v15  ;;  %vm1490_vm3 = vcmp.gt.f32.partialorder %v1458_v46, 0.0 }
 0x1d4   : > { %2066 = vst [vmem:[%s2924_s5 + $0x60] sm:$0xff] %v2038_v44   ;;  %vm1493_vm2 = vcmp.gt.f32.partialorder %v1461_v56, 0.0  ;;  %v1525_v38 = vmul.f32 0.1, %v1461_v56  ;;  %v1459_v60 = vadd.f32 %v2915_v24, %v1420_v20  ;;  %v1554_v29 = vsel %vm1490_vm3, %v1458_v46, %v1522_v5 }
 0x1d6   : > { %v1557_v45 = vsel %vm1493_vm2, %v1461_v56, %v1525_v38  ;;  %vm1491_vm4 = vcmp.gt.f32.partialorder %v1459_v60, 0.0  ;;  %v1523_v28 = vmul.f32 0.1, %v1459_v60 }
 0x1d7   : > { %v2053_v32 = vpack.c.bf16 %v1557_v45, %v1556_v26 }
 0x1d8   : > { %v1555_v40 = vsel %vm1491_vm4, %v1459_v60, %v1523_v28 }
 0x1d9   : > { %2069 = vst [vmem:[%s2924_s5 + $0x78] sm:$0xff] %v2053_v32   ;;  %v2048_v30 = vpack.c.bf16 %v1555_v40, %v1554_v29 }
 0x1db   : > { %2068 = vst [vmem:[%s2924_s5 + $0x70] sm:$0xff] %v2048_v30  }
 0x1dc PF: > { %s13_s16 = sadd.s32 1, %s2367_s16   ;;  %s3021_s12 = smov %s2359_s14 }
 0x1dd   : > { %p10_p7 = scmp.ge.s32.totalorder %s13_s16, 10   ;;  %s3022_s13 = smov %s2363_s15 }
 0x1de   : > { %s3023_s14 = smov %s3026_s17  ;;  %s3024_s15 = smov %s3030_s18 }
 0x1df   :  { %12 = sbr.rel (!%p10_p7) target bundleno = 3 (0x3), region = 65 }

// kernel: darknet_forward.14
= control target key start
LH: loop header
LB: loop body
LE: loop exit
PB: predicated region body
PF: predicated region fallthrough
CT: control target
= control target key end

     0   :  { %s931_s12 = smov 0   ;;  %s933_s13 = smov 0   ;;  %s1065_s0 = inlined_call_operand.vmem [shape: bf16[2,16,16,128], index: 0, kind: input, shape index: {}]   ;;  %s1066_s1 = inlined_call_operand.vmem [shape: bf16[1,128,128], index: 1, kind: input, shape index: {}]   ;;  %s1067_s2 = inlined_call_operand.vmem [shape: f32[1,128], index: 2, kind: input, shape index: {}]   ;;  %s1068_s3 = inlined_call_operand.vmem [shape: bf16[512,128], index: 3, kind: output, shape index: {}]  }
   0x1   :  { %s935_s14 = smov 0   ;;  %s937_s15 = smov 0  }
   0x2   :  { %s939_s16 = smov 0  }
   0x3 LB: > { %s22_s17 = sadd.s32 1, %s901_s14  ;;  %s25_s18 = sadd.s32 1, %s905_s15  ;;  %s909_s16 = sphi %s939_s16, %s13_s16   ;;  %s905_s15 = sphi %s937_s15, %s1072_s15   ;;  %s901_s14 = sphi %s935_s14, %s1071_s14   ;;  %s897_s13 = sphi %s933_s13, %s1070_s13   ;;  %s893_s12 = sphi %s931_s12, %s1069_s12  }
   0x4   : > { %p23_p0 = scmp.ge.s32.totalorder %s22_s17, 2  ;;  %p641_p1 = scmp.ge.s32.totalorder %s909_s16, 1 }
   0x5   : > { %p153_p2 = scmp.lt.s32.totalorder %s909_s16, 5 }
   0x6   : > { %s1074_s17 = smov (%p23_p0, %s22_s17), 0  ;;  %s1076_s18 = smov (!%p23_p0, %s25_s18), %s905_s15 }
   0x7   : > { %p154_p3 = pnand %p641_p1, %p153_p2  ;;  %p27_p4 = scmp.ge.s32.totalorder %s1076_s18, 2 }
   0x8   : > { %p179_p5 = scmp.lt.s32.totalorder (!%p154_p3), %s897_s13, 1  ;;  %s687_s24 = sshll.u32 (!%p154_p3), %s893_s12, 6 }
   0x9   : > { %s1078_s18 = smov (%p27_p4, %s1076_s18), 0  ;;  %157 = sbr.rel (%p154_p3) target bundleno = 263 (0x107), region = 32 }
   0xa   : > { %s644_s22 = sshll.u32 (!%p154_p3), %s897_s13, 1 }
   0xe   : > { %v855_v0 = vld [vmem:[%s1066_s1 + $0x38] sm:$0xff]   ;;  %v856_v1 = vld [vmem:[%s1066_s1 + $0x30] sm:$0xff]   ;;  %s180_s23 = scalar_select %p179_p5, %s897_s13, 1  ;;  %v857_v2 = vld [vmem:[%s1066_s1 + $0x28] sm:$0xff]  }
   0xf   : > { %767 = vmatprep.subr.bf16.mxu0 %v855_v0  ;;  %799 = vmatprep.subr.bf16.mxu1 %v855_v0  ;;  %v858_v3 = vld [vmem:[%s1066_s1 + $0x20] sm:$0xff]   ;;  %v859_v6 = vld [vmem:[%s1066_s1 + $0x18] sm:$0xff]   ;;  %v860_v7 = vld [vmem:[%s1066_s1 + $0x10] sm:$0xff]  }
  0x10   : > { %768 = vmatpush3.bf16.msra.mxu0 %v855_v0  ;;  %807 = vmatpush3.bf16.msra.mxu1 %v855_v0  ;;  %s685_s27 = sshll.u32 %s180_s23, 7  ;;  %v861_v8 = vld [vmem:[%s1066_s1 + $0x8] sm:$0xff]   ;;  %v862_v9 = vld [vmem:[%s1066_s1] sm:$0xff]   ;;  %s185_s23 = sadd.s32 %s893_s12, %s644_s22 }
  0x11   : > { %769 = vmatprep.subr.bf16.mxu0 %v856_v1  ;;  %800 = vmatprep.subr.bf16.mxu1 %v856_v1  ;;  %s183_s30 = scalar_lea.vmem %s1065_s0, %s685_s27  ;;  %v1010_v16 = vld [vmem:[%s1067_s2] ss:$0 sm:$0xff] }
  0x12   : > { %s980_s4 = scalar_lea.vmem %s183_s30, %s687_s24  ;;  %s645_s24 = sshll.u32 %s185_s23, 4 }
  0x13   : > { %v863_v4 = vld [vmem:[%s980_s4] sm:$0xff]   ;;  %v865_v10 = vld [vmem:[%s980_s4 + $0x8] sm:$0xff]   ;;  %v867_v12 = vld [vmem:[%s980_s4 + $0x10] sm:$0xff]   ;;  %p187_p6 = scmp.lt.s32.totalorder %s645_s24, 63 }
  0x14   : > { %770 = vmatpush3.bf16.msra.mxu0 %v856_v1  ;;  %808 = vmatpush3.bf16.msra.mxu1 %v856_v1  ;;  %v864_v5 = vld [vmem:[%s980_s4 + $0x20] sm:$0xff]   ;;  %v866_v11 = vld [vmem:[%s980_s4 + $0x28] sm:$0xff]   ;;  %v868_v13 = vld [vmem:[%s980_s4 + $0x30] sm:$0xff]  }
  0x15   : > { %771 = vmatprep.subr.bf16.mxu0 %v857_v2  ;;  %801 = vmatprep.subr.bf16.mxu1 %v857_v2  ;;  %v869_v14 = vld [vmem:[%s980_s4 + $0x18] sm:$0xff]   ;;  %s1080_s24 = smov (!%p187_p6, %s645_s24), 63 }
  0x16   : > { %783 = vmatprep.mubr.bf16.mxu0 %v863_v4  ;;  %791 = vmatprep.mubr.bf16.mxu1 %v864_v5  ;;  %v870_v15 = vld [vmem:[%s980_s4 + $0x38] sm:$0xff]   ;;  %s646_s12 = sshll.u32 %s1080_s24, 2 }
  0x17   : > { %s1026_s28 = scalar_lea.vmem %s1068_s3, %s646_s12 }
  0x18   : > { %772 = vmatpush3.bf16.msra.mxu0 %v857_v2  ;;  %809 = vmatpush3.bf16.msra.mxu1 %v857_v2 }
  0x19   : > { %773 = vmatprep.subr.bf16.mxu0 %v858_v3  ;;  %802 = vmatprep.subr.bf16.mxu1 %v858_v3 }
  0x1c   : > { %774 = vmatpush3.bf16.msra.mxu0 %v858_v3  ;;  %810 = vmatpush3.bf16.msra.mxu1 %v858_v3 }
  0x1d   : > { %775 = vmatprep.subr.bf16.mxu0 %v859_v6  ;;  %803 = vmatprep.subr.bf16.mxu1 %v859_v6 }
  0x20   : > { %776 = vmatpush3.bf16.msra.mxu0 %v859_v6  ;;  %811 = vmatpush3.bf16.msra.mxu1 %v859_v6 }
  0x21   : > { %777 = vmatprep.subr.bf16.mxu0 %v860_v7  ;;  %804 = vmatprep.subr.bf16.mxu1 %v860_v7 }
  0x24   : > { %778 = vmatpush3.bf16.msra.mxu0 %v860_v7  ;;  %812 = vmatpush3.bf16.msra.mxu1 %v860_v7 }
  0x25   : > { %779 = vmatprep.subr.bf16.mxu0 %v861_v8  ;;  %805 = vmatprep.subr.bf16.mxu1 %v861_v8 }
  0x28   : > { %780 = vmatpush3.bf16.msra.mxu0 %v861_v8  ;;  %813 = vmatpush3.bf16.msra.mxu1 %v861_v8 }
  0x29   : > { %781 = vmatprep.subr.bf16.mxu0 %v862_v9  ;;  %806 = vmatprep.subr.bf16.mxu1 %v862_v9 }
  0x2c   : > { %782 = vmatpush3.bf16.msra.mxu0 %v862_v9  ;;  %814 = vmatpush3.bf16.msra.mxu1 %v862_v9 }
  0x2f   : > { %784 = vmatmul.mubr.bf16.vlgmr.msra.gmra.mxu0 %v865_v10  ;;  %792 = vmatmul.mubr.bf16.vlgmr.msra.gmra.mxu1 %v866_v11 }
  0x30   : > { %787 = vmatprep.mubr.bf16.mxu0 %v867_v12  ;;  %795 = vmatprep.mubr.bf16.mxu1 %v868_v13 }
  0x37   : > { %788 = vmatmul.mubr.bf16.gmra.mxu0 %v869_v14  ;;  %796 = vmatmul.mubr.bf16.gmra.mxu1 %v870_v15 }
  0xef   : > { %v785_v17 = vpop.f32.mrf.mxu0  ;;  %v793_v18 = vpop.f32.mrf.mxu1 }
  0xf0   : > { %v377_v19 = vadd.f32 %v785_v17, %v1010_v16  ;;  %v409_v20 = vadd.f32 %v793_v18, %v1010_v16 }
  0xf1   : > { %v368_v21 = vpop.f32.mrf.mxu0  ;;  %v400_v22 = vpop.f32.mrf.mxu1 }
  0xf2   : > { %vm433_vm0 = vcmp.gt.f32.partialorder %v377_v19, 0.0  ;;  %v449_v23 = vmul.f32 0.1, %v377_v19  ;;  %vm441_vm1 = vcmp.gt.f32.partialorder %v409_v20, 0.0  ;;  %v457_v24 = vmul.f32 0.1, %v409_v20 }
  0xf3   : > { %v369_v25 = vadd.f32 %v1010_v16, %v368_v21  ;;  %v401_v26 = vadd.f32 %v1010_v16, %v400_v22  ;;  %v786_v27 = vpop.f32.mrf.mxu0  ;;  %v794_v28 = vpop.f32.mrf.mxu1 }
  0xf4   : > { %v380_v29 = vadd.f32 %v786_v27, %v1010_v16  ;;  %v412_v30 = vadd.f32 %v794_v28, %v1010_v16  ;;  %v465_v31 = vsel %vm433_vm0, %v377_v19, %v449_v23  ;;  %v473_v32 = vsel %vm441_vm1, %v409_v20, %v457_v24 }
  0xf5   : > { %vm431_vm2 = vcmp.gt.f32.partialorder %v369_v25, 0.0  ;;  %v447_v33 = vmul.f32 0.1, %v369_v25  ;;  %v371_v34 = vpop.f32.mrf.mxu0  ;;  %v403_v35 = vpop.f32.mrf.mxu1  ;;  %vm439_vm5 = vcmp.gt.f32.partialorder %v401_v26, 0.0  ;;  %v455_v38 = vmul.f32 0.1, %v401_v26 }
  0xf6   : > { %vm434_vm3 = vcmp.gt.f32.partialorder %v380_v29, 0.0  ;;  %v450_v36 = vmul.f32 0.1, %v380_v29  ;;  %vm442_vm4 = vcmp.gt.f32.partialorder %v412_v30, 0.0  ;;  %v458_v37 = vmul.f32 0.1, %v412_v30 }
  0xf7   : > { %v372_v39 = vadd.f32 %v1010_v16, %v371_v34  ;;  %v404_v40 = vadd.f32 %v1010_v16, %v403_v35  ;;  %v789_v41 = vpop.f32.mrf.mxu0  ;;  %v797_v42 = vpop.f32.mrf.mxu1  ;;  %v463_v53 = vsel %vm431_vm2, %v369_v25, %v447_v33  ;;  %v471_v58 = vsel %vm439_vm5, %v401_v26, %v455_v38 }
  0xf8   : > { %v466_v43 = vsel %vm434_vm3, %v380_v29, %v450_v36  ;;  %v474_v44 = vsel %vm442_vm4, %v412_v30, %v458_v37  ;;  %v393_v45 = vadd.f32 %v789_v41, %v1010_v16  ;;  %v425_v46 = vadd.f32 %v797_v42, %v1010_v16 }
  0xf9   : > { %v712_v47 = vpack.c.bf16 %v466_v43, %v465_v31  ;;  %v732_v48 = vpack.c.bf16 %v474_v44, %v473_v32  ;;  %vm432_vm6 = vcmp.gt.f32.partialorder %v372_v39, 0.0  ;;  %v448_v49 = vmul.f32 0.1, %v372_v39  ;;  %v384_v50 = vpop.f32.mrf.mxu0  ;;  %v416_v51 = vpop.f32.mrf.mxu1 }
  0xfa   : > { %vm440_vm7 = vcmp.gt.f32.partialorder %v404_v40, 0.0  ;;  %v456_v52 = vmul.f32 0.1, %v404_v40  ;;  %v385_v55 = vadd.f32 %v1010_v16, %v384_v50  ;;  %v417_v61 = vadd.f32 %v1010_v16, %v416_v51 }
  0xfb   : > { %744 = vst [vmem:[%s1026_s28 + $0x8] sm:$0xff] %v712_v47   ;;  %748 = vst [vmem:[%s1026_s28 + $0x28] sm:$0xff] %v732_v48   ;;  %v464_v54 = vsel %vm432_vm6, %v372_v39, %v448_v49  ;;  %v790_v56 = vpop.f32.mrf.mxu0  ;;  %v798_v57 = vpop.f32.mrf.mxu1  ;;  %vm437_vm8 = vcmp.gt.f32.partialorder %v393_v45, 0.0  ;;  %v453_v63 = vmul.f32 0.1, %v393_v45  ;;  %vm445_vm9 = vcmp.gt.f32.partialorder %v425_v46, 0.0 }
  0xfc   : > { %v707_v59 = vpack.c.bf16 %v464_v54, %v463_v53  ;;  %v472_v60 = vsel %vm440_vm7, %v404_v40, %v456_v52  ;;  %v461_v2 = vmul.f32 0.1, %v425_v46  ;;  %vm435_vm10 = vcmp.gt.f32.partialorder %v385_v55, 0.0 }
  0xfd   : > { %v727_v62 = vpack.c.bf16 %v472_v60, %v471_v58  ;;  %v387_v0 = vpop.f32.mrf.mxu0  ;;  %v419_v1 = vpop.f32.mrf.mxu1  ;;  %v396_v3 = vadd.f32 %v790_v56, %v1010_v16  ;;  %v428_v4 = vadd.f32 %v798_v57, %v1010_v16  ;;  %v451_v5 = vmul.f32 0.1, %v385_v55 }
  0xfe   : > { %708 = vst [vmem:[%s1026_s28] sm:$0xff] %v707_v59   ;;  %vm443_vm11 = vcmp.gt.f32.partialorder %v417_v61, 0.0  ;;  %v388_v6 = vadd.f32 %v1010_v16, %v387_v0  ;;  %v420_v7 = vadd.f32 %v1010_v16, %v419_v1  ;;  %v459_v8 = vmul.f32 0.1, %v417_v61 }
  0xff   : > { %747 = vst [vmem:[%s1026_s28 + $0x20] sm:$0xff] %v727_v62   ;;  %vm438_vm12 = vcmp.gt.f32.partialorder %v396_v3, 0.0  ;;  %v454_v9 = vmul.f32 0.1, %v396_v3  ;;  %vm446_vm13 = vcmp.gt.f32.partialorder %v428_v4, 0.0  ;;  %v469_v12 = vsel %vm437_vm8, %v393_v45, %v453_v63 }
 0x100   : > { %v462_v10 = vmul.f32 0.1, %v428_v4  ;;  %vm436_vm14 = vcmp.gt.f32.partialorder %v388_v6, 0.0  ;;  %v452_v11 = vmul.f32 0.1, %v388_v6  ;;  %vm444_vm15 = vcmp.gt.f32.partialorder %v420_v7, 0.0 }
 0x101   : > { %v477_v13 = vsel %vm445_vm9, %v425_v46, %v461_v2  ;;  %v470_v14 = vsel %vm438_vm12, %v396_v3, %v454_v9  ;;  %v460_v15 = vmul.f32 0.1, %v420_v7  ;;  %v467_v16 = vsel %vm435_vm10, %v385_v55, %v451_v5 }
 0x102   : > { %v722_v17 = vpack.c.bf16 %v470_v14, %v469_v12  ;;  %v478_v18 = vsel %vm446_vm13, %v428_v4, %v462_v10  ;;  %v468_v19 = vsel %vm436_vm14, %v388_v6, %v452_v11  ;;  %v475_v20 = vsel %vm443_vm11, %v417_v61, %v459_v8 }
 0x103   : > { %v742_v21 = vpack.c.bf16 %v478_v18, %v477_v13  ;;  %v717_v22 = vpack.c.bf16 %v468_v19, %v467_v16  ;;  %v476_v23 = vsel %vm444_vm15, %v420_v7, %v460_v15 }
 0x104   : > { %746 = vst [vmem:[%s1026_s28 + $0x18] sm:$0xff] %v722_v17   ;;  %v737_v24 = vpack.c.bf16 %v476_v23, %v475_v20 }
 0x105   : > { %750 = vst [vmem:[%s1026_s28 + $0x38] sm:$0xff] %v742_v21   ;;  %745 = vst [vmem:[%s1026_s28 + $0x10] sm:$0xff] %v717_v22  }
 0x106   : > { %749 = vst [vmem:[%s1026_s28 + $0x30] sm:$0xff] %v737_v24  }
 0x107 PF: > { %s13_s16 = sadd.s32 1, %s909_s16   ;;  %s1069_s12 = smov %s901_s14 }
 0x108   : > { %p10_p7 = scmp.ge.s32.totalorder %s13_s16, 6   ;;  %s1070_s13 = smov %s905_s15 }
 0x109   : > { %s1071_s14 = smov %s1074_s17  ;;  %s1072_s15 = smov %s1078_s18 }
 0x10a   :  { %12 = sbr.rel (!%p10_p7) target bundleno = 3 (0x3), region = 63 }

// kernel: darknet_forward.13
= control target key start
LH: loop header
LB: loop body
LE: loop exit
PB: predicated region body
PF: predicated region fallthrough
CT: control target
= control target key end

     0   :  { %s4304_s12 = smov 0   ;;  %s4306_s13 = smov 0   ;;  %s5548_s0 = inlined_call_operand.vmem [shape: bf16[2,17,17,512], index: 0, kind: input, shape index: {}]   ;;  %s5549_s1 = inlined_call_operand.vmem [shape: bf16[2,1024,128], index: 1, kind: input, shape index: {}]   ;;  %s5550_s2 = inlined_call_operand.vmem [shape: f32[1,128], index: 2, kind: input, shape index: {}]   ;;  %s5551_s3 = inlined_call_operand.vmem [shape: bf16[512,128], index: 3, kind: output, shape index: {}]  }
   0x1   :  { %s4308_s14 = smov 0   ;;  %s4310_s15 = smov 0  }
   0x2   :  { %s4312_s16 = smov 0  }
   0x3 LB: > { %s22_s17 = sadd.s32 1, %s4274_s14  ;;  %s25_s18 = sadd.s32 1, %s4278_s15  ;;  %s4282_s16 = sphi %s4312_s16, %s13_s16   ;;  %s4278_s15 = sphi %s4310_s15, %s5581_s15   ;;  %s4274_s14 = sphi %s4308_s14, %s5580_s14   ;;  %s4270_s13 = sphi %s4306_s13, %s5579_s13   ;;  %s4266_s12 = sphi %s4304_s12, %s5578_s12  }
   0x4   : > { %p23_p0 = scmp.ge.s32.totalorder %s22_s17, 2  ;;  %p3026_p1 = scmp.ge.s32.totalorder %s4282_s16, 1 }
   0x5   : > { %p153_p2 = scmp.lt.s32.totalorder %s4282_s16, 5 }
   0x6   : > { %s5583_s17 = smov (%p23_p0, %s22_s17), 0  ;;  %s5585_s18 = smov (!%p23_p0, %s25_s18), %s4278_s15 }
   0x7   : > { %p154_p3 = pnand %p3026_p1, %p153_p2  ;;  %p27_p4 = scmp.ge.s32.totalorder %s5585_s18, 2 }
   0x9   : > { %s5587_s18 = smov (%p27_p4, %s5585_s18), 0  ;;  %157 = sbr.rel (%p154_p3) target bundleno = 509 (0x1fd), region = 32 }
   0xe   : > { %v3998_v0 = vld [vmem:[%s5549_s1 + $0x278] sm:$0xff]   ;;  %v4002_v4 = vld [vmem:[%s5549_s1 + $0x270] sm:$0xff]   ;;  %v4006_v8 = vld [vmem:[%s5549_s1 + $0x268] sm:$0xff]   ;;  %p179_p5 = scmp.lt.s32.totalorder %s4270_s13, 1  ;;  %s3381_s6 = smul.u32 384, %s4266_s12 }
   0xf   : > { %v3999_v1 = vld [vmem:[%s5549_s1 + $0x2f8] sm:$0xff]   ;;  %3445 = vmatprep.subr.bf16.mxu0 %v3998_v0  ;;  %v4003_v5 = vld [vmem:[%s5549_s1 + $0x2f0] sm:$0xff]   ;;  %v4007_v9 = vld [vmem:[%s5549_s1 + $0x2e8] sm:$0xff]   ;;  %vm493_vm0 = vsmask.f32 7424 }
  0x10   : > { %v4000_v2 = vld [vmem:[%s5549_s1 + $0x238] sm:$0xff]   ;;  %3509 = vmatprep.subr.bf16.mxu1 %v3999_v1  ;;  %v4004_v6 = vld [vmem:[%s5549_s1 + $0x230] sm:$0xff]   ;;  %v4008_v10 = vld [vmem:[%s5549_s1 + $0x228] sm:$0xff]   ;;  %s180_s10 = scalar_select %p179_p5, %s4270_s13, 1 }
  0x11   : > { %v4001_v3 = vld [vmem:[%s5549_s1 + $0x2b8] sm:$0xff]   ;;  %3446 = vmatpush3.bf16.msra.mxu0 %v4000_v2  ;;  %v4005_v7 = vld [vmem:[%s5549_s1 + $0x2b0] sm:$0xff]   ;;  %v4009_v11 = vld [vmem:[%s5549_s1 + $0x2a8] sm:$0xff]  }
  0x12   : > { %3510 = vmatpush3.bf16.msra.mxu1 %v4001_v3  ;;  %3447 = vmatprep.subr.bf16.mxu0 %v4002_v4  ;;  %v4010_v12 = vld [vmem:[%s5549_s1 + $0x260] sm:$0xff]   ;;  %v4014_v16 = vld [vmem:[%s5549_s1 + $0x258] sm:$0xff]   ;;  %v4018_v20 = vld [vmem:[%s5549_s1 + $0x250] sm:$0xff]   ;;  %s3957_s26 = smul.u32 816, %s180_s10 }
  0x13   : > { %3511 = vmatprep.subr.bf16.mxu1 %v4003_v5  ;;  %v4011_v13 = vld [vmem:[%s5549_s1 + $0x2e0] sm:$0xff]   ;;  %v4015_v17 = vld [vmem:[%s5549_s1 + $0x2d8] sm:$0xff]   ;;  %v4019_v21 = vld [vmem:[%s5549_s1 + $0x2d0] sm:$0xff]  }
  0x14   : > { %v4012_v14 = vld [vmem:[%s5549_s1 + $0x220] sm:$0xff]   ;;  %v4016_v18 = vld [vmem:[%s5549_s1 + $0x218] sm:$0xff]   ;;  %v4020_v22 = vld [vmem:[%s5549_s1 + $0x210] sm:$0xff]   ;;  %s183_s11 = scalar_lea.vmem %s5548_s0, %s3957_s26 }
  0x15   : > { %3448 = vmatpush3.bf16.msra.mxu0 %v4004_v6  ;;  %v4013_v15 = vld [vmem:[%s5549_s1 + $0x2a0] sm:$0xff]   ;;  %v4017_v19 = vld [vmem:[%s5549_s1 + $0x298] sm:$0xff]   ;;  %v4021_v23 = vld [vmem:[%s5549_s1 + $0x290] sm:$0xff]   ;;  %s4434_s25 = scalar_lea.vmem %s183_s11, %s3381_s6 }
  0x16   : > { %3512 = vmatpush3.bf16.msra.mxu1 %v4005_v7  ;;  %3449 = vmatprep.subr.bf16.mxu0 %v4006_v8  ;;  %v4022_v24 = vld [vmem:[%s5549_s1 + $0x248] sm:$0xff]   ;;  %v4026_v28 = vld [vmem:[%s5549_s1 + $0x240] sm:$0xff]   ;;  %v4036_v36 = vld [vmem:[%s5549_s1 + $0x378] sm:$0xff]  }
  0x17   : > { %3513 = vmatprep.subr.bf16.mxu1 %v4007_v9  ;;  %v4023_v25 = vld [vmem:[%s5549_s1 + $0x2c8] sm:$0xff]   ;;  %v4027_v29 = vld [vmem:[%s5549_s1 + $0x2c0] sm:$0xff]   ;;  %v4037_v37 = vld [vmem:[%s5549_s1 + $0x338] sm:$0xff]  }
  0x18   : > { %v4024_v26 = vld [vmem:[%s5549_s1 + $0x208] sm:$0xff]   ;;  %v4028_v30 = vld [vmem:[%s5549_s1 + $0x200] sm:$0xff]   ;;  %v4038_v38 = vld [vmem:[%s5549_s1 + $0x3f8] sm:$0xff]  }
  0x19   : > { %3450 = vmatpush3.bf16.msra.mxu0 %v4008_v10  ;;  %v4025_v27 = vld [vmem:[%s5549_s1 + $0x288] sm:$0xff]   ;;  %v4029_v31 = vld [vmem:[%s5549_s1 + $0x280] sm:$0xff]   ;;  %v4039_v39 = vld [vmem:[%s5549_s1 + $0x3b8] sm:$0xff]  }
  0x1a   : > { %3514 = vmatpush3.bf16.msra.mxu1 %v4009_v11  ;;  %3451 = vmatprep.subr.bf16.mxu0 %v4010_v12  ;;  %v4443_v32 = vld [vmem:[%s4434_s25 + $0x34] ss:$16 sps:$4 sm:$0xff]   ;;  %v4446_v33 = vld [vmem:[%s4434_s25 + $0x3c] ss:$16 sps:$4 sm:$0xff]   ;;  %v4450_v34 = vld [vmem:[%s4434_s25 + $0x30] ss:$16 sps:$4 sm:$0xff]  }
  0x1b   : > { %3515 = vmatprep.subr.bf16.mxu1 %v4011_v13  ;;  %1665 = vmatprep.mubr.bf16.mxu0 %v4443_v32  ;;  %v4453_v35 = vld [vmem:[%s4434_s25 + $0x38] ss:$16 sps:$4 sm:$0xff]   ;;  %v4471_v40 = vld [vmem:[%s4434_s25 + $0x64] ss:$16 sps:$4 sm:$0xff]   ;;  %v4474_v41 = vld [vmem:[%s4434_s25 + $0x6c] ss:$16 sps:$4 sm:$0xff]  }
  0x1c   : > { %1762 = vmatprep.mubr.bf16.mxu1 %v4446_v33  ;;  %v4477_v42 = vld [vmem:[%s4434_s25 + $0x60] ss:$16 sps:$4 sm:$0xff]   ;;  %v4481_v43 = vld [vmem:[%s4434_s25 + $0x68] ss:$16 sps:$4 sm:$0xff]   ;;  %v4499_v48 = vld [vmem:[%s4434_s25 + $0x94] ss:$16 sps:$4 sm:$0xff]  }
  0x1d   : > { %3452 = vmatpush3.bf16.msra.mxu0 %v4012_v14  ;;  %v4046_v44 = vld [vmem:[%s5549_s1 + $0x370] sm:$0xff]   ;;  %v4502_v49 = vld [vmem:[%s4434_s25 + $0x9c] ss:$16 sps:$4 sm:$0xff]   ;;  %v4508_v51 = vld [vmem:[%s4434_s25 + $0x98] ss:$16 sps:$4 sm:$0xff]   ;;  %v557_v62 = vshll.u32 %v4443_v32, 16 }
  0x1e   : > { %3516 = vmatpush3.bf16.msra.mxu1 %v4013_v15  ;;  %3453 = vmatprep.subr.bf16.mxu0 %v4014_v16  ;;  %v4047_v45 = vld [vmem:[%s5549_s1 + $0x330] sm:$0xff]   ;;  %v4056_v52 = vld [vmem:[%s5549_s1 + $0x368] sm:$0xff]   ;;  %v4066_v60 = vld [vmem:[%s5549_s1 + $0x360] sm:$0xff]   ;;  %v555_v2 = vshrl.u32 %v4443_v32, 16  ;;  %v579_v5 = vshrl.u32 %v4446_v33, 16  ;;  %v581_v6 = vshll.u32 %v4446_v33, 16 }
  0x1f   : > { %3517 = vmatprep.subr.bf16.mxu1 %v4015_v17  ;;  %v4048_v46 = vld [vmem:[%s5549_s1 + $0x3f0] sm:$0xff]   ;;  %v4057_v53 = vld [vmem:[%s5549_s1 + $0x328] sm:$0xff]   ;;  %v4067_v61 = vld [vmem:[%s5549_s1 + $0x320] sm:$0xff]   ;;  %v4562_v4 = vrot.slane %v557_v62, 1  ;;  %v545_v7 = vshll.u32 %v4450_v34, 16  ;;  %v569_v8 = vshll.u32 %v4453_v35, 16 }
  0x20   : > { %v4049_v47 = vld [vmem:[%s5549_s1 + $0x3b0] sm:$0xff]   ;;  %v4058_v54 = vld [vmem:[%s5549_s1 + $0x3e8] sm:$0xff]   ;;  %v4068_v63 = vld [vmem:[%s5549_s1 + $0x3e0] sm:$0xff]   ;;  %v605_v12 = vshll.u32 %v4471_v40, 16  ;;  %v629_v14 = vshll.u32 %v4474_v41, 16  ;;  %v543_v16 = vshrl.u32 %v4450_v34, 16 }
  0x21   : > { %3454 = vmatpush3.bf16.msra.mxu0 %v4016_v18  ;;  %v4505_v50 = vld [vmem:[%s4434_s25 + $0x90] ss:$16 sps:$4 sm:$0xff]   ;;  %v4059_v55 = vld [vmem:[%s5549_s1 + $0x3a8] sm:$0xff]   ;;  %v4527_v56 = vld [vmem:[%s4434_s25 + $0xc4] ss:$16 sps:$4 sm:$0xff]   ;;  %v4591_v18 = vrot.slane %v581_v6, 1 }
  0x22   : > { %3518 = vmatpush3.bf16.msra.mxu1 %v4017_v19  ;;  %3455 = vmatprep.subr.bf16.mxu0 %v4018_v20  ;;  %v4530_v57 = vld [vmem:[%s4434_s25 + $0xcc] ss:$16 sps:$4 sm:$0xff]   ;;  %v4534_v58 = vld [vmem:[%s4434_s25 + $0xc0] ss:$16 sps:$4 sm:$0xff]   ;;  %v4537_v59 = vld [vmem:[%s4434_s25 + $0xc8] ss:$16 sps:$4 sm:$0xff]  }
  0x23   : > { %3519 = vmatprep.subr.bf16.mxu1 %v4019_v21  ;;  %v4069_v0 = vld [vmem:[%s5549_s1 + $0x3a0] sm:$0xff]   ;;  %v4560_v3 = vld [vmem:[%s4434_s25 + $0xfc] ss:$16 sps:$4 sm:$0xff]   ;;  %v4574_v10 = vld [vmem:[%s4434_s25 + $0xf8] ss:$16 sps:$4 sm:$0xff]   ;;  %v4593_v19 = vrot.slane %v545_v7, 1 }
  0x24   : > { %v4554_v1 = vld [vmem:[%s4434_s25 + $0xf4] ss:$16 sps:$4 sm:$0xff]   ;;  %v4571_v9 = vld [vmem:[%s4434_s25 + $0xf0] ss:$16 sps:$4 sm:$0xff]   ;;  %v4076_v11 = vld [vmem:[%s5549_s1 + $0x358] sm:$0xff]  }
  0x25   : > { %3456 = vmatpush3.bf16.msra.mxu0 %v4020_v22  ;;  %v4077_v13 = vld [vmem:[%s5549_s1 + $0x318] sm:$0xff]   ;;  %v4597_v21 = vld [vmem:[%s4434_s25 + $0x124] ss:$16 sps:$4 sm:$0xff]   ;;  %v4096_v6 = vld [vmem:[%s5549_s1 + $0x348] sm:$0xff]  }
  0x26   : > { %3520 = vmatpush3.bf16.msra.mxu1 %v4021_v23  ;;  %3457 = vmatprep.subr.bf16.mxu0 %v4022_v24  ;;  %v4078_v15 = vld [vmem:[%s5549_s1 + $0x3d8] sm:$0xff]   ;;  %v713_v23 = vshll.u32 %v4537_v59, 16 }
  0x27   : > { %3521 = vmatprep.subr.bf16.mxu1 %v4023_v25  ;;  %v4079_v17 = vld [vmem:[%s5549_s1 + $0x398] sm:$0xff]   ;;  %v4604_v25 = vrot.slane %v569_v8, 1  ;;  %v4097_v8 = vld [vmem:[%s5549_s1 + $0x308] sm:$0xff]  }
  0x28   : > { %v4602_v24 = vld [vmem:[%s4434_s25 + $0x12c] ss:$16 sps:$4 sm:$0xff]  }
  0x29   : > { %3458 = vmatpush3.bf16.msra.mxu0 %v4024_v26  ;;  %v4606_v26 = vrot.slane %v605_v12, 1  ;;  %v4098_v12 = vld [vmem:[%s5549_s1 + $0x3c8] sm:$0xff]  }
  0x2a   : > { %3522 = vmatpush3.bf16.msra.mxu1 %v4025_v27  ;;  %3459 = vmatprep.subr.bf16.mxu0 %v4026_v28  ;;  %v4608_v27 = vrot.slane %v629_v14, 1  ;;  %v4099_v14 = vld [vmem:[%s5549_s1 + $0x388] sm:$0xff]   ;;  %v4114_v28 = vld [vmem:[%s5549_s1 + $0x78] sm:$0xff]  }
  0x2b   : > { %3523 = vmatprep.subr.bf16.mxu1 %v4027_v29  ;;  %v4086_v29 = vld [vmem:[%s5549_s1 + $0x350] sm:$0xff]  }
  0x2d   : > { %3460 = vmatpush3.bf16.msra.mxu0 %v4028_v30  ;;  %v593_v30 = vshll.u32 %v4477_v42, 16 }
  0x2e   : > { %3524 = vmatpush3.bf16.msra.mxu1 %v4029_v31  ;;  %3573 = vmatprep.subr.bf16.mxu0 %v4036_v36  ;;  %v4087_v31 = vld [vmem:[%s5549_s1 + $0x310] sm:$0xff]   ;;  %v617_v36 = vshll.u32 %v4481_v43, 16 }
  0x2f   : > { %3637 = vmatprep.subr.bf16.mxu1 %v4038_v38  ;;  %v4627_v38 = vld [vmem:[%s4434_s25 + $0x128] ss:$16 sps:$4 sm:$0xff]  }
  0x30   : > { %1666 = vmatmul.mubr.bf16.vlgmr.msra.gmra.mxu0 %v4450_v34 }
  0x31   : > { %1763 = vmatmul.mubr.bf16.vlgmr.msra.gmra.mxu1 %v4453_v35  ;;  %3574 = vmatpush3.bf16.msra.mxu0 %v4037_v37  ;;  %v4624_v37 = vld [vmem:[%s4434_s25 + $0x120] ss:$16 sps:$4 sm:$0xff]  }
  0x32   : > { %3638 = vmatpush3.bf16.msra.mxu1 %v4039_v39  ;;  %1673 = vmatprep.mubr.bf16.mxu0 %v4471_v40  ;;  %v4088_v39 = vld [vmem:[%s5549_s1 + $0x3d0] sm:$0xff]  }
  0x33   : > { %1770 = vmatprep.mubr.bf16.mxu1 %v4474_v41  ;;  %3575 = vmatprep.subr.bf16.mxu0 %v4046_v44  ;;  %v653_v44 = vshll.u32 %v4499_v48, 16 }
  0x34   : > { %3639 = vmatprep.subr.bf16.mxu1 %v4048_v46  ;;  %v677_v46 = vshll.u32 %v4502_v49, 16 }
  0x35   : > { %3576 = vmatpush3.bf16.msra.mxu0 %v4047_v45  ;;  %v4089_v45 = vld [vmem:[%s5549_s1 + $0x390] sm:$0xff]   ;;  %v4650_v62 = vrot.slane %v653_v44, 1 }
  0x36   : > { %3640 = vmatpush3.bf16.msra.mxu1 %v4049_v47  ;;  %3577 = vmatprep.subr.bf16.mxu0 %v4056_v52  ;;  %v4638_v47 = vld [vmem:[%s4434_s25 + $0x154] ss:$16 sps:$4 sm:$0xff]   ;;  %v4657_v7 = vrot.slane %v677_v46, 1  ;;  %v4719_v44 = vld [vmem:[%s4434_s25 + $0x180] ss:$16 sps:$4 sm:$0xff]  }
  0x37   : > { %3641 = vmatprep.subr.bf16.mxu1 %v4058_v54  ;;  %v4643_v54 = vld [vmem:[%s4434_s25 + $0x15c] ss:$16 sps:$4 sm:$0xff]   ;;  %v4106_v46 = vld [vmem:[%s5549_s1 + $0x340] sm:$0xff]  }
  0x38   : > { %1674 = vmatmul.mubr.bf16.gmra.mxu0 %v4477_v42 }
  0x39   : > { %1771 = vmatmul.mubr.bf16.gmra.mxu1 %v4481_v43  ;;  %1681 = vmatprep.mubr.bf16.mxu0 %v4499_v48 }
  0x3a   : > { %1778 = vmatprep.mubr.bf16.mxu1 %v4502_v49  ;;  %3578 = vmatpush3.bf16.msra.mxu0 %v4057_v53  ;;  %v641_v53 = vshll.u32 %v4505_v50, 16 }
  0x3b   : > { %3642 = vmatpush3.bf16.msra.mxu1 %v4059_v55  ;;  %3579 = vmatprep.subr.bf16.mxu0 %v4066_v60  ;;  %v4645_v55 = vrot.slane %v593_v30, 1 }
  0x3c   : > { %3643 = vmatprep.subr.bf16.mxu1 %v4068_v63  ;;  %v210_v63 = vld [vmem:[%s4434_s25 + $0x58] sm:$0x11] }
  0x3d   : > { %v3072_v60 = vcombine.low %v210_v63, %v210_v63  ;;  %v3073_v52 = vcombine.high %v210_v63, %v210_v63 }
  0x3e   : > { %3580 = vmatpush3.bf16.msra.mxu0 %v4067_v61  ;;  %v4648_v61 = vrot.slane %v617_v36, 1  ;;  %v4683_v36 = vld [vmem:[%s4434_s25 + $0x158] ss:$16 sps:$4 sm:$0xff]  }
  0x3f   : > { %3644 = vmatpush3.bf16.msra.mxu1 %v4069_v0  ;;  %3581 = vmatprep.subr.bf16.mxu0 %v4076_v11  ;;  %v4664_v11 = vrot.slane %v641_v53, 1  ;;  %5557 = vst [vmem:[#allocation3_spill] sm:$0xff] %v4683_v36  ;;  %v574_v63 = vshll.u32 %v3072_v60, 16  ;;  %v586_v20 = vshll.u32 %v3073_v52, 16  ;;  %v215_v60 = vld [vmem:[%s4434_s25 + $0x80] sm:$0x11] }
  0x40   : > { %1682 = vmatmul.mubr.bf16.gmra.mxu0 %v4505_v50  ;;  %3645 = vmatprep.subr.bf16.mxu1 %v4078_v15  ;;  %v701_v15 = vshll.u32 %v4527_v56, 16 }
  0x41   : > { %1779 = vmatmul.mubr.bf16.gmra.mxu1 %v4508_v51  ;;  %1689 = vmatprep.mubr.bf16.mxu0 %v4527_v56 }
  0x42   : > { %1786 = vmatprep.mubr.bf16.mxu1 %v4530_v57  ;;  %3582 = vmatpush3.bf16.msra.mxu0 %v4077_v13  ;;  %v665_v13 = vshll.u32 %v4508_v51, 16 }
  0x43   : > { %3646 = vmatpush3.bf16.msra.mxu1 %v4079_v17  ;;  %3583 = vmatprep.subr.bf16.mxu0 %v4086_v29  ;;  %v725_v17 = vshll.u32 %v4530_v57, 16  ;;  %v4678_v29 = vld [vmem:[%s4434_s25 + $0x150] ss:$16 sps:$4 sm:$0xff]  }
  0x44   : > { %3647 = vmatprep.subr.bf16.mxu1 %v4088_v39  ;;  %5556 = vst [vmem:[#allocation2_spill] sm:$0xff] %v4678_v29  ;;  %v4686_v39 = vld [vmem:[%s4434_s25 + $0x184] ss:$16 sps:$4 sm:$0xff]   ;;  %v4695_v53 = vrot.slane %v665_v13, 1 }
  0x45   : > { %v4108_v13 = vld [vmem:[%s5549_s1 + $0x3c0] sm:$0xff]  }
  0x46   : > { %3584 = vmatpush3.bf16.msra.mxu0 %v4087_v31  ;;  %v4722_v31 = vld [vmem:[%s4434_s25 + $0x188] ss:$16 sps:$4 sm:$0xff]  }
  0x47   : > { %3648 = vmatpush3.bf16.msra.mxu1 %v4089_v45  ;;  %3585 = vmatprep.subr.bf16.mxu0 %v4096_v6  ;;  %v4690_v45 = vld [vmem:[%s4434_s25 + $0x18c] ss:$16 sps:$4 sm:$0xff]   ;;  %v4697_v6 = vrot.slane %v701_v15, 1  ;;  %v689_v15 = vshll.u32 %v4534_v58, 16 }
  0x48   : > { %1690 = vmatmul.mubr.bf16.gmra.mxu0 %v4534_v58  ;;  %3649 = vmatprep.subr.bf16.mxu1 %v4098_v12  ;;  %v4107_v12 = vld [vmem:[%s5549_s1 + $0x300] sm:$0xff]  }
  0x49   : > { %1787 = vmatmul.mubr.bf16.gmra.mxu1 %v4537_v59  ;;  %1697 = vmatprep.mubr.bf16.mxu0 %v4554_v1 }
  0x4a   : > { %1794 = vmatprep.mubr.bf16.mxu1 %v4560_v3  ;;  %3586 = vmatpush3.bf16.msra.mxu0 %v4097_v8  ;;  %v4699_v8 = vrot.slane %v725_v17, 1  ;;  %v4109_v17 = vld [vmem:[%s5549_s1 + $0x380] sm:$0xff]  }
  0x4b   : > { %3650 = vmatpush3.bf16.msra.mxu1 %v4099_v14  ;;  %3587 = vmatprep.subr.bf16.mxu0 %v4106_v46  ;;  %v209_v46 = vld [vmem:[%s4434_s25 + $0x50] sm:$0x11]  ;;  %v560_v14 = vor.u32 %v4562_v4, %v555_v2  ;;  %v749_v4 = vshll.u32 %v4554_v1, 16  ;;  %v4132_v2 = vld [vmem:[%s5549_s1 + $0xe8] sm:$0xff]  }
  0x4c   : > { %3651 = vmatprep.subr.bf16.mxu1 %v4108_v13  ;;  %v3070_v30 = vcombine.low %v209_v46, %v209_v46  ;;  %v3071_v0 = vcombine.high %v209_v46, %v209_v46  ;;  %v4116_v13 = vld [vmem:[%s5549_s1 + $0xf8] sm:$0xff]   ;;  %v584_v46 = vor.u32 %v4591_v18, %v579_v5  ;;  %v5558_v5 = vshrl.u32 %v4453_v35, 16 }
  0x4e   : > { %3588 = vmatpush3.bf16.msra.mxu0 %v4107_v12  ;;  %v550_v22 = vshll.u32 %v3070_v30, 16  ;;  %v562_v12 = vshll.u32 %v3071_v0, 16  ;;  %v588_v0 = vrot.slane %v586_v20, 1  ;;  %v572_v18 = vor.u32 %v4604_v25, %v5558_v5  ;;  %v222_v5 = vld [vmem:[%s4434_s25 + $0xb8] sm:$0x11] }
  0x4f   : > { %3652 = vmatpush3.bf16.msra.mxu1 %v4109_v17  ;;  %v4735_v17 = vrot.slane %v689_v15, 1  ;;  %3701 = vmatprep.subr.bf16.mxu0 %v4114_v28  ;;  %v548_v15 = vor.u32 %v4593_v19, %v543_v16  ;;  %v3074_v19 = vcombine.low %v215_v60, %v215_v60  ;;  %v4759_v20 = vrot.slane %v713_v23, 1  ;;  %v4117_v23 = vld [vmem:[%s5549_s1 + $0xb8] sm:$0xff]  }
  0x50   : > { %1698 = vmatmul.mubr.bf16.gmra.mxu0 %v4571_v9  ;;  %v564_v30 = vrot.slane %v562_v12, 1  ;;  %v552_v32 = vrot.slane %v550_v22, 1  ;;  %3765 = vmatprep.subr.bf16.mxu1 %v4116_v13  ;;  %v3075_v22 = vcombine.high %v215_v60, %v215_v60  ;;  %v4757_v34 = vsel %vm493_vm0, %v584_v46, %v588_v0  ;;  %v4115_v12 = vld [vmem:[%s5549_s1 + $0x38] sm:$0xff]   ;;  %v221_v60 = vld [vmem:[%s4434_s25 + $0xb0] sm:$0x11] }
  0x51   : > { %1795 = vmatmul.mubr.bf16.gmra.mxu1 %v4574_v10  ;;  %1705 = vmatprep.mubr.bf16.mxu0 %v4597_v21  ;;  %v5559_v28 = vshrl.u32 %v4471_v40, 16  ;;  %v5560_v13 = vshrl.u32 %v4474_v41, 16  ;;  %v4775_v40 = vrot.slane %v749_v4, 1  ;;  %v598_v0 = vshll.u32 %v3074_v19, 16  ;;  %v4122_v41 = vld [vmem:[%s5549_s1 + $0x70] sm:$0xff]  }
  0x52   : > { %1802 = vmatprep.mubr.bf16.mxu1 %v4602_v24  ;;  %v4750_v33 = vsel %vm493_vm0, %v560_v14, %v564_v30  ;;  %v610_v52 = vshll.u32 %v3075_v22, 16 }
  0x53   : > { %v608_v35 = vor.u32 %v4606_v26, %v5559_v28  ;;  %v4778_v26 = vsel %vm493_vm0, %v548_v15, %v552_v32  ;;  %v773_v32 = vshll.u32 %v4560_v3, 16 }
  0x54   : > { %v612_v30 = vrot.slane %v610_v52, 1 }
  0x56   : > { %v4789_v4 = vsel %vm493_vm0, %v608_v35, %v612_v30  ;;  %v600_v35 = vrot.slane %v598_v0, 1  ;;  %v5562_v0 = vshrl.u32 %v4481_v43, 16  ;;  %v227_v30 = vld [vmem:[%s4434_s25 + $0xe0] sm:$0x11] }
  0x58   : > { %1706 = vmatmul.mubr.bf16.gmra.mxu0 %v4624_v37 }
  0x59   : > { %1803 = vmatmul.mubr.bf16.gmra.mxu1 %v4627_v38  ;;  %1713 = vmatprep.mubr.bf16.mxu0 %v4638_v47 }
  0x5a   : > { %1810 = vmatprep.mubr.bf16.mxu1 %v4643_v54 }
  0x60   : > { %1714 = vmatmul.mubr.bf16.gmra.mxu0 %v4678_v29  ;;  %v216_v29 = vld [vmem:[%s4434_s25 + $0x88] sm:$0x11] }
  0x61   : > { %1811 = vmatmul.mubr.bf16.gmra.mxu1 %v4683_v36  ;;  %1721 = vmatprep.mubr.bf16.mxu0 %v4686_v39  ;;  %v576_v36 = vrot.slane %v574_v63, 1  ;;  %v3077_v16 = vcombine.high %v216_v29, %v216_v29  ;;  %v3076_v25 = vcombine.low %v216_v29, %v216_v29  ;;  %v632_v63 = vor.u32 %v4608_v27, %v5560_v13  ;;  %v4125_v13 = vld [vmem:[%s5549_s1 + $0xb0] sm:$0xff]  }
  0x62   : > { %1818 = vmatprep.mubr.bf16.mxu1 %v4690_v45  ;;  %v3079_v27 = vcombine.high %v221_v60, %v221_v60 }
  0x63   : > { %v634_v46 = vshll.u32 %v3077_v16, 16  ;;  %v4781_v29 = vsel %vm493_vm0, %v572_v18, %v576_v36  ;;  %v622_v28 = vshll.u32 %v3076_v25, 16  ;;  %v3081_v16 = vcombine.high %v222_v5, %v222_v5  ;;  %v4124_v36 = vld [vmem:[%s5549_s1 + $0xf0] sm:$0xff]  }
  0x64   : > { %v4123_v18 = vld [vmem:[%s5549_s1 + $0x30] sm:$0xff]   ;;  %v658_v19 = vshll.u32 %v3079_v27, 16  ;;  %v3078_v25 = vcombine.low %v221_v60, %v221_v60  ;;  %v5561_v60 = vshrl.u32 %v4477_v42, 16  ;;  %v620_v27 = vor.u32 %v4648_v61, %v5562_v0 }
  0x65   : > { %v636_v22 = vrot.slane %v634_v46, 1  ;;  %v682_v52 = vshll.u32 %v3081_v16, 16  ;;  %v3080_v46 = vcombine.low %v222_v5, %v222_v5  ;;  %v624_v16 = vrot.slane %v622_v28, 1 }
  0x66   : > { %v5563_v5 = vshrl.u32 %v4499_v48, 16  ;;  %v660_v42 = vrot.slane %v658_v19, 1  ;;  %v646_v48 = vshll.u32 %v3078_v25, 16  ;;  %v737_v28 = vshll.u32 %v4571_v9, 16  ;;  %v4131_v19 = vld [vmem:[%s5549_s1 + $0x28] sm:$0xff]  }
  0x67   : > { %v4796_v15 = vsel %vm493_vm0, %v632_v63, %v636_v22  ;;  %v4130_v63 = vld [vmem:[%s5549_s1 + $0x68] sm:$0xff]   ;;  %v596_v22 = vor.u32 %v4645_v55, %v5561_v60  ;;  %v5564_v55 = vshrl.u32 %v4502_v49, 16  ;;  %v684_v61 = vrot.slane %v682_v52, 1 }
  0x68   : > { %1722 = vmatmul.mubr.bf16.gmra.mxu0 %v4719_v44  ;;  %v656_v14 = vor.u32 %v4650_v62, %v5563_v5  ;;  %v1083_v60 = vshll.u32 %v4686_v39, 16  ;;  %v670_v0 = vshll.u32 %v3080_v46, 16  ;;  %v4834_v49 = vrot.slane %v773_v32, 1  ;;  %v4138_v46 = vld [vmem:[%s5549_s1 + $0x60] sm:$0xff]  }
  0x69   : > { %1819 = vmatmul.mubr.bf16.gmra.mxu1 %v4722_v31  ;;  %1859 = vmatprep.mubr.bf16.mxu0 %v4750_v33  ;;  %v680_v43 = vor.u32 %v4657_v7, %v5564_v55  ;;  %v4837_v7 = vsel %vm493_vm0, %v596_v22, %v600_v35  ;;  %v233_v22 = vld [vmem:[%s4434_s25 + $0x110] sm:$0x11]  ;;  %v5565_v5 = vshrl.u32 %v4505_v50, 16  ;;  %v5566_v55 = vshrl.u32 %v4508_v51, 16 }
  0x6a   : > { %1956 = vmatprep.mubr.bf16.mxu1 %v4757_v34  ;;  %v4846_v25 = vsel %vm493_vm0, %v656_v14, %v660_v42  ;;  %v672_v14 = vrot.slane %v670_v0, 1  ;;  %v5568_v50 = vshrl.u32 %v4530_v57, 16  ;;  %v1107_v0 = vshll.u32 %v4690_v45, 16  ;;  %v4148_v57 = vld [vmem:[%s5549_s1 + $0xd8] sm:$0xff]  }
  0x6b   : > { %v4849_v32 = vsel %vm493_vm0, %v680_v43, %v684_v61  ;;  %v644_v42 = vor.u32 %v4664_v11, %v5565_v5  ;;  %v668_v43 = vor.u32 %v4695_v53, %v5566_v55  ;;  %v4146_v53 = vld [vmem:[%s5549_s1 + $0x58] sm:$0xff]   ;;  %v5570_v55 = vshrl.u32 %v4537_v59, 16 }
  0x6c   : > { %v728_v11 = vor.u32 %v4699_v8, %v5568_v50  ;;  %v5571_v50 = vshrl.u32 %v4554_v1, 16  ;;  %v4157_v1 = vld [vmem:[%s5549_s1 + $0x90] sm:$0xff]  }
  0x70   : > { %1860 = vmatmul.mubr.bf16.vlgmr.msra.gmra.mxu0 %v4778_v26 }
  0x71   : > { %1957 = vmatmul.mubr.bf16.vlgmr.msra.gmra.mxu1 %v4781_v29  ;;  %3702 = vmatpush3.bf16.msra.mxu0 %v4115_v12  ;;  %v3083_v12 = vcombine.high %v227_v30, %v227_v30 }
  0x72   : > { %3766 = vmatpush3.bf16.msra.mxu1 %v4117_v23  ;;  %1867 = vmatprep.mubr.bf16.mxu0 %v4789_v4  ;;  %v228_v23 = vld [vmem:[%s4434_s25 + $0xe8] sm:$0x11] }
  0x73   : > { %1964 = vmatprep.mubr.bf16.mxu1 %v4796_v15  ;;  %3703 = vmatprep.subr.bf16.mxu0 %v4122_v41  ;;  %v3085_v62 = vcombine.high %v228_v23, %v228_v23  ;;  %v4840_v41 = vsel %vm493_vm0, %v620_v27, %v624_v16  ;;  %v706_v52 = vshll.u32 %v3083_v12, 16  ;;  %v4859_v27 = vld [vmem:[%s4434_s25 + $0x118] sm:$0x11]  ;;  %v4139_v16 = vld [vmem:[%s5549_s1 + $0x20] sm:$0xff]   ;;  %v3087_v12 = vcombine.high %v233_v22, %v233_v22 }
  0x74   : > { %3767 = vmatprep.subr.bf16.mxu1 %v4124_v36  ;;  %v4133_v36 = vld [vmem:[%s5549_s1 + $0xa8] sm:$0xff]   ;;  %v3089_v51 = vcombine.high %v4859_v27, %v4859_v27 }
  0x75   : > { %3704 = vmatpush3.bf16.msra.mxu0 %v4123_v18  ;;  %v730_v35 = vshll.u32 %v3085_v62, 16  ;;  %v648_v18 = vrot.slane %v646_v48, 1  ;;  %v708_v61 = vrot.slane %v706_v52, 1  ;;  %v754_v5 = vshll.u32 %v3087_v12, 16 }
  0x76   : > { %3768 = vmatpush3.bf16.msra.mxu1 %v4125_v13  ;;  %3705 = vmatprep.subr.bf16.mxu0 %v4130_v63  ;;  %v4140_v13 = vld [vmem:[%s5549_s1 + $0xe0] sm:$0xff]   ;;  %v3082_v63 = vcombine.low %v227_v30, %v227_v30  ;;  %v3088_v12 = vcombine.low %v4859_v27, %v4859_v27 }
  0x77   : > { %3769 = vmatprep.subr.bf16.mxu1 %v4132_v2  ;;  %v3084_v2 = vcombine.low %v228_v23, %v228_v23  ;;  %v4141_v30 = vld [vmem:[%s5549_s1 + $0xa0] sm:$0xff]   ;;  %v5567_v23 = vshrl.u32 %v4527_v56, 16  ;;  %v732_v62 = vrot.slane %v730_v35, 1  ;;  %v3086_v56 = vcombine.low %v233_v22, %v233_v22  ;;  %v4906_v22 = vld [vmem:[%s4434_s25 + $0x148] sm:$0x11] }
  0x78   : > { %1868 = vmatmul.mubr.bf16.gmra.mxu0 %v4837_v7  ;;  %v4894_v52 = vsel %vm493_vm0, %v644_v42, %v648_v18  ;;  %v4897_v35 = vsel %vm493_vm0, %v668_v43, %v672_v14  ;;  %v778_v18 = vshll.u32 %v3089_v51, 16  ;;  %v4149_v14 = vld [vmem:[%s5549_s1 + $0x98] sm:$0xff]   ;;  %v716_v43 = vor.u32 %v4759_v20, %v5570_v55 }
  0x79   : > { %1965 = vmatmul.mubr.bf16.gmra.mxu1 %v4840_v41  ;;  %1875 = vmatprep.mubr.bf16.mxu0 %v4846_v25  ;;  %v704_v48 = vor.u32 %v4697_v6, %v5567_v23  ;;  %v694_v6 = vshll.u32 %v3082_v63, 16  ;;  %v718_v8 = vshll.u32 %v3084_v2, 16  ;;  %v5569_v2 = vshrl.u32 %v4534_v58, 16 }
  0x7a   : > { %1972 = vmatprep.mubr.bf16.mxu1 %v4849_v32  ;;  %3706 = vmatpush3.bf16.msra.mxu0 %v4131_v19  ;;  %v739_v19 = vrot.slane %v737_v28, 1  ;;  %v4912_v28 = vsel %vm493_vm0, %v728_v11, %v732_v62  ;;  %v759_v58 = vshrl.u32 %v4574_v10, 16  ;;  %v3093_v20 = vcombine.high %v4906_v22, %v4906_v22 }
  0x7b   : > { %3770 = vmatpush3.bf16.msra.mxu1 %v4133_v36  ;;  %3707 = vmatprep.subr.bf16.mxu0 %v4138_v46  ;;  %v761_v36 = vshll.u32 %v4574_v10, 16  ;;  %v4147_v46 = vld [vmem:[%s5549_s1 + $0x18] sm:$0xff]   ;;  %v4909_v63 = vsel %vm493_vm0, %v704_v48, %v708_v61  ;;  %v692_v42 = vor.u32 %v4735_v17, %v5569_v2  ;;  %v4923_v61 = vshll.u32 %v3086_v56, 16  ;;  %v4156_v10 = vld [vmem:[%s5549_s1 + $0xd0] sm:$0xff]  }
  0x7c   : > { %3771 = vmatprep.subr.bf16.mxu1 %v4140_v13  ;;  %v4903_v13 = vld [vmem:[%s4434_s25 + $0x140] sm:$0x11]  ;;  %v797_v17 = vshll.u32 %v4597_v21, 16  ;;  %v696_v27 = vrot.slane %v694_v6, 1  ;;  %v756_v23 = vrot.slane %v754_v5, 1  ;;  %v752_v11 = vor.u32 %v4775_v40, %v5571_v50  ;;  %v4162_v6 = vld [vmem:[%s5549_s1 + $0x48] sm:$0xff]  }
  0x7d   : > { %v3091_v59 = vcombine.high %v4903_v13, %v4903_v13  ;;  %v763_v48 = vrot.slane %v761_v36, 1  ;;  %v5572_v62 = vshrl.u32 %v4560_v3, 16  ;;  %v821_v56 = vshll.u32 %v4602_v24, 16 }
  0x7e   : > { %3708 = vmatpush3.bf16.msra.mxu0 %v4139_v16  ;;  %v4154_v16 = vld [vmem:[%s5549_s1 + $0x50] sm:$0xff]   ;;  %v744_v40 = vrot.slane %v4923_v61, 1  ;;  %v766_v3 = vshll.u32 %v3088_v12, 16  ;;  %v819_v5 = vshrl.u32 %v4602_v24, 16  ;;  %v3090_v61 = vcombine.low %v4903_v13, %v4903_v13  ;;  %v4976_v12 = vld [vmem:[%s4434_s25 + $0x178] sm:$0x11] }
  0x7f   : > { %3772 = vmatpush3.bf16.msra.mxu1 %v4141_v30  ;;  %3709 = vmatprep.subr.bf16.mxu0 %v4146_v53  ;;  %v720_v30 = vrot.slane %v718_v8, 1  ;;  %v776_v51 = vor.u32 %v4834_v49, %v5572_v62  ;;  %v780_v53 = vrot.slane %v778_v18, 1  ;;  %v795_v49 = vshrl.u32 %v4597_v21, 16  ;;  %v4963_v18 = vld [vmem:[%s4434_s25 + $0x170] sm:$0x11] }
  0x80   : > { %3773 = vmatprep.subr.bf16.mxu1 %v4148_v57  ;;  %1876 = vmatmul.mubr.bf16.gmra.mxu0 %v4894_v52  ;;  %v4155_v57 = vld [vmem:[%s5549_s1 + $0x10] sm:$0xff]   ;;  %v799_v8 = vrot.slane %v797_v17, 1  ;;  %v802_v36 = vshll.u32 %v3091_v59, 16  ;;  %v5573_v21 = vshrl.u32 %v4571_v9, 16  ;;  %v823_v59 = vrot.slane %v821_v56, 1  ;;  %v4163_v9 = vld [vmem:[%s5549_s1 + $0x8] sm:$0xff]  }
  0x81   : > { %1973 = vmatmul.mubr.bf16.gmra.mxu1 %v4897_v35  ;;  %1883 = vmatprep.mubr.bf16.mxu0 %v4909_v63  ;;  %v4969_v2 = vsel %vm493_vm0, %v716_v43, %v720_v30  ;;  %v4982_v24 = vsel %vm493_vm0, %v776_v51, %v780_v53  ;;  %v768_v13 = vrot.slane %v766_v3, 1  ;;  %v3092_v43 = vcombine.low %v4906_v22, %v4906_v22  ;;  %v4165_v22 = vld [vmem:[%s5549_s1 + $0x88] sm:$0xff]  }
  0x82   : > { %1980 = vmatprep.mubr.bf16.mxu1 %v4912_v28  ;;  %3710 = vmatpush3.bf16.msra.mxu0 %v4147_v46  ;;  %v826_v46 = vshll.u32 %v3093_v20, 16  ;;  %v740_v55 = vor.u32 %v739_v19, %v5573_v21  ;;  %v4164_v19 = vld [vmem:[%s5549_s1 + $0xc8] sm:$0xff]   ;;  %v809_v17 = vshll.u32 %v4627_v38, 16  ;;  %v3095_v20 = vcombine.high %v4963_v18, %v4963_v18  ;;  %v5024_v21 = vld [vmem:[%s4434_s25 + $0x1a0] sm:$0x11] }
  0x83   : > { %3774 = vmatpush3.bf16.msra.mxu1 %v4149_v14  ;;  %3711 = vmatprep.subr.bf16.mxu0 %v4154_v16  ;;  %v4966_v14 = vsel %vm493_vm0, %v692_v42, %v696_v27  ;;  %v4979_v16 = vsel %vm493_vm0, %v752_v11, %v756_v23  ;;  %v785_v42 = vshll.u32 %v4624_v37, 16  ;;  %v804_v27 = vrot.slane %v802_v36, 1  ;;  %v4171_v36 = vld [vmem:[%s5549_s1] sm:$0xff]  }
  0x84   : > { %3775 = vmatprep.subr.bf16.mxu1 %v4156_v10  ;;  %v783_v30 = vshrl.u32 %v4624_v37, 16  ;;  %v845_v23 = vshll.u32 %v4638_v47, 16  ;;  %v3097_v10 = vcombine.high %v4976_v12, %v4976_v12  ;;  %v764_v50 = vor.u32 %v763_v48, %v759_v58 }
  0x85   : > { %v800_v11 = vor.u32 %v799_v8, %v795_v49  ;;  %v828_v62 = vrot.slane %v826_v46, 1  ;;  %v790_v51 = vshll.u32 %v3090_v61, 16  ;;  %v824_v53 = vor.u32 %v823_v59, %v819_v5  ;;  %v5033_v59 = vld [vmem:[%s4434_s25 + $0x1a8] sm:$0x11] }
  0x86   : > { %3712 = vmatpush3.bf16.msra.mxu0 %v4155_v57  ;;  %v787_v56 = vrot.slane %v785_v42, 1  ;;  %v807_v37 = vshrl.u32 %v4627_v38, 16  ;;  %v869_v57 = vshll.u32 %v4643_v54, 16  ;;  %v811_v3 = vrot.slane %v809_v17, 1 }
  0x87   : > { %3776 = vmatpush3.bf16.msra.mxu1 %v4157_v1  ;;  %3713 = vmatprep.subr.bf16.mxu0 %v4162_v6  ;;  %v4170_v1 = vld [vmem:[%s5549_s1 + $0x40] sm:$0xff]   ;;  %v814_v6 = vshll.u32 %v3092_v43, 16  ;;  %v843_v58 = vshrl.u32 %v4638_v47, 16  ;;  %v850_v48 = vshll.u32 %v3095_v20, 16  ;;  %v847_v49 = vrot.slane %v845_v23, 1 }
  0x88   : > { %1884 = vmatmul.mubr.bf16.gmra.mxu0 %v4966_v14  ;;  %3777 = vmatprep.subr.bf16.mxu1 %v4164_v19  ;;  %v867_v8 = vshrl.u32 %v4643_v54, 16  ;;  %v874_v38 = vshll.u32 %v3097_v10, 16  ;;  %v5018_v5 = vsel %vm493_vm0, %v740_v55, %v744_v40  ;;  %v5021_v46 = vsel %vm493_vm0, %v764_v50, %v768_v13  ;;  %v4172_v40 = vld [vmem:[%s5549_s1 + $0xc0] sm:$0xff]  }
  0x89   : > { %1981 = vmatmul.mubr.bf16.gmra.mxu1 %v4969_v2  ;;  %1891 = vmatprep.mubr.bf16.mxu0 %v4979_v16  ;;  %v5027_v47 = vsel %vm493_vm0, %v800_v11, %v804_v27  ;;  %v5030_v61 = vsel %vm493_vm0, %v824_v53, %v828_v62  ;;  %v871_v54 = vrot.slane %v869_v57, 1  ;;  %v788_v55 = vor.u32 %v787_v56, %v783_v30  ;;  %v4173_v13 = vld [vmem:[%s5549_s1 + $0x80] sm:$0xff]   ;;  %v4180_v53 = vld [vmem:[%s5549_s1 + $0x178] sm:$0xff]  }
  0x8a   : > { %1988 = vmatprep.mubr.bf16.mxu1 %v4982_v24  ;;  %3714 = vmatpush3.bf16.msra.mxu0 %v4163_v9  ;;  %v792_v42 = vrot.slane %v790_v51, 1  ;;  %v3094_v9 = vcombine.low %v4963_v18, %v4963_v18  ;;  %v3096_v19 = vcombine.low %v4976_v12, %v4976_v12  ;;  %v1071_v43 = vshll.u32 %v4719_v44, 16  ;;  %v5574_v27 = vld [vmem:[#allocation2_spill] sm:$0xff]  ;;  %v5575_v12 = vld [vmem:[#allocation3_spill] sm:$0xff] }
  0x8b   : > { %3778 = vmatpush3.bf16.msra.mxu1 %v4165_v22  ;;  %3715 = vmatprep.subr.bf16.mxu0 %v4170_v1  ;;  %v812_v17 = vor.u32 %v811_v3, %v807_v37  ;;  %v816_v20 = vrot.slane %v814_v6, 1  ;;  %v833_v30 = vshll.u32 %v5574_v27, 16  ;;  %v1095_v23 = vshll.u32 %v4722_v31, 16 }
  0x8c   : > { %v852_v18 = vrot.slane %v850_v48, 1  ;;  %v857_v10 = vshll.u32 %v5575_v12, 16  ;;  %v3103_v22 = vcombine.high %v5024_v21, %v5024_v21  ;;  %v848_v50 = vor.u32 %v847_v49, %v843_v58  ;;  %3779 = vmatprep.subr.bf16.mxu1 %v4172_v40  ;;  %v4182_v49 = vld [vmem:[%s5549_s1 + $0x1f8] sm:$0xff]  }
  0x8d   : > { %v872_v11 = vor.u32 %v871_v54, %v867_v8  ;;  %v876_v62 = vrot.slane %v874_v38, 1  ;;  %v3105_v51 = vcombine.high %v5033_v59, %v5033_v59  ;;  %v5061_v56 = vsel %vm493_vm0, %v788_v55, %v792_v42 }
  0x8e   : > { %3716 = vmatpush3.bf16.msra.mxu0 %v4171_v36  ;;  %v831_v37 = vshrl.u32 %v5574_v27, 16  ;;  %v838_v57 = vshll.u32 %v3094_v9, 16  ;;  %v862_v1 = vshll.u32 %v3096_v19, 16  ;;  %v5065_v3 = vsel %vm493_vm0, %v812_v17, %v816_v20 }
  0x8f   : > { %3780 = vmatpush3.bf16.msra.mxu1 %v4173_v13  ;;  %v835_v6 = vrot.slane %v833_v30, 1  ;;  %v855_v58 = vshrl.u32 %v5575_v12, 16  ;;  %v1081_v48 = vshrl.u32 %v4686_v39, 16  ;;  %3829 = vmatprep.subr.bf16.mxu0 %v4180_v53  ;;  %v859_v8 = vrot.slane %v857_v10, 1 }
  0x90   : > { %1892 = vmatmul.mubr.bf16.gmra.mxu0 %v5018_v5  ;;  %v1085_v38 = vrot.slane %v1083_v60, 1  ;;  %v1088_v36 = vshll.u32 %v3103_v22, 16  ;;  %v1105_v54 = vshrl.u32 %v4690_v45, 16  ;;  %v5076_v40 = vsel %vm493_vm0, %v848_v50, %v852_v18  ;;  %3893 = vmatprep.subr.bf16.mxu1 %v4182_v49  ;;  %v4183_v49 = vld [vmem:[%s5549_s1 + $0x1b8] sm:$0xff]  }
  0x91   : > { %1989 = vmatmul.mubr.bf16.gmra.mxu1 %v5021_v46  ;;  %1899 = vmatprep.mubr.bf16.mxu0 %v5027_v47  ;;  %v5079_v55 = vsel %vm493_vm0, %v872_v11, %v876_v62  ;;  %v1109_v42 = vrot.slane %v1107_v0, 1  ;;  %v1112_v9 = vshll.u32 %v3105_v51, 16  ;;  %v840_v19 = vrot.slane %v838_v57, 1 }
  0x92   : > { %1996 = vmatprep.mubr.bf16.mxu1 %v5030_v61  ;;  %v864_v13 = vrot.slane %v862_v1, 1  ;;  %v3102_v39 = vcombine.low %v5024_v21, %v5024_v21  ;;  %v836_v60 = vor.u32 %v835_v6, %v831_v37  ;;  %v860_v17 = vor.u32 %v859_v8, %v855_v58  ;;  %v5104_v37 = vld [vmem:[%s4434_s25 + $0x4] ss:$16 sps:$4 sm:$0xff]   ;;  %v5109_v1 = vld [vmem:[%s4434_s25 + $0xc] ss:$16 sps:$4 sm:$0xff]  }
  0x93   : > { %v3104_v45 = vcombine.low %v5033_v59, %v5033_v59  ;;  %v1086_v0 = vor.u32 %v1085_v38, %v1081_v48  ;;  %v1090_v20 = vrot.slane %v1088_v36, 1  ;;  %v1110_v27 = vor.u32 %v1109_v42, %v1105_v54  ;;  %v5114_v6 = vld [vmem:[%s4434_s25] ss:$16 sps:$4 sm:$0xff]   ;;  %v5117_v58 = vld [vmem:[%s4434_s25 + $0x8] ss:$16 sps:$4 sm:$0xff]  }
  0x94   : > { %v1114_v30 = vrot.slane %v1112_v9, 1  ;;  %v1069_v18 = vshrl.u32 %v4719_v44, 16  ;;  %v1073_v12 = vrot.slane %v1071_v43, 1  ;;  %v1076_v10 = vshll.u32 %v3102_v39, 16  ;;  %v4181_v48 = vld [vmem:[%s5549_s1 + $0x138] sm:$0xff]   ;;  %v4184_v8 = vld [vmem:[%s5549_s1 + $0x170] sm:$0xff]  }
  0x95   : > { %v1093_v21 = vshrl.u32 %v4722_v31, 16  ;;  %v5094_v22 = vsel %vm493_vm0, %v836_v60, %v840_v19  ;;  %v5097_v50 = vsel %vm493_vm0, %v860_v17, %v864_v13  ;;  %v1097_v11 = vrot.slane %v1095_v23, 1  ;;  %v4185_v38 = vld [vmem:[%s5549_s1 + $0x130] sm:$0xff]   ;;  %v4188_v42 = vld [vmem:[%s5549_s1 + $0x168] sm:$0xff]   ;;  %v4192_v17 = vld [vmem:[%s5549_s1 + $0x160] sm:$0xff]  }
  0x96   : > { %v1100_v59 = vshll.u32 %v3104_v45, 16  ;;  %v1091_v62 = vsel %vm493_vm0, %v1086_v0, %v1090_v20  ;;  %v1115_v51 = vsel %vm493_vm0, %v1110_v27, %v1114_v30  ;;  %v1074_v31 = vor.u32 %v1073_v12, %v1069_v18  ;;  %v4186_v36 = vld [vmem:[%s5549_s1 + $0x1f0] sm:$0xff]   ;;  %v4217_v19 = vld [vmem:[%s4434_s25 + $0x3c] ss:$16 sps:$4 sm:$0xff]   ;;  %v4194_v45 = vld [vmem:[%s5549_s1 + $0x1e0] sm:$0xff]  }
  0x97   : > { %v1078_v44 = vrot.slane %v1076_v10, 1  ;;  %v1098_v43 = vor.u32 %v1097_v11, %v1093_v21  ;;  %v4187_v54 = vld [vmem:[%s5549_s1 + $0x1b0] sm:$0xff]   ;;  %v4190_v13 = vld [vmem:[%s5549_s1 + $0x1e8] sm:$0xff]   ;;  %v4193_v18 = vld [vmem:[%s5549_s1 + $0x120] sm:$0xff]  }
  0x98   : > { %1900 = vmatmul.mubr.bf16.gmra.mxu0 %v5061_v56  ;;  %v1102_v53 = vrot.slane %v1100_v59, 1  ;;  %v4216_v9 = vld [vmem:[%s4434_s25 + $0x34] ss:$16 sps:$4 sm:$0xff]   ;;  %v4189_v39 = vld [vmem:[%s5549_s1 + $0x128] sm:$0xff]   ;;  %v4218_v0 = vld [vmem:[%s4434_s25 + $0x30] ss:$16 sps:$4 sm:$0xff]  }
  0x99   : > { %1997 = vmatmul.mubr.bf16.gmra.mxu1 %v5065_v3  ;;  %1907 = vmatprep.mubr.bf16.mxu0 %v5076_v40  ;;  %v1079_v23 = vsel %vm493_vm0, %v1074_v31, %v1078_v44  ;;  %v4191_v60 = vld [vmem:[%s5549_s1 + $0x1a8] sm:$0xff]   ;;  %v4220_v27 = vld [vmem:[%s4434_s25 + $0x64] ss:$16 sps:$4 sm:$0xff]   ;;  %v4196_v10 = vld [vmem:[%s5549_s1 + $0x158] sm:$0xff]  }
  0x9a   : > { %2004 = vmatprep.mubr.bf16.mxu1 %v5079_v55  ;;  %v1103_v57 = vsel %vm493_vm0, %v1098_v43, %v1102_v53  ;;  %v4219_v20 = vld [vmem:[%s4434_s25 + $0x38] ss:$16 sps:$4 sm:$0xff]   ;;  %v4221_v30 = vld [vmem:[%s4434_s25 + $0x6c] ss:$16 sps:$4 sm:$0xff]   ;;  %v4195_v12 = vld [vmem:[%s5549_s1 + $0x1a0] sm:$0xff]  }
  0x9b   : > { %v4198_v21 = vld [vmem:[%s5549_s1 + $0x1d8] sm:$0xff]   ;;  %v4222_v31 = vld [vmem:[%s4434_s25 + $0x60] ss:$16 sps:$4 sm:$0xff]   ;;  %v4224_v43 = vld [vmem:[%s4434_s25 + $0x94] ss:$16 sps:$4 sm:$0xff]  }
  0x9c   : > { %v4197_v11 = vld [vmem:[%s5549_s1 + $0x118] sm:$0xff]  }
  0x9d   : > { %v4199_v59 = vld [vmem:[%s5549_s1 + $0x198] sm:$0xff]  }
  0x9e   : > { %v4223_v44 = vld [vmem:[%s4434_s25 + $0x68] ss:$16 sps:$4 sm:$0xff]   ;;  %v4225_v53 = vld [vmem:[%s4434_s25 + $0x9c] ss:$16 sps:$4 sm:$0xff]  }
  0xa0   : > { %1908 = vmatmul.mubr.bf16.gmra.mxu0 %v5094_v22 }
  0xa1   : > { %2005 = vmatmul.mubr.bf16.gmra.mxu1 %v5097_v50  ;;  %1915 = vmatprep.mubr.bf16.mxu0 %v1091_v62  ;;  %v4200_v62 = vld [vmem:[%s5549_s1 + $0x150] sm:$0xff]  }
  0xa2   : > { %2012 = vmatprep.mubr.bf16.mxu1 %v1115_v51  ;;  %v4202_v51 = vld [vmem:[%s5549_s1 + $0x1d0] sm:$0xff]  }
  0xa8   : > { %1916 = vmatmul.mubr.bf16.gmra.mxu0 %v1079_v23  ;;  %v4201_v23 = vld [vmem:[%s5549_s1 + $0x110] sm:$0xff]  }
  0xa9   : > { %2013 = vmatmul.mubr.bf16.gmra.mxu1 %v1103_v57  ;;  %2437 = vmatprep.mubr.bf16.mxu0 %v5104_v37  ;;  %v4203_v57 = vld [vmem:[%s5549_s1 + $0x190] sm:$0xff]  }
  0xaa   : > { %2534 = vmatprep.mubr.bf16.mxu1 %v5109_v1 }
  0xb0   : > { %2438 = vmatmul.mubr.bf16.vlgmr.msra.gmra.mxu0 %v5114_v6 }
  0xb1   : > { %2535 = vmatmul.mubr.bf16.vlgmr.msra.gmra.mxu1 %v5117_v58  ;;  %3830 = vmatpush3.bf16.msra.mxu0 %v4181_v48  ;;  %v4204_v48 = vld [vmem:[%s5549_s1 + $0x148] sm:$0xff]  }
  0xb2   : > { %3894 = vmatpush3.bf16.msra.mxu1 %v4183_v49  ;;  %2445 = vmatprep.mubr.bf16.mxu0 %v4216_v9  ;;  %v4206_v49 = vld [vmem:[%s5549_s1 + $0x1c8] sm:$0xff]  }
  0xb3   : > { %2542 = vmatprep.mubr.bf16.mxu1 %v4217_v19  ;;  %3831 = vmatprep.subr.bf16.mxu0 %v4184_v8  ;;  %v4205_v8 = vld [vmem:[%s5549_s1 + $0x108] sm:$0xff]   ;;  %v4228_v19 = vld [vmem:[%s4434_s25 + $0xc4] ss:$16 sps:$4 sm:$0xff]  }
  0xb4   : > { %3895 = vmatprep.subr.bf16.mxu1 %v4186_v36  ;;  %v4208_v36 = vld [vmem:[%s5549_s1 + $0x140] sm:$0xff]   ;;  %v4227_v9 = vld [vmem:[%s4434_s25 + $0x98] ss:$16 sps:$4 sm:$0xff]  }
  0xb5   : > { %3832 = vmatpush3.bf16.msra.mxu0 %v4185_v38  ;;  %v4207_v38 = vld [vmem:[%s5549_s1 + $0x188] sm:$0xff]  }
  0xb6   : > { %3896 = vmatpush3.bf16.msra.mxu1 %v4187_v54  ;;  %3833 = vmatprep.subr.bf16.mxu0 %v4188_v42  ;;  %v4210_v54 = vld [vmem:[%s5549_s1 + $0x1c0] sm:$0xff]  }
  0xb7   : > { %3897 = vmatprep.subr.bf16.mxu1 %v4190_v13  ;;  %v4226_v42 = vld [vmem:[%s4434_s25 + $0x90] ss:$16 sps:$4 sm:$0xff]   ;;  %v4229_v13 = vld [vmem:[%s4434_s25 + $0xcc] ss:$16 sps:$4 sm:$0xff]  }
  0xb8   : > { %2446 = vmatmul.mubr.bf16.gmra.mxu0 %v4218_v0  ;;  %v4232_v0 = vld [vmem:[%s4434_s25 + $0xf4] ss:$16 sps:$4 sm:$0xff]  }
  0xb9   : > { %2543 = vmatmul.mubr.bf16.gmra.mxu1 %v4219_v20  ;;  %2453 = vmatprep.mubr.bf16.mxu0 %v4220_v27  ;;  %v4233_v20 = vld [vmem:[%s4434_s25 + $0xfc] ss:$16 sps:$4 sm:$0xff]   ;;  %v203_v27 = vld [vmem:[%s4434_s25 + $0x20] sm:$0x11] }
  0xba   : > { %2550 = vmatprep.mubr.bf16.mxu1 %v4221_v30  ;;  %3834 = vmatpush3.bf16.msra.mxu0 %v4189_v39  ;;  %v4209_v39 = vld [vmem:[%s5549_s1 + $0x100] sm:$0xff]   ;;  %v204_v30 = vld [vmem:[%s4434_s25 + $0x28] sm:$0x11] }
  0xbb   : > { %3898 = vmatpush3.bf16.msra.mxu1 %v4191_v60  ;;  %3835 = vmatprep.subr.bf16.mxu0 %v4192_v17  ;;  %v4211_v60 = vld [vmem:[%s5549_s1 + $0x180] sm:$0xff]  }
  0xbc   : > { %3899 = vmatprep.subr.bf16.mxu1 %v4194_v45  ;;  %v4230_v17 = vld [vmem:[%s4434_s25 + $0xc0] ss:$16 sps:$4 sm:$0xff]   ;;  %v4231_v45 = vld [vmem:[%s4434_s25 + $0xc8] ss:$16 sps:$4 sm:$0xff]  }
  0xbe   : > { %3836 = vmatpush3.bf16.msra.mxu0 %v4193_v18  ;;  %v4234_v18 = vld [vmem:[%s4434_s25 + $0xf0] ss:$16 sps:$4 sm:$0xff]  }
  0xbf   : > { %3900 = vmatpush3.bf16.msra.mxu1 %v4195_v12  ;;  %3837 = vmatprep.subr.bf16.mxu0 %v4196_v10  ;;  %v4235_v12 = vld [vmem:[%s4434_s25 + $0xf8] ss:$16 sps:$4 sm:$0xff]   ;;  %v509_v10 = vshll.u32 %v5104_v37, 16 }
  0xc0   : > { %3901 = vmatprep.subr.bf16.mxu1 %v4198_v21  ;;  %2454 = vmatmul.mubr.bf16.gmra.mxu0 %v4222_v31  ;;  %v4236_v21 = vld [vmem:[%s4434_s25 + $0x124] ss:$16 sps:$4 sm:$0xff]   ;;  %v507_v31 = vshrl.u32 %v5104_v37, 16  ;;  %v3066_v37 = vcombine.low %v203_v27, %v203_v27 }
  0xc1   : > { %2551 = vmatmul.mubr.bf16.gmra.mxu1 %v4223_v44  ;;  %2461 = vmatprep.mubr.bf16.mxu0 %v4224_v43  ;;  %v511_v44 = vrot.slane %v509_v10, 1  ;;  %v4242_v10 = vld [vmem:[%s4434_s25 + $0x150] ss:$16 sps:$4 sm:$0xff]  }
  0xc2   : > { %2558 = vmatprep.mubr.bf16.mxu1 %v4225_v53  ;;  %3838 = vmatpush3.bf16.msra.mxu0 %v4197_v11  ;;  %v4237_v11 = vld [vmem:[%s4434_s25 + $0x12c] ss:$16 sps:$4 sm:$0xff]   ;;  %v531_v53 = vshrl.u32 %v5109_v1, 16 }
  0xc3   : > { %3902 = vmatpush3.bf16.msra.mxu1 %v4199_v59  ;;  %3839 = vmatprep.subr.bf16.mxu0 %v4200_v62  ;;  %v533_v59 = vshll.u32 %v5109_v1, 16  ;;  %v3067_v62 = vcombine.high %v203_v27, %v203_v27  ;;  %v4243_v27 = vld [vmem:[%s4434_s25 + $0x158] ss:$16 sps:$4 sm:$0xff]  }
  0xc4   : > { %3903 = vmatprep.subr.bf16.mxu1 %v4202_v51  ;;  %v3069_v51 = vcombine.high %v204_v30, %v204_v30 }
  0xc5   : > { %v514_v43 = vshll.u32 %v3067_v62, 16 }
  0xc6   : > { %3840 = vmatpush3.bf16.msra.mxu0 %v4201_v23  ;;  %v535_v23 = vrot.slane %v533_v59, 1 }
  0xc7   : > { %3904 = vmatpush3.bf16.msra.mxu1 %v4203_v57  ;;  %3841 = vmatprep.subr.bf16.mxu0 %v4204_v48  ;;  %v538_v57 = vshll.u32 %v3069_v51, 16  ;;  %v4238_v48 = vld [vmem:[%s4434_s25 + $0x120] ss:$16 sps:$4 sm:$0xff]   ;;  %v516_v1 = vrot.slane %v514_v43, 1 }
  0xc8   : > { %3905 = vmatprep.subr.bf16.mxu1 %v4206_v49  ;;  %2462 = vmatmul.mubr.bf16.gmra.mxu0 %v4226_v42  ;;  %v4239_v49 = vld [vmem:[%s4434_s25 + $0x128] ss:$16 sps:$4 sm:$0xff]   ;;  %v3068_v42 = vcombine.low %v204_v30, %v204_v30 }
  0xc9   : > { %2559 = vmatmul.mubr.bf16.gmra.mxu1 %v4227_v9  ;;  %2469 = vmatprep.mubr.bf16.mxu0 %v4228_v19  ;;  %v512_v9 = vor.u32 %v511_v44, %v507_v31  ;;  %v536_v19 = vor.u32 %v535_v23, %v531_v53 }
  0xca   : > { %2566 = vmatprep.mubr.bf16.mxu1 %v4229_v13  ;;  %3842 = vmatpush3.bf16.msra.mxu0 %v4205_v8  ;;  %v497_v8 = vshll.u32 %v5114_v6, 16  ;;  %v540_v13 = vrot.slane %v538_v57, 1 }
  0xcb   : > { %3906 = vmatpush3.bf16.msra.mxu1 %v4207_v38  ;;  %3843 = vmatprep.subr.bf16.mxu0 %v4208_v36  ;;  %v521_v38 = vshll.u32 %v5117_v58, 16  ;;  %v4240_v36 = vld [vmem:[%s4434_s25 + $0x154] ss:$16 sps:$4 sm:$0xff]  }
  0xcc   : > { %3907 = vmatprep.subr.bf16.mxu1 %v4210_v54  ;;  %v4241_v54 = vld [vmem:[%s4434_s25 + $0x15c] ss:$16 sps:$4 sm:$0xff]   ;;  %s3028_s25 = sshll.u32 %s4270_s13, 1 }
  0xcd   : > { %s185_s5 = sadd.s32 %s4266_s12, %s3028_s25 }
  0xce   : > { %3844 = vmatpush3.bf16.msra.mxu0 %v4209_v39  ;;  %v495_v39 = vshrl.u32 %v5114_v6, 16  ;;  %s3029_s6 = sshll.u32 %s185_s5, 4 }
  0xcf   : > { %3908 = vmatpush3.bf16.msra.mxu1 %v4211_v60  ;;  %v519_v60 = vshrl.u32 %v5117_v58, 16  ;;  %p187_p6 = scmp.lt.s32.totalorder %s3029_s6, 63 }
  0xd0   : > { %2470 = vmatmul.mubr.bf16.gmra.mxu0 %v4230_v17  ;;  %v499_v17 = vrot.slane %v497_v8, 1 }
  0xd1   : > { %2567 = vmatmul.mubr.bf16.gmra.mxu1 %v4231_v45  ;;  %2477 = vmatprep.mubr.bf16.mxu0 %v4232_v0  ;;  %v523_v45 = vrot.slane %v521_v38, 1  ;;  %v502_v0 = vshll.u32 %v3066_v37, 16  ;;  %s5589_s6 = smov (!%p187_p6, %s3029_s6), 63 }
  0xd2   : > { %2574 = vmatprep.mubr.bf16.mxu1 %v4233_v20  ;;  %v526_v20 = vshll.u32 %v3068_v42, 16  ;;  %v500_v30 = vor.u32 %v499_v17, %v495_v39  ;;  %s3030_s12 = sshll.u32 %s5589_s6, 2 }
  0xd3   : > { %s5475_s10 = scalar_lea.vmem %s5551_s3, %s3030_s12 }
  0xd4   : > { %v528_v6 = vrot.slane %v526_v20, 1 }
  0xd8   : > { %2478 = vmatmul.mubr.bf16.gmra.mxu0 %v4234_v18  ;;  %v517_v18 = vsel %vm493_vm0, %v512_v9, %v516_v1 }
  0xd9   : > { %2575 = vmatmul.mubr.bf16.gmra.mxu1 %v4235_v12  ;;  %2485 = vmatprep.mubr.bf16.mxu0 %v4236_v21  ;;  %v541_v12 = vsel %vm493_vm0, %v536_v19, %v540_v13  ;;  %v504_v21 = vrot.slane %v502_v0, 1 }
  0xda   : > { %2582 = vmatprep.mubr.bf16.mxu1 %v4237_v11  ;;  %v524_v11 = vor.u32 %v523_v45, %v519_v60 }
  0xdb   : > { %v505_v58 = vsel %vm493_vm0, %v500_v30, %v504_v21 }
  0xdc   : > { %v529_v59 = vsel %vm493_vm0, %v524_v11, %v528_v6 }
  0xe0   : > { %2486 = vmatmul.mubr.bf16.gmra.mxu0 %v4238_v48 }
  0xe1   : > { %2583 = vmatmul.mubr.bf16.gmra.mxu1 %v4239_v49  ;;  %2493 = vmatprep.mubr.bf16.mxu0 %v4240_v36 }
  0xe2   : > { %2590 = vmatprep.mubr.bf16.mxu1 %v4241_v54 }
  0xe8   : > { %2494 = vmatmul.mubr.bf16.gmra.mxu0 %v4242_v10 }
  0xe9   : > { %2591 = vmatmul.mubr.bf16.gmra.mxu1 %v4243_v27  ;;  %2631 = vmatprep.mubr.bf16.mxu0 %v517_v18 }
  0xea   : > { %2728 = vmatprep.mubr.bf16.mxu1 %v541_v12 }
  0xf0   : > { %v3461_v62 = vpop.f32.mrf.mxu0  ;;  %2632 = vmatmul.mubr.bf16.vlgmr.msra.gmra.mxu0 %v505_v58 }
  0xf1   : > { %v3525_v51 = vpop.f32.mrf.mxu1  ;;  %2729 = vmatmul.mubr.bf16.vlgmr.msra.gmra.mxu1 %v529_v59  ;;  %2639 = vmatprep.mubr.bf16.mxu0 %v4750_v33 }
  0xf2   : > { %2736 = vmatprep.mubr.bf16.mxu1 %v4757_v34  ;;  %v3462_v31 = vpop.f32.mrf.mxu0 }
  0xf3   : > { %v3526_v44 = vpop.f32.mrf.mxu1  ;;  %v3463_v43 = vadd.f32 %v3462_v31, %v3461_v62 }
  0xf4   : > { %v3527_v53 = vadd.f32 %v3526_v44, %v3525_v51  ;;  %v3464_v23 = vpop.f32.mrf.mxu0 }
  0xf5   : > { %v3528_v57 = vpop.f32.mrf.mxu1 }
  0xf6   : > { %v5255_v48 = vadd.f32 %v3527_v53, %v3463_v43  ;;  %v3465_v49 = vpop.f32.mrf.mxu0 }
  0xf7   : > { %v3529_v8 = vpop.f32.mrf.mxu1  ;;  %v3466_v38 = vadd.f32 %v3465_v49, %v3464_v23 }
  0xf8   : > { %v3530_v36 = vadd.f32 %v3529_v8, %v3528_v57  ;;  %v3467_v54 = vpop.f32.mrf.mxu0  ;;  %2640 = vmatmul.mubr.bf16.gmra.mxu0 %v4778_v26 }
  0xf9   : > { %v3531_v37 = vpop.f32.mrf.mxu1  ;;  %2737 = vmatmul.mubr.bf16.gmra.mxu1 %v4781_v29  ;;  %2647 = vmatprep.mubr.bf16.mxu0 %v4789_v4 }
  0xfa   : > { %v5259_v33 = vadd.f32 %v3530_v36, %v3466_v38  ;;  %2744 = vmatprep.mubr.bf16.mxu1 %v4796_v15  ;;  %v3468_v34 = vpop.f32.mrf.mxu0 }
  0xfb   : > { %v3532_v42 = vpop.f32.mrf.mxu1  ;;  %v3469_v9 = vadd.f32 %v3468_v34, %v3467_v54 }
  0xfc   : > { %v3533_v1 = vadd.f32 %v3532_v42, %v3531_v37  ;;  %v3470_v19 = vpop.f32.mrf.mxu0 }
  0xfd   : > { %v3534_v13 = vpop.f32.mrf.mxu1 }
  0xfe   : > { %v5263_v39 = vadd.f32 %v3533_v1, %v3469_v9  ;;  %v3471_v60 = vpop.f32.mrf.mxu0 }
  0xff   : > { %v3535_v17 = vpop.f32.mrf.mxu1  ;;  %v3472_v45 = vadd.f32 %v3471_v60, %v3470_v19 }
 0x100   : > { %v3536_v26 = vadd.f32 %v3535_v17, %v3534_v13  ;;  %v3473_v0 = vpop.f32.mrf.mxu0  ;;  %2648 = vmatmul.mubr.bf16.gmra.mxu0 %v4837_v7 }
 0x101   : > { %v3537_v29 = vpop.f32.mrf.mxu1  ;;  %2745 = vmatmul.mubr.bf16.gmra.mxu1 %v4840_v41  ;;  %2655 = vmatprep.mubr.bf16.mxu0 %v4846_v25 }
 0x102   : > { %v5267_v4 = vadd.f32 %v3536_v26, %v3472_v45  ;;  %2752 = vmatprep.mubr.bf16.mxu1 %v4849_v32  ;;  %v3474_v15 = vpop.f32.mrf.mxu0 }
 0x103   : > { %v3538_v20 = vpop.f32.mrf.mxu1  ;;  %v3475_v18 = vadd.f32 %v3474_v15, %v3473_v0 }
 0x104   : > { %v3539_v12 = vadd.f32 %v3538_v20, %v3537_v29  ;;  %v3476_v10 = vpop.f32.mrf.mxu0 }
 0x105   : > { %v3540_v27 = vpop.f32.mrf.mxu1 }
 0x106   : > { %v5271_v30 = vadd.f32 %v3539_v12, %v3475_v18  ;;  %v3477_v21 = vpop.f32.mrf.mxu0 }
 0x107   : > { %v3541_v11 = vpop.f32.mrf.mxu1  ;;  %v3478_v6 = vadd.f32 %v3477_v21, %v3476_v10 }
 0x108   : > { %v3542_v7 = vadd.f32 %v3541_v11, %v3540_v27  ;;  %v3479_v58 = vpop.f32.mrf.mxu0  ;;  %2656 = vmatmul.mubr.bf16.gmra.mxu0 %v4894_v52 }
 0x109   : > { %v3543_v41 = vpop.f32.mrf.mxu1  ;;  %2753 = vmatmul.mubr.bf16.gmra.mxu1 %v4897_v35  ;;  %2663 = vmatprep.mubr.bf16.mxu0 %v4909_v63 }
 0x10a   : > { %v5275_v25 = vadd.f32 %v3542_v7, %v3478_v6  ;;  %2760 = vmatprep.mubr.bf16.mxu1 %v4912_v28  ;;  %v3480_v32 = vpop.f32.mrf.mxu0 }
 0x10b   : > { %v3544_v59 = vpop.f32.mrf.mxu1  ;;  %v3481_v62 = vadd.f32 %v3480_v32, %v3479_v58 }
 0x10c   : > { %v3545_v51 = vadd.f32 %v3544_v59, %v3543_v41  ;;  %v3482_v31 = vpop.f32.mrf.mxu0 }
 0x10d   : > { %v3546_v44 = vpop.f32.mrf.mxu1 }
 0x10e   : > { %v5279_v43 = vadd.f32 %v3545_v51, %v3481_v62  ;;  %v3483_v53 = vpop.f32.mrf.mxu0 }
 0x10f   : > { %v3547_v23 = vpop.f32.mrf.mxu1  ;;  %v3484_v57 = vadd.f32 %v3483_v53, %v3482_v31 }
 0x110   : > { %v3548_v52 = vadd.f32 %v3547_v23, %v3546_v44  ;;  %v3485_v49 = vpop.f32.mrf.mxu0  ;;  %2664 = vmatmul.mubr.bf16.gmra.mxu0 %v4966_v14 }
 0x111   : > { %v3549_v35 = vpop.f32.mrf.mxu1  ;;  %2761 = vmatmul.mubr.bf16.gmra.mxu1 %v4969_v2  ;;  %2671 = vmatprep.mubr.bf16.mxu0 %v4979_v16 }
 0x112   : > { %v5283_v63 = vadd.f32 %v3548_v52, %v3484_v57  ;;  %2768 = vmatprep.mubr.bf16.mxu1 %v4982_v24  ;;  %v3486_v28 = vpop.f32.mrf.mxu0 }
 0x113   : > { %v3550_v8 = vpop.f32.mrf.mxu1  ;;  %v3487_v38 = vadd.f32 %v3486_v28, %v3485_v49 }
 0x114   : > { %v3551_v36 = vadd.f32 %v3550_v8, %v3549_v35  ;;  %v3488_v54 = vpop.f32.mrf.mxu0 }
 0x115   : > { %v3552_v37 = vpop.f32.mrf.mxu1 }
 0x116   : > { %v5287_v34 = vadd.f32 %v3551_v36, %v3487_v38  ;;  %v3489_v42 = vpop.f32.mrf.mxu0 }
 0x117   : > { %v3553_v9 = vpop.f32.mrf.mxu1  ;;  %v3490_v1 = vadd.f32 %v3489_v42, %v3488_v54 }
 0x118   : > { %v3554_v14 = vadd.f32 %v3553_v9, %v3552_v37  ;;  %v3491_v19 = vpop.f32.mrf.mxu0  ;;  %2672 = vmatmul.mubr.bf16.gmra.mxu0 %v5018_v5 }
 0x119   : > { %v3555_v2 = vpop.f32.mrf.mxu1  ;;  %2769 = vmatmul.mubr.bf16.gmra.mxu1 %v5021_v46  ;;  %2679 = vmatprep.mubr.bf16.mxu0 %v5027_v47 }
 0x11a   : > { %v5291_v16 = vadd.f32 %v3554_v14, %v3490_v1  ;;  %2776 = vmatprep.mubr.bf16.mxu1 %v5030_v61  ;;  %v3492_v24 = vpop.f32.mrf.mxu0 }
 0x11b   : > { %v3556_v13 = vpop.f32.mrf.mxu1  ;;  %v3493_v60 = vadd.f32 %v3492_v24, %v3491_v19 }
 0x11c   : > { %v3557_v17 = vadd.f32 %v3556_v13, %v3555_v2  ;;  %v3494_v45 = vpop.f32.mrf.mxu0 }
 0x11d   : > { %v3558_v26 = vpop.f32.mrf.mxu1 }
 0x11e   : > { %v5295_v0 = vadd.f32 %v3557_v17, %v3493_v60  ;;  %v3495_v29 = vpop.f32.mrf.mxu0 }
 0x11f   : > { %v3559_v15 = vpop.f32.mrf.mxu1  ;;  %v3496_v20 = vadd.f32 %v3495_v29, %v3494_v45 }
 0x120   : > { %v3560_v5 = vadd.f32 %v3559_v15, %v3558_v26  ;;  %v3497_v18 = vpop.f32.mrf.mxu0  ;;  %2680 = vmatmul.mubr.bf16.gmra.mxu0 %v5061_v56 }
 0x121   : > { %v3561_v46 = vpop.f32.mrf.mxu1  ;;  %2777 = vmatmul.mubr.bf16.gmra.mxu1 %v5065_v3  ;;  %2687 = vmatprep.mubr.bf16.mxu0 %v5076_v40 }
 0x122   : > { %v5299_v47 = vadd.f32 %v3560_v5, %v3496_v20  ;;  %2784 = vmatprep.mubr.bf16.mxu1 %v5079_v55  ;;  %v3498_v61 = vpop.f32.mrf.mxu0 }
 0x123   : > { %v3562_v12 = vpop.f32.mrf.mxu1  ;;  %v3499_v10 = vadd.f32 %v3498_v61, %v3497_v18 }
 0x124   : > { %v3563_v27 = vadd.f32 %v3562_v12, %v3561_v46  ;;  %v3500_v21 = vpop.f32.mrf.mxu0 }
 0x125   : > { %v3564_v11 = vpop.f32.mrf.mxu1 }
 0x126   : > { %v5303_v6 = vadd.f32 %v3563_v27, %v3499_v10  ;;  %v3501_v7 = vpop.f32.mrf.mxu0 }
 0x127   : > { %v3565_v58 = vpop.f32.mrf.mxu1  ;;  %v3502_v41 = vadd.f32 %v3501_v7, %v3500_v21 }
 0x128   : > { %v3566_v56 = vadd.f32 %v3565_v58, %v3564_v11  ;;  %v3503_v32 = vpop.f32.mrf.mxu0  ;;  %2688 = vmatmul.mubr.bf16.gmra.mxu0 %v5094_v22 }
 0x129   : > { %v3567_v3 = vpop.f32.mrf.mxu1  ;;  %2785 = vmatmul.mubr.bf16.gmra.mxu1 %v5097_v50 }
 0x12a   : > { %v5307_v40 = vadd.f32 %v3566_v56, %v3502_v41  ;;  %v3504_v55 = vpop.f32.mrf.mxu0 }
 0x12b   : > { %v3568_v59 = vpop.f32.mrf.mxu1  ;;  %v3505_v62 = vadd.f32 %v3504_v55, %v3503_v32 }
 0x12c   : > { %v3569_v51 = vadd.f32 %v3568_v59, %v3567_v3  ;;  %v3506_v31 = vpop.f32.mrf.mxu0 }
 0x12d   : > { %v3570_v44 = vpop.f32.mrf.mxu1 }
 0x12e   : > { %v5309_v53 = vadd.f32 %v3569_v51, %v3505_v62  ;;  %v3507_v23 = vpop.f32.mrf.mxu0 }
 0x12f   : > { %v3571_v57 = vpop.f32.mrf.mxu1  ;;  %v3508_v52 = vadd.f32 %v3507_v23, %v3506_v31 }
 0x130   : > { %v3572_v49 = vadd.f32 %v3571_v57, %v3570_v44  ;;  %v3589_v35 = vpop.f32.mrf.mxu0 }
 0x131   : > { %v3653_v28 = vpop.f32.mrf.mxu1 }
 0x132   : > { %v5311_v8 = vadd.f32 %v3572_v49, %v3508_v52  ;;  %v3590_v22 = vpop.f32.mrf.mxu0 }
 0x133   : > { %v3654_v50 = vpop.f32.mrf.mxu1  ;;  %v3591_v38 = vadd.f32 %v3590_v22, %v3589_v35 }
 0x134   : > { %v3655_v36 = vadd.f32 %v3654_v50, %v3653_v28  ;;  %v3592_v54 = vpop.f32.mrf.mxu0 }
 0x135   : > { %v3656_v37 = vpop.f32.mrf.mxu1  ;;  %v1862_v42 = vadd.f32 %v3591_v38, %v5255_v48 }
 0x136   : > { %v3593_v9 = vpop.f32.mrf.mxu0 }
 0x137   : > { %v3657_v1 = vpop.f32.mrf.mxu1  ;;  %v5314_v14 = vadd.f32 %v3655_v36, %v1862_v42  ;;  %v3594_v19 = vadd.f32 %v3593_v9, %v3592_v54 }
 0x138   : > { %v3658_v2 = vadd.f32 %v3657_v1, %v3656_v37  ;;  %v3595_v24 = vpop.f32.mrf.mxu0 }
 0x139   : > { %v3659_v13 = vpop.f32.mrf.mxu1  ;;  %v1865_v60 = vadd.f32 %v3594_v19, %v5259_v33 }
 0x13a   : > { %v3596_v17 = vpop.f32.mrf.mxu0 }
 0x13b   : > { %v3660_v45 = vpop.f32.mrf.mxu1  ;;  %v5317_v26 = vadd.f32 %v3658_v2, %v1865_v60  ;;  %v3597_v29 = vadd.f32 %v3596_v17, %v3595_v24 }
 0x13c   : > { %v3661_v15 = vadd.f32 %v3660_v45, %v3659_v13  ;;  %v3598_v20 = vpop.f32.mrf.mxu0 }
 0x13d   : > { %v3662_v5 = vpop.f32.mrf.mxu1  ;;  %v1870_v48 = vadd.f32 %v3597_v29, %v5263_v39 }
 0x13e   : > { %v3599_v18 = vpop.f32.mrf.mxu0 }
 0x13f   : > { %v3663_v46 = vpop.f32.mrf.mxu1  ;;  %v5320_v61 = vadd.f32 %v3661_v15, %v1870_v48  ;;  %v3600_v12 = vadd.f32 %v3599_v18, %v3598_v20 }
 0x140   : > { %v3664_v10 = vadd.f32 %v3663_v46, %v3662_v5  ;;  %v3601_v27 = vpop.f32.mrf.mxu0 }
 0x141   : > { %v3665_v21 = vpop.f32.mrf.mxu1  ;;  %v1873_v33 = vadd.f32 %v3600_v12, %v5267_v4 }
 0x142   : > { %v3602_v11 = vpop.f32.mrf.mxu0 }
 0x143   : > { %v3666_v7 = vpop.f32.mrf.mxu1  ;;  %v5323_v58 = vadd.f32 %v3664_v10, %v1873_v33  ;;  %v3603_v41 = vadd.f32 %v3602_v11, %v3601_v27 }
 0x144   : > { %v3667_v56 = vadd.f32 %v3666_v7, %v3665_v21  ;;  %v3604_v32 = vpop.f32.mrf.mxu0 }
 0x145   : > { %v3668_v3 = vpop.f32.mrf.mxu1  ;;  %v1878_v39 = vadd.f32 %v3603_v41, %v5271_v30 }
 0x146   : > { %v3605_v55 = vpop.f32.mrf.mxu0 }
 0x147   : > { %v3669_v59 = vpop.f32.mrf.mxu1  ;;  %v5326_v62 = vadd.f32 %v3667_v56, %v1878_v39  ;;  %v3606_v51 = vadd.f32 %v3605_v55, %v3604_v32 }
 0x148   : > { %v3670_v31 = vadd.f32 %v3669_v59, %v3668_v3  ;;  %v3607_v44 = vpop.f32.mrf.mxu0 }
 0x149   : > { %v3671_v23 = vpop.f32.mrf.mxu1  ;;  %v1881_v4 = vadd.f32 %v3606_v51, %v5275_v25 }
 0x14a   : > { %v3608_v57 = vpop.f32.mrf.mxu0 }
 0x14b   : > { %v3672_v52 = vpop.f32.mrf.mxu1  ;;  %v5329_v49 = vadd.f32 %v3670_v31, %v1881_v4  ;;  %v3609_v35 = vadd.f32 %v3608_v57, %v3607_v44 }
 0x14c   : > { %v3673_v28 = vadd.f32 %v3672_v52, %v3671_v23  ;;  %v3610_v22 = vpop.f32.mrf.mxu0 }
 0x14d   : > { %v3674_v50 = vpop.f32.mrf.mxu1  ;;  %v1886_v30 = vadd.f32 %v3609_v35, %v5279_v43 }
 0x14e   : > { %v3611_v38 = vpop.f32.mrf.mxu0 }
 0x14f   : > { %v3675_v36 = vpop.f32.mrf.mxu1  ;;  %v5332_v54 = vadd.f32 %v3673_v28, %v1886_v30  ;;  %v3612_v37 = vadd.f32 %v3611_v38, %v3610_v22 }
 0x150   : > { %v3676_v42 = vadd.f32 %v3675_v36, %v3674_v50  ;;  %v3613_v9 = vpop.f32.mrf.mxu0 }
 0x151   : > { %v3677_v1 = vpop.f32.mrf.mxu1  ;;  %v1889_v25 = vadd.f32 %v3612_v37, %v5283_v63 }
 0x152   : > { %v3614_v19 = vpop.f32.mrf.mxu0 }
 0x153   : > { %v3678_v2 = vpop.f32.mrf.mxu1  ;;  %v5335_v24 = vadd.f32 %v3676_v42, %v1889_v25  ;;  %v3615_v13 = vadd.f32 %v3614_v19, %v3613_v9 }
 0x154   : > { %v3679_v60 = vadd.f32 %v3678_v2, %v3677_v1  ;;  %v3616_v17 = vpop.f32.mrf.mxu0 }
 0x155   : > { %v3680_v45 = vpop.f32.mrf.mxu1  ;;  %v1894_v43 = vadd.f32 %v3615_v13, %v5287_v34 }
 0x156   : > { %v3617_v29 = vpop.f32.mrf.mxu0 }
 0x157   : > { %v3681_v15 = vpop.f32.mrf.mxu1  ;;  %v5338_v20 = vadd.f32 %v3679_v60, %v1894_v43  ;;  %v3618_v5 = vadd.f32 %v3617_v29, %v3616_v17 }
 0x158   : > { %v3682_v48 = vadd.f32 %v3681_v15, %v3680_v45  ;;  %v3619_v18 = vpop.f32.mrf.mxu0 }
 0x159   : > { %v3683_v46 = vpop.f32.mrf.mxu1  ;;  %v1897_v63 = vadd.f32 %v3618_v5, %v5291_v16 }
 0x15a   : > { %v3620_v12 = vpop.f32.mrf.mxu0 }
 0x15b   : > { %v3684_v10 = vpop.f32.mrf.mxu1  ;;  %v5341_v27 = vadd.f32 %v3682_v48, %v1897_v63  ;;  %v3621_v21 = vadd.f32 %v3620_v12, %v3619_v18 }
 0x15c   : > { %v3685_v33 = vadd.f32 %v3684_v10, %v3683_v46  ;;  %v3622_v11 = vpop.f32.mrf.mxu0 }
 0x15d   : > { %v3686_v7 = vpop.f32.mrf.mxu1  ;;  %v1902_v34 = vadd.f32 %v3621_v21, %v5295_v0 }
 0x15e   : > { %v3623_v41 = vpop.f32.mrf.mxu0 }
 0x15f   : > { %v3687_v56 = vpop.f32.mrf.mxu1  ;;  %v5344_v32 = vadd.f32 %v3685_v33, %v1902_v34  ;;  %v3624_v3 = vadd.f32 %v3623_v41, %v3622_v11 }
 0x160   : > { %v3688_v39 = vadd.f32 %v3687_v56, %v3686_v7  ;;  %v3625_v55 = vpop.f32.mrf.mxu0 }
 0x161   : > { %v3689_v59 = vpop.f32.mrf.mxu1  ;;  %v1905_v16 = vadd.f32 %v3624_v3, %v5299_v47 }
 0x162   : > { %v3626_v51 = vpop.f32.mrf.mxu0 }
 0x163   : > { %v3690_v31 = vpop.f32.mrf.mxu1  ;;  %v5347_v44 = vadd.f32 %v3688_v39, %v1905_v16  ;;  %v3627_v23 = vadd.f32 %v3626_v51, %v3625_v55 }
 0x164   : > { %v3691_v4 = vadd.f32 %v3690_v31, %v3689_v59  ;;  %v3628_v57 = vpop.f32.mrf.mxu0 }
 0x165   : > { %v3692_v52 = vpop.f32.mrf.mxu1  ;;  %v1910_v0 = vadd.f32 %v3627_v23, %v5303_v6 }
 0x166   : > { %v3629_v35 = vpop.f32.mrf.mxu0 }
 0x167   : > { %v3693_v28 = vpop.f32.mrf.mxu1  ;;  %v5350_v22 = vadd.f32 %v3691_v4, %v1910_v0  ;;  %v3630_v50 = vadd.f32 %v3629_v35, %v3628_v57 }
 0x168   : > { %v3694_v30 = vadd.f32 %v3693_v28, %v3692_v52  ;;  %v3631_v38 = vpop.f32.mrf.mxu0 }
 0x169   : > { %v3695_v36 = vpop.f32.mrf.mxu1  ;;  %v1913_v47 = vadd.f32 %v3630_v50, %v5307_v40 }
 0x16a   : > { %v3632_v37 = vpop.f32.mrf.mxu0 }
 0x16b   : > { %v3696_v42 = vpop.f32.mrf.mxu1  ;;  %v5353_v9 = vadd.f32 %v3694_v30, %v1913_v47  ;;  %v3633_v1 = vadd.f32 %v3632_v37, %v3631_v38 }
 0x16c   : > { %v3697_v25 = vadd.f32 %v3696_v42, %v3695_v36  ;;  %v3634_v19 = vpop.f32.mrf.mxu0 }
 0x16d   : > { %v3698_v2 = vpop.f32.mrf.mxu1  ;;  %v1918_v6 = vadd.f32 %v3633_v1, %v5309_v53 }
 0x16e   : > { %v3635_v13 = vpop.f32.mrf.mxu0 }
 0x16f   : > { %v3699_v60 = vpop.f32.mrf.mxu1  ;;  %v5356_v17 = vadd.f32 %v3697_v25, %v1918_v6  ;;  %v3636_v45 = vadd.f32 %v3635_v13, %v3634_v19 }
 0x170   : > { %v3700_v43 = vadd.f32 %v3699_v60, %v3698_v2  ;;  %v3717_v29 = vpop.f32.mrf.mxu0 }
 0x171   : > { %v3781_v15 = vpop.f32.mrf.mxu1  ;;  %v1921_v40 = vadd.f32 %v3636_v45, %v5311_v8 }
 0x172   : > { %v3718_v5 = vpop.f32.mrf.mxu0 }
 0x173   : > { %v3782_v48 = vpop.f32.mrf.mxu1  ;;  %v5359_v18 = vadd.f32 %v3700_v43, %v1921_v40  ;;  %v3719_v46 = vadd.f32 %v3718_v5, %v3717_v29 }
 0x174   : > { %v3783_v63 = vadd.f32 %v3782_v48, %v3781_v15  ;;  %v5361_v12 = vpop.f32.mrf.mxu0 }
 0x175   : > { %v5363_v10 = vpop.f32.mrf.mxu1  ;;  %v2440_v53 = vadd.f32 %v3719_v46, %v5314_v14 }
 0x176   : > { %v5366_v21 = vpop.f32.mrf.mxu0 }
 0x177   : > { %v5368_v33 = vpop.f32.mrf.mxu1  ;;  %v5370_v11 = vadd.f32 %v3783_v63, %v2440_v53 }
 0x178   : > { %v3723_v7 = vpop.f32.mrf.mxu0 }
 0x179   : > { %v3787_v8 = vpop.f32.mrf.mxu1 }
 0x17a   : > { %v3724_v34 = vpop.f32.mrf.mxu0 }
 0x17b   : > { %v3788_v41 = vpop.f32.mrf.mxu1  ;;  %v3725_v56 = vadd.f32 %v3724_v34, %v3723_v7 }
 0x17c   : > { %v3789_v3 = vadd.f32 %v3788_v41, %v3787_v8  ;;  %v5372_v39 = vpop.f32.mrf.mxu0 }
 0x17d   : > { %v5374_v55 = vpop.f32.mrf.mxu1  ;;  %v2448_v59 = vadd.f32 %v3725_v56, %v5320_v61 }
 0x17e   : > { %v5377_v16 = vpop.f32.mrf.mxu0 }
 0x17f   : > { %v5379_v14 = vpop.f32.mrf.mxu1  ;;  %v5381_v51 = vadd.f32 %v3789_v3, %v2448_v59 }
 0x180   : > { %v3729_v31 = vpop.f32.mrf.mxu0 }
 0x181   : > { %v3793_v23 = vpop.f32.mrf.mxu1 }
 0x182   : > { %v3730_v4 = vpop.f32.mrf.mxu0 }
 0x183   : > { %v3794_v57 = vpop.f32.mrf.mxu1  ;;  %v3731_v52 = vadd.f32 %v3730_v4, %v3729_v31 }
 0x184   : > { %v3795_v0 = vadd.f32 %v3794_v57, %v3793_v23  ;;  %v5383_v35 = vpop.f32.mrf.mxu0 }
 0x185   : > { %v5385_v28 = vpop.f32.mrf.mxu1  ;;  %v2456_v50 = vadd.f32 %v3731_v52, %v5326_v62 }
 0x186   : > { %v5388_v30 = vpop.f32.mrf.mxu0 }
 0x187   : > { %v5390_v61 = vpop.f32.mrf.mxu1  ;;  %v5392_v38 = vadd.f32 %v3795_v0, %v2456_v50 }
 0x188   : > { %v3735_v36 = vpop.f32.mrf.mxu0 }
 0x189   : > { %v3799_v47 = vpop.f32.mrf.mxu1 }
 0x18a   : > { %v3736_v37 = vpop.f32.mrf.mxu0 }
 0x18b   : > { %v3800_v42 = vpop.f32.mrf.mxu1  ;;  %v3737_v1 = vadd.f32 %v3736_v37, %v3735_v36 }
 0x18c   : > { %v3801_v25 = vadd.f32 %v3800_v42, %v3799_v47  ;;  %v5394_v19 = vpop.f32.mrf.mxu0 }
 0x18d   : > { %v5396_v2 = vpop.f32.mrf.mxu1  ;;  %v2464_v6 = vadd.f32 %v3737_v1, %v5332_v54 }
 0x18e   : > { %v5399_v13 = vpop.f32.mrf.mxu0 }
 0x18f   : > { %v5401_v62 = vpop.f32.mrf.mxu1  ;;  %v5403_v60 = vadd.f32 %v3801_v25, %v2464_v6 }
 0x190   : > { %v3741_v45 = vpop.f32.mrf.mxu0 }
 0x191   : > { %v3805_v43 = vpop.f32.mrf.mxu1 }
 0x192   : > { %v3742_v29 = vpop.f32.mrf.mxu0 }
 0x193   : > { %v3806_v15 = vpop.f32.mrf.mxu1  ;;  %v3743_v40 = vadd.f32 %v3742_v29, %v3741_v45 }
 0x194   : > { %v3807_v5 = vadd.f32 %v3806_v15, %v3805_v43  ;;  %v5405_v48 = vpop.f32.mrf.mxu0 }
 0x195   : > { %v5407_v46 = vpop.f32.mrf.mxu1  ;;  %v2472_v63 = vadd.f32 %v3743_v40, %v5338_v20 }
 0x196   : > { %v5410_v53 = vpop.f32.mrf.mxu0 }
 0x197   : > { %v5412_v54 = vpop.f32.mrf.mxu1  ;;  %v5414_v7 = vadd.f32 %v3807_v5, %v2472_v63 }
 0x198   : > { %v3747_v8 = vpop.f32.mrf.mxu0 }
 0x199   : > { %v3811_v34 = vpop.f32.mrf.mxu1 }
 0x19a   : > { %v3748_v41 = vpop.f32.mrf.mxu0 }
 0x19b   : > { %v3812_v56 = vpop.f32.mrf.mxu1  ;;  %v3749_v3 = vadd.f32 %v3748_v41, %v3747_v8 }
 0x19c   : > { %v3813_v59 = vadd.f32 %v3812_v56, %v3811_v34  ;;  %v5416_v31 = vpop.f32.mrf.mxu0 }
 0x19d   : > { %v5418_v23 = vpop.f32.mrf.mxu1  ;;  %v2480_v4 = vadd.f32 %v3749_v3, %v5344_v32 }
 0x19e   : > { %v5421_v57 = vpop.f32.mrf.mxu0 }
 0x19f   : > { %v5423_v20 = vpop.f32.mrf.mxu1  ;;  %v5425_v52 = vadd.f32 %v3813_v59, %v2480_v4  ;;  %v3722_v59 = vadd.f32 %v5366_v21, %v5361_v12  ;;  %v3728_v12 = vadd.f32 %v5377_v16, %v5372_v39  ;;  %v5462_v21 = vld [vmem:[%s5550_s2] ss:$0 sm:$0xff] }
 0x1a0   : > { %v3753_v0 = vpop.f32.mrf.mxu0 }
 0x1a1   : > { %v3817_v50 = vpop.f32.mrf.mxu1 }
 0x1a2   : > { %v3754_v36 = vpop.f32.mrf.mxu0 }
 0x1a3   : > { %v3818_v47 = vpop.f32.mrf.mxu1  ;;  %v3755_v37 = vadd.f32 %v3754_v36, %v3753_v0 }
 0x1a4   : > { %v3819_v42 = vadd.f32 %v3818_v47, %v3817_v50  ;;  %v5427_v1 = vpop.f32.mrf.mxu0 }
 0x1a5   : > { %v5429_v25 = vpop.f32.mrf.mxu1  ;;  %v2488_v6 = vadd.f32 %v3755_v37, %v5350_v22  ;;  %v2443_v37 = vadd.f32 %v3722_v59, %v5317_v26 }
 0x1a6   : > { %v5432_v32 = vpop.f32.mrf.mxu0 }
 0x1a7   : > { %v5434_v45 = vpop.f32.mrf.mxu1  ;;  %v5436_v43 = vadd.f32 %v3819_v42, %v2488_v6 }
 0x1a8   : > { %v3759_v29 = vpop.f32.mrf.mxu0 }
 0x1a9   : > { %v3823_v15 = vpop.f32.mrf.mxu1 }
 0x1aa   : > { %v3760_v40 = vpop.f32.mrf.mxu0 }
 0x1ab   : > { %v3824_v5 = vpop.f32.mrf.mxu1  ;;  %v3761_v63 = vadd.f32 %v3760_v40, %v3759_v29  ;;  %v3786_v29 = vadd.f32 %v5368_v33, %v5363_v10 }
 0x1ac   : > { %v3825_v8 = vadd.f32 %v3824_v5, %v3823_v15  ;;  %v5438_v34 = vpop.f32.mrf.mxu0 }
 0x1ad   : > { %v5440_v41 = vpop.f32.mrf.mxu1  ;;  %v2496_v56 = vadd.f32 %v3761_v63, %v5356_v17  ;;  %v2540_v63 = vadd.f32 %v3786_v29, %v2443_v37 }
 0x1ae   : > { %v5444_v22 = vpop.f32.mrf.mxu0 }
 0x1af   : > { %v5446_v3 = vpop.f32.mrf.mxu1  ;;  %v5450_v4 = vadd.f32 %v3825_v8, %v2496_v56 }
 0x1b0   : > { %v3845_v0 = vpop.f32.mrf.mxu0 }
 0x1b1   : > { %5576 = vst [vmem:[#allocation2_spill] sm:$0xff] %v5450_v4  ;;  %v3909_v50 = vpop.f32.mrf.mxu1 }
 0x1b2   : > { %v3846_v36 = vpop.f32.mrf.mxu0 }
 0x1b3   : > { %v3910_v47 = vpop.f32.mrf.mxu1  ;;  %v3847_v42 = vadd.f32 %v3846_v36, %v3845_v0 }
 0x1b4   : > { %v3848_v17 = vpop.f32.mrf.mxu0  ;;  %v3911_v40 = vadd.f32 %v3910_v47, %v3909_v50  ;;  %v2451_v50 = vadd.f32 %v3728_v12, %v5323_v58  ;;  %v3734_v58 = vadd.f32 %v5388_v30, %v5383_v35 }
 0x1b5   : > { %v3912_v6 = vpop.f32.mrf.mxu1  ;;  %v2634_v15 = vadd.f32 %v3847_v42, %v5370_v11  ;;  %v3792_v42 = vadd.f32 %v5379_v14, %v5374_v55 }
 0x1b6   : > { %v3849_v5 = vpop.f32.mrf.mxu0 }
 0x1b7   : > { %v3913_v26 = vpop.f32.mrf.mxu1  ;;  %v2731_v8 = vadd.f32 %v3911_v40, %v2634_v15  ;;  %v3850_v56 = vadd.f32 %v3849_v5, %v3848_v17 }
 0x1b8   : > { %v3851_v59 = vpop.f32.mrf.mxu0  ;;  %v3914_v11 = vadd.f32 %v3913_v26, %v3912_v6  ;;  %v2548_v6 = vadd.f32 %v3792_v42, %v2451_v50 }
 0x1b9   : > { %v3915_v0 = vpop.f32.mrf.mxu1  ;;  %v2800_v10 = vadd.f32 %v5462_v21, %v2731_v8  ;;  %v2637_v33 = vadd.f32 %v3850_v56, %v2540_v63 }
 0x1ba   : > { %v3852_v39 = vpop.f32.mrf.mxu0 }
 0x1bb   : > { %v3916_v16 = vpop.f32.mrf.mxu1  ;;  %v2734_v36 = vadd.f32 %v3914_v11, %v2637_v33  ;;  %v3853_v47 = vadd.f32 %v3852_v39, %v3851_v59  ;;  %v2832_v4 = vmul.f32 0.1, %v2800_v10  ;;  %vm2816_vm1 = vcmp.gt.f32.partialorder %v2800_v10, 0.0 }
 0x1bc   : > { %v3854_v37 = vpop.f32.mrf.mxu0  ;;  %v3917_v40 = vadd.f32 %v3916_v16, %v3915_v0  ;;  %v2459_v0 = vadd.f32 %v3734_v58, %v5329_v49  ;;  %v3740_v49 = vadd.f32 %v5399_v13, %v5394_v19 }
 0x1bd   : > { %v3918_v29 = vpop.f32.mrf.mxu1  ;;  %v2801_v17 = vadd.f32 %v5462_v21, %v2734_v36  ;;  %v2642_v15 = vadd.f32 %v3853_v47, %v5381_v51  ;;  %v2848_v14 = vsel %vm2816_vm1, %v2800_v10, %v2832_v4  ;;  %v3798_v10 = vadd.f32 %v5390_v61, %v5385_v28 }
 0x1be   : > { %v3855_v12 = vpop.f32.mrf.mxu0 }
 0x1bf   : > { %v3919_v5 = vpop.f32.mrf.mxu1  ;;  %vm2817_vm2 = vcmp.gt.f32.partialorder %v2801_v17, 0.0  ;;  %v2833_v26 = vmul.f32 0.1, %v2801_v17  ;;  %v2739_v63 = vadd.f32 %v3917_v40, %v2642_v15  ;;  %v3856_v55 = vadd.f32 %v3855_v12, %v3854_v37 }
 0x1c0   : > { %v3857_v8 = vpop.f32.mrf.mxu0  ;;  %v3920_v30 = vadd.f32 %v3919_v5, %v3918_v29 }
 0x1c1   : > { %v3921_v56 = vpop.f32.mrf.mxu1  ;;  %v2849_v51 = vsel %vm2817_vm2, %v2801_v17, %v2833_v26  ;;  %v2802_v59 = vadd.f32 %v5462_v21, %v2739_v63  ;;  %v2645_v35 = vadd.f32 %v3856_v55, %v2548_v6  ;;  %v2556_v17 = vadd.f32 %v3798_v10, %v2459_v0 }
 0x1c2   : > { %v3401_v33 = vpack.c.bf16 %v2849_v51, %v2848_v14  ;;  %v3858_v11 = vpop.f32.mrf.mxu0  ;;  %v2467_v14 = vadd.f32 %v3740_v49, %v5335_v24  ;;  %v3746_v24 = vadd.f32 %v5410_v53, %v5405_v48 }
 0x1c3   : > { %v3922_v50 = vpop.f32.mrf.mxu1  ;;  %v2742_v39 = vadd.f32 %v3920_v30, %v2645_v35  ;;  %v3859_v4 = vadd.f32 %v3858_v11, %v3857_v8  ;;  %v2834_v16 = vmul.f32 0.1, %v2802_v59  ;;  %vm2818_vm3 = vcmp.gt.f32.partialorder %v2802_v59, 0.0 }
 0x1c4   : > { %3402 = vst [vmem:[%s5475_s10] sm:$0xff] %v3401_v33   ;;  %v3860_v36 = vpop.f32.mrf.mxu0  ;;  %v3923_v29 = vadd.f32 %v3922_v50, %v3921_v56  ;;  %v3804_v35 = vadd.f32 %v5401_v62, %v5396_v2  ;;  %v2475_v49 = vadd.f32 %v3746_v24, %v5341_v27  ;;  %v3752_v27 = vadd.f32 %v5421_v57, %v5416_v31 }
 0x1c5   : > { %v3924_v47 = vpop.f32.mrf.mxu1  ;;  %v2803_v42 = vadd.f32 %v5462_v21, %v2742_v39  ;;  %v2650_v37 = vadd.f32 %v3859_v4, %v5392_v38  ;;  %v2850_v61 = vsel %vm2818_vm3, %v2802_v59, %v2834_v16 }
 0x1c6   : > { %v3861_v15 = vpop.f32.mrf.mxu0  ;;  %v2564_v39 = vadd.f32 %v3804_v35, %v2467_v14 }
 0x1c7   : > { %v3925_v40 = vpop.f32.mrf.mxu1  ;;  %vm2819_vm4 = vcmp.gt.f32.partialorder %v2803_v42, 0.0  ;;  %v2835_v6 = vmul.f32 0.1, %v2803_v42  ;;  %v2747_v58 = vadd.f32 %v3923_v29, %v2650_v37  ;;  %v3862_v28 = vadd.f32 %v3861_v15, %v3860_v36 }
 0x1c8   : > { %v3863_v12 = vpop.f32.mrf.mxu0  ;;  %v3926_v38 = vadd.f32 %v3925_v40, %v3924_v47 }
 0x1c9   : > { %v3927_v5 = vpop.f32.mrf.mxu1  ;;  %v2851_v26 = vsel %vm2819_vm4, %v2803_v42, %v2835_v6  ;;  %v2804_v63 = vadd.f32 %v5462_v21, %v2747_v58  ;;  %v2653_v55 = vadd.f32 %v3862_v28, %v2556_v17  ;;  %v3810_v58 = vadd.f32 %v5412_v54, %v5407_v46 }
 0x1ca   : > { %v3406_v8 = vpack.c.bf16 %v2851_v26, %v2850_v61  ;;  %v3864_v56 = vpop.f32.mrf.mxu0 }
 0x1cb   : > { %v3928_v19 = vpop.f32.mrf.mxu1  ;;  %v2750_v13 = vadd.f32 %v3926_v38, %v2653_v55  ;;  %v3865_v51 = vadd.f32 %v3864_v56, %v3863_v12  ;;  %v2836_v30 = vmul.f32 0.1, %v2804_v63  ;;  %vm2820_vm5 = vcmp.gt.f32.partialorder %v2804_v63, 0.0 }
 0x1cc   : > { %3438 = vst [vmem:[%s5475_s10 + $0x8] sm:$0xff] %v3406_v8   ;;  %v3866_v59 = vpop.f32.mrf.mxu0  ;;  %v3929_v50 = vadd.f32 %v3928_v19, %v3927_v5  ;;  %v2572_v55 = vadd.f32 %v3810_v58, %v2475_v49  ;;  %v3822_v58 = vadd.f32 %v5434_v45, %v5429_v25 }
 0x1cd   : > { %v3930_v0 = vpop.f32.mrf.mxu1  ;;  %v2805_v33 = vadd.f32 %v5462_v21, %v2750_v13  ;;  %v2658_v11 = vadd.f32 %v3865_v51, %v5403_v60  ;;  %v2852_v62 = vsel %vm2820_vm5, %v2804_v63, %v2836_v30 }
 0x1ce   : > { %v3867_v4 = vpop.f32.mrf.mxu0 }
 0x1cf   : > { %v3931_v10 = vpop.f32.mrf.mxu1  ;;  %vm2821_vm6 = vcmp.gt.f32.partialorder %v2805_v33, 0.0  ;;  %v2837_v16 = vmul.f32 0.1, %v2805_v33  ;;  %v2755_v36 = vadd.f32 %v3929_v50, %v2658_v11  ;;  %v3868_v2 = vadd.f32 %v3867_v4, %v3866_v59 }
 0x1d0   : > { %v3869_v47 = vpop.f32.mrf.mxu0  ;;  %v3932_v60 = vadd.f32 %v3931_v10, %v3930_v0  ;;  %v2483_v59 = vadd.f32 %v3752_v27, %v5347_v44  ;;  %v3816_v50 = vadd.f32 %v5423_v20, %v5418_v23  ;;  %v3758_v44 = vadd.f32 %v5432_v32, %v5427_v1 }
 0x1d1   : > { %v3933_v42 = vpop.f32.mrf.mxu1  ;;  %v2853_v37 = vsel %vm2821_vm6, %v2805_v33, %v2837_v16  ;;  %v2806_v29 = vadd.f32 %v5462_v21, %v2755_v36  ;;  %v2661_v17 = vadd.f32 %v3868_v2, %v2564_v39 }
 0x1d2   : > { %v3411_v15 = vpack.c.bf16 %v2853_v37, %v2852_v62  ;;  %v3870_v40 = vpop.f32.mrf.mxu0  ;;  %v2580_v2 = vadd.f32 %v3816_v50, %v2483_v59  ;;  %v3828_v59 = vadd.f32 %v5446_v3, %v5440_v41 }
 0x1d3   : > { %v3934_v48 = vpop.f32.mrf.mxu1  ;;  %v2758_v53 = vadd.f32 %v3932_v60, %v2661_v17  ;;  %v3871_v6 = vadd.f32 %v3870_v40, %v3869_v47  ;;  %v2838_v28 = vmul.f32 0.1, %v2806_v29  ;;  %vm2822_vm7 = vcmp.gt.f32.partialorder %v2806_v29, 0.0 }
 0x1d4   : > { %3439 = vst [vmem:[%s5475_s10 + $0x10] sm:$0xff] %v3411_v15   ;;  %v3872_v61 = vpop.f32.mrf.mxu0  ;;  %v3935_v63 = vadd.f32 %v3934_v48, %v3933_v42  ;;  %v2491_v40 = vadd.f32 %v3758_v44, %v5353_v9  ;;  %v3764_v9 = vadd.f32 %v5444_v22, %v5438_v34 }
 0x1d5   : > { %v3936_v12 = vpop.f32.mrf.mxu1  ;;  %v2807_v5 = vadd.f32 %v5462_v21, %v2758_v53  ;;  %v2666_v26 = vadd.f32 %v3871_v6, %v5414_v7  ;;  %v2854_v54 = vsel %vm2822_vm7, %v2806_v29, %v2838_v28 }
 0x1d6   : > { %v3873_v38 = vpop.f32.mrf.mxu0 }
 0x1d7   : > { %v3937_v14 = vpop.f32.mrf.mxu1  ;;  %vm2823_vm8 = vcmp.gt.f32.partialorder %v2807_v5, 0.0  ;;  %v2839_v8 = vmul.f32 0.1, %v2807_v5  ;;  %v2763_v56 = vadd.f32 %v3935_v63, %v2666_v26  ;;  %v3874_v46 = vadd.f32 %v3873_v38, %v3872_v61 }
 0x1d8   : > { %v3875_v19 = vpop.f32.mrf.mxu0  ;;  %v3938_v7 = vadd.f32 %v3937_v14, %v3936_v12 }
 0x1d9   : > { %v3939_v13 = vpop.f32.mrf.mxu1  ;;  %v2855_v51 = vsel %vm2823_vm8, %v2807_v5, %v2839_v8  ;;  %v2808_v35 = vadd.f32 %v5462_v21, %v2763_v56  ;;  %v2669_v30 = vadd.f32 %v3874_v46, %v2572_v55  ;;  %v2588_v55 = vadd.f32 %v3822_v58, %v2491_v40 }
 0x1da   : > { %v3416_v0 = vpack.c.bf16 %v2855_v51, %v2854_v54  ;;  %v3876_v33 = vpop.f32.mrf.mxu0  ;;  %v2499_v51 = vadd.f32 %v3764_v9, %v5359_v18 }
 0x1db   : > { %v3940_v31 = vpop.f32.mrf.mxu1  ;;  %v2766_v57 = vadd.f32 %v3938_v7, %v2669_v30  ;;  %v3877_v11 = vadd.f32 %v3876_v33, %v3875_v19  ;;  %v2840_v39 = vmul.f32 0.1, %v2808_v35  ;;  %vm2824_vm9 = vcmp.gt.f32.partialorder %v2808_v35, 0.0 }
 0x1dc   : > { %3440 = vst [vmem:[%s5475_s10 + $0x18] sm:$0xff] %v3416_v0   ;;  %v3878_v24 = vpop.f32.mrf.mxu0  ;;  %v3941_v36 = vadd.f32 %v3940_v31, %v3939_v13  ;;  %v2596_v18 = vadd.f32 %v3828_v59, %v2499_v51 }
 0x1dd   : > { %v3942_v4 = vpop.f32.mrf.mxu1  ;;  %v2809_v10 = vadd.f32 %v5462_v21, %v2766_v57  ;;  %v2674_v16 = vadd.f32 %v3877_v11, %v5425_v52  ;;  %v2856_v20 = vsel %vm2824_vm9, %v2808_v35, %v2840_v39  ;;  %v5577_v11 = vld [vmem:[#allocation2_spill] sm:$0xff] }
 0x1de   : > { %v3879_v62 = vpop.f32.mrf.mxu0 }
 0x1df   : > { %v3943_v47 = vpop.f32.mrf.mxu1  ;;  %vm2825_vm10 = vcmp.gt.f32.partialorder %v2809_v10, 0.0  ;;  %v2841_v42 = vmul.f32 0.1, %v2809_v10  ;;  %v2771_v37 = vadd.f32 %v3941_v36, %v2674_v16  ;;  %v3880_v23 = vadd.f32 %v3879_v62, %v3878_v24 }
 0x1e0   : > { %v3881_v29 = vpop.f32.mrf.mxu0  ;;  %v3944_v52 = vadd.f32 %v3943_v47, %v3942_v4 }
 0x1e1   : > { %v3945_v17 = vpop.f32.mrf.mxu1  ;;  %v2857_v60 = vsel %vm2825_vm10, %v2809_v10, %v2841_v42  ;;  %v2810_v49 = vadd.f32 %v5462_v21, %v2771_v37  ;;  %v2677_v15 = vadd.f32 %v3880_v23, %v2580_v2 }
 0x1e2   : > { %v3421_v48 = vpack.c.bf16 %v2857_v60, %v2856_v20  ;;  %v3882_v53 = vpop.f32.mrf.mxu0 }
 0x1e3   : > { %v3946_v1 = vpop.f32.mrf.mxu1  ;;  %v2774_v32 = vadd.f32 %v3944_v52, %v2677_v15  ;;  %v3883_v6 = vadd.f32 %v3882_v53, %v3881_v29  ;;  %v2842_v28 = vmul.f32 0.1, %v2810_v49  ;;  %vm2826_vm11 = vcmp.gt.f32.partialorder %v2810_v49, 0.0 }
 0x1e4   : > { %3441 = vst [vmem:[%s5475_s10 + $0x20] sm:$0xff] %v3421_v48   ;;  %v3884_v61 = vpop.f32.mrf.mxu0  ;;  %v3947_v63 = vadd.f32 %v3946_v1, %v3945_v17 }
 0x1e5   : > { %v3948_v12 = vpop.f32.mrf.mxu1  ;;  %v2811_v5 = vadd.f32 %v5462_v21, %v2774_v32  ;;  %v2682_v26 = vadd.f32 %v3883_v6, %v5436_v43  ;;  %v2858_v45 = vsel %vm2826_vm11, %v2810_v49, %v2842_v28 }
 0x1e6   : > { %v3885_v27 = vpop.f32.mrf.mxu0 }
 0x1e7   : > { %v3949_v38 = vpop.f32.mrf.mxu1  ;;  %vm2827_vm12 = vcmp.gt.f32.partialorder %v2811_v5, 0.0  ;;  %v2843_v14 = vmul.f32 0.1, %v2811_v5  ;;  %v2779_v8 = vadd.f32 %v3947_v63, %v2682_v26  ;;  %v3886_v25 = vadd.f32 %v3885_v27, %v3884_v61 }
 0x1e8   : > { %v3887_v56 = vpop.f32.mrf.mxu0  ;;  %v3950_v43 = vadd.f32 %v3949_v38, %v3948_v12 }
 0x1e9   : > { %v3951_v46 = vpop.f32.mrf.mxu1  ;;  %v2859_v54 = vsel %vm2827_vm12, %v2811_v5, %v2843_v14  ;;  %v2812_v19 = vadd.f32 %v5462_v21, %v2779_v8  ;;  %v2685_v13 = vadd.f32 %v3886_v25, %v2588_v55 }
 0x1ea   : > { %v3426_v35 = vpack.c.bf16 %v2859_v54, %v2858_v45  ;;  %v3888_v30 = vpop.f32.mrf.mxu0 }
 0x1eb   : > { %v3952_v34 = vpop.f32.mrf.mxu1  ;;  %v2782_v22 = vadd.f32 %v3950_v43, %v2685_v13  ;;  %v3889_v7 = vadd.f32 %v3888_v30, %v3887_v56  ;;  %v2844_v0 = vmul.f32 0.1, %v2812_v19  ;;  %vm2828_vm13 = vcmp.gt.f32.partialorder %v2812_v19, 0.0 }
 0x1ec   : > { %3442 = vst [vmem:[%s5475_s10 + $0x28] sm:$0xff] %v3426_v35   ;;  %v3890_v33 = vpop.f32.mrf.mxu0  ;;  %v3953_v39 = vadd.f32 %v3952_v34, %v3951_v46 }
 0x1ed   : > { %v3954_v31 = vpop.f32.mrf.mxu1  ;;  %v2813_v57 = vadd.f32 %v5462_v21, %v2782_v22  ;;  %v2690_v50 = vadd.f32 %v3889_v7, %v5577_v11  ;;  %v2860_v2 = vsel %vm2828_vm13, %v2812_v19, %v2844_v0 }
 0x1ee   : > { %v3891_v24 = vpop.f32.mrf.mxu0 }
 0x1ef   : > { %v3955_v4 = vpop.f32.mrf.mxu1  ;;  %vm2829_vm14 = vcmp.gt.f32.partialorder %v2813_v57, 0.0  ;;  %v2845_v10 = vmul.f32 0.1, %v2813_v57  ;;  %v2787_v16 = vadd.f32 %v3953_v39, %v2690_v50  ;;  %v3892_v36 = vadd.f32 %v3891_v24, %v3890_v33 }
 0x1f0   : > { %v3956_v62 = vadd.f32 %v3955_v4, %v3954_v31 }
 0x1f1   : > { %v2861_v41 = vsel %vm2829_vm14, %v2813_v57, %v2845_v10  ;;  %v2814_v3 = vadd.f32 %v5462_v21, %v2787_v16  ;;  %v2693_v44 = vadd.f32 %v3892_v36, %v2596_v18 }
 0x1f2   : > { %v3431_v47 = vpack.c.bf16 %v2861_v41, %v2860_v2 }
 0x1f3   : > { %v2790_v42 = vadd.f32 %v3956_v62, %v2693_v44  ;;  %v2846_v37 = vmul.f32 0.1, %v2814_v3  ;;  %vm2830_vm15 = vcmp.gt.f32.partialorder %v2814_v3, 0.0 }
 0x1f4   : > { %3443 = vst [vmem:[%s5475_s10 + $0x30] sm:$0xff] %v3431_v47  }
 0x1f5   : > { %v2815_v23 = vadd.f32 %v5462_v21, %v2790_v42  ;;  %v2862_v29 = vsel %vm2830_vm15, %v2814_v3, %v2846_v37 }
 0x1f7   : > { %vm2831_vm0 = vcmp.gt.f32.partialorder %v2815_v23, 0.0  ;;  %v2847_v20 = vmul.f32 0.1, %v2815_v23 }
 0x1f9   : > { %v2863_v17 = vsel %vm2831_vm0, %v2815_v23, %v2847_v20 }
 0x1fa   : > { %v3436_v60 = vpack.c.bf16 %v2863_v17, %v2862_v29 }
 0x1fc   : > { %3444 = vst [vmem:[%s5475_s10 + $0x38] sm:$0xff] %v3436_v60  }
 0x1fd PF: > { %s13_s16 = sadd.s32 1, %s4282_s16   ;;  %s5578_s12 = smov %s4274_s14 }
 0x1fe   : > { %p10_p7 = scmp.ge.s32.totalorder %s13_s16, 6   ;;  %s5579_s13 = smov %s4278_s15 }
 0x1ff   : > { %s5580_s14 = smov %s5583_s17  ;;  %s5581_s15 = smov %s5587_s18 }
 0x200   :  { %12 = sbr.rel (!%p10_p7) target bundleno = 3 (0x3), region = 64 }

// kernel: darknet_forward.15
= control target key start
LH: loop header
LB: loop body
LE: loop exit
PB: predicated region body
PF: predicated region fallthrough
CT: control target
= control target key end

     0   :  { %s2880_s15 = smov 0   ;;  %s2882_s16 = smov 0   ;;  %s3548_s0 = inlined_call_operand.vmem [shape: bf16[2,18,18,128], index: 0, kind: input, shape index: {}]   ;;  %s3549_s1 = inlined_call_operand.vmem [shape: bf16[3,384,128], index: 1, kind: input, shape index: {}]   ;;  %s3550_s2 = inlined_call_operand.vmem [shape: f32[1,128], index: 2, kind: input, shape index: {}]   ;;  %s3551_s3 = inlined_call_operand.vmem [shape: bf16[512,128], index: 3, kind: input, shape index: {}]   ;;  %s3552_s4 = inlined_call_operand.vmem [shape: bf16[512,128], index: 4, kind: output, shape index: {}]  }
   0x1   :  { %s2884_s17 = smov 0   ;;  %s2886_s18 = smov 0  }
   0x2   :  { %s2888_s19 = smov 0  }
   0x3 LB: > { %s23_s20 = sadd.s32 1, %s2845_s17  ;;  %s26_s21 = sadd.s32 1, %s2849_s18  ;;  %s2853_s19 = sphi %s2888_s19, %s14_s19   ;;  %s2849_s18 = sphi %s2886_s18, %s3556_s18   ;;  %s2845_s17 = sphi %s2884_s17, %s3555_s17   ;;  %s2841_s16 = sphi %s2882_s16, %s3554_s16   ;;  %s2837_s15 = sphi %s2880_s15, %s3553_s15  }
   0x4   : > { %p24_p0 = scmp.ge.s32.totalorder %s23_s20, 2  ;;  %p2025_p1 = scmp.ge.s32.totalorder %s2853_s19, 1 }
   0x5   : > { %p197_p2 = scmp.lt.s32.totalorder %s2853_s19, 5 }
   0x6   : > { %s3558_s20 = smov (%p24_p0, %s23_s20), 0  ;;  %s3560_s21 = smov (!%p24_p0, %s26_s21), %s2849_s18 }
   0x7   : > { %p198_p3 = pnand %p2025_p1, %p197_p2  ;;  %p28_p4 = scmp.ge.s32.totalorder %s3560_s21, 2 }
   0x8   : > { %p232_p5 = scmp.lt.s32.totalorder (!%p198_p3), %s2841_s16, 1  ;;  %s2243_s13 = smul.u32 (!%p198_p3), 96, %s2837_s15 }
   0x9   : > { %s3562_s21 = smov (%p28_p4, %s3560_s21), 0  ;;  %201 = sbr.rel (%p198_p3) target bundleno = 415 (0x19f), region = 36 }
   0xe   : > { %v2723_v0 = vld [vmem:[%s3549_s1 + $0x138] sm:$0xff]   ;;  %v2726_v3 = vld [vmem:[%s3549_s1 + $0x130] sm:$0xff]   ;;  %v2729_v6 = vld [vmem:[%s3549_s1 + $0x128] sm:$0xff]   ;;  %s233_s27 = scalar_select %p232_p5, %s2841_s16, 1  ;;  %vm469_vm0 = vcmask 1046528  }
   0xf   : > { %v2724_v1 = vld [vmem:[%s3549_s1 + $0x178] sm:$0xff]   ;;  %2346 = vmatprep.subr.bf16.mxu0 %v2723_v0  ;;  %v2727_v4 = vld [vmem:[%s3549_s1 + $0x170] sm:$0xff]   ;;  %v2730_v7 = vld [vmem:[%s3549_s1 + $0x168] sm:$0xff]   ;;  %vm364_vm1 = vsmask.f32 7424 }
  0x10   : > { %v2725_v2 = vld [vmem:[%s3549_s1 + $0xf8] sm:$0xff]   ;;  %2586 = vmatprep.subr.bf16.mxu1 %v2724_v1  ;;  %v2728_v5 = vld [vmem:[%s3549_s1 + $0xf0] sm:$0xff]   ;;  %v2731_v8 = vld [vmem:[%s3549_s1 + $0xe8] sm:$0xff]   ;;  %s2682_s8 = smul.u32 216, %s233_s27 }
  0x11   : > { %2347 = vmatpush3.bf16.msra.mxu0 %v2725_v2  ;;  %2587 = vmatpush3.bf16.msra.mxu1 %v2724_v1  ;;  %v2732_v9 = vld [vmem:[%s3549_s1 + $0x120] sm:$0xff]   ;;  %v2735_v12 = vld [vmem:[%s3549_s1 + $0x118] sm:$0xff]   ;;  %v2738_v15 = vld [vmem:[%s3549_s1 + $0x110] sm:$0xff]  }
  0x12   : > { %2348 = vmatprep.subr.bf16.mxu0 %v2726_v3  ;;  %2588 = vmatprep.subr.bf16.mxu1 %v2727_v4  ;;  %v2733_v10 = vld [vmem:[%s3549_s1 + $0x160] sm:$0xff]   ;;  %v2736_v13 = vld [vmem:[%s3549_s1 + $0x158] sm:$0xff]   ;;  %v2739_v16 = vld [vmem:[%s3549_s1 + $0x150] sm:$0xff]   ;;  %s236_s25 = scalar_lea.vmem %s3548_s0, %s2682_s8 }
  0x13   : > { %v2734_v11 = vld [vmem:[%s3549_s1 + $0xe0] sm:$0xff]   ;;  %v2737_v14 = vld [vmem:[%s3549_s1 + $0xd8] sm:$0xff]   ;;  %v2740_v17 = vld [vmem:[%s3549_s1 + $0xd0] sm:$0xff]   ;;  %s2983_s6 = scalar_lea.vmem %s236_s25, %s2243_s13 }
  0x14   : > { %v2741_v18 = vld [vmem:[%s3549_s1 + $0x108] sm:$0xff]   ;;  %v2744_v21 = vld [vmem:[%s3549_s1 + $0x100] sm:$0xff]   ;;  %v2748_v24 = vld [vmem:[%s2983_s6 + $0x14] ss:$0 sps:$4 sm:$0x11]  }
  0x15   : > { %2349 = vmatpush3.bf16.msra.mxu0 %v2728_v5  ;;  %2589 = vmatpush3.bf16.msra.mxu1 %v2727_v4  ;;  %v2742_v19 = vld [vmem:[%s3549_s1 + $0x148] sm:$0xff]   ;;  %v2745_v22 = vld [vmem:[%s3549_s1 + $0x140] sm:$0xff]   ;;  %v385_v28 = vshll.u32 %v2748_v24, 16  ;;  %v3002_v30 = vld [vmem:[%s2983_s6 + $0x18] sm:$0xff]   ;;  %v474_v32 = vrot.slane %v2748_v24, 1 }
  0x16   : > { %2350 = vmatprep.subr.bf16.mxu0 %v2729_v6  ;;  %2590 = vmatprep.subr.bf16.mxu1 %v2730_v7  ;;  %v2743_v20 = vld [vmem:[%s3549_s1 + $0xc8] sm:$0xff]   ;;  %v2746_v25 = vld [vmem:[%s3549_s1 + $0xc0] sm:$0xff]   ;;  %v2751_v31 = vld [vmem:[%s3549_s1 + $0x78] sm:$0xff]   ;;  %v476_v36 = vrot.slane %v3002_v30, 1  ;;  %v390_v45 = vshrl.u32 %v3002_v30, 16  ;;  %v392_v46 = vshll.u32 %v3002_v30, 16 }
  0x17   : > { %v2992_v23 = vld [vmem:[%s2983_s6 + $0xc] sm:$0xff]   ;;  %v2750_v33 = vld [vmem:[%s2983_s6 + $0x20] ss:$0 sps:$4 sm:$0x11]   ;;  %v387_v35 = vrot.slane %v385_v28, 1  ;;  %v2752_v37 = vld [vmem:[%s3549_s1 + $0xb8] sm:$0xff]  }
  0x18   : > { %v378_v26 = vshrl.u32 %v2992_v23, 16  ;;  %v380_v27 = vshll.u32 %v2992_v23, 16  ;;  %v473_v29 = vrot.slane %v2992_v23, 1  ;;  %v477_v39 = vrot.slane %v2750_v33, 1  ;;  %v2753_v40 = vld [vmem:[%s3549_s1 + $0x38] sm:$0xff]   ;;  %v2754_v43 = vld [vmem:[%s3549_s1 + $0x70] sm:$0xff]  }
  0x19   : > { %2351 = vmatpush3.bf16.msra.mxu0 %v2731_v8  ;;  %2591 = vmatpush3.bf16.msra.mxu1 %v2730_v7  ;;  %v397_v47 = vshll.u32 %v2750_v33, 16  ;;  %v3031_v48 = vld [vmem:[%s2983_s6 + $0x24] sm:$0xff]   ;;  %v2755_v49 = vld [vmem:[%s3549_s1 + $0x30] sm:$0xff]   ;;  %v394_v50 = vrot.slane %v392_v46, 1  ;;  %v3075_v7 = vld [vmem:[%s2983_s6 + $0x3c] sm:$0xff]  }
  0x1a   : > { %2352 = vmatprep.subr.bf16.mxu0 %v2732_v9  ;;  %2592 = vmatprep.subr.bf16.mxu1 %v2733_v10  ;;  %v382_v34 = vrot.slane %v380_v27, 1  ;;  %v3013_v38 = vsel %vm469_vm0, %v473_v29, %v474_v32  ;;  %v3020_v42 = vsel %vm469_vm0, %v476_v36, %v477_v39  ;;  %v2757_v52 = vld [vmem:[%s2983_s6 + $0x2c] ss:$0 sps:$4 sm:$0x11]   ;;  %v479_v53 = vrot.slane %v3031_v48, 1  ;;  %v3042_v56 = vld [vmem:[%s2983_s6 + $0x30] sm:$0xff]  }
  0x1b   : > { %2602 = vmatprep.mubr.bf16.mxu1 %v3013_v38  ;;  %v399_v51 = vrot.slane %v397_v47, 1  ;;  %v395_v54 = vor.u32 %v394_v50, %v390_v45  ;;  %v480_v55 = vrot.slane %v2757_v52, 1  ;;  %v2759_v57 = vld [vmem:[%s2983_s6 + $0x38] ss:$0 sps:$4 sm:$0x11]   ;;  %v2760_v58 = vld [vmem:[%s3549_s1 + $0x68] sm:$0xff]  }
  0x1c   : > { %v383_v41 = vor.u32 %v382_v34, %v378_v26  ;;  %v482_v61 = vrot.slane %v3042_v56, 1  ;;  %v483_v62 = vrot.slane %v2759_v57, 1  ;;  %v2761_v63 = vld [vmem:[%s3549_s1 + $0xb0] sm:$0xff]   ;;  %v2762_v0 = vld [vmem:[%s3549_s1 + $0x28] sm:$0xff]   ;;  %v2763_v2 = vld [vmem:[%s3549_s1 + $0x60] sm:$0xff]   ;;  %v402_v3 = vshrl.u32 %v3031_v48, 16 }
  0x1d   : > { %2353 = vmatpush3.bf16.msra.mxu0 %v2734_v11  ;;  %2593 = vmatpush3.bf16.msra.mxu1 %v2733_v10  ;;  %v3049_v59 = vsel %vm364_vm1, %v395_v54, %v399_v51  ;;  %v3052_v60 = vsel %vm469_vm0, %v479_v53, %v480_v55  ;;  %v2764_v4 = vld [vmem:[%s3549_s1 + $0x20] sm:$0xff]   ;;  %v404_v5 = vshll.u32 %v3031_v48, 16  ;;  %v409_v6 = vshll.u32 %v2757_v52, 16  ;;  %v2773_v27 = vld [vmem:[%s3549_s1 + $0x10] sm:$0xff]   ;;  %v2780_v50 = vld [vmem:[%s3549_s1 + $0x8] sm:$0xff]  }
  0x1e   : > { %2354 = vmatprep.subr.bf16.mxu0 %v2735_v12  ;;  %2594 = vmatprep.subr.bf16.mxu1 %v2736_v13  ;;  %v3026_v44 = vsel %vm364_vm1, %v383_v41, %v387_v35  ;;  %v3064_v1 = vsel %vm469_vm0, %v482_v61, %v483_v62  ;;  %v3080_v10 = vld [vmem:[%s2983_s6 + $0x44] ss:$0 sps:$4 sm:$0x11]   ;;  %v485_v11 = vrot.slane %v3075_v7, 1  ;;  %v414_v26 = vshrl.u32 %v3042_v56, 16  ;;  %v2778_v41 = vld [vmem:[%s3549_s1 + $0x48] sm:$0xff]  }
  0x1f   : > { %801 = vmatprep.mubr.bf16.mxu0 %v3026_v44  ;;  %v406_v8 = vrot.slane %v404_v5, 1  ;;  %v411_v9 = vrot.slane %v409_v6, 1  ;;  %v416_v28 = vshll.u32 %v3042_v56, 16  ;;  %v421_v29 = vshll.u32 %v2759_v57, 16  ;;  %v3131_v39 = vld [vmem:[%s2983_s6 + $0x60] sm:$0xff]  }
  0x20   : > { %v3126_v34 = vld [vmem:[%s2983_s6 + $0x5c] ss:$0 sps:$4 sm:$0x11]   ;;  %v572_v46 = vrot.slane %v3131_v39, 1  ;;  %v2781_v52 = vld [vmem:[%s3549_s1 + $0x40] sm:$0xff]   ;;  %v426_v53 = vshrl.u32 %v3075_v7, 16 }
  0x21   : > { %2355 = vmatpush3.bf16.msra.mxu0 %v2737_v14  ;;  %2595 = vmatpush3.bf16.msra.mxu1 %v2736_v13  ;;  %v407_v12 = vor.u32 %v406_v8, %v402_v3  ;;  %v486_v13 = vrot.slane %v3080_v10, 1  ;;  %v3085_v14 = vld [vmem:[%s2983_s6 + $0x48] sm:$0xff]   ;;  %v418_v32 = vrot.slane %v416_v28, 1  ;;  %v423_v33 = vrot.slane %v421_v29, 1  ;;  %v2782_v54 = vld [vmem:[%s3549_s1] sm:$0xff]   ;;  %v2785_v3 = vld [vmem:[%s3549_s1 + $0x98] sm:$0xff]  }
  0x22   : > { %2356 = vmatprep.subr.bf16.mxu0 %v2738_v15  ;;  %2596 = vmatprep.subr.bf16.mxu1 %v2739_v16  ;;  %v3088_v15 = vld [vmem:[%s2983_s6 + $0x50] ss:$0 sps:$4 sm:$0x11]   ;;  %v428_v55 = vshll.u32 %v3075_v7, 16  ;;  %v433_v57 = vshll.u32 %v3080_v10, 16  ;;  %v438_v6 = vshrl.u32 %v3085_v14, 16 }
  0x23   : > { %v419_v36 = vor.u32 %v418_v32, %v414_v26  ;;  %v440_v8 = vshll.u32 %v3085_v14, 16 }
  0x24   : > { %v430_v61 = vrot.slane %v428_v55, 1  ;;  %v435_v62 = vrot.slane %v433_v57, 1 }
  0x25   : > { %2357 = vmatpush3.bf16.msra.mxu0 %v2740_v17  ;;  %2597 = vmatpush3.bf16.msra.mxu1 %v2739_v16  ;;  %v2769_v16 = vld [vmem:[%s3549_s1 + $0x58] sm:$0xff]   ;;  %v3094_v17 = vsel %vm364_vm1, %v407_v12, %v411_v9  ;;  %v2786_v9 = vld [vmem:[%s3549_s1 + $0x90] sm:$0xff]  }
  0x26   : > { %2358 = vmatprep.subr.bf16.mxu0 %v2741_v18  ;;  %2598 = vmatprep.subr.bf16.mxu1 %v2742_v19  ;;  %v3097_v18 = vsel %vm469_vm0, %v485_v11, %v486_v13  ;;  %v445_v11 = vshll.u32 %v3088_v15, 16 }
  0x29   : > { %2359 = vmatpush3.bf16.msra.mxu0 %v2743_v20  ;;  %2599 = vmatpush3.bf16.msra.mxu1 %v2742_v19  ;;  %v488_v19 = vrot.slane %v3085_v14, 1  ;;  %v489_v20 = vrot.slane %v3088_v15, 1 }
  0x2a   : > { %2360 = vmatprep.subr.bf16.mxu0 %v2744_v21  ;;  %2600 = vmatprep.subr.bf16.mxu1 %v2745_v22  ;;  %v2770_v21 = vld [vmem:[%s3549_s1 + $0xa8] sm:$0xff]  }
  0x2b   : > { %v3110_v24 = vsel %vm469_vm0, %v488_v19, %v489_v20  ;;  %v442_v20 = vrot.slane %v440_v8, 1  ;;  %v2801_v8 = vld [vmem:[%s3549_s1 + $0x1d8] sm:$0xff]  }
  0x2d   : > { %2361 = vmatpush3.bf16.msra.mxu0 %v2746_v25  ;;  %2601 = vmatpush3.bf16.msra.mxu1 %v2745_v22  ;;  %v2771_v22 = vld [vmem:[%s3549_s1 + $0x18] sm:$0xff]   ;;  %v2772_v25 = vld [vmem:[%s3549_s1 + $0x50] sm:$0xff]   ;;  %v443_v15 = vor.u32 %v442_v20, %v438_v6  ;;  %v2799_v6 = vld [vmem:[%s3549_s1 + $0x1a0] sm:$0xff]  }
  0x2e   : > { %2426 = vmatprep.subr.bf16.mxu1 %v2751_v31  ;;  %2618 = vmatprep.subr.bf16.mxu0 %v2752_v37  ;;  %v3123_v31 = vld [vmem:[%s2983_s6 + $0x54] sm:$0xff]   ;;  %v2811_v20 = vld [vmem:[%s3549_s1 + $0x180] sm:$0xff]  }
  0x2f   : > { %v491_v35 = vrot.slane %v3123_v31, 1  ;;  %v450_v12 = vshrl.u32 %v3123_v31, 16  ;;  %v452_v13 = vshll.u32 %v3123_v31, 16 }
  0x30   : > { %802 = vmatmul.mubr.bf16.vlgmr.msra.gmra.mxu0 %v2992_v23  ;;  %2603 = vmatmul.mubr.bf16.vlgmr.msra.gmra.mxu1 %v3020_v42 }
  0x31   : > { %2427 = vmatpush3.bf16.msra.mxu1 %v2753_v40  ;;  %2619 = vmatpush3.bf16.msra.mxu0 %v2752_v37  ;;  %v492_v37 = vrot.slane %v3126_v34, 1  ;;  %v3134_v40 = vld [vmem:[%s2983_s6 + $0x68] ss:$0 sps:$4 sm:$0x11]   ;;  %v454_v26 = vrot.slane %v452_v13, 1 }
  0x32   : > { %2428 = vmatprep.subr.bf16.mxu1 %v2754_v43  ;;  %809 = vmatprep.mubr.bf16.mxu0 %v3049_v59  ;;  %v3140_v43 = vsel %vm364_vm1, %v419_v36, %v423_v33  ;;  %v573_v47 = vrot.slane %v3134_v40, 1  ;;  %v2791_v36 = vld [vmem:[%s3549_s1 + $0x238] sm:$0xff]   ;;  %v2808_v13 = vld [vmem:[%s3549_s1 + $0x188] sm:$0xff]  }
  0x33   : > { %2606 = vmatprep.mubr.bf16.mxu1 %v3052_v60  ;;  %2620 = vmatprep.subr.bf16.mxu0 %v2761_v63  ;;  %v3143_v45 = vsel %vm469_vm0, %v491_v35, %v492_v37  ;;  %v455_v32 = vor.u32 %v454_v26, %v450_v12  ;;  %v2788_v35 = vld [vmem:[%s3549_s1 + $0x80] sm:$0xff]   ;;  %v560_v37 = vshrl.u32 %v3131_v39, 16  ;;  %v2807_v12 = vld [vmem:[%s3549_s1 + $0x1c8] sm:$0xff]  }
  0x34   : > { %v3157_v51 = vsel %vm469_vm0, %v572_v46, %v573_v47 }
  0x35   : > { %2429 = vmatpush3.bf16.msra.mxu1 %v2755_v49  ;;  %2621 = vmatpush3.bf16.msra.mxu0 %v2761_v63  ;;  %v2779_v49 = vld [vmem:[%s3549_s1 + $0xa0] sm:$0xff]   ;;  %v3173_v63 = vld [vmem:[%s2983_s6 + $0x8] ss:$0 sps:$4 sm:$0x11]  }
  0x36   : > { %2430 = vmatprep.subr.bf16.mxu1 %v2760_v58  ;;  %2622 = vmatprep.subr.bf16.mxu0 %v2770_v21  ;;  %v3170_v58 = vld [vmem:[%s2983_s6] sm:$0xff]   ;;  %v373_v5 = vshll.u32 %v3173_v63, 16  ;;  %v471_v57 = vrot.slane %v3173_v63, 1  ;;  %v2790_v63 = vld [vmem:[%s3549_s1 + $0x1b8] sm:$0xff]  }
  0x37   : > { %v470_v55 = vrot.slane %v3170_v58, 1 }
  0x38   : > { %810 = vmatmul.mubr.bf16.gmra.mxu0 %v3002_v30  ;;  %2607 = vmatmul.mubr.bf16.gmra.mxu1 %v3064_v1  ;;  %v375_v19 = vrot.slane %v373_v5, 1  ;;  %v2798_v5 = vld [vmem:[%s3549_s1 + $0x1e0] sm:$0xff]  }
  0x39   : > { %2431 = vmatpush3.bf16.msra.mxu1 %v2762_v0  ;;  %817 = vmatprep.mubr.bf16.mxu0 %v3094_v17  ;;  %v366_v0 = vshrl.u32 %v3170_v58, 16 }
  0x3a   : > { %2432 = vmatprep.subr.bf16.mxu1 %v2763_v2  ;;  %2610 = vmatprep.mubr.bf16.mxu1 %v3097_v18  ;;  %v368_v2 = vshll.u32 %v3170_v58, 16 }
  0x3b   : > { %2623 = vmatpush3.bf16.msra.mxu0 %v2770_v21  ;;  %v457_v21 = vshll.u32 %v3126_v34, 16  ;;  %v562_v34 = vshll.u32 %v3131_v39, 16 }
  0x3c   : > { %2624 = vmatprep.subr.bf16.mxu0 %v2779_v49  ;;  %v370_v10 = vrot.slane %v368_v2, 1  ;;  %v2812_v2 = vld [vmem:[%s3549_s1 + $0x200] sm:$0xff]  }
  0x3d   : > { %2433 = vmatpush3.bf16.msra.mxu1 %v2764_v4  ;;  %v431_v4 = vor.u32 %v430_v61, %v426_v53  ;;  %v459_v33 = vrot.slane %v457_v21, 1  ;;  %v564_v47 = vrot.slane %v562_v34, 1  ;;  %v2800_v53 = vld [vmem:[%s3549_s1 + $0x220] sm:$0xff]   ;;  %v2806_v61 = vld [vmem:[%s3549_s1 + $0x210] sm:$0xff]  }
  0x3e   : > { %2434 = vmatprep.subr.bf16.mxu1 %v2769_v16 }
  0x3f   : > { %2625 = vmatpush3.bf16.msra.mxu0 %v2779_v49  ;;  %v3190_v16 = vsel %vm364_vm1, %v431_v4, %v435_v62  ;;  %v3215_v46 = vsel %vm364_vm1, %v455_v32, %v459_v33  ;;  %v2789_v49 = vld [vmem:[%s3549_s1 + $0x1f8] sm:$0xff]   ;;  %v472_v62 = vsel %vm469_vm0, %v470_v55, %v471_v57  ;;  %v2795_v4 = vld [vmem:[%s3549_s1 + $0x1e8] sm:$0xff]  }
  0x40   : > { %818 = vmatmul.mubr.bf16.gmra.mxu0 %v3031_v48  ;;  %2611 = vmatmul.mubr.bf16.gmra.mxu1 %v3110_v24 }
  0x41   : > { %2435 = vmatpush3.bf16.msra.mxu1 %v2771_v22  ;;  %825 = vmatprep.mubr.bf16.mxu0 %v3140_v43  ;;  %v371_v22 = vor.u32 %v370_v10, %v366_v0  ;;  %v2792_v0 = vld [vmem:[%s3549_s1 + $0x1f0] sm:$0xff]  }
  0x42   : > { %2436 = vmatprep.subr.bf16.mxu1 %v2772_v25  ;;  %2614 = vmatprep.mubr.bf16.mxu1 %v3143_v45  ;;  %v447_v25 = vrot.slane %v445_v11, 1  ;;  %v2804_v10 = vld [vmem:[%s3549_s1 + $0x1d0] sm:$0xff]  }
  0x43   : > { %2626 = vmatprep.subr.bf16.mxu0 %v2785_v3  ;;  %v376_v28 = vsel %vm364_vm1, %v371_v22, %v375_v19  ;;  %v2805_v11 = vld [vmem:[%s3549_s1 + $0x190] sm:$0xff]   ;;  %v2810_v19 = vld [vmem:[%s3549_s1 + $0x1c0] sm:$0xff]  }
  0x44   : > { %2627 = vmatpush3.bf16.msra.mxu0 %v2785_v3  ;;  %v3200_v29 = vsel %vm364_vm1, %v443_v15, %v447_v25  ;;  %v2793_v3 = vld [vmem:[%s3549_s1 + $0x1b0] sm:$0xff]  }
  0x45   : > { %2437 = vmatpush3.bf16.msra.mxu1 %v2773_v27  ;;  %2628 = vmatprep.subr.bf16.mxu0 %v2786_v9  ;;  %v2787_v27 = vld [vmem:[%s3549_s1 + $0x88] sm:$0xff]  }
  0x46   : > { %2438 = vmatprep.subr.bf16.mxu1 %v2778_v41  ;;  %v567_v41 = vshll.u32 %v3134_v40, 16  ;;  %v565_v40 = vor.u32 %v564_v47, %v560_v37 }
  0x48   : > { %826 = vmatmul.mubr.bf16.gmra.mxu0 %v3042_v56  ;;  %2615 = vmatmul.mubr.bf16.gmra.mxu1 %v3157_v51 }
  0x49   : > { %2439 = vmatpush3.bf16.msra.mxu1 %v2780_v50  ;;  %833 = vmatprep.mubr.bf16.mxu0 %v3190_v16  ;;  %v569_v50 = vrot.slane %v567_v41, 1 }
  0x4a   : > { %2440 = vmatprep.subr.bf16.mxu1 %v2781_v52  ;;  %1139 = vmatprep.mubr.bf16.mxu1 %v376_v28  ;;  %v2797_v52 = vld [vmem:[%s3549_s1 + $0x228] sm:$0xff]  }
  0x4b   : > { %2629 = vmatpush3.bf16.msra.mxu0 %v2786_v9  ;;  %v2802_v9 = vld [vmem:[%s3549_s1 + $0x198] sm:$0xff]  }
  0x4c   : > { %2630 = vmatprep.subr.bf16.mxu0 %v2787_v27 }
  0x4d   : > { %2441 = vmatpush3.bf16.msra.mxu1 %v2782_v54  ;;  %v3234_v54 = vsel %vm364_vm1, %v565_v40, %v569_v50 }
  0x4e   : > { %2650 = vmatprep.subr.bf16.mxu1 %v2791_v36 }
  0x4f   : > { %2631 = vmatpush3.bf16.msra.mxu0 %v2787_v27 }
  0x50   : > { %834 = vmatmul.mubr.bf16.gmra.mxu0 %v3075_v7  ;;  %1140 = vmatmul.mubr.bf16.vlgmr.msra.gmra.mxu1 %v3170_v58  ;;  %v2809_v58 = vld [vmem:[%s3549_s1 + $0x208] sm:$0xff]  }
  0x51   : > { %841 = vmatprep.mubr.bf16.mxu0 %v3200_v29  ;;  %1147 = vmatprep.mubr.bf16.mxu1 %v3026_v44  ;;  %v2794_v44 = vld [vmem:[%s3549_s1 + $0x230] sm:$0xff]  }
  0x52   : > { %2632 = vmatprep.subr.bf16.mxu0 %v2788_v35  ;;  %2651 = vmatpush3.bf16.msra.mxu1 %v2791_v36 }
  0x53   : > { %2652 = vmatprep.subr.bf16.mxu1 %v2794_v44  ;;  %2633 = vmatpush3.bf16.msra.mxu0 %v2788_v35 }
  0x54   : > { %2506 = vmatprep.subr.bf16.mxu0 %v2789_v49 }
  0x56   : > { %2653 = vmatpush3.bf16.msra.mxu1 %v2794_v44 }
  0x57   : > { %2654 = vmatprep.subr.bf16.mxu1 %v2797_v52 }
  0x58   : > { %842 = vmatmul.mubr.bf16.gmra.mxu0 %v3085_v14  ;;  %1148 = vmatmul.mubr.bf16.gmra.mxu1 %v2992_v23  ;;  %v2803_v23 = vld [vmem:[%s3549_s1 + $0x218] sm:$0xff]  }
  0x59   : > { %849 = vmatprep.mubr.bf16.mxu0 %v3215_v46  ;;  %1155 = vmatprep.mubr.bf16.mxu1 %v3049_v59 }
  0x5a   : > { %2655 = vmatpush3.bf16.msra.mxu1 %v2797_v52 }
  0x5b   : > { %2656 = vmatprep.subr.bf16.mxu1 %v2800_v53 }
  0x5e   : > { %2657 = vmatpush3.bf16.msra.mxu1 %v2800_v53 }
  0x5f   : > { %2658 = vmatprep.subr.bf16.mxu1 %v2803_v23 }
  0x60   : > { %850 = vmatmul.mubr.bf16.gmra.mxu0 %v3123_v31  ;;  %1156 = vmatmul.mubr.bf16.gmra.mxu1 %v3002_v30 }
  0x61   : > { %857 = vmatprep.mubr.bf16.mxu0 %v3234_v54  ;;  %1163 = vmatprep.mubr.bf16.mxu1 %v3094_v17 }
  0x62   : > { %2659 = vmatpush3.bf16.msra.mxu1 %v2803_v23 }
  0x63   : > { %2660 = vmatprep.subr.bf16.mxu1 %v2806_v61 }
  0x66   : > { %2661 = vmatpush3.bf16.msra.mxu1 %v2806_v61 }
  0x67   : > { %2662 = vmatprep.subr.bf16.mxu1 %v2809_v58 }
  0x68   : > { %858 = vmatmul.mubr.bf16.gmra.mxu0 %v3131_v39  ;;  %1164 = vmatmul.mubr.bf16.gmra.mxu1 %v3031_v48 }
  0x69   : > { %2634 = vmatprep.mubr.bf16.mxu0 %v472_v62  ;;  %1171 = vmatprep.mubr.bf16.mxu1 %v3140_v43 }
  0x6a   : > { %2663 = vmatpush3.bf16.msra.mxu1 %v2809_v58 }
  0x6b   : > { %2664 = vmatprep.subr.bf16.mxu1 %v2812_v2 }
  0x6e   : > { %2665 = vmatpush3.bf16.msra.mxu1 %v2812_v2 }
  0x70   : > { %2635 = vmatmul.mubr.bf16.vlgmr.msra.gmra.mxu0 %v3013_v38  ;;  %1172 = vmatmul.mubr.bf16.gmra.mxu1 %v3042_v56  ;;  %v2796_v38 = vld [vmem:[%s3549_s1 + $0x1a8] sm:$0xff]  }
  0x71   : > { %2507 = vmatpush3.bf16.msra.mxu0 %v2790_v63  ;;  %2638 = vmatprep.mubr.bf16.mxu0 %v3020_v42 }
  0x72   : > { %2508 = vmatprep.subr.bf16.mxu0 %v2792_v0  ;;  %1179 = vmatprep.mubr.bf16.mxu1 %v3190_v16 }
  0x75   : > { %2509 = vmatpush3.bf16.msra.mxu0 %v2793_v3 }
  0x76   : > { %2510 = vmatprep.subr.bf16.mxu0 %v2795_v4 }
  0x78   : > { %2639 = vmatmul.mubr.bf16.gmra.mxu0 %v3052_v60  ;;  %1180 = vmatmul.mubr.bf16.gmra.mxu1 %v3075_v7 }
  0x79   : > { %2511 = vmatpush3.bf16.msra.mxu0 %v2796_v38  ;;  %2642 = vmatprep.mubr.bf16.mxu0 %v3064_v1 }
  0x7a   : > { %2512 = vmatprep.subr.bf16.mxu0 %v2798_v5  ;;  %1187 = vmatprep.mubr.bf16.mxu1 %v3200_v29 }
  0x7d   : > { %2513 = vmatpush3.bf16.msra.mxu0 %v2799_v6 }
  0x7e   : > { %2514 = vmatprep.subr.bf16.mxu0 %v2801_v8 }
  0x80   : > { %2643 = vmatmul.mubr.bf16.gmra.mxu0 %v3097_v18  ;;  %1188 = vmatmul.mubr.bf16.gmra.mxu1 %v3085_v14 }
  0x81   : > { %2515 = vmatpush3.bf16.msra.mxu0 %v2802_v9  ;;  %2646 = vmatprep.mubr.bf16.mxu0 %v3110_v24 }
  0x82   : > { %2516 = vmatprep.subr.bf16.mxu0 %v2804_v10  ;;  %1195 = vmatprep.mubr.bf16.mxu1 %v3215_v46 }
  0x85   : > { %2517 = vmatpush3.bf16.msra.mxu0 %v2805_v11 }
  0x86   : > { %2518 = vmatprep.subr.bf16.mxu0 %v2807_v12 }
  0x88   : > { %2647 = vmatmul.mubr.bf16.gmra.mxu0 %v3143_v45  ;;  %1196 = vmatmul.mubr.bf16.gmra.mxu1 %v3123_v31 }
  0x89   : > { %2519 = vmatpush3.bf16.msra.mxu0 %v2808_v13  ;;  %1552 = vmatprep.mubr.bf16.mxu0 %v3049_v59  ;;  %v2814_v59 = vld [vmem:[%s2983_s6 + $0x74] ss:$0 sps:$4 sm:$0x11]  }
  0x8a   : > { %2520 = vmatprep.subr.bf16.mxu0 %v2810_v19  ;;  %2666 = vmatprep.mubr.bf16.mxu1 %v3020_v42  ;;  %v2813_v42 = vld [vmem:[%s2983_s6 + $0x6c] sm:$0xff]   ;;  %s2027_s6 = sshll.u32 %s2841_s16, 1 }
  0x8b   : > { %s238_s26 = sadd.s32 %s2837_s15, %s2027_s6 }
  0x8c   : > { %s2028_s27 = sshll.u32 %s238_s26, 4 }
  0x8d   : > { %2521 = vmatpush3.bf16.msra.mxu0 %v2811_v20  ;;  %p240_p6 = scmp.lt.s32.totalorder %s2028_s27, 63 }
  0x8f   : > { %s3564_s27 = smov (!%p240_p6, %s2028_s27), 63 }
  0x90   : > { %1553 = vmatmul.mubr.bf16.vlgmr.msra.gmra.mxu0 %v3002_v30  ;;  %2667 = vmatmul.mubr.bf16.vlgmr.msra.gmra.mxu1 %v3052_v60  ;;  %v1323_v30 = vrot.slane %v2813_v42, 1  ;;  %v1324_v60 = vrot.slane %v2814_v59, 1  ;;  %s2029_s15 = sshll.u32 %s3564_s27, 2 }
  0x91   : > { %1560 = vmatprep.mubr.bf16.mxu0 %v3094_v17  ;;  %2670 = vmatprep.mubr.bf16.mxu1 %v3064_v1  ;;  %v1311_v1 = vshrl.u32 %v2813_v42, 16  ;;  %s3445_s5 = scalar_lea.vmem %s3551_s3, %s2029_s15  ;;  %s3468_s9 = scalar_lea.vmem %s3552_s4, %s2029_s15 }
  0x98   : > { %1561 = vmatmul.mubr.bf16.gmra.mxu0 %v3031_v48  ;;  %2671 = vmatmul.mubr.bf16.gmra.mxu1 %v3097_v18  ;;  %v1325_v48 = vsel %vm469_vm0, %v1323_v30, %v1324_v60  ;;  %v1318_v18 = vshll.u32 %v2814_v59, 16 }
  0x99   : > { %1568 = vmatprep.mubr.bf16.mxu0 %v3140_v43  ;;  %2674 = vmatprep.mubr.bf16.mxu1 %v3110_v24 }
  0x9a   : > { %v1320_v43 = vrot.slane %v1318_v18, 1 }
  0xa0   : > { %1569 = vmatmul.mubr.bf16.gmra.mxu0 %v3042_v56  ;;  %2675 = vmatmul.mubr.bf16.gmra.mxu1 %v3143_v45  ;;  %v1313_v56 = vshll.u32 %v2813_v42, 16 }
  0xa1   : > { %1576 = vmatprep.mubr.bf16.mxu0 %v3190_v16  ;;  %2678 = vmatprep.mubr.bf16.mxu1 %v3157_v51 }
  0xa2   : > { %v1315_v17 = vrot.slane %v1313_v56, 1 }
  0xa4   : > { %v1316_v24 = vor.u32 %v1315_v17, %v1311_v1 }
  0xa8   : > { %1577 = vmatmul.mubr.bf16.gmra.mxu0 %v3075_v7  ;;  %2679 = vmatmul.mubr.bf16.gmra.mxu1 %v1325_v48  ;;  %v1321_v7 = vsel %vm364_vm1, %v1316_v24, %v1320_v43 }
  0xa9   : > { %1584 = vmatprep.mubr.bf16.mxu0 %v3200_v29 }
  0xb0   : > { %1585 = vmatmul.mubr.bf16.gmra.mxu0 %v3085_v14 }
  0xb1   : > { %1592 = vmatprep.mubr.bf16.mxu0 %v3215_v46 }
  0xb8   : > { %1593 = vmatmul.mubr.bf16.gmra.mxu0 %v3123_v31 }
  0xb9   : > { %1600 = vmatprep.mubr.bf16.mxu0 %v3234_v54 }
  0xc0   : > { %1601 = vmatmul.mubr.bf16.gmra.mxu0 %v3131_v39 }
  0xc1   : > { %1608 = vmatprep.mubr.bf16.mxu0 %v1321_v7 }
  0xc8   : > { %1609 = vmatmul.mubr.bf16.gmra.mxu0 %v2813_v42 }
  0xf0   : > { %v2362_v45 = vpop.f32.mrf.mxu0  ;;  %v2604_v14 = vpop.f32.mrf.mxu1 }
  0xf2   : > { %v2363_v51 = vpop.f32.mrf.mxu0  ;;  %v900_v16 = vpop.f32.mrf.mxu1 }
  0xf3   : > { %v2364_v21 = vadd.f32 %v2363_v51, %v2362_v45 }
  0xf4   : > { %v2365_v22 = vpop.f32.mrf.mxu0  ;;  %v2605_v25 = vpop.f32.mrf.mxu1 }
  0xf5   : > { %v901_v26 = vadd.f32 %v2364_v21, %v900_v16 }
  0xf6   : > { %v2366_v15 = vpop.f32.mrf.mxu0  ;;  %v903_v31 = vpop.f32.mrf.mxu1 }
  0xf7   : > { %v2367_v27 = vadd.f32 %v2366_v15, %v2365_v22 }
  0xf8   : > { %v2368_v28 = vpop.f32.mrf.mxu0  ;;  %v2608_v29 = vpop.f32.mrf.mxu1 }
  0xf9   : > { %v3342_v32 = vadd.f32 %v2367_v27, %v903_v31 }
  0xfa   : > { %v2369_v33 = vpop.f32.mrf.mxu0  ;;  %v916_v34 = vpop.f32.mrf.mxu1 }
  0xfb   : > { %v2370_v39 = vadd.f32 %v2369_v33, %v2368_v28 }
  0xfc   : > { %v2371_v35 = vpop.f32.mrf.mxu0  ;;  %v2609_v36 = vpop.f32.mrf.mxu1 }
  0xfd   : > { %v909_v37 = vadd.f32 %v2604_v14, %v2370_v39 }
  0xfe   : > { %v2372_v41 = vpop.f32.mrf.mxu0  ;;  %v919_v46 = vpop.f32.mrf.mxu1 }
  0xff   : > { %v2373_v47 = vadd.f32 %v2372_v41, %v2371_v35 }
 0x100   : > { %v2374_v49 = vpop.f32.mrf.mxu0  ;;  %v2612_v44 = vpop.f32.mrf.mxu1 }
 0x101   : > { %v3344_v40 = vadd.f32 %v2605_v25, %v2373_v47 }
 0x102   : > { %v2375_v50 = vpop.f32.mrf.mxu0  ;;  %v932_v52 = vpop.f32.mrf.mxu1 }
 0x103   : > { %v2376_v53 = vadd.f32 %v2375_v50, %v2374_v49 }
 0x104   : > { %v2377_v54 = vpop.f32.mrf.mxu0  ;;  %v2613_v23 = vpop.f32.mrf.mxu1 }
 0x105   : > { %v917_v55 = vadd.f32 %v2376_v53, %v916_v34 }
 0x106   : > { %v2378_v57 = vpop.f32.mrf.mxu0  ;;  %v935_v61 = vpop.f32.mrf.mxu1 }
 0x107   : > { %v2379_v62 = vadd.f32 %v2378_v57, %v2377_v54 }
 0x108   : > { %v2380_v58 = vpop.f32.mrf.mxu0  ;;  %v2616_v0 = vpop.f32.mrf.mxu1 }
 0x109   : > { %v3346_v63 = vadd.f32 %v2379_v62, %v919_v46 }
 0x10a   : > { %v2381_v2 = vpop.f32.mrf.mxu0  ;;  %v948_v4 = vpop.f32.mrf.mxu1 }
 0x10b   : > { %v2382_v3 = vadd.f32 %v2381_v2, %v2380_v58 }
 0x10c   : > { %v2383_v38 = vpop.f32.mrf.mxu0  ;;  %v2617_v6 = vpop.f32.mrf.mxu1 }
 0x10d   : > { %v925_v5 = vadd.f32 %v2608_v29, %v2382_v3 }
 0x10e   : > { %v2384_v8 = vpop.f32.mrf.mxu0  ;;  %v951_v10 = vpop.f32.mrf.mxu1 }
 0x10f   : > { %v2385_v9 = vadd.f32 %v2384_v8, %v2383_v38 }
 0x110   : > { %v2386_v12 = vpop.f32.mrf.mxu0  ;;  %v2442_v19 = vpop.f32.mrf.mxu1 }
 0x111   : > { %v3348_v11 = vadd.f32 %v2609_v36, %v2385_v9 }
 0x112   : > { %v2387_v13 = vpop.f32.mrf.mxu0  ;;  %v2443_v30 = vpop.f32.mrf.mxu1 }
 0x113   : > { %v2388_v20 = vadd.f32 %v2387_v13, %v2386_v12  ;;  %v2444_v60 = vadd.f32 %v2443_v30, %v2442_v19 }
 0x114   : > { %v2389_v42 = vpop.f32.mrf.mxu0  ;;  %v3350_v56 = vpop.f32.mrf.mxu1 }
 0x115   : > { %v933_v59 = vadd.f32 %v2388_v20, %v932_v52  ;;  %v3352_v18 = vadd.f32 %v2444_v60, %v901_v26 }
 0x116   : > { %v2390_v48 = vpop.f32.mrf.mxu0  ;;  %v3356_v43 = vpop.f32.mrf.mxu1 }
 0x117   : > { %v2391_v1 = vadd.f32 %v2390_v48, %v2389_v42 }
 0x118   : > { %v2392_v17 = vpop.f32.mrf.mxu0  ;;  %v2448_v45 = vpop.f32.mrf.mxu1 }
 0x119   : > { %v3354_v24 = vadd.f32 %v2391_v1, %v935_v61 }
 0x11a   : > { %v2393_v7 = vpop.f32.mrf.mxu0  ;;  %v2449_v21 = vpop.f32.mrf.mxu1 }
 0x11b   : > { %v2394_v14 = vadd.f32 %v2393_v7, %v2392_v17  ;;  %v2450_v22 = vadd.f32 %v2449_v21, %v2448_v45 }
 0x11c   : > { %v2395_v51 = vpop.f32.mrf.mxu0  ;;  %v3358_v15 = vpop.f32.mrf.mxu1 }
 0x11d   : > { %v941_v16 = vadd.f32 %v2612_v44, %v2394_v14  ;;  %v3360_v28 = vadd.f32 %v2450_v22, %v909_v37 }
 0x11e   : > { %v2396_v25 = vpop.f32.mrf.mxu0  ;;  %v3364_v29 = vpop.f32.mrf.mxu1 }
 0x11f   : > { %v2397_v31 = vadd.f32 %v2396_v25, %v2395_v51 }
 0x120   : > { %v2398_v27 = vpop.f32.mrf.mxu0  ;;  %v2454_v34 = vpop.f32.mrf.mxu1 }
 0x121   : > { %v3362_v26 = vadd.f32 %v2613_v23, %v2397_v31 }
 0x122   : > { %v2399_v33 = vpop.f32.mrf.mxu0  ;;  %v2455_v41 = vpop.f32.mrf.mxu1 }
 0x123   : > { %v2400_v39 = vadd.f32 %v2399_v33, %v2398_v27  ;;  %v2456_v46 = vadd.f32 %v2455_v41, %v2454_v34 }
 0x124   : > { %v2401_v35 = vpop.f32.mrf.mxu0  ;;  %v3366_v49 = vpop.f32.mrf.mxu1 }
 0x125   : > { %v949_v36 = vadd.f32 %v2400_v39, %v948_v4  ;;  %v3368_v52 = vadd.f32 %v2456_v46, %v917_v55 }
 0x126   : > { %v2402_v47 = vpop.f32.mrf.mxu0  ;;  %v3372_v53 = vpop.f32.mrf.mxu1 }
 0x127   : > { %v2403_v44 = vadd.f32 %v2402_v47, %v2401_v35 }
 0x128   : > { %v2404_v50 = vpop.f32.mrf.mxu0  ;;  %v2460_v23 = vpop.f32.mrf.mxu1 }
 0x129   : > { %v3370_v37 = vadd.f32 %v2403_v44, %v951_v10 }
 0x12a   : > { %v2405_v54 = vpop.f32.mrf.mxu0  ;;  %v2461_v58 = vpop.f32.mrf.mxu1 }
 0x12b   : > { %v2406_v57 = vadd.f32 %v2405_v54, %v2404_v50  ;;  %v2462_v2 = vadd.f32 %v2461_v58, %v2460_v23 }
 0x12c   : > { %v2407_v61 = vpop.f32.mrf.mxu0  ;;  %v3374_v4 = vpop.f32.mrf.mxu1 }
 0x12d   : > { %v957_v62 = vadd.f32 %v2616_v0, %v2406_v57  ;;  %v3378_v9 = vadd.f32 %v2462_v2, %v925_v5 }
 0x12e   : > { %v2408_v3 = vpop.f32.mrf.mxu0  ;;  %v3380_v10 = vpop.f32.mrf.mxu1 }
 0x12f   : > { %v2409_v38 = vadd.f32 %v2408_v3, %v2407_v61 }
 0x130   : > { %v3376_v8 = vpop.f32.mrf.mxu0  ;;  %v2466_v13 = vpop.f32.mrf.mxu1 }
 0x131   : > { %v960_v55 = vadd.f32 %v2617_v6, %v2409_v38 }
 0x132   : > { %v1238_v12 = vpop.f32.mrf.mxu0  ;;  %v2467_v20 = vpop.f32.mrf.mxu1 }
 0x133   : > { %v2468_v42 = vadd.f32 %v2467_v20, %v2466_v13 }
 0x134   : > { %v3382_v19 = vpop.f32.mrf.mxu0  ;;  %v3386_v30 = vpop.f32.mrf.mxu1 }
 0x135   : > { %v3390_v48 = vadd.f32 %v2468_v42, %v933_v59 }
 0x136   : > { %v3384_v0 = vpop.f32.mrf.mxu0  ;;  %v3392_v5 = vpop.f32.mrf.mxu1 }
 0x138   : > { %v3388_v60 = vpop.f32.mrf.mxu0  ;;  %v2472_v1 = vpop.f32.mrf.mxu1 }
 0x13a   : > { %v3394_v6 = vpop.f32.mrf.mxu0  ;;  %v2473_v7 = vpop.f32.mrf.mxu1 }
 0x13b   : > { %v2474_v45 = vadd.f32 %v2473_v7, %v2472_v1  ;;  %v2447_v7 = vadd.f32 %v3356_v43, %v3350_v56 }
 0x13c   : > { %v3396_v17 = vpop.f32.mrf.mxu0  ;;  %v3400_v51 = vpop.f32.mrf.mxu1 }
 0x13d   : > { %v1182_v21 = vadd.f32 %v2474_v45, %v941_v16 }
 0x13e   : > { %v3398_v14 = vpop.f32.mrf.mxu0  ;;  %v3402_v25 = vpop.f32.mrf.mxu1 }
 0x140   : > { %v2644_v22 = vpop.f32.mrf.mxu0  ;;  %v2478_v27 = vpop.f32.mrf.mxu1 }
 0x141   : > { %v3404_v59 = vadd.f32 %v2644_v22, %v1182_v21 }
 0x142   : > { %v3406_v31 = vpop.f32.mrf.mxu0  ;;  %v2479_v34 = vpop.f32.mrf.mxu1 }
 0x143   : > { %v2480_v39 = vadd.f32 %v2479_v34, %v2478_v27 }
 0x144   : > { %v3408_v33 = vpop.f32.mrf.mxu0  ;;  %v3413_v41 = vpop.f32.mrf.mxu1 }
 0x145   : > { %v3416_v16 = vadd.f32 %v2480_v39, %v949_v36 }
 0x146   : > { %v3411_v35 = vpop.f32.mrf.mxu0  ;;  %v3418_v47 = vpop.f32.mrf.mxu1 }
 0x148   : > { %v2648_v46 = vpop.f32.mrf.mxu0  ;;  %v2484_v50 = vpop.f32.mrf.mxu1 }
 0x14a   : > { %v3420_v44 = vpop.f32.mrf.mxu0  ;;  %v2485_v23 = vpop.f32.mrf.mxu1 }
 0x14b   : > { %v2486_v57 = vadd.f32 %v2485_v23, %v2484_v50 }
 0x14c   : > { %v2649_v54 = vpop.f32.mrf.mxu0  ;;  %v2487_v58 = vpop.f32.mrf.mxu1 }
 0x14d   : > { %v1198_v2 = vadd.f32 %v2486_v57, %v957_v62  ;;  %v1239_v62 = vadd.f32 %v1238_v12, %v3352_v18  ;;  %v1145_v57 = vadd.f32 %v2447_v7, %v3342_v32  ;;  %v2261_v32 = vld [vmem:[%s3445_s5] sm:$0xff]   ;;  %v1247_v7 = vadd.f32 %v3376_v8, %v3360_v28 }
 0x14e   : > { %v3422_v61 = vpop.f32.mrf.mxu0  ;;  %v2488_v38 = vpop.f32.mrf.mxu1 }
 0x14f   : > { %v3426_v36 = vadd.f32 %v2648_v46, %v1198_v2  ;;  %v2489_v13 = vadd.f32 %v2488_v38, %v2487_v58  ;;  %v3437_v46 = vld [vmem:[%s3550_s2] ss:$0 sm:$0xff]  ;;  %v2453_v2 = vadd.f32 %v3364_v29, %v3358_v15  ;;  %v2263_v29 = vunpack.c.h.bf16 %v2261_v32 }
 0x150   : > { %v2522_v3 = vpop.f32.mrf.mxu0  ;;  %v2668_v1 = vpop.f32.mrf.mxu1 }
 0x151   : > { %v1201_v45 = vadd.f32 %v2489_v13, %v960_v55  ;;  %v1242_v55 = vadd.f32 %v3384_v0, %v1145_v57  ;;  %v2262_v0 = vunpack.c.l.bf16 %v2261_v32  ;;  %v1153_v15 = vadd.f32 %v2453_v2, %v3344_v40 }
 0x152   : > { %v2523_v20 = vpop.f32.mrf.mxu0  ;;  %v1651_v22 = vpop.f32.mrf.mxu1 }
 0x153   : > { %v2524_v42 = vadd.f32 %v2523_v20, %v2522_v3  ;;  %v3432_v27 = vadd.f32 %v2649_v54, %v1201_v45  ;;  %v1250_v28 = vadd.f32 %v3382_v19, %v1153_v15 }
 0x154   : > { %v2525_v21 = vpop.f32.mrf.mxu0  ;;  %v2669_v23 = vpop.f32.mrf.mxu1 }
 0x155   : > { %v1652_v34 = vadd.f32 %v2524_v42, %v1651_v22 }
 0x156   : > { %v2526_v39 = vpop.f32.mrf.mxu0  ;;  %v1654_v43 = vpop.f32.mrf.mxu1 }
 0x157   : > { %v2527_v50 = vadd.f32 %v2526_v39, %v2525_v21  ;;  %v1714_v56 = vadd.f32 %v1652_v34, %v1239_v62 }
 0x158   : > { %v2528_v18 = vpop.f32.mrf.mxu0  ;;  %v3452_v38 = vpop.f32.mrf.mxu1 }
 0x159   : > { %v1737_v12 = vadd.f32 %v3437_v46, %v1714_v56  ;;  %v1655_v54 = vadd.f32 %v2527_v50, %v1654_v43 }
 0x15a   : > { %v2529_v58 = vpop.f32.mrf.mxu0  ;;  %v1667_v62 = vpop.f32.mrf.mxu1 }
 0x15b   : > { %v2530_v3 = vadd.f32 %v2529_v58, %v2528_v18  ;;  %v1769_v13 = vmul.f32 0.1, %v1737_v12  ;;  %v1715_v20 = vadd.f32 %v1655_v54, %v1242_v55  ;;  %vm1753_vm2 = vcmp.gt.f32.partialorder %v1737_v12, 0.0  ;;  %v2332_v55 = vld [vmem:[%s3445_s5 + $0x8] sm:$0xff]  }
 0x15c   : > { %v2531_v42 = vpop.f32.mrf.mxu0  ;;  %v2459_v18 = vadd.f32 %v3372_v53, %v3366_v49  ;;  %v2673_v40 = vpop.f32.mrf.mxu1  ;;  %v2266_v49 = vunpack.c.l.bf16 %v2332_v55 }
 0x15d   : > { %v1660_v45 = vadd.f32 %v2668_v1, %v2530_v3  ;;  %v1738_v21 = vadd.f32 %v3437_v46, %v1715_v20  ;;  %v1785_v50 = vsel %vm1753_vm2, %v1737_v12, %v1769_v13  ;;  %v1255_v13 = vadd.f32 %v3394_v6, %v3368_v52 }
 0x15e   : > { %v2532_v22 = vpop.f32.mrf.mxu0  ;;  %v1833_v58 = vadd.f32 %v2262_v0, %v1785_v50  ;;  %v1161_v20 = vadd.f32 %v2459_v18, %v3346_v63  ;;  %v1670_v0 = vpop.f32.mrf.mxu1  ;;  %v2465_v18 = vadd.f32 %v3380_v10, %v3374_v4 }
 0x15f   : > { %v1716_v34 = vadd.f32 %v1660_v45, %v1247_v7  ;;  %v2533_v39 = vadd.f32 %v2532_v22, %v2531_v42  ;;  %vm1754_vm3 = vcmp.gt.f32.partialorder %v1738_v21, 0.0  ;;  %v1770_v57 = vmul.f32 0.1, %v1738_v21 }
 0x160   : > { %v2534_v56 = vpop.f32.mrf.mxu0  ;;  %v2267_v42 = vunpack.c.h.bf16 %v2332_v55 }
 0x161   : > { %v1739_v8 = vadd.f32 %v3437_v46, %v1716_v34  ;;  %v1663_v1 = vadd.f32 %v2669_v23, %v2533_v39  ;;  %v1786_v43 = vsel %vm1754_vm3, %v1738_v21, %v1770_v57  ;;  %v1258_v39 = vadd.f32 %v3398_v14, %v1161_v20 }
 0x162   : > { %v2535_v54 = vpop.f32.mrf.mxu0  ;;  %v1834_v2 = vadd.f32 %v2263_v29, %v1786_v43 }
 0x163   : > { %v1771_v32 = vmul.f32 0.1, %v1739_v8  ;;  %v1717_v12 = vadd.f32 %v1663_v1, %v1250_v28  ;;  %vm1755_vm4 = vcmp.gt.f32.partialorder %v1739_v8, 0.0  ;;  %v2536_v19 = vadd.f32 %v2535_v54, %v2534_v56  ;;  %v2333_v28 = vld [vmem:[%s3445_s5 + $0x10] sm:$0xff]  }
 0x164   : > { %v2537_v23 = vpop.f32.mrf.mxu0  ;;  %v2295_v3 = vpack.c.bf16 %v1834_v2, %v1833_v58  ;;  %v1263_v54 = vadd.f32 %v3388_v60, %v3378_v9 }
 0x165   : > { %v1740_v53 = vadd.f32 %v3437_v46, %v1717_v12  ;;  %v1668_v7 = vadd.f32 %v2536_v19, %v1667_v62  ;;  %v1787_v21 = vsel %vm1755_vm4, %v1739_v8, %v1771_v32  ;;  %v3477_v62 = vpop.f32.mrf.mxu1  ;;  %v2270_v32 = vunpack.c.l.bf16 %v2333_v28 }
 0x166   : > { %v2538_v45 = vpop.f32.mrf.mxu0  ;;  %2296 = vst [vmem:[%s3468_s9] sm:$0xff] %v2295_v3   ;;  %v1835_v56 = vadd.f32 %v2266_v49, %v1787_v21  ;;  %v2271_v12 = vunpack.c.h.bf16 %v2333_v28  ;;  %v1169_v49 = vadd.f32 %v2465_v18, %v3348_v11  ;;  %v2471_v21 = vadd.f32 %v3392_v5, %v3386_v30 }
 0x167   : > { %vm1756_vm5 = vcmp.gt.f32.partialorder %v1740_v53, 0.0  ;;  %v1772_v22 = vmul.f32 0.1, %v1740_v53  ;;  %v2539_v15 = vadd.f32 %v2538_v45, %v2537_v23  ;;  %v1718_v29 = vadd.f32 %v1668_v7, %v1255_v13  ;;  %v1683_v23 = vpop.f32.mrf.mxu1 }
 0x168   : > { %v2540_v34 = vpop.f32.mrf.mxu0  ;;  %v1266_v60 = vadd.f32 %v3396_v17, %v1169_v49 }
 0x169   : > { %v1788_v50 = vsel %vm1756_vm5, %v1740_v53, %v1772_v22  ;;  %v1671_v57 = vadd.f32 %v2539_v15, %v1670_v0  ;;  %v1741_v63 = vadd.f32 %v3437_v46, %v1718_v29  ;;  %v2677_v0 = vpop.f32.mrf.mxu1  ;;  %v2334_v22 = vld [vmem:[%s3445_s5 + $0x18] sm:$0xff]  }
 0x16a   : > { %v1836_v52 = vadd.f32 %v2267_v42, %v1788_v50  ;;  %v2541_v6 = vpop.f32.mrf.mxu0  ;;  %v1271_v50 = vadd.f32 %v3406_v31, %v3390_v48  ;;  %v2275_v30 = vunpack.c.h.bf16 %v2334_v22 }
 0x16b   : > { %v1719_v1 = vadd.f32 %v1671_v57, %v1258_v39  ;;  %v2542_v8 = vadd.f32 %v2541_v6, %v2540_v34  ;;  %vm1757_vm6 = vcmp.gt.f32.partialorder %v1741_v63, 0.0  ;;  %v1773_v55 = vmul.f32 0.1, %v1741_v63 }
 0x16c   : > { %v2300_v43 = vpack.c.bf16 %v1836_v52, %v1835_v56  ;;  %v2543_v14 = vpop.f32.mrf.mxu0  ;;  %v2274_v57 = vunpack.c.l.bf16 %v2334_v22  ;;  %v1686_v52 = vpop.f32.mrf.mxu1 }
 0x16d   : > { %v1742_v58 = vadd.f32 %v3437_v46, %v1719_v1  ;;  %v1676_v2 = vadd.f32 %v3452_v38, %v2542_v8  ;;  %v1789_v3 = vsel %vm1757_vm6, %v1741_v63, %v1773_v55  ;;  %v1177_v63 = vadd.f32 %v2471_v21, %v3354_v24 }
 0x16e   : > { %2339 = vst [vmem:[%s3468_s9 + $0x8] sm:$0xff] %v2300_v43   ;;  %v2544_v19 = vpop.f32.mrf.mxu0  ;;  %v1837_v38 = vadd.f32 %v2270_v32, %v1789_v3  ;;  %v2477_v43 = vadd.f32 %v3402_v25, %v3400_v51 }
 0x16f   : > { %vm1758_vm7 = vcmp.gt.f32.partialorder %v1742_v58, 0.0  ;;  %v1774_v4 = vmul.f32 0.1, %v1742_v58  ;;  %v1720_v10 = vadd.f32 %v1676_v2, %v1263_v54  ;;  %v2545_v53 = vadd.f32 %v2544_v19, %v2543_v14  ;;  %v2335_v2 = vld [vmem:[%s3445_s5 + $0x20] sm:$0xff]  }
 0x170   : > { %v2546_v13 = vpop.f32.mrf.mxu0  ;;  %v1274_v48 = vadd.f32 %v3411_v35, %v1177_v63  ;;  %v2279_v51 = vunpack.c.h.bf16 %v2335_v2 }
 0x171   : > { %v1790_v20 = vsel %vm1758_vm7, %v1742_v58, %v1774_v4  ;;  %v1743_v9 = vadd.f32 %v3437_v46, %v1720_v10  ;;  %v1679_v7 = vadd.f32 %v2673_v40, %v2545_v53  ;;  %v1185_v4 = vadd.f32 %v2477_v43, %v3362_v26 }
 0x172   : > { %v1838_v42 = vadd.f32 %v2271_v12, %v1790_v20  ;;  %v2547_v45 = vpop.f32.mrf.mxu0  ;;  %v3503_v12 = vpop.f32.mrf.mxu1  ;;  %v2278_v10 = vunpack.c.l.bf16 %v2335_v2 }
 0x173   : > { %v2548_v15 = vadd.f32 %v2547_v45, %v2546_v13  ;;  %v1775_v11 = vmul.f32 0.1, %v1743_v9  ;;  %v1721_v34 = vadd.f32 %v1679_v7, %v1266_v60  ;;  %vm1759_vm8 = vcmp.gt.f32.partialorder %v1743_v9, 0.0 }
 0x174   : > { %v2305_v29 = vpack.c.bf16 %v1838_v42, %v1837_v38  ;;  %v2549_v39 = vpop.f32.mrf.mxu0  ;;  %v1282_v42 = vadd.f32 %v3408_v33, %v1185_v4  ;;  %v1287_v33 = vadd.f32 %v3420_v44, %v3416_v16 }
 0x175   : > { %v1684_v17 = vadd.f32 %v2548_v15, %v1683_v23  ;;  %v1744_v40 = vadd.f32 %v3437_v46, %v1721_v34  ;;  %v1791_v28 = vsel %vm1759_vm8, %v1743_v9, %v1775_v11  ;;  %v1699_v9 = vpop.f32.mrf.mxu1  ;;  %v2336_v15 = vld [vmem:[%s3445_s5 + $0x28] sm:$0xff]  }
 0x176   : > { %2340 = vst [vmem:[%s3468_s9 + $0x10] sm:$0xff] %v2305_v29   ;;  %v2550_v56 = vpop.f32.mrf.mxu0  ;;  %v1839_v54 = vadd.f32 %v2274_v57, %v1791_v28 }
 0x177   : > { %v1722_v5 = vadd.f32 %v1684_v17, %v1271_v50  ;;  %v2551_v6 = vadd.f32 %v2550_v56, %v2549_v39  ;;  %vm1760_vm9 = vcmp.gt.f32.partialorder %v1744_v40, 0.0  ;;  %v1776_v1 = vmul.f32 0.1, %v1744_v40  ;;  %v2681_v34 = vpop.f32.mrf.mxu1 }
 0x178   : > { %v2552_v8 = vpop.f32.mrf.mxu0  ;;  %v2483_v39 = vadd.f32 %v3418_v47, %v3413_v41  ;;  %v2283_v56 = vunpack.c.h.bf16 %v2336_v15 }
 0x179   : > { %v1745_v31 = vadd.f32 %v3437_v46, %v1722_v5  ;;  %v1687_v18 = vadd.f32 %v2551_v6, %v1686_v52  ;;  %v1792_v55 = vsel %vm1760_vm9, %v1744_v40, %v1776_v1  ;;  %v2282_v40 = vunpack.c.l.bf16 %v2336_v15  ;;  %v1702_v41 = vpop.f32.mrf.mxu1 }
 0x17a   : > { %v2553_v14 = vpop.f32.mrf.mxu0  ;;  %v1840_v24 = vadd.f32 %v2275_v30, %v1792_v55  ;;  %v1193_v47 = vadd.f32 %v2483_v39, %v3370_v37 }
 0x17b   : > { %v1777_v58 = vmul.f32 0.1, %v1745_v31  ;;  %v1723_v32 = vadd.f32 %v1687_v18, %v1274_v48  ;;  %vm1761_vm10 = vcmp.gt.f32.partialorder %v1745_v31, 0.0  ;;  %v2554_v19 = vadd.f32 %v2553_v14, %v2552_v8 }
 0x17c   : > { %v2555_v23 = vpop.f32.mrf.mxu0  ;;  %v2310_v35 = vpack.c.bf16 %v1840_v24, %v1839_v54  ;;  %v1290_v44 = vadd.f32 %v3422_v61, %v1193_v47  ;;  %v2337_v54 = vld [vmem:[%s3445_s5 + $0x30] sm:$0xff]  }
 0x17d   : > { %v1746_v3 = vadd.f32 %v3437_v46, %v1723_v32  ;;  %v1692_v25 = vadd.f32 %v3477_v62, %v2554_v19  ;;  %v1793_v53 = vsel %vm1761_vm10, %v1745_v31, %v1777_v58  ;;  %v2286_v19 = vunpack.c.l.bf16 %v2337_v54 }
 0x17e   : > { %v2556_v49 = vpop.f32.mrf.mxu0  ;;  %2341 = vst [vmem:[%s3468_s9 + $0x18] sm:$0xff] %v2310_v35   ;;  %v1841_v26 = vadd.f32 %v2278_v10, %v1793_v53  ;;  %v2287_v61 = vunpack.c.h.bf16 %v2337_v54 }
 0x17f   : > { %vm1762_vm11 = vcmp.gt.f32.partialorder %v1746_v3, 0.0  ;;  %v1778_v13 = vmul.f32 0.1, %v1746_v3  ;;  %v2557_v20 = vadd.f32 %v2556_v49, %v2555_v23  ;;  %v1724_v60 = vadd.f32 %v1692_v25, %v3404_v59 }
 0x180   : > { %v2558_v38 = vpop.f32.mrf.mxu0 }
 0x181   : > { %v1794_v7 = vsel %vm1762_vm11, %v1746_v3, %v1778_v13  ;;  %v1695_v45 = vadd.f32 %v2677_v0, %v2557_v20  ;;  %v1747_v62 = vadd.f32 %v3437_v46, %v1724_v60  ;;  %v2338_v13 = vld [vmem:[%s3445_s5 + $0x38] sm:$0xff]  }
 0x182   : > { %v1842_v21 = vadd.f32 %v2279_v51, %v1794_v7  ;;  %v2559_v22 = vpop.f32.mrf.mxu0  ;;  %v2290_v60 = vunpack.c.l.bf16 %v2338_v13 }
 0x183   : > { %v1725_v29 = vadd.f32 %v1695_v45, %v1282_v42  ;;  %v2560_v11 = vadd.f32 %v2559_v22, %v2558_v38  ;;  %vm1763_vm12 = vcmp.gt.f32.partialorder %v1747_v62, 0.0  ;;  %v1779_v59 = vmul.f32 0.1, %v1747_v62 }
 0x184   : > { %v2315_v50 = vpack.c.bf16 %v1842_v21, %v1841_v26  ;;  %v2561_v17 = vpop.f32.mrf.mxu0  ;;  %v2291_v38 = vunpack.c.h.bf16 %v2338_v13 }
 0x185   : > { %v1748_v0 = vadd.f32 %v3437_v46, %v1725_v29  ;;  %v1700_v57 = vadd.f32 %v2560_v11, %v1699_v9  ;;  %v1795_v63 = vsel %vm1763_vm12, %v1747_v62, %v1779_v59 }
 0x186   : > { %2342 = vst [vmem:[%s3468_s9 + $0x20] sm:$0xff] %v2315_v50   ;;  %v2562_v52 = vpop.f32.mrf.mxu0  ;;  %v1843_v8 = vadd.f32 %v2282_v40, %v1795_v63 }
 0x187   : > { %vm1764_vm13 = vcmp.gt.f32.partialorder %v1748_v0, 0.0  ;;  %v1780_v30 = vmul.f32 0.1, %v1748_v0  ;;  %v1726_v5 = vadd.f32 %v1700_v57, %v1287_v33  ;;  %v2563_v6 = vadd.f32 %v2562_v52, %v2561_v17 }
 0x188   : > { %v2564_v28 = vpop.f32.mrf.mxu0 }
 0x189   : > { %v1796_v1 = vsel %vm1764_vm13, %v1748_v0, %v1780_v30  ;;  %v1749_v16 = vadd.f32 %v3437_v46, %v1726_v5  ;;  %v1703_v31 = vadd.f32 %v2563_v6, %v1702_v41 }
 0x18a   : > { %v1844_v48 = vadd.f32 %v2283_v56, %v1796_v1  ;;  %v2565_v18 = vpop.f32.mrf.mxu0 }
 0x18b   : > { %v2566_v43 = vadd.f32 %v2565_v18, %v2564_v28  ;;  %v1781_v14 = vmul.f32 0.1, %v1749_v16  ;;  %v1727_v24 = vadd.f32 %v1703_v31, %v1290_v44  ;;  %vm1765_vm14 = vcmp.gt.f32.partialorder %v1749_v16, 0.0 }
 0x18c   : > { %v2320_v55 = vpack.c.bf16 %v1844_v48, %v1843_v8  ;;  %v2567_v58 = vpop.f32.mrf.mxu0 }
 0x18d   : > { %v1708_v37 = vadd.f32 %v3503_v12, %v2566_v43  ;;  %v1750_v2 = vadd.f32 %v3437_v46, %v1727_v24  ;;  %v1797_v3 = vsel %vm1765_vm14, %v1749_v16, %v1781_v14 }
 0x18e   : > { %2343 = vst [vmem:[%s3468_s9 + $0x28] sm:$0xff] %v2320_v55   ;;  %v2568_v32 = vpop.f32.mrf.mxu0  ;;  %v1845_v49 = vadd.f32 %v2286_v19, %v1797_v3 }
 0x18f   : > { %v1728_v23 = vadd.f32 %v1708_v37, %v3426_v36  ;;  %v2569_v35 = vadd.f32 %v2568_v32, %v2567_v58  ;;  %vm1766_vm15 = vcmp.gt.f32.partialorder %v1750_v2, 0.0  ;;  %v1782_v4 = vmul.f32 0.1, %v1750_v2 }
 0x191   : > { %v1751_v10 = vadd.f32 %v3437_v46, %v1728_v23  ;;  %v1711_v51 = vadd.f32 %v2681_v34, %v2569_v35  ;;  %v1798_v25 = vsel %vm1766_vm15, %v1750_v2, %v1782_v4 }
 0x192   : > { %v1846_v12 = vadd.f32 %v2287_v61, %v1798_v25 }
 0x193   : > { %v1783_v53 = vmul.f32 0.1, %v1751_v10  ;;  %v1729_v20 = vadd.f32 %v1711_v51, %v3432_v27  ;;  %vm1767_vm0 = vcmp.gt.f32.partialorder %v1751_v10, 0.0 }
 0x194   : > { %v2325_v9 = vpack.c.bf16 %v1846_v12, %v1845_v49 }
 0x195   : > { %v1752_v36 = vadd.f32 %v3437_v46, %v1729_v20  ;;  %v1799_v42 = vsel %vm1767_vm0, %v1751_v10, %v1783_v53 }
 0x196   : > { %2344 = vst [vmem:[%s3468_s9 + $0x30] sm:$0xff] %v2325_v9   ;;  %v1847_v26 = vadd.f32 %v2290_v60, %v1799_v42 }
 0x197   : > { %vm1768_vm1 = vcmp.gt.f32.partialorder %v1752_v36, 0.0  ;;  %v1784_v7 = vmul.f32 0.1, %v1752_v36 }
 0x199   : > { %v1800_v45 = vsel %vm1768_vm1, %v1752_v36, %v1784_v7 }
 0x19a   : > { %v1848_v21 = vadd.f32 %v2291_v38, %v1800_v45 }
 0x19c   : > { %v2330_v62 = vpack.c.bf16 %v1848_v21, %v1847_v26 }
 0x19e   : > { %2345 = vst [vmem:[%s3468_s9 + $0x38] sm:$0xff] %v2330_v62  }
 0x19f PF: > { %s14_s19 = sadd.s32 1, %s2853_s19   ;;  %s3553_s15 = smov %s2845_s17 }
 0x1a0   : > { %p11_p7 = scmp.ge.s32.totalorder %s14_s19, 6   ;;  %s3554_s16 = smov %s2849_s18 }
 0x1a1   : > { %s3555_s17 = smov %s3558_s20  ;;  %s3556_s18 = smov %s3562_s21 }
 0x1a2   :  { %13 = sbr.rel (!%p11_p7) target bundleno = 3 (0x3), region = 72 }

// kernel: darknet_forward.17
= control target key start
LH: loop header
LB: loop body
LE: loop exit
PB: predicated region body
PF: predicated region fallthrough
CT: control target
= control target key end

     0   :  { %s691_s12 = smov 0   ;;  %s693_s13 = smov 0   ;;  %s762_s0 = inlined_call_operand.vmem [shape: bf16[2,8,8,128], index: 0, kind: input, shape index: {}]   ;;  %s763_s1 = inlined_call_operand.vmem [shape: bf16[1,128,128], index: 1, kind: input, shape index: {}]   ;;  %s764_s2 = inlined_call_operand.vmem [shape: f32[1,128], index: 2, kind: input, shape index: {}]   ;;  %s765_s3 = inlined_call_operand.vmem [shape: bf16[128,128], index: 3, kind: output, shape index: {}]  }
   0x1   :  { %s695_s14 = smov 0  }
   0x2 LB: > { %s25_s15 = sadd.s32 1, %s665_s13  ;;  %p499_p0 = scmp.ge.s32.totalorder %s669_s14, 1  ;;  %s669_s14 = sphi %s695_s14, %s13_s14   ;;  %s665_s13 = sphi %s693_s13, %s767_s13   ;;  %s661_s12 = sphi %s691_s12, %s766_s12  }
   0x3   : > { %p27_p1 = scmp.ge.s32.totalorder %s25_s15, 2  ;;  %p151_p2 = scmp.lt.s32.totalorder %s669_s14, 3 }
   0x5   : > { %s769_s15 = smov (%p27_p1, %s25_s15), 0  ;;  %p152_p3 = pnand %p499_p0, %p151_p2 }
   0x6   : > { %p176_p4 = scmp.lt.s32.totalorder (!%p152_p3), %s661_s12, 1  ;;  %s502_s10 = sshll.u32 (!%p152_p3), %s661_s12, 3 }
   0x7   : > { %155 = sbr.rel (%p152_p3) target bundleno = 254 (0xfe), region = 32  ;;  %p183_p5 = scmp.lt.s32.totalorder (!%p152_p3), %s502_s10, 15 }
   0xc   : > { %v635_v0 = vld [vmem:[%s763_s1 + $0x38] sm:$0xff]   ;;  %v636_v1 = vld [vmem:[%s763_s1 + $0x30] sm:$0xff]   ;;  %s177_s20 = scalar_select %p176_p4, %s661_s12, 1  ;;  %v637_v2 = vld [vmem:[%s763_s1 + $0x28] sm:$0xff]  }
   0xd   : > { %571 = vmatprep.subr.bf16.mxu0 %v635_v0  ;;  %595 = vmatprep.subr.bf16.mxu1 %v635_v0  ;;  %v638_v3 = vld [vmem:[%s763_s1 + $0x20] sm:$0xff]   ;;  %v639_v6 = vld [vmem:[%s763_s1 + $0x18] sm:$0xff]   ;;  %v640_v7 = vld [vmem:[%s763_s1 + $0x10] sm:$0xff]   ;;  %s771_s10 = smov (!%p183_p5, %s502_s10), 15 }
   0xe   : > { %572 = vmatpush3.bf16.msra.mxu0 %v635_v0  ;;  %603 = vmatpush3.bf16.msra.mxu1 %v635_v0  ;;  %s527_s23 = sshll.u32 %s177_s20, 5  ;;  %v641_v8 = vld [vmem:[%s763_s1 + $0x8] sm:$0xff]   ;;  %v642_v9 = vld [vmem:[%s763_s1] sm:$0xff]   ;;  %s503_s12 = sshll.u32 %s771_s10, 2 }
   0xf   : > { %573 = vmatprep.subr.bf16.mxu0 %v636_v1  ;;  %596 = vmatprep.subr.bf16.mxu1 %v636_v1  ;;  %s725_s26 = scalar_lea.vmem %s762_s0, %s527_s23  ;;  %v504_v12 = vld [vmem:[%s764_s2] ss:$0 sm:$0xff]  ;;  %s186_s19 = scalar_lea.vmem %s765_s3, %s503_s12 }
  0x10   : > { %v643_v4 = vld [vmem:[%s725_s26] sm:$0xff]   ;;  %v644_v5 = vld [vmem:[%s725_s26 + $0x10] sm:$0xff]   ;;  %v645_v10 = vld [vmem:[%s725_s26 + $0x8] sm:$0xff]  }
  0x11   : > { %587 = vmatprep.mubr.bf16.mxu0 %v643_v4  ;;  %591 = vmatprep.mubr.bf16.mxu1 %v644_v5  ;;  %v646_v11 = vld [vmem:[%s725_s26 + $0x18] sm:$0xff]  }
  0x12   : > { %574 = vmatpush3.bf16.msra.mxu0 %v636_v1  ;;  %604 = vmatpush3.bf16.msra.mxu1 %v636_v1 }
  0x13   : > { %575 = vmatprep.subr.bf16.mxu0 %v637_v2  ;;  %597 = vmatprep.subr.bf16.mxu1 %v637_v2 }
  0x16   : > { %576 = vmatpush3.bf16.msra.mxu0 %v637_v2  ;;  %605 = vmatpush3.bf16.msra.mxu1 %v637_v2 }
  0x17   : > { %577 = vmatprep.subr.bf16.mxu0 %v638_v3  ;;  %598 = vmatprep.subr.bf16.mxu1 %v638_v3 }
  0x1a   : > { %578 = vmatpush3.bf16.msra.mxu0 %v638_v3  ;;  %606 = vmatpush3.bf16.msra.mxu1 %v638_v3 }
  0x1b   : > { %579 = vmatprep.subr.bf16.mxu0 %v639_v6  ;;  %599 = vmatprep.subr.bf16.mxu1 %v639_v6 }
  0x1e   : > { %580 = vmatpush3.bf16.msra.mxu0 %v639_v6  ;;  %607 = vmatpush3.bf16.msra.mxu1 %v639_v6 }
  0x1f   : > { %581 = vmatprep.subr.bf16.mxu0 %v640_v7  ;;  %600 = vmatprep.subr.bf16.mxu1 %v640_v7 }
  0x22   : > { %582 = vmatpush3.bf16.msra.mxu0 %v640_v7  ;;  %608 = vmatpush3.bf16.msra.mxu1 %v640_v7 }
  0x23   : > { %583 = vmatprep.subr.bf16.mxu0 %v641_v8  ;;  %601 = vmatprep.subr.bf16.mxu1 %v641_v8 }
  0x26   : > { %584 = vmatpush3.bf16.msra.mxu0 %v641_v8  ;;  %609 = vmatpush3.bf16.msra.mxu1 %v641_v8 }
  0x27   : > { %585 = vmatprep.subr.bf16.mxu0 %v642_v9  ;;  %602 = vmatprep.subr.bf16.mxu1 %v642_v9 }
  0x2a   : > { %586 = vmatpush3.bf16.msra.mxu0 %v642_v9  ;;  %610 = vmatpush3.bf16.msra.mxu1 %v642_v9 }
  0x2d   : > { %588 = vmatmul.mubr.bf16.vlgmr.msra.gmra.mxu0 %v645_v10  ;;  %592 = vmatmul.mubr.bf16.vlgmr.msra.gmra.mxu1 %v646_v11 }
  0xed   : > { %v589_v13 = vpop.f32.mrf.mxu0  ;;  %v593_v14 = vpop.f32.mrf.mxu1 }
  0xee   : > { %v339_v15 = vadd.f32 %v589_v13, %v504_v12  ;;  %v355_v16 = vadd.f32 %v593_v14, %v504_v12 }
  0xef   : > { %v330_v17 = vpop.f32.mrf.mxu0  ;;  %v346_v18 = vpop.f32.mrf.mxu1 }
  0xf0   : > { %vm363_vm0 = vcmp.gt.f32.partialorder %v339_v15, 0.0  ;;  %v371_v19 = vmul.f32 0.1, %v339_v15  ;;  %vm367_vm1 = vcmp.gt.f32.partialorder %v355_v16, 0.0  ;;  %v375_v20 = vmul.f32 0.1, %v355_v16 }
  0xf1   : > { %v331_v21 = vadd.f32 %v504_v12, %v330_v17  ;;  %v590_v22 = vpop.f32.mrf.mxu0  ;;  %v594_v23 = vpop.f32.mrf.mxu1  ;;  %v347_v24 = vadd.f32 %v504_v12, %v346_v18 }
  0xf2   : > { %v342_v25 = vadd.f32 %v590_v22, %v504_v12  ;;  %v358_v26 = vadd.f32 %v594_v23, %v504_v12  ;;  %v379_v27 = vsel %vm363_vm0, %v339_v15, %v371_v19  ;;  %v383_v28 = vsel %vm367_vm1, %v355_v16, %v375_v20 }
  0xf3   : > { %v333_v29 = vpop.f32.mrf.mxu0  ;;  %v349_v30 = vpop.f32.mrf.mxu1  ;;  %vm361_vm4 = vcmp.gt.f32.partialorder %v331_v21, 0.0  ;;  %v369_v33 = vmul.f32 0.1, %v331_v21  ;;  %vm365_vm5 = vcmp.gt.f32.partialorder %v347_v24, 0.0  ;;  %v373_v36 = vmul.f32 0.1, %v347_v24 }
  0xf4   : > { %vm364_vm2 = vcmp.gt.f32.partialorder %v342_v25, 0.0  ;;  %v372_v31 = vmul.f32 0.1, %v342_v25  ;;  %vm368_vm3 = vcmp.gt.f32.partialorder %v358_v26, 0.0  ;;  %v376_v32 = vmul.f32 0.1, %v358_v26 }
  0xf5   : > { %v334_v34 = vadd.f32 %v504_v12, %v333_v29  ;;  %v350_v35 = vadd.f32 %v504_v12, %v349_v30  ;;  %v377_v43 = vsel %vm361_vm4, %v331_v21, %v369_v33  ;;  %v381_v45 = vsel %vm365_vm5, %v347_v24, %v373_v36 }
  0xf6   : > { %v380_v37 = vsel %vm364_vm2, %v342_v25, %v372_v31  ;;  %v384_v38 = vsel %vm368_vm3, %v358_v26, %v376_v32 }
  0xf7   : > { %v544_v39 = vpack.c.bf16 %v380_v37, %v379_v27  ;;  %v554_v40 = vpack.c.bf16 %v384_v38, %v383_v28  ;;  %vm362_vm6 = vcmp.gt.f32.partialorder %v334_v34, 0.0  ;;  %v370_v41 = vmul.f32 0.1, %v334_v34 }
  0xf8   : > { %vm366_vm7 = vcmp.gt.f32.partialorder %v350_v35, 0.0  ;;  %v374_v42 = vmul.f32 0.1, %v350_v35 }
  0xf9   : > { %556 = vst [vmem:[%s186_s19 + $0x8] sm:$0xff] %v544_v39   ;;  %558 = vst [vmem:[%s186_s19 + $0x18] sm:$0xff] %v554_v40   ;;  %v378_v44 = vsel %vm362_vm6, %v334_v34, %v370_v41 }
  0xfa   : > { %v539_v46 = vpack.c.bf16 %v378_v44, %v377_v43  ;;  %v382_v47 = vsel %vm366_vm7, %v350_v35, %v374_v42 }
  0xfb   : > { %v549_v48 = vpack.c.bf16 %v382_v47, %v381_v45 }
  0xfc   : > { %540 = vst [vmem:[%s186_s19] sm:$0xff] %v539_v46  }
  0xfd   : > { %557 = vst [vmem:[%s186_s19 + $0x10] sm:$0xff] %v549_v48  }
  0xfe PF: > { %s13_s14 = sadd.s32 1, %s669_s14   ;;  %s766_s12 = smov %s665_s13 }
  0xff   : > { %p10_p6 = scmp.ge.s32.totalorder %s13_s14, 4   ;;  %s767_s13 = smov %s769_s15 }
 0x101   :  { %12 = sbr.rel (!%p10_p6) target bundleno = 2 (0x2), region = 63 }

// kernel: darknet_forward.16
= control target key start
LH: loop header
LB: loop body
LE: loop exit
PB: predicated region body
PF: predicated region fallthrough
CT: control target
= control target key end

     0   :  { %s3445_s12 = smov 0   ;;  %s3447_s13 = smov 0   ;;  %s4401_s0 = inlined_call_operand.vmem [shape: bf16[2,9,9,512], index: 0, kind: input, shape index: {}]   ;;  %s4402_s1 = inlined_call_operand.vmem [shape: bf16[2,1024,128], index: 1, kind: input, shape index: {}]   ;;  %s4403_s2 = inlined_call_operand.vmem [shape: f32[1,128], index: 2, kind: input, shape index: {}]   ;;  %s4404_s3 = inlined_call_operand.vmem [shape: bf16[128,128], index: 3, kind: output, shape index: {}]  }
   0x1   :  { %s3449_s14 = smov 0  }
   0x2 LB: > { %s25_s15 = sadd.s32 1, %s3419_s13  ;;  %p2488_p0 = scmp.ge.s32.totalorder %s3423_s14, 1  ;;  %s3423_s14 = sphi %s3449_s14, %s13_s14   ;;  %s3419_s13 = sphi %s3447_s13, %s4450_s13   ;;  %s3415_s12 = sphi %s3445_s12, %s4449_s12  }
   0x3   : > { %p27_p1 = scmp.ge.s32.totalorder %s25_s15, 2  ;;  %p151_p2 = scmp.lt.s32.totalorder %s3423_s14, 3 }
   0x5   : > { %s4452_s15 = smov (%p27_p1, %s25_s15), 0  ;;  %p152_p3 = pnand %p2488_p0, %p151_p2 }
   0x7   : > { %155 = sbr.rel (%p152_p3) target bundleno = 393 (0x189), region = 32 }
   0xc   : > { %v3235_v0 = vld [vmem:[%s4402_s1 + $0x278] sm:$0xff]   ;;  %v3239_v4 = vld [vmem:[%s4402_s1 + $0x270] sm:$0xff]   ;;  %v3243_v8 = vld [vmem:[%s4402_s1 + $0x268] sm:$0xff]   ;;  %p176_p4 = scmp.lt.s32.totalorder %s3415_s12, 1  ;;  %s2490_s4 = sshll.u32 %s3415_s12, 3 }
   0xd   : > { %v3236_v1 = vld [vmem:[%s4402_s1 + $0x2f8] sm:$0xff]   ;;  %2890 = vmatprep.subr.bf16.mxu0 %v3235_v0  ;;  %v3240_v5 = vld [vmem:[%s4402_s1 + $0x2f0] sm:$0xff]   ;;  %v3244_v9 = vld [vmem:[%s4402_s1 + $0x2e8] sm:$0xff]   ;;  %p4327_p5 = scmp.lt.s32.totalorder %s2490_s4, 15 }
   0xe   : > { %v3237_v2 = vld [vmem:[%s4402_s1 + $0x238] sm:$0xff]   ;;  %2930 = vmatprep.subr.bf16.mxu1 %v3236_v1  ;;  %v3241_v6 = vld [vmem:[%s4402_s1 + $0x230] sm:$0xff]   ;;  %v3245_v10 = vld [vmem:[%s4402_s1 + $0x228] sm:$0xff]   ;;  %s177_s10 = scalar_select %p176_p4, %s3415_s12, 1 }
   0xf   : > { %v3238_v3 = vld [vmem:[%s4402_s1 + $0x2b8] sm:$0xff]   ;;  %2891 = vmatpush3.bf16.msra.mxu0 %v3237_v2  ;;  %v3242_v7 = vld [vmem:[%s4402_s1 + $0x2b0] sm:$0xff]   ;;  %v3246_v11 = vld [vmem:[%s4402_s1 + $0x2a8] sm:$0xff]   ;;  %s4454_s4 = smov (!%p4327_p5, %s2490_s4), 15 }
  0x10   : > { %2931 = vmatpush3.bf16.msra.mxu1 %v3238_v3  ;;  %2892 = vmatprep.subr.bf16.mxu0 %v3239_v4  ;;  %v3247_v12 = vld [vmem:[%s4402_s1 + $0x260] sm:$0xff]   ;;  %v3251_v16 = vld [vmem:[%s4402_s1 + $0x258] sm:$0xff]   ;;  %v3255_v20 = vld [vmem:[%s4402_s1 + $0x250] sm:$0xff]   ;;  %s3210_s23 = smul.u32 288, %s177_s10  ;;  %s2491_s12 = sshll.u32 %s4454_s4, 2 }
  0x11   : > { %2932 = vmatprep.subr.bf16.mxu1 %v3240_v5  ;;  %v3248_v13 = vld [vmem:[%s4402_s1 + $0x2e0] sm:$0xff]   ;;  %v3252_v17 = vld [vmem:[%s4402_s1 + $0x2d8] sm:$0xff]   ;;  %v3256_v21 = vld [vmem:[%s4402_s1 + $0x2d0] sm:$0xff]   ;;  %s4364_s11 = scalar_lea.vmem %s4404_s3, %s2491_s12 }
  0x12   : > { %v3249_v14 = vld [vmem:[%s4402_s1 + $0x220] sm:$0xff]   ;;  %v3253_v18 = vld [vmem:[%s4402_s1 + $0x218] sm:$0xff]   ;;  %v3257_v22 = vld [vmem:[%s4402_s1 + $0x210] sm:$0xff]   ;;  %s3560_s7 = scalar_lea.vmem %s4401_s0, %s3210_s23 }
  0x13   : > { %2893 = vmatpush3.bf16.msra.mxu0 %v3241_v6  ;;  %v3250_v15 = vld [vmem:[%s4402_s1 + $0x2a0] sm:$0xff]   ;;  %v3254_v19 = vld [vmem:[%s4402_s1 + $0x298] sm:$0xff]   ;;  %v3258_v23 = vld [vmem:[%s4402_s1 + $0x290] sm:$0xff]  }
  0x14   : > { %2933 = vmatpush3.bf16.msra.mxu1 %v3242_v7  ;;  %2894 = vmatprep.subr.bf16.mxu0 %v3243_v8  ;;  %v3259_v24 = vld [vmem:[%s4402_s1 + $0x248] sm:$0xff]   ;;  %v3263_v28 = vld [vmem:[%s4402_s1 + $0x240] sm:$0xff]   ;;  %v3267_v40 = vld [vmem:[%s4402_s1 + $0x378] sm:$0xff]  }
  0x15   : > { %2934 = vmatprep.subr.bf16.mxu1 %v3244_v9  ;;  %v3260_v25 = vld [vmem:[%s4402_s1 + $0x2c8] sm:$0xff]   ;;  %v3264_v29 = vld [vmem:[%s4402_s1 + $0x2c0] sm:$0xff]   ;;  %v3268_v41 = vld [vmem:[%s4402_s1 + $0x3f8] sm:$0xff]  }
  0x16   : > { %v3261_v26 = vld [vmem:[%s4402_s1 + $0x208] sm:$0xff]   ;;  %v3265_v30 = vld [vmem:[%s4402_s1 + $0x200] sm:$0xff]   ;;  %v3269_v42 = vld [vmem:[%s4402_s1 + $0x338] sm:$0xff]  }
  0x17   : > { %2895 = vmatpush3.bf16.msra.mxu0 %v3245_v10  ;;  %v3262_v27 = vld [vmem:[%s4402_s1 + $0x288] sm:$0xff]   ;;  %v3266_v31 = vld [vmem:[%s4402_s1 + $0x280] sm:$0xff]   ;;  %v3270_v43 = vld [vmem:[%s4402_s1 + $0x3b8] sm:$0xff]  }
  0x18   : > { %2935 = vmatpush3.bf16.msra.mxu1 %v3246_v11  ;;  %2896 = vmatprep.subr.bf16.mxu0 %v3247_v12  ;;  %v3569_v32 = vld [vmem:[%s3560_s7 + $0x20] sm:$0xff]  ;;  %v3575_v34 = vld [vmem:[%s3560_s7 + $0x28] sm:$0xff]  ;;  %v3271_v44 = vld [vmem:[%s4402_s1 + $0x370] sm:$0xff]  }
  0x19   : > { %2936 = vmatprep.subr.bf16.mxu1 %v3248_v13  ;;  %v3572_v33 = vld [vmem:[%s3560_s7 + $0x40] sm:$0xff]  ;;  %v3580_v36 = vld [vmem:[%s3560_s7 + $0x48] sm:$0xff]  ;;  %v3272_v45 = vld [vmem:[%s4402_s1 + $0x3f0] sm:$0xff]  }
  0x1a   : > { %v2657_v35 = vcombine.high %v3569_v32, %v3572_v33  ;;  %v2656_v37 = vcombine.low %v3569_v32, %v3572_v33  ;;  %v2659_v38 = vcombine.high %v3575_v34, %v3580_v36  ;;  %v2658_v39 = vcombine.low %v3575_v34, %v3580_v36  ;;  %v3273_v46 = vld [vmem:[%s4402_s1 + $0x330] sm:$0xff]   ;;  %v3613_v48 = vld [vmem:[%s3560_s7 + $0x60] sm:$0xff]  ;;  %v3621_v51 = vld [vmem:[%s3560_s7 + $0x68] sm:$0xff] }
  0x1b   : > { %2897 = vmatpush3.bf16.msra.mxu0 %v3249_v14  ;;  %v3274_v47 = vld [vmem:[%s4402_s1 + $0x3b0] sm:$0xff]   ;;  %v3616_v49 = vld [vmem:[%s3560_s7 + $0x80] sm:$0xff]  ;;  %v3624_v52 = vld [vmem:[%s3560_s7 + $0x88] sm:$0xff]  ;;  %v2761_v54 = vcombine.high %v3572_v33, %v3613_v48  ;;  %v2763_v59 = vcombine.high %v3580_v36, %v3621_v51 }
  0x1c   : > { %2937 = vmatpush3.bf16.msra.mxu1 %v3250_v15  ;;  %2898 = vmatprep.subr.bf16.mxu0 %v3251_v16  ;;  %v2665_v50 = vcombine.high %v3613_v48, %v3616_v49  ;;  %v2664_v53 = vcombine.low %v3613_v48, %v3616_v49  ;;  %v2667_v56 = vcombine.high %v3621_v51, %v3624_v52  ;;  %v3275_v58 = vld [vmem:[%s4402_s1 + $0x368] sm:$0xff]   ;;  %v3279_v0 = vld [vmem:[%s4402_s1 + $0x360] sm:$0xff]   ;;  %v3283_v14 = vld [vmem:[%s4402_s1 + $0x358] sm:$0xff]  }
  0x1d   : > { %2938 = vmatprep.subr.bf16.mxu1 %v3252_v17  ;;  %1399 = vmatprep.mubr.bf16.mxu0 %v2657_v35  ;;  %v2666_v57 = vcombine.low %v3621_v51, %v3624_v52  ;;  %v3276_v61 = vld [vmem:[%s4402_s1 + $0x3e8] sm:$0xff]   ;;  %v3280_v1 = vld [vmem:[%s4402_s1 + $0x3e0] sm:$0xff]   ;;  %v3284_v15 = vld [vmem:[%s4402_s1 + $0x3d8] sm:$0xff]  }
  0x1e   : > { %1464 = vmatprep.mubr.bf16.mxu1 %v2659_v38  ;;  %v3277_v62 = vld [vmem:[%s4402_s1 + $0x328] sm:$0xff]   ;;  %v3281_v2 = vld [vmem:[%s4402_s1 + $0x320] sm:$0xff]  }
  0x1f   : > { %2899 = vmatpush3.bf16.msra.mxu0 %v3253_v18  ;;  %v3278_v63 = vld [vmem:[%s4402_s1 + $0x3a8] sm:$0xff]   ;;  %v3282_v3 = vld [vmem:[%s4402_s1 + $0x3a0] sm:$0xff]   ;;  %v3285_v18 = vld [vmem:[%s4402_s1 + $0x318] sm:$0xff]  }
  0x20   : > { %2939 = vmatpush3.bf16.msra.mxu1 %v3254_v19  ;;  %2900 = vmatprep.subr.bf16.mxu0 %v3255_v20  ;;  %v3665_v4 = vld [vmem:[%s3560_s7 + $0xa0] sm:$0xff]  ;;  %v3671_v6 = vld [vmem:[%s3560_s7 + $0xa8] sm:$0xff]  ;;  %v3286_v19 = vld [vmem:[%s4402_s1 + $0x398] sm:$0xff]  }
  0x21   : > { %2940 = vmatprep.subr.bf16.mxu1 %v3256_v21  ;;  %v3668_v5 = vld [vmem:[%s3560_s7 + $0xc0] sm:$0xff]  ;;  %v3674_v7 = vld [vmem:[%s3560_s7 + $0xc8] sm:$0xff]  ;;  %v3287_v20 = vld [vmem:[%s4402_s1 + $0x350] sm:$0xff]  }
  0x22   : > { %v2673_v10 = vcombine.high %v3665_v4, %v3668_v5  ;;  %v2675_v11 = vcombine.high %v3671_v6, %v3674_v7  ;;  %v2672_v12 = vcombine.low %v3665_v4, %v3668_v5  ;;  %v2674_v13 = vcombine.low %v3671_v6, %v3674_v7  ;;  %v3288_v21 = vld [vmem:[%s4402_s1 + $0x3d0] sm:$0xff]  }
  0x23   : > { %2901 = vmatpush3.bf16.msra.mxu0 %v3257_v22  ;;  %v3289_v22 = vld [vmem:[%s4402_s1 + $0x310] sm:$0xff]  }
  0x24   : > { %2941 = vmatpush3.bf16.msra.mxu1 %v3258_v23  ;;  %2902 = vmatprep.subr.bf16.mxu0 %v3259_v24  ;;  %v3290_v23 = vld [vmem:[%s4402_s1 + $0x390] sm:$0xff]   ;;  %v3717_v24 = vld [vmem:[%s3560_s7 + $0xe0] sm:$0xff] }
  0x25   : > { %2942 = vmatprep.subr.bf16.mxu1 %v3260_v25  ;;  %v3720_v25 = vld [vmem:[%s3560_s7 + $0x100] sm:$0xff] }
  0x27   : > { %2903 = vmatpush3.bf16.msra.mxu0 %v3261_v26  ;;  %v3723_v26 = vld [vmem:[%s3560_s7 + $0xe8] sm:$0xff] }
  0x28   : > { %2943 = vmatpush3.bf16.msra.mxu1 %v3262_v27  ;;  %2904 = vmatprep.subr.bf16.mxu0 %v3263_v28  ;;  %v2681_v27 = vcombine.high %v3717_v24, %v3720_v25  ;;  %v3728_v28 = vld [vmem:[%s3560_s7 + $0x108] sm:$0xff] }
  0x29   : > { %2944 = vmatprep.subr.bf16.mxu1 %v3264_v29  ;;  %v2680_v29 = vcombine.low %v3717_v24, %v3720_v25  ;;  %v2682_v35 = vcombine.low %v3723_v26, %v3728_v28 }
  0x2b   : > { %2905 = vmatpush3.bf16.msra.mxu0 %v3265_v30 }
  0x2c   : > { %2945 = vmatpush3.bf16.msra.mxu1 %v3266_v31  ;;  %2970 = vmatprep.subr.bf16.mxu0 %v3267_v40  ;;  %v2683_v31 = vcombine.high %v3723_v26, %v3728_v28  ;;  %v3292_v40 = vld [vmem:[%s4402_s1 + $0x3c8] sm:$0xff]  }
  0x2d   : > { %3010 = vmatprep.subr.bf16.mxu1 %v3268_v41 }
  0x2e   : > { %1400 = vmatmul.mubr.bf16.vlgmr.msra.gmra.mxu0 %v2656_v37  ;;  %v3291_v37 = vld [vmem:[%s4402_s1 + $0x348] sm:$0xff]  }
  0x2f   : > { %1465 = vmatmul.mubr.bf16.vlgmr.msra.gmra.mxu1 %v2658_v39  ;;  %2971 = vmatpush3.bf16.msra.mxu0 %v3269_v42  ;;  %v3293_v42 = vld [vmem:[%s4402_s1 + $0x308] sm:$0xff]  }
  0x30   : > { %3011 = vmatpush3.bf16.msra.mxu1 %v3270_v43  ;;  %2972 = vmatprep.subr.bf16.mxu0 %v3271_v44  ;;  %v3294_v43 = vld [vmem:[%s4402_s1 + $0x388] sm:$0xff]   ;;  %v3295_v44 = vld [vmem:[%s4402_s1 + $0x340] sm:$0xff]  }
  0x31   : > { %3012 = vmatprep.subr.bf16.mxu1 %v3272_v45  ;;  %1407 = vmatprep.mubr.bf16.mxu0 %v2665_v50  ;;  %v3296_v45 = vld [vmem:[%s4402_s1 + $0x3c0] sm:$0xff]   ;;  %v200_v50 = vld [vmem:[%s3560_s7 + $0x30] sm:$0x11] }
  0x32   : > { %1472 = vmatprep.mubr.bf16.mxu1 %v2667_v56  ;;  %v2496_v56 = vcombine.low %v3569_v32, %v200_v50 }
  0x33   : > { %2973 = vmatpush3.bf16.msra.mxu0 %v3273_v46  ;;  %v3297_v46 = vld [vmem:[%s4402_s1 + $0x300] sm:$0xff]  }
  0x34   : > { %3013 = vmatpush3.bf16.msra.mxu1 %v3274_v47  ;;  %2974 = vmatprep.subr.bf16.mxu0 %v3275_v58  ;;  %v3298_v47 = vld [vmem:[%s4402_s1 + $0x380] sm:$0xff]  }
  0x35   : > { %3014 = vmatprep.subr.bf16.mxu1 %v3276_v61 }
  0x36   : > { %1408 = vmatmul.mubr.bf16.gmra.mxu0 %v2664_v53  ;;  %v204_v53 = vld [vmem:[%s3560_s7 + $0x50] sm:$0x11] }
  0x37   : > { %1473 = vmatmul.mubr.bf16.gmra.mxu1 %v2666_v57  ;;  %2975 = vmatpush3.bf16.msra.mxu0 %v3277_v62  ;;  %v2497_v57 = vcombine.high %v3569_v32, %v200_v50  ;;  %v2500_v58 = vcombine.low %v3572_v33, %v204_v53  ;;  %v2501_v61 = vcombine.high %v3572_v33, %v204_v53  ;;  %v201_v62 = vld [vmem:[%s3560_s7 + $0x38] sm:$0x11]  ;;  %v387_v32 = vshrl.u32 %v2496_v56, 16 }
  0x38   : > { %3015 = vmatpush3.bf16.msra.mxu1 %v3278_v63  ;;  %2976 = vmatprep.subr.bf16.mxu0 %v3279_v0  ;;  %v205_v63 = vld [vmem:[%s3560_s7 + $0x58] sm:$0x11]  ;;  %v2498_v0 = vcombine.low %v3575_v34, %v201_v62 }
  0x39   : > { %3016 = vmatprep.subr.bf16.mxu1 %v3280_v1  ;;  %1415 = vmatprep.mubr.bf16.mxu0 %v2673_v10  ;;  %v2499_v1 = vcombine.high %v3575_v34, %v201_v62  ;;  %v3307_v10 = vld [vmem:[%s4402_s1 + $0x78] sm:$0xff]  }
  0x3a   : > { %1480 = vmatprep.mubr.bf16.mxu1 %v2675_v11  ;;  %v389_v11 = vshll.u32 %v2496_v56, 16  ;;  %v3308_v34 = vld [vmem:[%s4402_s1 + $0xf8] sm:$0xff]  }
  0x3b   : > { %2977 = vmatpush3.bf16.msra.mxu0 %v3281_v2  ;;  %v2502_v2 = vcombine.low %v3580_v36, %v205_v63 }
  0x3c   : > { %3017 = vmatpush3.bf16.msra.mxu1 %v3282_v3  ;;  %2978 = vmatprep.subr.bf16.mxu0 %v3283_v14  ;;  %v2503_v3 = vcombine.high %v3580_v36, %v205_v63  ;;  %v415_v14 = vshrl.u32 %v2500_v58, 16 }
  0x3d   : > { %3018 = vmatprep.subr.bf16.mxu1 %v3284_v15  ;;  %v417_v15 = vshll.u32 %v2500_v58, 16  ;;  %v3309_v58 = vld [vmem:[%s4402_s1 + $0x38] sm:$0xff]  }
  0x3e   : > { %1416 = vmatmul.mubr.bf16.gmra.mxu0 %v2672_v12  ;;  %v394_v12 = vshrl.u32 %v2497_v57, 16 }
  0x3f   : > { %1481 = vmatmul.mubr.bf16.gmra.mxu1 %v2674_v13  ;;  %2979 = vmatpush3.bf16.msra.mxu0 %v3285_v18  ;;  %v396_v13 = vshll.u32 %v2497_v57, 16  ;;  %v422_v18 = vshrl.u32 %v2501_v61, 16 }
  0x40   : > { %3019 = vmatpush3.bf16.msra.mxu1 %v3286_v19  ;;  %2980 = vmatprep.subr.bf16.mxu0 %v3287_v20  ;;  %v424_v19 = vshll.u32 %v2501_v61, 16  ;;  %v391_v20 = vrot.slane %v389_v11, 1 }
  0x41   : > { %3020 = vmatprep.subr.bf16.mxu1 %v3288_v21  ;;  %1423 = vmatprep.mubr.bf16.mxu0 %v2681_v27  ;;  %v398_v21 = vrot.slane %v396_v13, 1  ;;  %v419_v27 = vrot.slane %v417_v15, 1  ;;  %v212_v13 = vld [vmem:[%s3560_s7 + $0x90] sm:$0x11]  ;;  %v209_v15 = vld [vmem:[%s3560_s7 + $0x78] sm:$0x11] }
  0x42   : > { %1488 = vmatprep.mubr.bf16.mxu1 %v2683_v31  ;;  %v408_v31 = vshrl.u32 %v2499_v1, 16  ;;  %v3790_v53 = vor.u32 %v391_v20, %v387_v32  ;;  %v208_v32 = vld [vmem:[%s3560_s7 + $0x70] sm:$0x11] }
  0x43   : > { %2981 = vmatpush3.bf16.msra.mxu0 %v3289_v22  ;;  %v401_v22 = vshrl.u32 %v2498_v0, 16  ;;  %v3792_v56 = vor.u32 %v419_v27, %v415_v14  ;;  %v2505_v14 = vcombine.high %v3613_v48, %v208_v32  ;;  %v3313_v20 = vld [vmem:[%s4402_s1 + $0x30] sm:$0xff]  }
  0x44   : > { %3021 = vmatpush3.bf16.msra.mxu1 %v3290_v23  ;;  %2982 = vmatprep.subr.bf16.mxu0 %v3291_v37  ;;  %v403_v23 = vshll.u32 %v2498_v0, 16  ;;  %v3786_v37 = vor.u32 %v398_v21, %v394_v12  ;;  %v3311_v0 = vld [vmem:[%s4402_s1 + $0x70] sm:$0xff]   ;;  %v2509_v21 = vcombine.high %v3616_v49, %v212_v13 }
  0x45   : > { %3022 = vmatprep.subr.bf16.mxu1 %v3292_v40  ;;  %v3312_v12 = vld [vmem:[%s4402_s1 + $0xf0] sm:$0xff]   ;;  %v450_v27 = vshrl.u32 %v2505_v14, 16 }
  0x46   : > { %1424 = vmatmul.mubr.bf16.gmra.mxu0 %v2680_v29  ;;  %v426_v29 = vrot.slane %v424_v19, 1  ;;  %v405_v40 = vrot.slane %v403_v23, 1  ;;  %v2504_v19 = vcombine.low %v3613_v48, %v208_v32 }
  0x47   : > { %1489 = vmatmul.mubr.bf16.gmra.mxu1 %v2682_v35  ;;  %2983 = vmatpush3.bf16.msra.mxu0 %v3293_v42  ;;  %v410_v35 = vshll.u32 %v2499_v1, 16  ;;  %v429_v42 = vshrl.u32 %v2502_v2, 16  ;;  %v2660_v1 = vcombine.low %v3790_v53, %v3792_v56 }
  0x48   : > { %3023 = vmatpush3.bf16.msra.mxu1 %v3294_v43  ;;  %2984 = vmatprep.subr.bf16.mxu0 %v3295_v44  ;;  %v431_v43 = vshll.u32 %v2502_v2, 16  ;;  %v3788_v44 = vor.u32 %v426_v29, %v422_v18  ;;  %v3794_v57 = vor.u32 %v405_v40, %v401_v22  ;;  %v213_v18 = vld [vmem:[%s3560_s7 + $0x98] sm:$0x11]  ;;  %v2507_v22 = vcombine.high %v3621_v51, %v209_v15  ;;  %v3323_v40 = vld [vmem:[%s4402_s1 + $0x68] sm:$0xff]  }
  0x49   : > { %3024 = vmatprep.subr.bf16.mxu1 %v3296_v45  ;;  %v412_v45 = vrot.slane %v410_v35, 1  ;;  %v2511_v23 = vcombine.high %v3624_v52, %v213_v18  ;;  %v452_v29 = vshll.u32 %v2505_v14, 16  ;;  %v443_v35 = vshrl.u32 %v2504_v19, 16 }
  0x4a   : > { %v433_v50 = vrot.slane %v431_v43, 1  ;;  %v2661_v61 = vcombine.low %v3786_v37, %v3788_v44  ;;  %v478_v43 = vshrl.u32 %v2509_v21, 16 }
  0x4b   : > { %2985 = vmatpush3.bf16.msra.mxu0 %v3297_v46  ;;  %v436_v46 = vshrl.u32 %v2503_v3, 16  ;;  %v3801_v62 = vor.u32 %v412_v45, %v408_v31  ;;  %v2508_v31 = vcombine.low %v3616_v49, %v212_v13  ;;  %v480_v45 = vshll.u32 %v2509_v21, 16 }
  0x4c   : > { %3025 = vmatpush3.bf16.msra.mxu1 %v3298_v47  ;;  %3050 = vmatprep.subr.bf16.mxu0 %v3307_v10  ;;  %v438_v47 = vshll.u32 %v2503_v3, 16  ;;  %v3808_v2 = vor.u32 %v433_v50, %v429_v42  ;;  %v3310_v10 = vld [vmem:[%s4402_s1 + $0xb8] sm:$0xff]   ;;  %v3314_v42 = vld [vmem:[%s4402_s1 + $0xb0] sm:$0xff]   ;;  %v454_v50 = vrot.slane %v452_v29, 1  ;;  %v2506_v21 = vcombine.low %v3621_v51, %v209_v15  ;;  %v3327_v15 = vld [vmem:[%s4402_s1 + $0x60] sm:$0xff]  }
  0x4d   : > { %3090 = vmatprep.subr.bf16.mxu1 %v3308_v34  ;;  %1529 = vmatprep.mubr.bf16.mxu0 %v2661_v61  ;;  %v494_v61 = vshll.u32 %v2511_v23, 16  ;;  %v471_v32 = vshrl.u32 %v2508_v31, 16  ;;  %v473_v13 = vshll.u32 %v2508_v31, 16 }
  0x4e   : > { %v440_v63 = vrot.slane %v438_v47, 1  ;;  %1530 = vmatmul.mubr.bf16.vlgmr.msra.gmra.mxu0 %v2660_v1  ;;  %v2662_v11 = vcombine.low %v3794_v57, %v3808_v2  ;;  %v466_v47 = vshll.u32 %v2507_v22, 16  ;;  %v3841_v14 = vor.u32 %v454_v50, %v450_v27 }
  0x4f   : > { %3051 = vmatpush3.bf16.msra.mxu0 %v3309_v58  ;;  %v492_v58 = vshrl.u32 %v2511_v23, 16  ;;  %v457_v29 = vshrl.u32 %v2506_v21, 16  ;;  %v459_v31 = vshll.u32 %v2506_v21, 16  ;;  %v220_v21 = vld [vmem:[%s3560_s7 + $0xd0] sm:$0x11] }
  0x50   : > { %v3810_v3 = vor.u32 %v440_v63, %v436_v46  ;;  %3052 = vmatprep.subr.bf16.mxu0 %v3311_v0  ;;  %v464_v46 = vshrl.u32 %v2507_v22, 16  ;;  %v445_v63 = vshll.u32 %v2504_v19, 16  ;;  %v482_v0 = vrot.slane %v480_v45, 1 }
  0x51   : > { %v468_v1 = vrot.slane %v466_v47, 1  ;;  %v2510_v22 = vcombine.low %v3624_v52, %v213_v18  ;;  %v3326_v18 = vld [vmem:[%s4402_s1 + $0xa8] sm:$0xff]   ;;  %v3329_v47 = vld [vmem:[%s4402_s1 + $0x20] sm:$0xff]   ;;  %v2516_v50 = vcombine.low %v3668_v5, %v220_v21 }
  0x52   : > { %v2663_v34 = vcombine.low %v3801_v62, %v3810_v3  ;;  %v447_v41 = vrot.slane %v445_v63, 1  ;;  %v3850_v19 = vor.u32 %v482_v0, %v478_v43  ;;  %v3339_v0 = vld [vmem:[%s4402_s1 + $0x58] sm:$0xff]  }
  0x53   : > { %3053 = vmatpush3.bf16.msra.mxu0 %v3313_v20  ;;  %v3852_v20 = vor.u32 %v468_v1, %v464_v46  ;;  %v485_v45 = vshrl.u32 %v2510_v22, 16  ;;  %v487_v46 = vshll.u32 %v2510_v22, 16  ;;  %v2517_v22 = vcombine.high %v3668_v5, %v220_v21 }
  0x54   : > { %1594 = vmatprep.mubr.bf16.mxu1 %v2663_v34  ;;  %v496_v34 = vrot.slane %v494_v61, 1  ;;  %3054 = vmatprep.subr.bf16.mxu0 %v3323_v40  ;;  %v3860_v27 = vor.u32 %v447_v41, %v443_v35  ;;  %v2669_v40 = vcombine.low %v3841_v14, %v3850_v19  ;;  %v3328_v41 = vld [vmem:[%s4402_s1 + $0xe0] sm:$0xff]   ;;  %v527_v21 = vshrl.u32 %v2516_v50, 16 }
  0x55   : > { %1595 = vmatmul.mubr.bf16.vlgmr.msra.gmra.mxu1 %v2662_v11  ;;  %v3324_v11 = vld [vmem:[%s4402_s1 + $0xe8] sm:$0xff]   ;;  %v489_v63 = vrot.slane %v487_v46, 1  ;;  %v3340_v46 = vld [vmem:[%s4402_s1 + $0xd8] sm:$0xff]  }
  0x56   : > { %3091 = vmatpush3.bf16.msra.mxu1 %v3310_v10  ;;  %v3325_v10 = vld [vmem:[%s4402_s1 + $0x28] sm:$0xff]   ;;  %v3858_v23 = vor.u32 %v496_v34, %v492_v58  ;;  %1537 = vmatprep.mubr.bf16.mxu0 %v2669_v40  ;;  %v216_v34 = vld [vmem:[%s3560_s7 + $0xb0] sm:$0x11] }
  0x57   : > { %3092 = vmatprep.subr.bf16.mxu1 %v3312_v12  ;;  %v475_v12 = vrot.slane %v473_v13, 1  ;;  %3055 = vmatpush3.bf16.msra.mxu0 %v3325_v10  ;;  %v3330_v13 = vld [vmem:[%s4402_s1 + $0xa0] sm:$0xff]   ;;  %v3896_v10 = vor.u32 %v489_v63, %v485_v45  ;;  %v2512_v40 = vcombine.low %v3665_v4, %v216_v34 }
  0x58   : > { %v2671_v35 = vcombine.low %v3852_v20, %v3858_v23  ;;  %3056 = vmatprep.subr.bf16.mxu0 %v3327_v15  ;;  %v221_v15 = vld [vmem:[%s3560_s7 + $0xd8] sm:$0x11] }
  0x59   : > { %v3864_v43 = vor.u32 %v475_v12, %v471_v32  ;;  %v2513_v12 = vcombine.high %v3665_v4, %v216_v34  ;;  %v499_v39 = vshrl.u32 %v2512_v40, 16  ;;  %v501_v17 = vshll.u32 %v2512_v40, 16 }
  0x5a   : > { %3093 = vmatpush3.bf16.msra.mxu1 %v3314_v42  ;;  %v461_v42 = vrot.slane %v459_v31, 1  ;;  %1602 = vmatprep.mubr.bf16.mxu1 %v2671_v35  ;;  %v2519_v31 = vcombine.high %v3674_v7, %v221_v15 }
  0x5b   : > { %3094 = vmatprep.subr.bf16.mxu1 %v3324_v11  ;;  %v2668_v61 = vcombine.low %v3860_v27, %v3864_v43  ;;  %v217_v11 = vld [vmem:[%s3560_s7 + $0xb8] sm:$0x11]  ;;  %3057 = vmatpush3.bf16.msra.mxu0 %v3329_v47  ;;  %v508_v35 = vshll.u32 %v2513_v12, 16  ;;  %v536_v47 = vshll.u32 %v2517_v22, 16 }
  0x5c   : > { %v3888_v32 = vor.u32 %v461_v42, %v457_v29  ;;  %v2515_v29 = vcombine.high %v3671_v6, %v217_v11  ;;  %v534_v42 = vshrl.u32 %v2517_v22, 16  ;;  %3058 = vmatprep.subr.bf16.mxu0 %v3339_v0  ;;  %v548_v1 = vshrl.u32 %v2519_v31, 16  ;;  %v3343_v22 = vld [vmem:[%s4402_s1 + $0x50] sm:$0xff]  }
  0x5d   : > { %1538 = vmatmul.mubr.bf16.gmra.mxu0 %v2668_v61  ;;  %v510_v34 = vrot.slane %v508_v35, 1  ;;  %v550_v58 = vshll.u32 %v2519_v31, 16  ;;  %v538_v0 = vrot.slane %v536_v47, 1  ;;  %v2514_v30 = vcombine.low %v3671_v6, %v217_v11 }
  0x5e   : > { %3095 = vmatpush3.bf16.msra.mxu1 %v3326_v18  ;;  %v2670_v45 = vcombine.low %v3888_v32, %v3896_v10  ;;  %v506_v18 = vshrl.u32 %v2513_v12, 16  ;;  %v520_v61 = vshrl.u32 %v2515_v29, 16  ;;  %v522_v63 = vshll.u32 %v2515_v29, 16  ;;  %v3342_v12 = vld [vmem:[%s4402_s1 + $0x98] sm:$0xff]  }
  0x5f   : > { %3096 = vmatprep.subr.bf16.mxu1 %v3328_v41  ;;  %v3341_v41 = vld [vmem:[%s4402_s1 + $0x18] sm:$0xff]   ;;  %v552_v31 = vrot.slane %v550_v58, 1  ;;  %v3925_v35 = vor.u32 %v538_v0, %v534_v42  ;;  %v503_v11 = vrot.slane %v501_v17, 1  ;;  %v515_v47 = vshll.u32 %v2514_v30, 16  ;;  %v3346_v42 = vld [vmem:[%s4402_s1 + $0x90] sm:$0xff]  }
  0x60   : > { %1603 = vmatmul.mubr.bf16.gmra.mxu1 %v2670_v45  ;;  %v524_v38 = vrot.slane %v522_v63, 1  ;;  %3059 = vmatpush3.bf16.msra.mxu0 %v3341_v41  ;;  %v3920_v29 = vor.u32 %v510_v34, %v506_v18  ;;  %v529_v45 = vshll.u32 %v2516_v50, 16  ;;  %v2518_v41 = vcombine.low %v3674_v7, %v221_v15  ;;  %v3345_v18 = vld [vmem:[%s4402_s1 + $0x10] sm:$0xff]   ;;  %v3355_v34 = vld [vmem:[%s4402_s1 + $0x48] sm:$0xff]  }
  0x61   : > { %3060 = vmatprep.subr.bf16.mxu0 %v3343_v22  ;;  %v3933_v58 = vor.u32 %v552_v31, %v548_v1  ;;  %v228_v22 = vld [vmem:[%s3560_s7 + $0x110] sm:$0x11]  ;;  %v3356_v31 = vld [vmem:[%s4402_s1 + $0xc8] sm:$0xff]  }
  0x62   : > { %3097 = vmatpush3.bf16.msra.mxu1 %v3330_v13  ;;  %v3344_v13 = vld [vmem:[%s4402_s1 + $0xd0] sm:$0xff]   ;;  %v3927_v40 = vor.u32 %v524_v38, %v520_v61  ;;  %v531_v50 = vrot.slane %v529_v45, 1  ;;  %v2677_v17 = vcombine.low %v3920_v29, %v3925_v35  ;;  %v3940_v38 = vor.u32 %v503_v11, %v499_v39 }
  0x63   : > { %3098 = vmatprep.subr.bf16.mxu1 %v3340_v46  ;;  %v513_v46 = vshrl.u32 %v2514_v30, 16  ;;  %v541_v15 = vshrl.u32 %v2518_v41, 16  ;;  %v543_v61 = vshll.u32 %v2518_v41, 16  ;;  %v517_v30 = vrot.slane %v515_v47, 1  ;;  %v225_v47 = vld [vmem:[%s3560_s7 + $0xf8] sm:$0x11] }
  0x64   : > { %3061 = vmatpush3.bf16.msra.mxu0 %v3345_v18  ;;  %v2679_v1 = vcombine.low %v3927_v40, %v3933_v58  ;;  %v3944_v63 = vor.u32 %v531_v50, %v527_v21  ;;  %1545 = vmatprep.mubr.bf16.mxu0 %v2677_v17  ;;  %v2525_v50 = vcombine.high %v3720_v25, %v228_v22  ;;  %v229_v17 = vld [vmem:[%s3560_s7 + $0x118] sm:$0x11] }
  0x65   : > { %v545_v0 = vrot.slane %v543_v61, 1  ;;  %v3964_v41 = vor.u32 %v517_v30, %v513_v46  ;;  %v2523_v45 = vcombine.high %v3723_v26, %v225_v47  ;;  %v2527_v39 = vcombine.high %v3728_v28, %v229_v17  ;;  %3062 = vmatprep.subr.bf16.mxu0 %v3355_v34 }
  0x66   : > { %3099 = vmatpush3.bf16.msra.mxu1 %v3342_v12  ;;  %v224_v12 = vld [vmem:[%s3560_s7 + $0xf0] sm:$0x11]  ;;  %1610 = vmatprep.mubr.bf16.mxu1 %v2679_v1  ;;  %v2676_v11 = vcombine.low %v3940_v38, %v3944_v63  ;;  %v766_v46 = vshrl.u32 %v2525_v50, 16  ;;  %v768_v30 = vshll.u32 %v2525_v50, 16  ;;  %v2524_v34 = vcombine.low %v3720_v25, %v228_v22 }
  0x67   : > { %3100 = vmatprep.subr.bf16.mxu1 %v3344_v13  ;;  %v2521_v18 = vcombine.high %v3717_v24, %v224_v12  ;;  %v3970_v61 = vor.u32 %v545_v0, %v541_v15  ;;  %v2520_v1 = vcombine.low %v3717_v24, %v224_v12  ;;  %v576_v16 = vshrl.u32 %v2523_v45, 16 }
  0x68   : > { %1546 = vmatmul.mubr.bf16.gmra.mxu0 %v2676_v11  ;;  %v578_v60 = vshll.u32 %v2523_v45, 16  ;;  %v780_v15 = vshrl.u32 %v2527_v39, 16  ;;  %v770_v8 = vrot.slane %v768_v30, 1  ;;  %v782_v12 = vshll.u32 %v2527_v39, 16  ;;  %v3359_v45 = vld [vmem:[%s4402_s1 + $0x40] sm:$0xff]  }
  0x69   : > { %v562_v13 = vshrl.u32 %v2521_v18, 16  ;;  %v564_v21 = vshll.u32 %v2521_v18, 16  ;;  %v2678_v9 = vcombine.low %v3964_v41, %v3970_v61  ;;  %v555_v11 = vshrl.u32 %v2520_v1, 16 }
  0x6a   : > { %3101 = vmatpush3.bf16.msra.mxu1 %v3346_v42  ;;  %v3357_v42 = vld [vmem:[%s4402_s1 + $0x8] sm:$0xff]   ;;  %v580_v18 = vrot.slane %v578_v60, 1  ;;  %v557_v55 = vshll.u32 %v2520_v1, 16  ;;  %v2522_v50 = vcombine.low %v3723_v26, %v225_v47  ;;  %v771_v39 = vor.u32 %v770_v8, %v766_v46 }
  0x6b   : > { %3102 = vmatprep.subr.bf16.mxu1 %v3356_v31  ;;  %v566_v0 = vrot.slane %v564_v21, 1  ;;  %1611 = vmatmul.mubr.bf16.gmra.mxu1 %v2678_v9  ;;  %v3358_v31 = vld [vmem:[%s4402_s1 + $0x88] sm:$0xff]   ;;  %v784_v30 = vrot.slane %v782_v12, 1  ;;  %v2526_v60 = vcombine.low %v3728_v28, %v229_v17  ;;  %v3360_v9 = vld [vmem:[%s4402_s1 + $0xc0] sm:$0xff]   ;;  %v759_v47 = vshrl.u32 %v2524_v34, 16 }
  0x6c   : > { %3063 = vmatpush3.bf16.msra.mxu0 %v3357_v42  ;;  %v3994_v25 = vor.u32 %v580_v18, %v576_v16  ;;  %v559_v22 = vrot.slane %v557_v55, 1  ;;  %v761_v1 = vshll.u32 %v2524_v34, 16  ;;  %v569_v28 = vshrl.u32 %v2522_v50, 16  ;;  %v3362_v12 = vld [vmem:[%s4402_s1 + $0x80] sm:$0xff]  }
  0x6d   : > { %v3988_v21 = vor.u32 %v566_v0, %v562_v13  ;;  %3064 = vmatprep.subr.bf16.mxu0 %v3359_v45  ;;  %v3361_v13 = vld [vmem:[%s4402_s1] sm:$0xff]   ;;  %v785_v46 = vor.u32 %v784_v30, %v780_v15  ;;  %v571_v17 = vshll.u32 %v2522_v50, 16  ;;  %v773_v55 = vshrl.u32 %v2526_v60, 16  ;;  %v4012_v45 = vld [vmem:[%s3560_s7 + $0x8] sm:$0xff] }
  0x6e   : > { %3103 = vmatpush3.bf16.msra.mxu1 %v3358_v31  ;;  %v4000_v42 = vor.u32 %v559_v22, %v555_v11  ;;  %v763_v16 = vrot.slane %v761_v1, 1  ;;  %v775_v0 = vshll.u32 %v2526_v60, 16  ;;  %v4007_v15 = vld [vmem:[%s3560_s7] sm:$0xff]  ;;  %v2774_v11 = vcombine.low %v3896_v10, %v3964_v41 }
  0x6f   : > { %v2685_v8 = vcombine.low %v3988_v21, %v771_v39  ;;  %3104 = vmatprep.subr.bf16.mxu1 %v3360_v9  ;;  %v2687_v18 = vcombine.low %v3994_v25, %v785_v46  ;;  %v573_v34 = vrot.slane %v571_v17, 1  ;;  %v3399_v30 = vld [vmem:[%s3560_s7 + $0x20] sm:$0xff]  ;;  %v3363_v9 = vld [vmem:[%s4402_s1 + $0x178] sm:$0xff]  }
  0x70   : > { %3065 = vmatpush3.bf16.msra.mxu0 %v3361_v13  ;;  %v764_v50 = vor.u32 %v763_v16, %v759_v47  ;;  %v777_v31 = vrot.slane %v775_v0, 1  ;;  %v2753_v60 = vcombine.high %v4007_v15, %v3399_v30  ;;  %v3364_v47 = vld [vmem:[%s4402_s1 + $0x1f8] sm:$0xff]   ;;  %v2780_v13 = vcombine.low %v3944_v63, %v4000_v42 }
  0x71   : > { %1553 = vmatprep.mubr.bf16.mxu0 %v2685_v8  ;;  %1618 = vmatprep.mubr.bf16.mxu1 %v2687_v18  ;;  %v4014_v39 = vor.u32 %v573_v34, %v569_v28  ;;  %v3400_v8 = vld [vmem:[%s3560_s7 + $0x28] sm:$0xff]  ;;  %v2752_v16 = vcombine.low %v4007_v15, %v3399_v30  ;;  %v3366_v18 = vld [vmem:[%s4402_s1 + $0x1b8] sm:$0xff]   ;;  %v3368_v34 = vld [vmem:[%s4402_s1 + $0x1f0] sm:$0xff]  }
  0x72   : > { %3105 = vmatpush3.bf16.msra.mxu1 %v3362_v12  ;;  %v2684_v22 = vcombine.low %v4000_v42, %v764_v50  ;;  %v778_v1 = vor.u32 %v777_v31, %v773_v55  ;;  %v2755_v46 = vcombine.high %v4012_v45, %v3400_v8  ;;  %3130 = vmatprep.subr.bf16.mxu0 %v3363_v9  ;;  %v3365_v55 = vld [vmem:[%s4402_s1 + $0x138] sm:$0xff]   ;;  %v3367_v12 = vld [vmem:[%s4402_s1 + $0x170] sm:$0xff]   ;;  %v3371_v31 = vld [vmem:[%s4402_s1 + $0x168] sm:$0xff]  }
  0x73   : > { %v2782_v28 = vcombine.low %v3970_v61, %v4014_v39  ;;  %3170 = vmatprep.subr.bf16.mxu1 %v3364_v47  ;;  %v2754_v0 = vcombine.low %v4012_v45, %v3400_v8  ;;  %v3369_v50 = vld [vmem:[%s4402_s1 + $0x130] sm:$0xff]   ;;  %v3375_v9 = vld [vmem:[%s4402_s1 + $0x160] sm:$0xff]   ;;  %v4406_v8 = vcombine.high %v3616_v49, %v3665_v4 }
  0x74   : > { %1554 = vmatmul.mubr.bf16.gmra.mxu0 %v2684_v22  ;;  %v2686_v17 = vcombine.low %v4014_v39, %v778_v1  ;;  %v3370_v30 = vld [vmem:[%s4402_s1 + $0x1b0] sm:$0xff]   ;;  %v4405_v22 = vcombine.low %v3572_v33, %v3613_v48  ;;  %v3376_v1 = vld [vmem:[%s4402_s1 + $0x1e0] sm:$0xff]   ;;  %v3379_v33 = vld [vmem:[%s4402_s1 + $0x158] sm:$0xff]  }
  0x75   : > { %2107 = vmatprep.mubr.bf16.mxu0 %v2753_v60  ;;  %v3373_v60 = vld [vmem:[%s4402_s1 + $0x128] sm:$0xff]   ;;  %v3377_v47 = vld [vmem:[%s4402_s1 + $0x120] sm:$0xff]  }
  0x76   : > { %1619 = vmatmul.mubr.bf16.gmra.mxu1 %v2686_v17  ;;  %v3378_v48 = vld [vmem:[%s4402_s1 + $0x1a0] sm:$0xff]   ;;  %v4408_v17 = vcombine.high %v3624_v52, %v3671_v6 }
  0x77   : > { %2172 = vmatprep.mubr.bf16.mxu1 %v2755_v46  ;;  %v4407_v46 = vcombine.low %v3580_v36, %v3621_v51  ;;  %v3380_v36 = vld [vmem:[%s4402_s1 + $0x1d8] sm:$0xff]  }
  0x78   : > { %v3381_v51 = vld [vmem:[%s4402_s1 + $0x118] sm:$0xff]  }
  0x7c   : > { %2108 = vmatmul.mubr.bf16.vlgmr.msra.gmra.mxu0 %v2752_v16  ;;  %v3383_v16 = vld [vmem:[%s4402_s1 + $0x150] sm:$0xff]  }
  0x7d   : > { %3131 = vmatpush3.bf16.msra.mxu0 %v3365_v55  ;;  %2115 = vmatprep.mubr.bf16.mxu0 %v2761_v54  ;;  %v3372_v54 = vld [vmem:[%s4402_s1 + $0x1e8] sm:$0xff]   ;;  %v3382_v55 = vld [vmem:[%s4402_s1 + $0x198] sm:$0xff]  }
  0x7e   : > { %2173 = vmatmul.mubr.bf16.vlgmr.msra.gmra.mxu1 %v2754_v0  ;;  %3132 = vmatprep.subr.bf16.mxu0 %v3367_v12  ;;  %v4409_v0 = vcombine.low %v3616_v49, %v3665_v4  ;;  %v3384_v12 = vld [vmem:[%s4402_s1 + $0x1d0] sm:$0xff]   ;;  %v3387_v49 = vld [vmem:[%s4402_s1 + $0x148] sm:$0xff]  }
  0x7f   : > { %3171 = vmatpush3.bf16.msra.mxu1 %v3366_v18  ;;  %2180 = vmatprep.mubr.bf16.mxu1 %v2763_v59  ;;  %v3374_v59 = vld [vmem:[%s4402_s1 + $0x1a8] sm:$0xff]   ;;  %v3385_v18 = vld [vmem:[%s4402_s1 + $0x110] sm:$0xff]  }
  0x80   : > { %3172 = vmatprep.subr.bf16.mxu1 %v3368_v34  ;;  %v4410_v34 = vcombine.high %v3668_v5, %v3717_v24  ;;  %v3386_v4 = vld [vmem:[%s4402_s1 + $0x190] sm:$0xff]  }
  0x81   : > { %3133 = vmatpush3.bf16.msra.mxu0 %v3369_v50  ;;  %v4411_v50 = vcombine.low %v3624_v52, %v3671_v6  ;;  %v3388_v52 = vld [vmem:[%s4402_s1 + $0x1c8] sm:$0xff]   ;;  %v196_v6 = vld [vmem:[%s3560_s7 + $0x10] sm:$0x11] }
  0x82   : > { %3134 = vmatprep.subr.bf16.mxu0 %v3371_v31  ;;  %v4412_v31 = vcombine.high %v3674_v7, %v3723_v26 }
  0x83   : > { %3173 = vmatpush3.bf16.msra.mxu1 %v3370_v30  ;;  %v197_v30 = vld [vmem:[%s3560_s7 + $0x18] sm:$0x11] }
  0x84   : > { %2116 = vmatmul.mubr.bf16.gmra.mxu0 %v4405_v22  ;;  %3174 = vmatprep.subr.bf16.mxu1 %v3372_v54  ;;  %v3389_v54 = vld [vmem:[%s4402_s1 + $0x108] sm:$0xff]   ;;  %v2495_v22 = vcombine.high %v4012_v45, %v197_v30 }
  0x85   : > { %3135 = vmatpush3.bf16.msra.mxu0 %v3373_v60  ;;  %2123 = vmatprep.mubr.bf16.mxu0 %v4406_v8  ;;  %v2492_v60 = vcombine.low %v4007_v15, %v196_v6 }
  0x86   : > { %2181 = vmatmul.mubr.bf16.gmra.mxu1 %v4407_v46  ;;  %3136 = vmatprep.subr.bf16.mxu0 %v3375_v9  ;;  %v2493_v9 = vcombine.high %v4007_v15, %v196_v6  ;;  %v4413_v15 = vcombine.low %v3668_v5, %v3717_v24  ;;  %v4414_v5 = vcombine.low %v3674_v7, %v3723_v26 }
  0x87   : > { %3175 = vmatpush3.bf16.msra.mxu1 %v3374_v59  ;;  %2188 = vmatprep.mubr.bf16.mxu1 %v4408_v17  ;;  %v2494_v59 = vcombine.low %v4012_v45, %v197_v30  ;;  %v359_v8 = vshrl.u32 %v2492_v60, 16  ;;  %v361_v46 = vshll.u32 %v2492_v60, 16  ;;  %v3392_v45 = vld [vmem:[%s4402_s1 + $0x1c0] sm:$0xff]   ;;  %v4415_v30 = vcombine.low %v3788_v44, %v3841_v14 }
  0x88   : > { %3176 = vmatprep.subr.bf16.mxu1 %v3376_v1  ;;  %v3391_v1 = vld [vmem:[%s4402_s1 + $0x140] sm:$0xff]   ;;  %v4420_v44 = vcombine.low %v3858_v23, %v3927_v40 }
  0x89   : > { %3137 = vmatpush3.bf16.msra.mxu0 %v3377_v47  ;;  %v3390_v47 = vld [vmem:[%s4402_s1 + $0x188] sm:$0xff]   ;;  %v373_v17 = vshrl.u32 %v2494_v59, 16 }
  0x8a   : > { %3138 = vmatprep.subr.bf16.mxu0 %v3379_v33  ;;  %v366_v33 = vshrl.u32 %v2493_v9, 16 }
  0x8b   : > { %3177 = vmatpush3.bf16.msra.mxu1 %v3378_v48  ;;  %v368_v48 = vshll.u32 %v2493_v9, 16 }
  0x8c   : > { %2124 = vmatmul.mubr.bf16.gmra.mxu0 %v4409_v0  ;;  %3178 = vmatprep.subr.bf16.mxu1 %v3380_v36  ;;  %v375_v36 = vshll.u32 %v2494_v59, 16  ;;  %v363_v0 = vrot.slane %v361_v46, 1 }
  0x8d   : > { %3139 = vmatpush3.bf16.msra.mxu0 %v3381_v51  ;;  %2131 = vmatprep.mubr.bf16.mxu0 %v4410_v34  ;;  %v380_v51 = vshrl.u32 %v2495_v22, 16  ;;  %v3394_v34 = vld [vmem:[%s4402_s1 + $0x180] sm:$0xff]  }
  0x8e   : > { %2189 = vmatmul.mubr.bf16.gmra.mxu1 %v4411_v50  ;;  %3140 = vmatprep.subr.bf16.mxu0 %v3383_v16  ;;  %v382_v16 = vshll.u32 %v2495_v22, 16  ;;  %v377_v24 = vrot.slane %v375_v36, 1 }
  0x8f   : > { %3179 = vmatpush3.bf16.msra.mxu1 %v3382_v55  ;;  %2196 = vmatprep.mubr.bf16.mxu1 %v4412_v31  ;;  %v3393_v55 = vld [vmem:[%s4402_s1 + $0x100] sm:$0xff]  }
  0x90   : > { %3180 = vmatprep.subr.bf16.mxu1 %v3384_v12  ;;  %v370_v12 = vrot.slane %v368_v48, 1  ;;  %v378_v31 = vor.u32 %v377_v24, %v373_v17 }
  0x91   : > { %3141 = vmatpush3.bf16.msra.mxu0 %v3385_v18  ;;  %v384_v18 = vrot.slane %v382_v16, 1 }
  0x92   : > { %3142 = vmatprep.subr.bf16.mxu0 %v3387_v49  ;;  %v371_v50 = vor.u32 %v370_v12, %v366_v33  ;;  %v364_v49 = vor.u32 %v363_v0, %v359_v8  ;;  %v2758_v26 = vcombine.low %v378_v31, %v3794_v57  ;;  %v4419_v57 = vcombine.low %v3808_v2, %v3888_v32 }
  0x93   : > { %3181 = vmatpush3.bf16.msra.mxu1 %v3386_v4  ;;  %v385_v4 = vor.u32 %v384_v18, %v380_v51 }
  0x94   : > { %2132 = vmatmul.mubr.bf16.gmra.mxu0 %v4413_v15  ;;  %3182 = vmatprep.subr.bf16.mxu1 %v3388_v52  ;;  %v2757_v52 = vcombine.low %v371_v50, %v3786_v37  ;;  %v2756_v6 = vcombine.low %v364_v49, %v3790_v53  ;;  %v4417_v37 = vcombine.low %v3792_v56, %v3860_v27 }
  0x95   : > { %3143 = vmatpush3.bf16.msra.mxu0 %v3389_v54  ;;  %v2759_v7 = vcombine.low %v385_v4, %v3801_v62  ;;  %v4416_v54 = vcombine.low %v3810_v3, %v3852_v20  ;;  %v4418_v53 = vcombine.low %v3850_v19, %v3920_v29  ;;  %v2781_v62 = vcombine.low %v3925_v35, %v3988_v21 }
  0x96   : > { %2197 = vmatmul.mubr.bf16.gmra.mxu1 %v4414_v5  ;;  %3144 = vmatprep.subr.bf16.mxu0 %v3391_v1  ;;  %v2783_v3 = vcombine.low %v3933_v58, %v3994_v25  ;;  %v4421_v56 = vcombine.low %v3864_v43, %v3940_v38 }
  0x97   : > { %3183 = vmatpush3.bf16.msra.mxu1 %v3390_v47  ;;  %2237 = vmatprep.mubr.bf16.mxu0 %v2757_v52 }
  0x98   : > { %3184 = vmatprep.subr.bf16.mxu1 %v3392_v45  ;;  %2302 = vmatprep.mubr.bf16.mxu1 %v2759_v7 }
  0x99   : > { %3145 = vmatpush3.bf16.msra.mxu0 %v3393_v55 }
  0x9b   : > { %3185 = vmatpush3.bf16.msra.mxu1 %v3394_v34 }
  0x9c   : > { %2238 = vmatmul.mubr.bf16.vlgmr.msra.gmra.mxu0 %v2756_v6 }
  0x9d   : > { %2245 = vmatprep.mubr.bf16.mxu0 %v4415_v30 }
  0x9e   : > { %2303 = vmatmul.mubr.bf16.vlgmr.msra.gmra.mxu1 %v2758_v26 }
  0x9f   : > { %2310 = vmatprep.mubr.bf16.mxu1 %v4416_v54 }
  0xa4   : > { %2246 = vmatmul.mubr.bf16.gmra.mxu0 %v4417_v37 }
  0xa5   : > { %2253 = vmatprep.mubr.bf16.mxu0 %v4418_v53 }
  0xa6   : > { %2311 = vmatmul.mubr.bf16.gmra.mxu1 %v4419_v57 }
  0xa7   : > { %2318 = vmatprep.mubr.bf16.mxu1 %v4420_v44 }
  0xac   : > { %2254 = vmatmul.mubr.bf16.gmra.mxu0 %v4421_v56 }
  0xad   : > { %2261 = vmatprep.mubr.bf16.mxu0 %v2781_v62 }
  0xae   : > { %2319 = vmatmul.mubr.bf16.gmra.mxu1 %v2774_v11 }
  0xaf   : > { %2326 = vmatprep.mubr.bf16.mxu1 %v2783_v3 }
  0xb4   : > { %2262 = vmatmul.mubr.bf16.gmra.mxu0 %v2780_v13 }
  0xb6   : > { %2327 = vmatmul.mubr.bf16.gmra.mxu1 %v2782_v28 }
  0xee   : > { %v2906_v2 = vpop.f32.mrf.mxu0 }
  0xef   : > { %v2946_v14 = vpop.f32.mrf.mxu1 }
  0xf0   : > { %v2907_v19 = vpop.f32.mrf.mxu0 }
  0xf1   : > { %v2908_v20 = vadd.f32 %v2907_v19, %v2906_v2  ;;  %v2947_v23 = vpop.f32.mrf.mxu1 }
  0xf2   : > { %v2948_v27 = vadd.f32 %v2947_v23, %v2946_v14  ;;  %v2909_v43 = vpop.f32.mrf.mxu0 }
  0xf3   : > { %v2949_v32 = vpop.f32.mrf.mxu1 }
  0xf4   : > { %v4204_v29 = vadd.f32 %v2948_v27, %v2908_v20  ;;  %v2910_v10 = vpop.f32.mrf.mxu0 }
  0xf5   : > { %v2911_v35 = vadd.f32 %v2910_v10, %v2909_v43  ;;  %v2950_v40 = vpop.f32.mrf.mxu1 }
  0xf6   : > { %v2951_v58 = vadd.f32 %v2950_v40, %v2949_v32  ;;  %v2912_v38 = vpop.f32.mrf.mxu0 }
  0xf7   : > { %v2952_v41 = vpop.f32.mrf.mxu1 }
  0xf8   : > { %v4206_v63 = vadd.f32 %v2951_v58, %v2911_v35  ;;  %v2913_v61 = vpop.f32.mrf.mxu0 }
  0xf9   : > { %v2914_v21 = vadd.f32 %v2913_v61, %v2912_v38  ;;  %v2953_v25 = vpop.f32.mrf.mxu1 }
  0xfa   : > { %v2954_v42 = vadd.f32 %v2953_v25, %v2952_v41  ;;  %v2915_v11 = vpop.f32.mrf.mxu0 }
  0xfb   : > { %v2955_v39 = vpop.f32.mrf.mxu1 }
  0xfc   : > { %v4208_v13 = vadd.f32 %v2954_v42, %v2914_v21  ;;  %v2916_v28 = vpop.f32.mrf.mxu0 }
  0xfd   : > { %v2917_v60 = vadd.f32 %v2916_v28, %v2915_v11  ;;  %v2956_v9 = vpop.f32.mrf.mxu1 }
  0xfe   : > { %v2957_v59 = vadd.f32 %v2956_v9, %v2955_v39  ;;  %v2918_v1 = vpop.f32.mrf.mxu0 }
  0xff   : > { %v2958_v47 = vpop.f32.mrf.mxu1 }
 0x100   : > { %v4210_v22 = vadd.f32 %v2957_v59, %v2917_v60  ;;  %v2919_v8 = vpop.f32.mrf.mxu0 }
 0x101   : > { %v2959_v46 = vpop.f32.mrf.mxu1  ;;  %v2920_v33 = vadd.f32 %v2919_v8, %v2918_v1 }
 0x102   : > { %v2960_v48 = vadd.f32 %v2959_v46, %v2958_v47  ;;  %v2921_v15 = vpop.f32.mrf.mxu0 }
 0x103   : > { %v2961_v45 = vpop.f32.mrf.mxu1 }
 0x104   : > { %v4212_v17 = vadd.f32 %v2960_v48, %v2920_v33  ;;  %v2922_v36 = vpop.f32.mrf.mxu0 }
 0x105   : > { %v2962_v51 = vpop.f32.mrf.mxu1  ;;  %v2923_v16 = vadd.f32 %v2922_v36, %v2921_v15 }
 0x106   : > { %v2963_v55 = vadd.f32 %v2962_v51, %v2961_v45  ;;  %v2924_v12 = vpop.f32.mrf.mxu0 }
 0x107   : > { %v2964_v5 = vpop.f32.mrf.mxu1 }
 0x108   : > { %v4214_v0 = vadd.f32 %v2963_v55, %v2923_v16  ;;  %v2925_v24 = vpop.f32.mrf.mxu0 }
 0x109   : > { %v2926_v18 = vadd.f32 %v2925_v24, %v2924_v12  ;;  %v2965_v34 = vpop.f32.mrf.mxu1 }
 0x10a   : > { %v2966_v50 = vadd.f32 %v2965_v34, %v2964_v5  ;;  %v2927_v49 = vpop.f32.mrf.mxu0 }
 0x10b   : > { %v2967_v4 = vpop.f32.mrf.mxu1 }
 0x10c   : > { %v4216_v31 = vadd.f32 %v2966_v50, %v2926_v18  ;;  %v2928_v52 = vpop.f32.mrf.mxu0 }
 0x10d   : > { %v2929_v6 = vadd.f32 %v2928_v52, %v2927_v49  ;;  %v2968_v7 = vpop.f32.mrf.mxu1 }
 0x10e   : > { %4422 = vst [vmem:[#allocation2_spill] sm:$0xff] %v4216_v31  ;;  %v2969_v26 = vadd.f32 %v2968_v7, %v2967_v4  ;;  %v2986_v54 = vpop.f32.mrf.mxu0 }
 0x110   : > { %v4218_v30 = vadd.f32 %v2969_v26, %v2929_v6  ;;  %v2987_v37 = vpop.f32.mrf.mxu0 }
 0x111   : > { %v2988_v6 = vadd.f32 %v2987_v37, %v2986_v54 }
 0x112   : > { %4423 = vst [vmem:[#allocation3_spill] sm:$0xff] %v4218_v30  ;;  %v2989_v57 = vpop.f32.mrf.mxu0 }
 0x113   : > { %v1532_v30 = vadd.f32 %v2988_v6, %v4204_v29 }
 0x114   : > { %v2990_v3 = vpop.f32.mrf.mxu0 }
 0x115   : > { %v3026_v53 = vpop.f32.mrf.mxu1 }
 0x117   : > { %v3027_v44 = vpop.f32.mrf.mxu1 }
 0x119   : > { %v4220_v62 = vpop.f32.mrf.mxu1 }
 0x11b   : > { %v4222_v56 = vpop.f32.mrf.mxu1 }
 0x11c   : > { %v3031_v29 = vadd.f32 %v4222_v56, %v4220_v62 }
 0x11d   : > { %v2992_v2 = vpop.f32.mrf.mxu0 }
 0x11f   : > { %v2993_v14 = vpop.f32.mrf.mxu0 }
 0x120   : > { %v4224_v19 = vpop.f32.mrf.mxu1  ;;  %v2994_v31 = vadd.f32 %v2993_v14, %v2992_v2 }
 0x121   : > { %v2995_v23 = vpop.f32.mrf.mxu0 }
 0x122   : > { %v4226_v20 = vpop.f32.mrf.mxu1 }
 0x123   : > { %v2996_v43 = vpop.f32.mrf.mxu0 }
 0x124   : > { %v4228_v27 = vpop.f32.mrf.mxu1 }
 0x126   : > { %v4230_v32 = vpop.f32.mrf.mxu1 }
 0x128   : > { %v4232_v10 = vpop.f32.mrf.mxu0 }
 0x12a   : > { %v4234_v35 = vpop.f32.mrf.mxu0 }
 0x12b   : > { %v4236_v40 = vpop.f32.mrf.mxu1  ;;  %v3000_v2 = vadd.f32 %v4234_v35, %v4232_v10 }
 0x12c   : > { %v4240_v38 = vpop.f32.mrf.mxu0 }
 0x12d   : > { %v4238_v58 = vpop.f32.mrf.mxu1 }
 0x12e   : > { %v4244_v61 = vpop.f32.mrf.mxu0 }
 0x12f   : > { %v4242_v41 = vpop.f32.mrf.mxu1  ;;  %v3003_v10 = vadd.f32 %v4244_v61, %v4240_v38  ;;  %v3040_v61 = vadd.f32 %v4238_v58, %v4236_v40 }
 0x131   : > { %v4246_v21 = vpop.f32.mrf.mxu1 }
 0x134   : > { %v4248_v25 = vpop.f32.mrf.mxu0 }
 0x136   : > { %v4250_v42 = vpop.f32.mrf.mxu1  ;;  %v4252_v11 = vpop.f32.mrf.mxu0 }
 0x137   : > { %4424 = vst [vmem:[#allocation4_spill] sm:$0xff] %v4250_v42 }
 0x138   : > { %v4254_v39 = vpop.f32.mrf.mxu1  ;;  %v4256_v28 = vpop.f32.mrf.mxu0 }
 0x139   : > { %4425 = vst [vmem:[#allocation5_spill] sm:$0xff] %v4254_v39  ;;  %4426 = vst [vmem:[#allocation6_spill] sm:$0xff] %v4256_v28  ;;  %v2991_v39 = vadd.f32 %v2990_v3, %v2989_v57 }
 0x13a   : > { %v4258_v60 = vpop.f32.mrf.mxu1  ;;  %v4260_v9 = vpop.f32.mrf.mxu0 }
 0x13b   : > { %4427 = vst [vmem:[#allocation7_spill] sm:$0xff] %v4258_v60  ;;  %4428 = vst [vmem:[#allocation8_spill] sm:$0xff] %v4260_v9  ;;  %v3028_v9 = vadd.f32 %v3027_v44, %v3026_v53  ;;  %v2997_v53 = vadd.f32 %v2996_v43, %v2995_v23 }
 0x13c   : > { %v4262_v59 = vpop.f32.mrf.mxu1  ;;  %v3066_v1 = vpop.f32.mrf.mxu0 }
 0x13d   : > { %4429 = vst [vmem:[#allocation9_spill] sm:$0xff] %v4262_v59  ;;  %v1597_v37 = vadd.f32 %v3028_v9, %v1532_v30  ;;  %v1540_v30 = vadd.f32 %v2994_v31, %v4208_v13  ;;  %v1543_v23 = vadd.f32 %v2997_v53, %v4210_v22 }
 0x13e   : > { %v3106_v47 = vpop.f32.mrf.mxu1  ;;  %v3067_v8 = vpop.f32.mrf.mxu0 }
 0x140   : > { %v3107_v46 = vpop.f32.mrf.mxu1  ;;  %v3069_v33 = vpop.f32.mrf.mxu0 }
 0x141   : > { %v3108_v9 = vadd.f32 %v3107_v46, %v3106_v47 }
 0x142   : > { %v3109_v48 = vpop.f32.mrf.mxu1  ;;  %v3070_v15 = vpop.f32.mrf.mxu0 }
 0x143   : > { %v3071_v3 = vadd.f32 %v3070_v15, %v3069_v33 }
 0x144   : > { %v3110_v45 = vpop.f32.mrf.mxu1  ;;  %v3072_v36 = vpop.f32.mrf.mxu0 }
 0x145   : > { %v3111_v31 = vadd.f32 %v3110_v45, %v3109_v48 }
 0x146   : > { %v4264_v51 = vpop.f32.mrf.mxu1  ;;  %v3073_v16 = vpop.f32.mrf.mxu0 }
 0x148   : > { %v4266_v55 = vpop.f32.mrf.mxu1  ;;  %v3075_v12 = vpop.f32.mrf.mxu0 }
 0x14a   : > { %v4268_v5 = vpop.f32.mrf.mxu1  ;;  %v3076_v24 = vpop.f32.mrf.mxu0 }
 0x14b   : > { %v3077_v35 = vadd.f32 %v3076_v24, %v3075_v12  ;;  %v3114_v24 = vadd.f32 %v4266_v55, %v4264_v51  ;;  %v3043_v55 = vadd.f32 %v4246_v21, %v4242_v41 }
 0x14c   : > { %v4270_v18 = vpop.f32.mrf.mxu1  ;;  %v4272_v34 = vpop.f32.mrf.mxu0 }
 0x14e   : > { %v4274_v50 = vpop.f32.mrf.mxu1  ;;  %v4276_v49 = vpop.f32.mrf.mxu0 }
 0x14f   : > { %4430 = vst [vmem:[#allocation10_spill] sm:$0xff] %v4274_v50 }
 0x150   : > { %v4278_v4 = vpop.f32.mrf.mxu1  ;;  %v4280_v52 = vpop.f32.mrf.mxu0 }
 0x151   : > { %4431 = vst [vmem:[#allocation11_spill] sm:$0xff] %v4278_v4  ;;  %v3068_v4 = vadd.f32 %v3067_v8, %v3066_v1 }
 0x152   : > { %v4282_v7 = vpop.f32.mrf.mxu1  ;;  %v4284_v26 = vpop.f32.mrf.mxu0 }
 0x153   : > { %4432 = vst [vmem:[#allocation12_spill] sm:$0xff] %v4282_v7  ;;  %v1535_v7 = vadd.f32 %v2991_v39, %v4206_v63  ;;  %v2110_v57 = vadd.f32 %v3068_v4, %v1597_v37  ;;  %v3034_v63 = vadd.f32 %v4226_v20, %v4224_v19  ;;  %v3074_v4 = vadd.f32 %v3073_v16, %v3072_v36  ;;  %v4323_v36 = vld [vmem:[%s4403_s2] ss:$0 sm:$0xff] }
 0x154   : > { %v4286_v59 = vpop.f32.mrf.mxu1  ;;  %v4288_v60 = vpop.f32.mrf.mxu0  ;;  %v3037_v19 = vadd.f32 %v4230_v32, %v4228_v27  ;;  %v1548_v20 = vadd.f32 %v3000_v2, %v4212_v17  ;;  %v3083_v41 = vadd.f32 %v4284_v26, %v4280_v52 }
 0x155   : > { %4433 = vst [vmem:[#allocation13_spill] sm:$0xff] %v4286_v59  ;;  %4434 = vst [vmem:[#allocation14_spill] sm:$0xff] %v4288_v60  ;;  %v1600_v8 = vadd.f32 %v3031_v29, %v1535_v7  ;;  %v2175_v62 = vadd.f32 %v3108_v9, %v2110_v57  ;;  %v1605_v13 = vadd.f32 %v3034_v63, %v1540_v30 }
 0x156   : > { %v4291_v42 = vpop.f32.mrf.mxu1  ;;  %v4293_v50 = vpop.f32.mrf.mxu0  ;;  %v1608_v38 = vadd.f32 %v3037_v19, %v1543_v23  ;;  %v1551_v29 = vadd.f32 %v3003_v10, %v4214_v0  ;;  %v1613_v53 = vadd.f32 %v3040_v61, %v1548_v20  ;;  %v3006_v0 = vadd.f32 %v4252_v11, %v4248_v25  ;;  %v4437_v23 = vld [vmem:[#allocation6_spill] sm:$0xff] }
 0x157   : > { %v2113_v56 = vadd.f32 %v3071_v3, %v1600_v8  ;;  %v2118_v17 = vadd.f32 %v3074_v4, %v1605_v13  ;;  %v3080_v3 = vadd.f32 %v4276_v49, %v4272_v34  ;;  %v3117_v34 = vadd.f32 %v4270_v18, %v4268_v5  ;;  %v4436_v4 = vld [vmem:[#allocation2_spill] sm:$0xff] }
 0x158   : > { %v4295_v28 = vpop.f32.mrf.mxu1  ;;  %v4297_v54 = vpop.f32.mrf.mxu0  ;;  %v2121_v57 = vadd.f32 %v3077_v35, %v1608_v38  ;;  %v4439_v13 = vld [vmem:[#allocation10_spill] sm:$0xff] }
 0x159   : > { %v2178_v27 = vadd.f32 %v3111_v31, %v2113_v56  ;;  %v2126_v56 = vadd.f32 %v3080_v3, %v1613_v53  ;;  %v4440_v31 = vld [vmem:[#allocation11_spill] sm:$0xff] }
 0x15a   : > { %v4300_v59 = vpop.f32.mrf.mxu1  ;;  %v4302_v60 = vpop.f32.mrf.mxu0 }
 0x15c   : > { %v4306_v44 = vpop.f32.mrf.mxu1  ;;  %v3146_v1 = vpop.f32.mrf.mxu0  ;;  %v4446_v3 = vld [vmem:[#allocation13_spill] sm:$0xff] }
 0x15e   : > { %v3186_v14 = vpop.f32.mrf.mxu1  ;;  %v3147_v39 = vpop.f32.mrf.mxu0 }
 0x15f   : > { %v3148_v33 = vadd.f32 %v3147_v39, %v3146_v1  ;;  %v2183_v1 = vadd.f32 %v3114_v24, %v2118_v17  ;;  %v1616_v39 = vadd.f32 %v3043_v55, %v1551_v29  ;;  %v4447_v55 = vld [vmem:[#allocation7_spill] sm:$0xff] }
 0x160   : > { %v3187_v43 = vpop.f32.mrf.mxu1  ;;  %v3149_v15 = vpop.f32.mrf.mxu0 }
 0x161   : > { %v2240_v47 = vadd.f32 %v3148_v33, %v2175_v62  ;;  %v3188_v46 = vadd.f32 %v3187_v43, %v3186_v14  ;;  %v2186_v62 = vadd.f32 %v3117_v34, %v2121_v57  ;;  %v1556_v33 = vadd.f32 %v3006_v0, %v4436_v4  ;;  %v4438_v43 = vld [vmem:[#allocation8_spill] sm:$0xff]  ;;  %v4448_v0 = vld [vmem:[#allocation9_spill] sm:$0xff] }
 0x162   : > { %v3189_v22 = vpop.f32.mrf.mxu1  ;;  %v3150_v16 = vpop.f32.mrf.mxu0  ;;  %v2129_v17 = vadd.f32 %v3083_v41, %v1616_v39  ;;  %v4445_v57 = vld [vmem:[#allocation12_spill] sm:$0xff]  ;;  %v3049_v34 = vadd.f32 %v4448_v0, %v4447_v55  ;;  %v3126_v41 = vadd.f32 %v4295_v28, %v4291_v42  ;;  %v3129_v42 = vadd.f32 %v4306_v44, %v4300_v59 }
 0x163   : > { %v2305_v32 = vadd.f32 %v3188_v46, %v2240_v47  ;;  %v3151_v48 = vadd.f32 %v3150_v16, %v3149_v15  ;;  %v3009_v15 = vadd.f32 %v4438_v43, %v4437_v23  ;;  %v3120_v47 = vadd.f32 %v4440_v31, %v4439_v13  ;;  %v4442_v16 = vld [vmem:[#allocation5_spill] sm:$0xff] }
 0x164   : > { %v3190_v45 = vpop.f32.mrf.mxu1  ;;  %v3152_v12 = vpop.f32.mrf.mxu0 }
 0x165   : > { %v2342_v6 = vadd.f32 %v4323_v36, %v2305_v32  ;;  %v2243_v7 = vadd.f32 %v3151_v48, %v2178_v27  ;;  %v3191_v37 = vadd.f32 %v3190_v45, %v3189_v22  ;;  %v4441_v22 = vld [vmem:[#allocation4_spill] sm:$0xff]  ;;  %v4443_v32 = vld [vmem:[#allocation14_spill] sm:$0xff] }
 0x166   : > { %v3192_v40 = vpop.f32.mrf.mxu1  ;;  %v3153_v58 = vpop.f32.mrf.mxu0  ;;  %v3046_v27 = vadd.f32 %v4442_v16, %v4441_v22  ;;  %v3086_v48 = vadd.f32 %v4293_v50, %v4443_v32 }
 0x167   : > { %v2308_v8 = vadd.f32 %v3191_v37, %v2243_v7  ;;  %v3154_v51 = vadd.f32 %v3153_v58, %v3152_v12  ;;  %v2358_v49 = vmul.f32 0.1, %v2342_v6  ;;  %vm2350_vm0 = vcmp.gt.f32.partialorder %v2342_v6, 0.0  ;;  %v4444_v37 = vld [vmem:[#allocation3_spill] sm:$0xff] }
 0x168   : > { %v3193_v30 = vpop.f32.mrf.mxu1  ;;  %v3155_v9 = vpop.f32.mrf.mxu0  ;;  %v2191_v12 = vadd.f32 %v3120_v47, %v2126_v56  ;;  %v1621_v7 = vadd.f32 %v3046_v27, %v1556_v33  ;;  %v1559_v29 = vadd.f32 %v3009_v15, %v4444_v37 }
 0x169   : > { %v2343_v63 = vadd.f32 %v4323_v36, %v2308_v8  ;;  %v2248_v2 = vadd.f32 %v3154_v51, %v2183_v1  ;;  %v3194_v14 = vadd.f32 %v3193_v30, %v3192_v40  ;;  %v2366_v46 = vsel %vm2350_vm0, %v2342_v6, %v2358_v49 }
 0x16a   : > { %v3195_v21 = vpop.f32.mrf.mxu1  ;;  %v3156_v25 = vpop.f32.mrf.mxu0  ;;  %v3123_v40 = vadd.f32 %v4446_v3, %v4445_v57  ;;  %v2134_v30 = vadd.f32 %v3086_v48, %v1621_v7  ;;  %v1624_v56 = vadd.f32 %v3049_v34, %v1559_v29 }
 0x16b   : > { %vm2351_vm1 = vcmp.gt.f32.partialorder %v2343_v63, 0.0  ;;  %v2359_v11 = vmul.f32 0.1, %v2343_v63  ;;  %v2313_v5 = vadd.f32 %v3194_v14, %v2248_v2  ;;  %v3157_v18 = vadd.f32 %v3156_v25, %v3155_v9 }
 0x16c   : > { %v3196_v19 = vpop.f32.mrf.mxu1  ;;  %v3158_v20 = vpop.f32.mrf.mxu0  ;;  %v2194_v49 = vadd.f32 %v3123_v40, %v2129_v17  ;;  %v3089_v9 = vadd.f32 %v4302_v60, %v4297_v54  ;;  %v2199_v15 = vadd.f32 %v3126_v41, %v2134_v30 }
 0x16d   : > { %v2367_v52 = vsel %vm2351_vm1, %v2343_v63, %v2359_v11  ;;  %v2344_v26 = vadd.f32 %v4323_v36, %v2313_v5  ;;  %v2251_v10 = vadd.f32 %v3157_v18, %v2186_v62  ;;  %v3197_v35 = vadd.f32 %v3196_v19, %v3195_v21 }
 0x16e   : > { %v2870_v38 = vpack.c.bf16 %v2367_v52, %v2366_v46  ;;  %v3198_v61 = vpop.f32.mrf.mxu1  ;;  %v3159_v45 = vpop.f32.mrf.mxu0  ;;  %v2137_v54 = vadd.f32 %v3089_v9, %v1624_v56 }
 0x16f   : > { %v2316_v24 = vadd.f32 %v3197_v35, %v2251_v10  ;;  %v3160_v6 = vadd.f32 %v3159_v45, %v3158_v20  ;;  %v2360_v58 = vmul.f32 0.1, %v2344_v26  ;;  %vm2352_vm2 = vcmp.gt.f32.partialorder %v2344_v26, 0.0 }
 0x170   : > { %2871 = vst [vmem:[%s4364_s11] sm:$0xff] %v2870_v38   ;;  %v3199_v53 = vpop.f32.mrf.mxu1  ;;  %v3161_v1 = vpop.f32.mrf.mxu0 }
 0x171   : > { %v2345_v8 = vadd.f32 %v4323_v36, %v2316_v24  ;;  %v2256_v50 = vadd.f32 %v3160_v6, %v2191_v12  ;;  %v3200_v51 = vadd.f32 %v3199_v53, %v3198_v61  ;;  %v2368_v21 = vsel %vm2352_vm2, %v2344_v26, %v2360_v58 }
 0x172   : > { %v3201_v63 = vpop.f32.mrf.mxu1  ;;  %v3162_v2 = vpop.f32.mrf.mxu0  ;;  %v2202_v26 = vadd.f32 %v3129_v42, %v2137_v54 }
 0x173   : > { %vm2353_vm3 = vcmp.gt.f32.partialorder %v2345_v8, 0.0  ;;  %v2361_v14 = vmul.f32 0.1, %v2345_v8  ;;  %v2321_v39 = vadd.f32 %v3200_v51, %v2256_v50  ;;  %v3163_v62 = vadd.f32 %v3162_v2, %v3161_v1 }
 0x174   : > { %v3202_v25 = vpop.f32.mrf.mxu1  ;;  %v3164_v11 = vpop.f32.mrf.mxu0 }
 0x175   : > { %v2369_v5 = vsel %vm2353_vm3, %v2345_v8, %v2361_v14  ;;  %v2346_v18 = vadd.f32 %v4323_v36, %v2321_v39  ;;  %v2259_v4 = vadd.f32 %v3163_v62, %v2194_v49  ;;  %v3203_v60 = vadd.f32 %v3202_v25, %v3201_v63 }
 0x176   : > { %v2875_v33 = vpack.c.bf16 %v2369_v5, %v2368_v21  ;;  %v3204_v23 = vpop.f32.mrf.mxu1  ;;  %v3165_v43 = vpop.f32.mrf.mxu0 }
 0x177   : > { %v2324_v13 = vadd.f32 %v3203_v60, %v2259_v4  ;;  %v3166_v31 = vadd.f32 %v3165_v43, %v3164_v11  ;;  %v2362_v28 = vmul.f32 0.1, %v2346_v18  ;;  %vm2354_vm4 = vcmp.gt.f32.partialorder %v2346_v18, 0.0 }
 0x178   : > { %2887 = vst [vmem:[%s4364_s11 + $0x8] sm:$0xff] %v2875_v33   ;;  %v3205_v47 = vpop.f32.mrf.mxu1  ;;  %v3167_v46 = vpop.f32.mrf.mxu0 }
 0x179   : > { %v2347_v19 = vadd.f32 %v4323_v36, %v2324_v13  ;;  %v2264_v20 = vadd.f32 %v3166_v31, %v2199_v15  ;;  %v3206_v52 = vadd.f32 %v3205_v47, %v3204_v23  ;;  %v2370_v17 = vsel %vm2354_vm4, %v2346_v18, %v2362_v28 }
 0x17a   : > { %v3207_v10 = vpop.f32.mrf.mxu1  ;;  %v3168_v35 = vpop.f32.mrf.mxu0 }
 0x17b   : > { %vm2355_vm5 = vcmp.gt.f32.partialorder %v2347_v19, 0.0  ;;  %v2363_v22 = vmul.f32 0.1, %v2347_v19  ;;  %v2329_v16 = vadd.f32 %v3206_v52, %v2264_v20  ;;  %v3169_v27 = vadd.f32 %v3168_v35, %v3167_v46 }
 0x17c   : > { %v3208_v32 = vpop.f32.mrf.mxu1 }
 0x17d   : > { %v2371_v59 = vsel %vm2355_vm5, %v2347_v19, %v2363_v22  ;;  %v2348_v44 = vadd.f32 %v4323_v36, %v2329_v16  ;;  %v2267_v48 = vadd.f32 %v3169_v27, %v2202_v26  ;;  %v3209_v38 = vadd.f32 %v3208_v32, %v3207_v10 }
 0x17e   : > { %v2880_v61 = vpack.c.bf16 %v2371_v59, %v2370_v17 }
 0x17f   : > { %v2332_v45 = vadd.f32 %v3209_v38, %v2267_v48  ;;  %v2364_v12 = vmul.f32 0.1, %v2348_v44  ;;  %vm2356_vm6 = vcmp.gt.f32.partialorder %v2348_v44, 0.0 }
 0x180   : > { %2888 = vst [vmem:[%s4364_s11 + $0x10] sm:$0xff] %v2880_v61  }
 0x181   : > { %v2349_v24 = vadd.f32 %v4323_v36, %v2332_v45  ;;  %v2372_v7 = vsel %vm2356_vm6, %v2348_v44, %v2364_v12 }
 0x183   : > { %vm2357_vm7 = vcmp.gt.f32.partialorder %v2349_v24, 0.0  ;;  %v2365_v6 = vmul.f32 0.1, %v2349_v24 }
 0x185   : > { %v2373_v37 = vsel %vm2357_vm7, %v2349_v24, %v2365_v6 }
 0x186   : > { %v2885_v29 = vpack.c.bf16 %v2373_v37, %v2372_v7 }
 0x188   : > { %2889 = vst [vmem:[%s4364_s11 + $0x18] sm:$0xff] %v2885_v29  }
 0x189 PF: > { %s13_s14 = sadd.s32 1, %s3423_s14   ;;  %s4449_s12 = smov %s3419_s13 }
 0x18a   : > { %p10_p6 = scmp.ge.s32.totalorder %s13_s14, 4   ;;  %s4450_s13 = smov %s4452_s15 }
 0x18c   :  { %12 = sbr.rel (!%p10_p6) target bundleno = 2 (0x2), region = 64 }

// kernel: darknet_forward.20
= control target key start
LH: loop header
LB: loop body
LE: loop exit
PB: predicated region body
PF: predicated region fallthrough
CT: control target
= control target key end

     0   :  { %s596_s12 = smov 0   ;;  %s598_s13 = smov 0   ;;  %s667_s0 = inlined_call_operand.vmem [shape: bf16[2,8,8,128], index: 0, kind: input, shape index: {}]   ;;  %s668_s1 = inlined_call_operand.vmem [shape: bf16[1,128,128], index: 1, kind: input, shape index: {}]   ;;  %s669_s2 = inlined_call_operand.vmem [shape: f32[1,128], index: 2, kind: input, shape index: {}]   ;;  %s670_s3 = inlined_call_operand.vmem [shape: f32[128,128], index: 3, kind: output, shape index: {}]  }
   0x1   :  { %s600_s14 = smov 0  }
   0x2 LB: > { %s25_s15 = sadd.s32 1, %s570_s13  ;;  %p443_p0 = scmp.ge.s32.totalorder %s574_s14, 1  ;;  %s574_s14 = sphi %s600_s14, %s13_s14   ;;  %s570_s13 = sphi %s598_s13, %s672_s13   ;;  %s566_s12 = sphi %s596_s12, %s671_s12  }
   0x3   : > { %p27_p1 = scmp.ge.s32.totalorder %s25_s15, 2  ;;  %p151_p2 = scmp.lt.s32.totalorder %s574_s14, 3 }
   0x5   : > { %s674_s15 = smov (%p27_p1, %s25_s15), 0  ;;  %p152_p3 = pnand %p443_p0, %p151_p2 }
   0x6   : > { %p176_p4 = scmp.lt.s32.totalorder (!%p152_p3), %s566_s12, 1  ;;  %s446_s10 = sshll.u32 (!%p152_p3), %s566_s12, 3 }
   0x7   : > { %155 = sbr.rel (%p152_p3) target bundleno = 247 (0xf7), region = 32  ;;  %p183_p5 = scmp.lt.s32.totalorder (!%p152_p3), %s446_s10, 15 }
   0xc   : > { %v540_v0 = vld [vmem:[%s668_s1 + $0x38] sm:$0xff]   ;;  %v541_v1 = vld [vmem:[%s668_s1 + $0x30] sm:$0xff]   ;;  %s177_s20 = scalar_select %p176_p4, %s566_s12, 1  ;;  %v542_v2 = vld [vmem:[%s668_s1 + $0x28] sm:$0xff]  }
   0xd   : > { %476 = vmatprep.subr.bf16.mxu0 %v540_v0  ;;  %500 = vmatprep.subr.bf16.mxu1 %v540_v0  ;;  %v543_v3 = vld [vmem:[%s668_s1 + $0x20] sm:$0xff]   ;;  %v544_v6 = vld [vmem:[%s668_s1 + $0x18] sm:$0xff]   ;;  %v545_v7 = vld [vmem:[%s668_s1 + $0x10] sm:$0xff]   ;;  %s676_s10 = smov (!%p183_p5, %s446_s10), 15 }
   0xe   : > { %477 = vmatpush3.bf16.msra.mxu0 %v540_v0  ;;  %508 = vmatpush3.bf16.msra.mxu1 %v540_v0  ;;  %s463_s23 = sshll.u32 %s177_s20, 5  ;;  %v546_v8 = vld [vmem:[%s668_s1 + $0x8] sm:$0xff]   ;;  %v547_v9 = vld [vmem:[%s668_s1] sm:$0xff]   ;;  %s447_s11 = sshll.u32 %s676_s10, 3 }
   0xf   : > { %478 = vmatprep.subr.bf16.mxu0 %v541_v1  ;;  %501 = vmatprep.subr.bf16.mxu1 %v541_v1  ;;  %s630_s26 = scalar_lea.vmem %s667_s0, %s463_s23  ;;  %v448_v12 = vld [vmem:[%s669_s2] ss:$0 sm:$0xff]  ;;  %s186_s20 = scalar_lea.vmem %s670_s3, %s447_s11 }
  0x10   : > { %v548_v4 = vld [vmem:[%s630_s26] sm:$0xff]   ;;  %v549_v5 = vld [vmem:[%s630_s26 + $0x10] sm:$0xff]   ;;  %v550_v10 = vld [vmem:[%s630_s26 + $0x8] sm:$0xff]  }
  0x11   : > { %492 = vmatprep.mubr.bf16.mxu0 %v548_v4  ;;  %496 = vmatprep.mubr.bf16.mxu1 %v549_v5  ;;  %v551_v11 = vld [vmem:[%s630_s26 + $0x18] sm:$0xff]  }
  0x12   : > { %479 = vmatpush3.bf16.msra.mxu0 %v541_v1  ;;  %509 = vmatpush3.bf16.msra.mxu1 %v541_v1 }
  0x13   : > { %480 = vmatprep.subr.bf16.mxu0 %v542_v2  ;;  %502 = vmatprep.subr.bf16.mxu1 %v542_v2 }
  0x16   : > { %481 = vmatpush3.bf16.msra.mxu0 %v542_v2  ;;  %510 = vmatpush3.bf16.msra.mxu1 %v542_v2 }
  0x17   : > { %482 = vmatprep.subr.bf16.mxu0 %v543_v3  ;;  %503 = vmatprep.subr.bf16.mxu1 %v543_v3 }
  0x1a   : > { %483 = vmatpush3.bf16.msra.mxu0 %v543_v3  ;;  %511 = vmatpush3.bf16.msra.mxu1 %v543_v3 }
  0x1b   : > { %484 = vmatprep.subr.bf16.mxu0 %v544_v6  ;;  %504 = vmatprep.subr.bf16.mxu1 %v544_v6 }
  0x1e   : > { %485 = vmatpush3.bf16.msra.mxu0 %v544_v6  ;;  %512 = vmatpush3.bf16.msra.mxu1 %v544_v6 }
  0x1f   : > { %486 = vmatprep.subr.bf16.mxu0 %v545_v7  ;;  %505 = vmatprep.subr.bf16.mxu1 %v545_v7 }
  0x22   : > { %487 = vmatpush3.bf16.msra.mxu0 %v545_v7  ;;  %513 = vmatpush3.bf16.msra.mxu1 %v545_v7 }
  0x23   : > { %488 = vmatprep.subr.bf16.mxu0 %v546_v8  ;;  %506 = vmatprep.subr.bf16.mxu1 %v546_v8 }
  0x26   : > { %489 = vmatpush3.bf16.msra.mxu0 %v546_v8  ;;  %514 = vmatpush3.bf16.msra.mxu1 %v546_v8 }
  0x27   : > { %490 = vmatprep.subr.bf16.mxu0 %v547_v9  ;;  %507 = vmatprep.subr.bf16.mxu1 %v547_v9 }
  0x2a   : > { %491 = vmatpush3.bf16.msra.mxu0 %v547_v9  ;;  %515 = vmatpush3.bf16.msra.mxu1 %v547_v9 }
  0x2d   : > { %493 = vmatmul.mubr.bf16.vlgmr.msra.gmra.mxu0 %v550_v10  ;;  %497 = vmatmul.mubr.bf16.vlgmr.msra.gmra.mxu1 %v551_v11 }
  0xed   : > { %v494_v13 = vpop.f32.mrf.mxu0  ;;  %v498_v14 = vpop.f32.mrf.mxu1 }
  0xee   : > { %v339_v15 = vadd.f32 %v494_v13, %v448_v12  ;;  %v355_v16 = vadd.f32 %v498_v14, %v448_v12 }
  0xef   : > { %v330_v17 = vpop.f32.mrf.mxu0  ;;  %v346_v18 = vpop.f32.mrf.mxu1 }
  0xf0   : > { %363 = vst [vmem:[%s186_s20 + $0x10] sm:$0xff] %v339_v15  ;;  %367 = vst [vmem:[%s186_s20 + $0x30] sm:$0xff] %v355_v16  ;;  %v331_v19 = vadd.f32 %v448_v12, %v330_v17  ;;  %v347_v20 = vadd.f32 %v448_v12, %v346_v18 }
  0xf1   : > { %v495_v21 = vpop.f32.mrf.mxu0  ;;  %v499_v22 = vpop.f32.mrf.mxu1 }
  0xf2   : > { %361 = vst [vmem:[%s186_s20] sm:$0xff] %v331_v19  ;;  %365 = vst [vmem:[%s186_s20 + $0x20] sm:$0xff] %v347_v20  ;;  %v342_v23 = vadd.f32 %v495_v21, %v448_v12  ;;  %v358_v24 = vadd.f32 %v499_v22, %v448_v12 }
  0xf3   : > { %v333_v25 = vpop.f32.mrf.mxu0  ;;  %v349_v26 = vpop.f32.mrf.mxu1 }
  0xf4   : > { %364 = vst [vmem:[%s186_s20 + $0x18] sm:$0xff] %v342_v23  ;;  %368 = vst [vmem:[%s186_s20 + $0x38] sm:$0xff] %v358_v24  ;;  %v334_v27 = vadd.f32 %v448_v12, %v333_v25  ;;  %v350_v28 = vadd.f32 %v448_v12, %v349_v26 }
  0xf6   : > { %362 = vst [vmem:[%s186_s20 + $0x8] sm:$0xff] %v334_v27  ;;  %366 = vst [vmem:[%s186_s20 + $0x28] sm:$0xff] %v350_v28 }
  0xf7 PF: > { %s13_s14 = sadd.s32 1, %s574_s14   ;;  %s671_s12 = smov %s570_s13 }
  0xf8   : > { %p10_p6 = scmp.ge.s32.totalorder %s13_s14, 4   ;;  %s672_s13 = smov %s674_s15 }
  0xfa   :  { %12 = sbr.rel (!%p10_p6) target bundleno = 2 (0x2), region = 63 }

// kernel: darknet_forward.18
= control target key start
LH: loop header
LB: loop body
LE: loop exit
PB: predicated region body
PF: predicated region fallthrough
CT: control target
= control target key end

     0   :  { %s2304_s15 = smov 0   ;;  %s2306_s16 = smov 0   ;;  %s2848_s0 = inlined_call_operand.vmem [shape: bf16[2,10,10,128], index: 0, kind: input, shape index: {}]   ;;  %s2849_s1 = inlined_call_operand.vmem [shape: bf16[3,384,128], index: 1, kind: input, shape index: {}]   ;;  %s2850_s2 = inlined_call_operand.vmem [shape: f32[1,128], index: 2, kind: input, shape index: {}]   ;;  %s2851_s3 = inlined_call_operand.vmem [shape: bf16[128,128], index: 3, kind: input, shape index: {}]   ;;  %s2852_s4 = inlined_call_operand.vmem [shape: bf16[128,128], index: 4, kind: output, shape index: {}]  }
   0x1   :  { %s2308_s17 = smov 0  }
   0x2 LB: > { %s26_s18 = sadd.s32 1, %s2273_s16  ;;  %p1639_p0 = scmp.ge.s32.totalorder %s2277_s17, 1  ;;  %s2277_s17 = sphi %s2308_s17, %s14_s17   ;;  %s2273_s16 = sphi %s2306_s16, %s2854_s16   ;;  %s2269_s15 = sphi %s2304_s15, %s2853_s15  }
   0x3   : > { %p28_p1 = scmp.ge.s32.totalorder %s26_s18, 2  ;;  %p191_p2 = scmp.lt.s32.totalorder %s2277_s17, 3 }
   0x5   : > { %s2856_s18 = smov (%p28_p1, %s26_s18), 0  ;;  %p192_p3 = pnand %p1639_p0, %p191_p2 }
   0x6   : > { %p224_p4 = scmp.lt.s32.totalorder (!%p192_p3), %s2269_s15, 1 }
   0x7   : > { %195 = sbr.rel (%p192_p3) target bundleno = 348 (0x15c), region = 36 }
   0xc   : > { %v2164_v0 = vld [vmem:[%s2849_s1 + $0x138] sm:$0xff]   ;;  %v2167_v3 = vld [vmem:[%s2849_s1 + $0x130] sm:$0xff]   ;;  %v2170_v6 = vld [vmem:[%s2849_s1 + $0x128] sm:$0xff]   ;;  %s225_s23 = scalar_select %p224_p4, %s2269_s15, 1 }
   0xd   : > { %v2165_v1 = vld [vmem:[%s2849_s1 + $0xf8] sm:$0xff]   ;;  %1911 = vmatprep.subr.bf16.mxu0 %v2164_v0  ;;  %v2168_v4 = vld [vmem:[%s2849_s1 + $0xf0] sm:$0xff]   ;;  %v2171_v7 = vld [vmem:[%s2849_s1 + $0xe8] sm:$0xff]  }
   0xe   : > { %v2166_v2 = vld [vmem:[%s2849_s1 + $0x178] sm:$0xff]   ;;  %1912 = vmatpush3.bf16.msra.mxu0 %v2165_v1  ;;  %v2169_v5 = vld [vmem:[%s2849_s1 + $0x170] sm:$0xff]   ;;  %v2172_v8 = vld [vmem:[%s2849_s1 + $0x168] sm:$0xff]   ;;  %s2139_s30 = smul.u32 80, %s225_s23 }
   0xf   : > { %2067 = vmatprep.subr.bf16.mxu1 %v2166_v2  ;;  %1913 = vmatprep.subr.bf16.mxu0 %v2167_v3  ;;  %v2173_v9 = vld [vmem:[%s2849_s1 + $0x120] sm:$0xff]   ;;  %v2176_v12 = vld [vmem:[%s2849_s1 + $0x118] sm:$0xff]   ;;  %v2179_v15 = vld [vmem:[%s2849_s1 + $0x110] sm:$0xff]  }
  0x10   : > { %2068 = vmatpush3.bf16.msra.mxu1 %v2166_v2  ;;  %v2174_v10 = vld [vmem:[%s2849_s1 + $0xe0] sm:$0xff]   ;;  %v2178_v13 = vld [vmem:[%s2849_s1 + $0x158] sm:$0xff]   ;;  %v2181_v16 = vld [vmem:[%s2849_s1 + $0x150] sm:$0xff]   ;;  %s2389_s19 = scalar_lea.vmem %s2848_s0, %s2139_s30 }
  0x11   : > { %2069 = vmatprep.subr.bf16.mxu1 %v2169_v5  ;;  %v2175_v11 = vld [vmem:[%s2849_s1 + $0x160] sm:$0xff]   ;;  %v2177_v14 = vld [vmem:[%s2849_s1 + $0xd8] sm:$0xff]   ;;  %v2180_v17 = vld [vmem:[%s2849_s1 + $0xd0] sm:$0xff]  }
  0x12   : > { %1914 = vmatpush3.bf16.msra.mxu0 %v2168_v4  ;;  %v2182_v18 = vld [vmem:[%s2849_s1 + $0x108] sm:$0xff]   ;;  %v2185_v21 = vld [vmem:[%s2849_s1 + $0x100] sm:$0xff]   ;;  %v2402_v24 = vld [vmem:[%s2389_s19 + $0x10] sm:$0xf] }
  0x13   : > { %1915 = vmatprep.subr.bf16.mxu0 %v2170_v6  ;;  %v2183_v19 = vld [vmem:[%s2849_s1 + $0xc8] sm:$0xff]   ;;  %v255_v25 = vld [vmem:[%s2389_s19 + $0x14] sm:$0x1]  ;;  %v2187_v27 = vld [vmem:[%s2849_s1 + $0x140] sm:$0xff]  }
  0x14   : > { %2070 = vmatpush3.bf16.msra.mxu1 %v2169_v5  ;;  %v2184_v20 = vld [vmem:[%s2849_s1 + $0x148] sm:$0xff]   ;;  %v2412_v28 = vcombine.low %v2402_v24, %v255_v25  ;;  %v2415_v29 = vld [vmem:[%s2389_s19 + $0x18] sm:$0xf]  ;;  %v257_v30 = vld [vmem:[%s2389_s19 + $0x1c] sm:$0x1] }
  0x15   : > { %2071 = vmatprep.subr.bf16.mxu1 %v2172_v8  ;;  %v2398_v22 = vld [vmem:[%s2389_s19 + $0x8] sm:$0xf]  ;;  %v253_v23 = vld [vmem:[%s2389_s19 + $0xc] sm:$0x1]  ;;  %v2186_v31 = vld [vmem:[%s2849_s1 + $0xc0] sm:$0xff]   ;;  %v2424_v34 = vcombine.low %v2415_v29, %v257_v30 }
  0x16   : > { %1916 = vmatpush3.bf16.msra.mxu0 %v2171_v7  ;;  %v2406_v26 = vcombine.low %v2398_v22, %v253_v23  ;;  %v325_v36 = vshrl.u32 %v2412_v28, 16  ;;  %v327_v37 = vshll.u32 %v2412_v28, 16  ;;  %v2191_v38 = vld [vmem:[%s2849_s1 + $0x78] sm:$0xff]   ;;  %v368_v39 = vrot.slane %v2412_v28, 1  ;;  %v2434_v41 = vld [vmem:[%s2389_s19 + $0x20] sm:$0xf] }
  0x17   : > { %1917 = vmatprep.subr.bf16.mxu0 %v2173_v9  ;;  %v259_v42 = vld [vmem:[%s2389_s19 + $0x24] sm:$0x1]  ;;  %v2195_v43 = vld [vmem:[%s2849_s1 + $0xb8] sm:$0xff]   ;;  %v369_v45 = vrot.slane %v2424_v34, 1  ;;  %v1702_v51 = vcombine.low %v2398_v22, %v2402_v24  ;;  %v2198_v53 = vld [vmem:[%s2849_s1 + $0xb0] sm:$0xff]   ;;  %v332_v54 = vshrl.u32 %v2424_v34, 16  ;;  %v1705_v9 = vcombine.low %v2415_v29, %v2434_v41 }
  0x18   : > { %2072 = vmatpush3.bf16.msra.mxu1 %v2172_v8  ;;  %v318_v32 = vshrl.u32 %v2406_v26, 16  ;;  %v320_v33 = vshll.u32 %v2406_v26, 16  ;;  %v367_v35 = vrot.slane %v2406_v26, 1  ;;  %v329_v44 = vrot.slane %v327_v37, 1  ;;  %v2193_v52 = vld [vmem:[%s2849_s1 + $0x38] sm:$0xff]   ;;  %v2196_v60 = vld [vmem:[%s2849_s1 + $0x70] sm:$0xff]  }
  0x19   : > { %2073 = vmatprep.subr.bf16.mxu1 %v2175_v11  ;;  %v2446_v47 = vcombine.low %v2434_v41, %v259_v42  ;;  %v334_v55 = vshll.u32 %v2424_v34, 16  ;;  %v2197_v63 = vld [vmem:[%s2849_s1 + $0x30] sm:$0xff]   ;;  %v2200_v2 = vld [vmem:[%s2849_s1 + $0x68] sm:$0xff]   ;;  %v265_v23 = vld [vmem:[%s2389_s19 + $0x3c] sm:$0x1] }
  0x1a   : > { %1918 = vmatpush3.bf16.msra.mxu0 %v2174_v10  ;;  %v322_v40 = vrot.slane %v320_v33, 1  ;;  %v1704_v46 = vcombine.low %v367_v35, %v368_v39  ;;  %v2450_v49 = vor.u32 %v329_v44, %v325_v36  ;;  %v2202_v3 = vld [vmem:[%s2849_s1 + $0xa8] sm:$0xff]   ;;  %v2497_v8 = vld [vmem:[%s2389_s19 + $0x30] sm:$0xf]  ;;  %v263_v10 = vld [vmem:[%s2389_s19 + $0x34] sm:$0x1] }
  0x1b   : > { %1919 = vmatprep.subr.bf16.mxu0 %v2176_v12  ;;  %v370_v50 = vrot.slane %v2446_v47, 1  ;;  %v339_v58 = vshrl.u32 %v2446_v47, 16  ;;  %v341_v59 = vshll.u32 %v2446_v47, 16  ;;  %v336_v61 = vrot.slane %v334_v55, 1  ;;  %v2201_v5 = vld [vmem:[%s2849_s1 + $0x28] sm:$0xff]   ;;  %v2205_v12 = vld [vmem:[%s2849_s1 + $0xa0] sm:$0xff]  }
  0x1c   : > { %2074 = vmatpush3.bf16.msra.mxu1 %v2175_v11  ;;  %v2448_v48 = vor.u32 %v322_v40, %v318_v32  ;;  %2083 = vmatprep.mubr.bf16.mxu1 %v1704_v46  ;;  %v2493_v6 = vld [vmem:[%s2389_s19 + $0x28] sm:$0xf]  ;;  %v261_v7 = vld [vmem:[%s2389_s19 + $0x2c] sm:$0x1]  ;;  %v2204_v25 = vld [vmem:[%s2849_s1 + $0x20] sm:$0xff]  }
  0x1d   : > { %2075 = vmatprep.subr.bf16.mxu1 %v2178_v13  ;;  %v1707_v57 = vcombine.low %v369_v45, %v370_v50  ;;  %v343_v62 = vrot.slane %v341_v59, 1  ;;  %v2477_v0 = vor.u32 %v336_v61, %v332_v54  ;;  %v2503_v11 = vcombine.low %v2493_v6, %v261_v7  ;;  %v2528_v30 = vld [vmem:[%s2389_s19 + $0x40] sm:$0xf]  ;;  %v2209_v42 = vld [vmem:[%s2849_s1 + $0x58] sm:$0xff]   ;;  %v2229_v28 = vld [vmem:[%s2849_s1 + $0x1f0] sm:$0xff]  }
  0x1e   : > { %1920 = vmatpush3.bf16.msra.mxu0 %v2177_v14  ;;  %v1703_v56 = vcombine.low %v2448_v48, %v2450_v49  ;;  %v2203_v14 = vld [vmem:[%s2849_s1 + $0x60] sm:$0xff]   ;;  %v2210_v46 = vld [vmem:[%s2849_s1 + $0x18] sm:$0xff]   ;;  %v2233_v47 = vld [vmem:[%s2849_s1 + $0x1e8] sm:$0xff]  }
  0x1f   : > { %1921 = vmatprep.subr.bf16.mxu0 %v2179_v15  ;;  %v2479_v1 = vor.u32 %v343_v62, %v339_v58  ;;  %v346_v15 = vshrl.u32 %v2503_v11, 16  ;;  %v2630_v34 = vcombine.low %v2450_v49, %v2477_v0  ;;  %v1741_v49 = vcombine.low %v2402_v24, %v2415_v29  ;;  %v2237_v24 = vld [vmem:[%s2849_s1 + $0x1a0] sm:$0xff]   ;;  %v2242_v29 = vld [vmem:[%s2849_s1 + $0x218] sm:$0xff]  }
  0x20   : > { %2076 = vmatpush3.bf16.msra.mxu1 %v2178_v13  ;;  %702 = vmatprep.mubr.bf16.mxu0 %v1703_v56  ;;  %v2509_v13 = vcombine.low %v2497_v8, %v263_v10  ;;  %v251_v10 = vld [vmem:[%s2389_s19 + $0x4] sm:$0x1] }
  0x21   : > { %2077 = vmatprep.subr.bf16.mxu1 %v2181_v16  ;;  %v1706_v4 = vcombine.low %v2477_v0, %v2479_v1  ;;  %v2238_v0 = vld [vmem:[%s2849_s1 + $0x220] sm:$0xff]  }
  0x22   : > { %1922 = vmatpush3.bf16.msra.mxu0 %v2180_v17  ;;  %v371_v17 = vrot.slane %v2503_v11, 1 }
  0x23   : > { %1923 = vmatprep.subr.bf16.mxu0 %v2182_v18  ;;  %v2518_v18 = vld [vmem:[%s2389_s19 + $0x38] sm:$0xf] }
  0x24   : > { %2078 = vmatpush3.bf16.msra.mxu1 %v2181_v16  ;;  %v348_v16 = vshll.u32 %v2503_v11, 16  ;;  %v2532_v32 = vcombine.low %v2518_v18, %v265_v23  ;;  %v2236_v11 = vld [vmem:[%s2849_s1 + $0x1e0] sm:$0xff]  }
  0x25   : > { %2079 = vmatprep.subr.bf16.mxu1 %v2184_v20 }
  0x26   : > { %1924 = vmatpush3.bf16.msra.mxu0 %v2183_v19  ;;  %v353_v19 = vshrl.u32 %v2509_v13, 16  ;;  %v360_v54 = vshrl.u32 %v2532_v32, 16  ;;  %v362_v55 = vshll.u32 %v2532_v32, 16 }
  0x27   : > { %1925 = vmatprep.subr.bf16.mxu0 %v2185_v21  ;;  %v372_v21 = vrot.slane %v2509_v13, 1 }
  0x28   : > { %2080 = vmatpush3.bf16.msra.mxu1 %v2184_v20  ;;  %v355_v20 = vshll.u32 %v2509_v13, 16  ;;  %v364_v61 = vrot.slane %v362_v55, 1  ;;  %v2247_v55 = vld [vmem:[%s2849_s1 + $0x1c8] sm:$0xff]  }
  0x29   : > { %2081 = vmatprep.subr.bf16.mxu1 %v2187_v27  ;;  %v1710_v36 = vcombine.low %v371_v17, %v372_v21 }
  0x2a   : > { %1926 = vmatpush3.bf16.msra.mxu0 %v2186_v31  ;;  %v267_v31 = vld [vmem:[%s2389_s19 + $0x44] sm:$0x1]  ;;  %v357_v33 = vrot.slane %v355_v20, 1 }
  0x2b   : > { %1963 = vmatprep.subr.bf16.mxu0 %v2191_v38  ;;  %v2539_v37 = vcombine.low %v2528_v30, %v267_v31  ;;  %v2213_v38 = vld [vmem:[%s2849_s1 + $0x98] sm:$0xff]  }
  0x2c   : > { %2082 = vmatpush3.bf16.msra.mxu1 %v2187_v27  ;;  %v350_v27 = vrot.slane %v348_v16, 1  ;;  %v2550_v44 = vor.u32 %v357_v33, %v353_v19  ;;  %v2223_v16 = vld [vmem:[%s2849_s1 + $0x80] sm:$0xff]  }
  0x2d   : > { %2091 = vmatprep.subr.bf16.mxu1 %v2195_v43  ;;  %703 = vmatmul.mubr.bf16.vlgmr.msra.gmra.mxu0 %v1702_v51  ;;  %v450_v51 = vrot.slane %v2539_v37, 1  ;;  %v444_v58 = vshrl.u32 %v2539_v37, 16  ;;  %v446_v59 = vshll.u32 %v2539_v37, 16  ;;  %v2221_v19 = vld [vmem:[%s2849_s1 + $0x40] sm:$0xff]  }
  0x2e   : > { %1964 = vmatpush3.bf16.msra.mxu0 %v2193_v52  ;;  %710 = vmatprep.mubr.bf16.mxu0 %v1706_v4  ;;  %v2544_v40 = vor.u32 %v350_v27, %v346_v15  ;;  %v2216_v52 = vld [vmem:[%s2849_s1 + $0x90] sm:$0xff]   ;;  %v2218_v4 = vld [vmem:[%s2849_s1 + $0x48] sm:$0xff]   ;;  %v2222_v27 = vld [vmem:[%s2849_s1] sm:$0xff]  }
  0x2f   : > { %2084 = vmatmul.mubr.bf16.vlgmr.msra.gmra.mxu1 %v1707_v57  ;;  %1965 = vmatprep.subr.bf16.mxu0 %v2196_v60  ;;  %v2214_v60 = vld [vmem:[%s2849_s1 + $0x50] sm:$0xff]   ;;  %v448_v62 = vrot.slane %v446_v59, 1  ;;  %v269_v59 = vld [vmem:[%s2389_s19 + $0x4c] sm:$0x1] }
  0x30   : > { %2092 = vmatpush3.bf16.msra.mxu1 %v2195_v43  ;;  %v373_v43 = vrot.slane %v2532_v32, 1  ;;  %2087 = vmatprep.mubr.bf16.mxu1 %v1710_v36  ;;  %v1709_v56 = vcombine.low %v2544_v40, %v2550_v44  ;;  %v2228_v36 = vld [vmem:[%s2849_s1 + $0x238] sm:$0xff]   ;;  %v1745_v13 = vcombine.low %v2479_v1, %v2544_v40  ;;  %v1744_v1 = vcombine.low %v2434_v41, %v2493_v6  ;;  %v2245_v40 = vld [vmem:[%s2849_s1 + $0x210] sm:$0xff]  }
  0x31   : > { %2093 = vmatprep.subr.bf16.mxu1 %v2198_v53  ;;  %v2241_v32 = vld [vmem:[%s2849_s1 + $0x198] sm:$0xff]  }
  0x32   : > { %1966 = vmatpush3.bf16.msra.mxu0 %v2197_v63  ;;  %v1713_v57 = vcombine.low %v373_v43, %v450_v51  ;;  %v2215_v63 = vld [vmem:[%s2849_s1 + $0x10] sm:$0xff]  }
  0x33   : > { %1967 = vmatprep.subr.bf16.mxu0 %v2200_v2  ;;  %v2577_v2 = vor.u32 %v364_v61, %v360_v54  ;;  %v2243_v54 = vld [vmem:[%s2849_s1 + $0x1d0] sm:$0xff]  }
  0x34   : > { %2094 = vmatpush3.bf16.msra.mxu1 %v2198_v53  ;;  %v1708_v53 = vcombine.low %v2493_v6, %v2497_v8  ;;  %v2244_v6 = vld [vmem:[%s2849_s1 + $0x190] sm:$0xff]  }
  0x35   : > { %2095 = vmatprep.subr.bf16.mxu1 %v2202_v3  ;;  %711 = vmatmul.mubr.bf16.gmra.mxu0 %v1705_v9  ;;  %v250_v9 = vld [vmem:[%s2389_s19] sm:$0xf]  ;;  %v1748_v41 = vcombine.low %v2550_v44, %v2577_v2  ;;  %v1747_v44 = vcombine.low %v2497_v8, %v2518_v18 }
  0x36   : > { %1968 = vmatpush3.bf16.msra.mxu0 %v2201_v5  ;;  %718 = vmatprep.mubr.bf16.mxu0 %v1709_v56  ;;  %v2220_v5 = vld [vmem:[%s2849_s1 + $0x88] sm:$0xff]   ;;  %v1645_v15 = vcombine.low %v250_v9, %v251_v10  ;;  %v2251_v8 = vld [vmem:[%s2849_s1 + $0x180] sm:$0xff]  }
  0x37   : > { %1969 = vmatprep.subr.bf16.mxu0 %v2203_v14  ;;  %2088 = vmatmul.mubr.bf16.gmra.mxu1 %v1713_v57  ;;  %v2219_v14 = vld [vmem:[%s2849_s1 + $0x8] sm:$0xff]   ;;  %v2252_v57 = vld [vmem:[%s2849_s1 + $0x200] sm:$0xff]  }
  0x38   : > { %2096 = vmatpush3.bf16.msra.mxu1 %v2202_v3  ;;  %v2579_v3 = vor.u32 %v448_v62, %v444_v58  ;;  %v311_v20 = vshrl.u32 %v1645_v15, 16  ;;  %v313_v23 = vshll.u32 %v1645_v15, 16  ;;  %v2248_v56 = vld [vmem:[%s2849_s1 + $0x188] sm:$0xff]   ;;  %v2250_v58 = vld [vmem:[%s2849_s1 + $0x1c0] sm:$0xff]  }
  0x39   : > { %2097 = vmatprep.subr.bf16.mxu1 %v2205_v12 }
  0x3a   : > { %1970 = vmatpush3.bf16.msra.mxu0 %v2204_v25  ;;  %v1712_v7 = vcombine.low %v2577_v2, %v2579_v3  ;;  %v366_v25 = vrot.slane %v1645_v15, 1  ;;  %v315_v31 = vrot.slane %v313_v23, 1 }
  0x3b   : > { %1971 = vmatprep.subr.bf16.mxu0 %v2209_v42  ;;  %v2226_v42 = vld [vmem:[%s2849_s1 + $0x1f8] sm:$0xff]  }
  0x3c   : > { %2098 = vmatpush3.bf16.msra.mxu1 %v2205_v12  ;;  %v1711_v12 = vcombine.low %v2518_v18, %v2528_v30  ;;  %v1740_v33 = vcombine.low %v366_v25, %v367_v35  ;;  %v1738_v35 = vcombine.low %v250_v9, %v2398_v22  ;;  %v2636_v22 = vcombine.low %v370_v50, %v371_v17  ;;  %v2234_v50 = vld [vmem:[%s2849_s1 + $0x1a8] sm:$0xff]   ;;  %v2240_v17 = vld [vmem:[%s2849_s1 + $0x1d8] sm:$0xff]  }
  0x3d   : > { %2099 = vmatprep.subr.bf16.mxu1 %v2213_v38  ;;  %719 = vmatmul.mubr.bf16.gmra.mxu0 %v1708_v53  ;;  %v2231_v53 = vld [vmem:[%s2849_s1 + $0x230] sm:$0xff]  }
  0x3e   : > { %1972 = vmatpush3.bf16.msra.mxu0 %v2210_v46  ;;  %726 = vmatprep.mubr.bf16.mxu0 %v1712_v7  ;;  %v1743_v46 = vcombine.low %v368_v39, %v369_v45  ;;  %v2230_v39 = vld [vmem:[%s2849_s1 + $0x1b0] sm:$0xff]   ;;  %v2235_v45 = vld [vmem:[%s2849_s1 + $0x228] sm:$0xff]  }
  0x3f   : > { %1973 = vmatprep.subr.bf16.mxu0 %v2214_v60  ;;  %2107 = vmatprep.mubr.bf16.mxu1 %v1740_v33 }
  0x40   : > { %2100 = vmatpush3.bf16.msra.mxu1 %v2213_v38  ;;  %v316_v38 = vor.u32 %v315_v31, %v311_v20 }
  0x41   : > { %2101 = vmatprep.subr.bf16.mxu1 %v2216_v52 }
  0x42   : > { %1974 = vmatpush3.bf16.msra.mxu0 %v2215_v63  ;;  %v1739_v26 = vcombine.low %v316_v38, %v2448_v48  ;;  %v1749_v48 = vcombine.low %v372_v21, %v373_v43  ;;  %v268_v21 = vld [vmem:[%s2389_s19 + $0x48] sm:$0xf]  ;;  %s1641_s19 = sshll.u32 %s2269_s15, 3 }
  0x43   : > { %1975 = vmatprep.subr.bf16.mxu0 %v2218_v4  ;;  %v1823_v43 = vcombine.low %v2528_v30, %v268_v21  ;;  %v2249_v30 = vld [vmem:[%s2849_s1 + $0x208] sm:$0xff]   ;;  %v1774_v18 = vcombine.low %v268_v21, %v269_v59  ;;  %p231_p5 = scmp.lt.s32.totalorder %s1641_s19, 15 }
  0x44   : > { %2102 = vmatpush3.bf16.msra.mxu1 %v2216_v52  ;;  %v2227_v52 = vld [vmem:[%s2849_s1 + $0x1b8] sm:$0xff]  }
  0x45   : > { %2103 = vmatprep.subr.bf16.mxu1 %v2220_v5  ;;  %727 = vmatmul.mubr.bf16.gmra.mxu0 %v1711_v12  ;;  %v1110_v60 = vrot.slane %v1774_v18, 1  ;;  %v1106_v61 = vshll.u32 %v1774_v18, 16  ;;  %v1104_v63 = vshrl.u32 %v1774_v18, 16  ;;  %s2858_s19 = smov (!%p231_p5, %s1641_s19), 15 }
  0x46   : > { %1976 = vmatpush3.bf16.msra.mxu0 %v2219_v14  ;;  %1000 = vmatprep.mubr.bf16.mxu0 %v1739_v26  ;;  %s1642_s15 = sshll.u32 %s2858_s19, 2 }
  0x47   : > { %1977 = vmatprep.subr.bf16.mxu0 %v2221_v19  ;;  %v1825_v62 = vcombine.low %v450_v51, %v1110_v60  ;;  %v1108_v2 = vrot.slane %v1106_v61, 1  ;;  %s2781_s21 = scalar_lea.vmem %s2851_s3, %s1642_s15  ;;  %s2812_s26 = scalar_lea.vmem %s2852_s4, %s1642_s15 }
  0x48   : > { %2104 = vmatpush3.bf16.msra.mxu1 %v2220_v5 }
  0x49   : > { %2105 = vmatprep.subr.bf16.mxu1 %v2223_v16  ;;  %v1109_v4 = vor.u32 %v1108_v2, %v1104_v63 }
  0x4a   : > { %1978 = vmatpush3.bf16.msra.mxu0 %v2222_v27 }
  0x4b   : > { %2015 = vmatprep.subr.bf16.mxu0 %v2226_v42  ;;  %v1824_v5 = vcombine.low %v2579_v3, %v1109_v4 }
  0x4c   : > { %2106 = vmatpush3.bf16.msra.mxu1 %v2223_v16 }
  0x4d   : > { %2115 = vmatprep.subr.bf16.mxu1 %v2228_v36  ;;  %1001 = vmatmul.mubr.bf16.vlgmr.msra.gmra.mxu0 %v1738_v35 }
  0x4e   : > { %2016 = vmatpush3.bf16.msra.mxu0 %v2227_v52  ;;  %1008 = vmatprep.mubr.bf16.mxu0 %v2630_v34 }
  0x4f   : > { %2108 = vmatmul.mubr.bf16.vlgmr.msra.gmra.mxu1 %v1743_v46  ;;  %2017 = vmatprep.subr.bf16.mxu0 %v2229_v28 }
  0x50   : > { %2116 = vmatpush3.bf16.msra.mxu1 %v2228_v36  ;;  %2111 = vmatprep.mubr.bf16.mxu1 %v2636_v22 }
  0x51   : > { %2117 = vmatprep.subr.bf16.mxu1 %v2231_v53 }
  0x52   : > { %2018 = vmatpush3.bf16.msra.mxu0 %v2230_v39 }
  0x53   : > { %2019 = vmatprep.subr.bf16.mxu0 %v2233_v47 }
  0x54   : > { %2118 = vmatpush3.bf16.msra.mxu1 %v2231_v53 }
  0x55   : > { %2119 = vmatprep.subr.bf16.mxu1 %v2235_v45  ;;  %1009 = vmatmul.mubr.bf16.gmra.mxu0 %v1741_v49 }
  0x56   : > { %2020 = vmatpush3.bf16.msra.mxu0 %v2234_v50  ;;  %1016 = vmatprep.mubr.bf16.mxu0 %v1745_v13 }
  0x57   : > { %2112 = vmatmul.mubr.bf16.gmra.mxu1 %v1749_v48  ;;  %2021 = vmatprep.subr.bf16.mxu0 %v2236_v11 }
  0x58   : > { %2120 = vmatpush3.bf16.msra.mxu1 %v2235_v45  ;;  %2131 = vmatprep.mubr.bf16.mxu1 %v1743_v46 }
  0x59   : > { %2121 = vmatprep.subr.bf16.mxu1 %v2238_v0 }
  0x5a   : > { %2022 = vmatpush3.bf16.msra.mxu0 %v2237_v24 }
  0x5b   : > { %2023 = vmatprep.subr.bf16.mxu0 %v2240_v17 }
  0x5c   : > { %2122 = vmatpush3.bf16.msra.mxu1 %v2238_v0 }
  0x5d   : > { %2123 = vmatprep.subr.bf16.mxu1 %v2242_v29  ;;  %1017 = vmatmul.mubr.bf16.gmra.mxu0 %v1744_v1 }
  0x5e   : > { %2024 = vmatpush3.bf16.msra.mxu0 %v2241_v32  ;;  %1024 = vmatprep.mubr.bf16.mxu0 %v1748_v41 }
  0x5f   : > { %2025 = vmatprep.subr.bf16.mxu0 %v2243_v54 }
  0x60   : > { %2124 = vmatpush3.bf16.msra.mxu1 %v2242_v29 }
  0x61   : > { %2125 = vmatprep.subr.bf16.mxu1 %v2245_v40 }
  0x62   : > { %2026 = vmatpush3.bf16.msra.mxu0 %v2244_v6 }
  0x63   : > { %2027 = vmatprep.subr.bf16.mxu0 %v2247_v55 }
  0x64   : > { %2126 = vmatpush3.bf16.msra.mxu1 %v2245_v40 }
  0x65   : > { %2127 = vmatprep.subr.bf16.mxu1 %v2249_v30  ;;  %1025 = vmatmul.mubr.bf16.gmra.mxu0 %v1747_v44 }
  0x66   : > { %2028 = vmatpush3.bf16.msra.mxu0 %v2248_v56  ;;  %1344 = vmatprep.mubr.bf16.mxu0 %v2630_v34 }
  0x67   : > { %2029 = vmatprep.subr.bf16.mxu0 %v2250_v58 }
  0x68   : > { %2128 = vmatpush3.bf16.msra.mxu1 %v2249_v30 }
  0x69   : > { %2129 = vmatprep.subr.bf16.mxu1 %v2252_v57 }
  0x6a   : > { %2030 = vmatpush3.bf16.msra.mxu0 %v2251_v8 }
  0x6c   : > { %2130 = vmatpush3.bf16.msra.mxu1 %v2252_v57 }
  0x6d   : > { %1345 = vmatmul.mubr.bf16.vlgmr.msra.gmra.mxu0 %v1741_v49 }
  0x6e   : > { %1352 = vmatprep.mubr.bf16.mxu0 %v1745_v13 }
  0x6f   : > { %2132 = vmatmul.mubr.bf16.vlgmr.msra.gmra.mxu1 %v2636_v22 }
  0x70   : > { %2135 = vmatprep.mubr.bf16.mxu1 %v1749_v48 }
  0x75   : > { %1353 = vmatmul.mubr.bf16.gmra.mxu0 %v1744_v1 }
  0x76   : > { %1360 = vmatprep.mubr.bf16.mxu0 %v1748_v41 }
  0x77   : > { %2136 = vmatmul.mubr.bf16.gmra.mxu1 %v1825_v62 }
  0x7d   : > { %1361 = vmatmul.mubr.bf16.gmra.mxu0 %v1747_v44 }
  0x7e   : > { %1368 = vmatprep.mubr.bf16.mxu0 %v1824_v5 }
  0x85   : > { %1369 = vmatmul.mubr.bf16.gmra.mxu0 %v1823_v43 }
  0xed   : > { %v1927_v7 = vpop.f32.mrf.mxu0 }
  0xef   : > { %v1928_v9 = vpop.f32.mrf.mxu0  ;;  %v2719_v15 = vpop.f32.mrf.mxu1 }
  0xf0   : > { %v1929_v10 = vadd.f32 %v1928_v9, %v1927_v7 }
  0xf1   : > { %v1930_v12 = vpop.f32.mrf.mxu0  ;;  %v769_v16 = vpop.f32.mrf.mxu1 }
  0xf2   : > { %v770_v58 = vadd.f32 %v1929_v10, %v769_v16 }
  0xf3   : > { %v1931_v14 = vpop.f32.mrf.mxu0  ;;  %v2725_v25 = vpop.f32.mrf.mxu1 }
  0xf4   : > { %v1932_v59 = vadd.f32 %v1931_v14, %v1930_v12  ;;  %v2786_v14 = vld [vmem:[%s2850_s2] ss:$0 sm:$0xff] }
  0xf5   : > { %v1933_v37 = vpop.f32.mrf.mxu0  ;;  %v772_v31 = vpop.f32.mrf.mxu1 }
  0xf6   : > { %v773_v2 = vadd.f32 %v1932_v59, %v772_v31 }
  0xf7   : > { %v1934_v51 = vpop.f32.mrf.mxu0  ;;  %v2731_v38 = vpop.f32.mrf.mxu1 }
  0xf8   : > { %v2721_v19 = vadd.f32 %v1934_v51, %v1933_v37 }
  0xf9   : > { %v2723_v20 = vpop.f32.mrf.mxu0  ;;  %v2735_v26 = vpop.f32.mrf.mxu1 }
  0xfb   : > { %v1937_v23 = vpop.f32.mrf.mxu0  ;;  %v2741_v28 = vpop.f32.mrf.mxu1 }
  0xfc   : > { %v1938_v12 = vadd.f32 %v1937_v23, %v2723_v20 }
  0xfd   : > { %v1939_v3 = vpop.f32.mrf.mxu0  ;;  %v2745_v39 = vpop.f32.mrf.mxu1 }
  0xff   : > { %v1940_v27 = vpop.f32.mrf.mxu0 }
 0x100   : > { %v2727_v33 = vadd.f32 %v1940_v27, %v1939_v3  ;;  %v778_v27 = vadd.f32 %v2719_v15, %v2721_v19 }
 0x101   : > { %v2729_v36 = vpop.f32.mrf.mxu0 }
 0x103   : > { %v2733_v42 = vpop.f32.mrf.mxu0 }
 0x105   : > { %v1945_v46 = vpop.f32.mrf.mxu0 }
 0x107   : > { %v1946_v35 = vpop.f32.mrf.mxu0 }
 0x108   : > { %v2737_v52 = vadd.f32 %v1946_v35, %v1945_v46 }
 0x109   : > { %v2739_v53 = vpop.f32.mrf.mxu0 }
 0x10b   : > { %v2743_v34 = vpop.f32.mrf.mxu0 }
 0x10d   : > { %v1979_v22 = vpop.f32.mrf.mxu0 }
 0x10f   : > { %v1980_v45 = vpop.f32.mrf.mxu0  ;;  %v2747_v47 = vpop.f32.mrf.mxu1 }
 0x110   : > { %v1981_v44 = vadd.f32 %v1980_v45, %v1979_v22 }
 0x111   : > { %v1982_v48 = vpop.f32.mrf.mxu0  ;;  %v1067_v50 = vpop.f32.mrf.mxu1 }
 0x112   : > { %v1003_v61 = vadd.f32 %v1981_v44, %v770_v58 }
 0x113   : > { %v1983_v49 = vpop.f32.mrf.mxu0  ;;  %v2749_v13 = vpop.f32.mrf.mxu1 }
 0x114   : > { %v1984_v60 = vadd.f32 %v1983_v49, %v1982_v48  ;;  %v1068_v9 = vadd.f32 %v1067_v50, %v1003_v61  ;;  %v1870_v48 = vld [vmem:[%s2781_s21] sm:$0xff]   ;;  %v781_v50 = vadd.f32 %v2725_v25, %v1938_v12  ;;  %v786_v61 = vadd.f32 %v2727_v33, %v2735_v26  ;;  %v1905_v12 = vld [vmem:[%s2781_s21 + $0x8] sm:$0xff]  }
 0x115   : > { %v1985_v0 = vpop.f32.mrf.mxu0  ;;  %v1070_v17 = vpop.f32.mrf.mxu1  ;;  %v1871_v19 = vunpack.c.l.bf16 %v1870_v48  ;;  %v1944_v25 = vadd.f32 %v2733_v42, %v2729_v36 }
 0x116   : > { %v1006_v51 = vadd.f32 %v1984_v60, %v773_v2 }
 0x117   : > { %v1986_v11 = vpop.f32.mrf.mxu0  ;;  %v2751_v21 = vpop.f32.mrf.mxu1 }
 0x118   : > { %v1987_v37 = vadd.f32 %v1986_v11, %v1985_v0  ;;  %v1071_v22 = vadd.f32 %v1070_v17, %v1006_v51 }
 0x119   : > { %v1988_v24 = vpop.f32.mrf.mxu0  ;;  %v2755_v43 = vpop.f32.mrf.mxu1 }
 0x11a   : > { %v1011_v35 = vadd.f32 %v1987_v37, %v778_v27  ;;  %v789_v37 = vadd.f32 %v1944_v25, %v2745_v39 }
 0x11b   : > { %v1989_v29 = vpop.f32.mrf.mxu0  ;;  %v2762_v6 = vpop.f32.mrf.mxu1 }
 0x11c   : > { %v1990_v20 = vadd.f32 %v1989_v29, %v1988_v24  ;;  %v1076_v24 = vadd.f32 %v2747_v47, %v1011_v35 }
 0x11d   : > { %v1991_v1 = vpop.f32.mrf.mxu0  ;;  %v2768_v56 = vpop.f32.mrf.mxu1 }
 0x11e   : > { %v1014_v15 = vadd.f32 %v1990_v20, %v781_v50  ;;  %v1875_v20 = vunpack.c.l.bf16 %v1905_v12 }
 0x11f   : > { %v1992_v32 = vpop.f32.mrf.mxu0 }
 0x120   : > { %v1993_v29 = vadd.f32 %v1992_v32, %v1991_v1  ;;  %v1079_v1 = vadd.f32 %v2749_v13, %v1014_v15 }
 0x121   : > { %v2753_v40 = vpop.f32.mrf.mxu0 }
 0x122   : > { %v1019_v33 = vadd.f32 %v1993_v29, %v786_v61 }
 0x123   : > { %v2757_v54 = vpop.f32.mrf.mxu0 }
 0x124   : > { %v1996_v32 = vadd.f32 %v2757_v54, %v2753_v40 }
 0x125   : > { %v2759_v41 = vpop.f32.mrf.mxu0 }
 0x126   : > { %v1022_v39 = vadd.f32 %v1996_v32, %v789_v37 }
 0x127   : > { %v2764_v30 = vpop.f32.mrf.mxu0 }
 0x129   : > { %v2766_v55 = vpop.f32.mrf.mxu0 }
 0x12b   : > { %v2770_v57 = vpop.f32.mrf.mxu0 }
 0x12d   : > { %v2031_v18 = vpop.f32.mrf.mxu0 }
 0x12f   : > { %v2133_v8 = vpop.f32.mrf.mxu1  ;;  %v2032_v63 = vpop.f32.mrf.mxu0 }
 0x130   : > { %v2033_v4 = vadd.f32 %v2032_v63, %v2031_v18  ;;  %v1872_v63 = vunpack.c.h.bf16 %v1870_v48 }
 0x131   : > { %v1411_v62 = vpop.f32.mrf.mxu1  ;;  %v2034_v7 = vpop.f32.mrf.mxu0 }
 0x132   : > { %v1412_v10 = vadd.f32 %v2033_v4, %v1411_v62 }
 0x133   : > { %v2134_v5 = vpop.f32.mrf.mxu1  ;;  %v2035_v16 = vpop.f32.mrf.mxu0 }
 0x134   : > { %v1442_v31 = vadd.f32 %v1412_v10, %v1068_v9  ;;  %v2036_v46 = vadd.f32 %v2035_v16, %v2034_v7 }
 0x135   : > { %v1414_v3 = vpop.f32.mrf.mxu1  ;;  %v2037_v23 = vpop.f32.mrf.mxu0 }
 0x136   : > { %v1457_v45 = vadd.f32 %v2786_v14, %v1442_v31  ;;  %v1415_v49 = vadd.f32 %v2036_v46, %v1414_v3  ;;  %v1084_v46 = vadd.f32 %v2755_v43, %v1019_v33 }
 0x137   : > { %v2038_v0 = vpop.f32.mrf.mxu0  ;;  %v2793_v11 = vpop.f32.mrf.mxu1 }
 0x138   : > { %vm1465_vm0 = vcmp.gt.f32.partialorder %v1457_v45, 0.0  ;;  %v1473_v44 = vmul.f32 0.1, %v1457_v45  ;;  %v1443_v58 = vadd.f32 %v1415_v49, %v1071_v22  ;;  %v2039_v59 = vadd.f32 %v2038_v0, %v2037_v23 }
 0x139   : > { %v2040_v18 = vpop.f32.mrf.mxu0  ;;  %v1427_v4 = vpop.f32.mrf.mxu1  ;;  %v794_v22 = vadd.f32 %v2731_v38, %v2737_v52  ;;  %v1876_v49 = vunpack.c.h.bf16 %v1905_v12  ;;  %v2002_v38 = vadd.f32 %v2770_v57, %v2766_v55 }
 0x13a   : > { %v1458_v17 = vadd.f32 %v2786_v14, %v1443_v58  ;;  %v1420_v60 = vadd.f32 %v2133_v8, %v2039_v59  ;;  %v1481_v62 = vsel %vm1465_vm0, %v1457_v45, %v1473_v44  ;;  %v1950_v45 = vadd.f32 %v2743_v34, %v2739_v53 }
 0x13b   : > { %v2041_v2 = vpop.f32.mrf.mxu0  ;;  %v1505_v51 = vadd.f32 %v1871_v19, %v1481_v62  ;;  %v2138_v3 = vpop.f32.mrf.mxu1  ;;  %v1087_v58 = vadd.f32 %v2768_v56, %v1022_v39 }
 0x13c   : > { %vm1466_vm1 = vcmp.gt.f32.partialorder %v1458_v17, 0.0  ;;  %v1474_v7 = vmul.f32 0.1, %v1458_v17  ;;  %v1444_v9 = vadd.f32 %v1420_v60, %v1076_v24  ;;  %v2042_v47 = vadd.f32 %v2041_v2, %v2040_v18 }
 0x13d   : > { %v2043_v8 = vpop.f32.mrf.mxu0  ;;  %v797_v15 = vadd.f32 %v2741_v28, %v1950_v45 }
 0x13e   : > { %v1482_v26 = vsel %vm1466_vm1, %v1458_v17, %v1474_v7  ;;  %v1459_v36 = vadd.f32 %v2786_v14, %v1444_v9  ;;  %v1423_v42 = vadd.f32 %v2134_v5, %v2042_v47  ;;  %v1999_v5 = vadd.f32 %v2764_v30, %v2759_v41  ;;  %v1430_v41 = vpop.f32.mrf.mxu1  ;;  %v1906_v17 = vld [vmem:[%s2781_s21 + $0x10] sm:$0xff]  }
 0x13f   : > { %v1506_v10 = vadd.f32 %v1872_v63, %v1482_v26  ;;  %v2044_v16 = vpop.f32.mrf.mxu0  ;;  %v1030_v55 = vadd.f32 %v2002_v38, %v797_v15  ;;  %v1879_v2 = vunpack.c.l.bf16 %v1906_v17 }
 0x140   : > { %vm1467_vm2 = vcmp.gt.f32.partialorder %v1459_v36, 0.0  ;;  %v1475_v13 = vmul.f32 0.1, %v1459_v36  ;;  %v1445_v40 = vadd.f32 %v1423_v42, %v1079_v1  ;;  %v2045_v54 = vadd.f32 %v2044_v16, %v2043_v8  ;;  %v1907_v42 = vld [vmem:[%s2781_s21 + $0x18] sm:$0xff]  }
 0x141   : > { %v1888_v27 = vpack.c.bf16 %v1506_v10, %v1505_v51  ;;  %v2046_v31 = vpop.f32.mrf.mxu0  ;;  %v1027_v44 = vadd.f32 %v1999_v5, %v794_v22  ;;  %v1095_v32 = vadd.f32 %v2762_v6, %v1030_v55  ;;  %v1883_v12 = vunpack.c.l.bf16 %v1907_v42 }
 0x142   : > { %v1460_v23 = vadd.f32 %v2786_v14, %v1445_v40  ;;  %v1428_v35 = vadd.f32 %v2045_v54, %v1427_v4  ;;  %v1483_v48 = vsel %vm1467_vm2, %v1459_v36, %v1475_v13  ;;  %v1880_v4 = vunpack.c.h.bf16 %v1906_v17 }
 0x143   : > { %1889 = vst [vmem:[%s2812_s26] sm:$0xff] %v1888_v27   ;;  %v2047_v50 = vpop.f32.mrf.mxu0  ;;  %v1507_v19 = vadd.f32 %v1875_v20, %v1483_v48  ;;  %v1092_v62 = vadd.f32 %v2751_v21, %v1027_v44  ;;  %v1884_v16 = vunpack.c.h.bf16 %v1907_v42 }
 0x144   : > { %vm1468_vm3 = vcmp.gt.f32.partialorder %v1460_v23, 0.0  ;;  %v1476_v30 = vmul.f32 0.1, %v1460_v23  ;;  %v1446_v0 = vadd.f32 %v1428_v35, %v1084_v46  ;;  %v2048_v43 = vadd.f32 %v2047_v50, %v2046_v31 }
 0x145   : > { %v2049_v59 = vpop.f32.mrf.mxu0 }
 0x146   : > { %v1484_v52 = vsel %vm1468_vm3, %v1460_v23, %v1476_v30  ;;  %v1461_v53 = vadd.f32 %v2786_v14, %v1446_v0  ;;  %v1431_v34 = vadd.f32 %v2048_v43, %v1430_v41 }
 0x147   : > { %v1508_v18 = vadd.f32 %v1876_v49, %v1484_v52  ;;  %v2050_v24 = vpop.f32.mrf.mxu0 }
 0x148   : > { %vm1469_vm4 = vcmp.gt.f32.partialorder %v1461_v53, 0.0  ;;  %v1477_v29 = vmul.f32 0.1, %v1461_v53  ;;  %v1447_v60 = vadd.f32 %v1431_v34, %v1087_v58  ;;  %v2051_v61 = vadd.f32 %v2050_v24, %v2049_v59 }
 0x149   : > { %v1893_v56 = vpack.c.bf16 %v1508_v18, %v1507_v19  ;;  %v2052_v25 = vpop.f32.mrf.mxu0 }
 0x14a   : > { %v1462_v57 = vadd.f32 %v2786_v14, %v1447_v60  ;;  %v1436_v63 = vadd.f32 %v2793_v11, %v2051_v61  ;;  %v1485_v28 = vsel %vm1469_vm4, %v1461_v53, %v1477_v29 }
 0x14b   : > { %1908 = vst [vmem:[%s2812_s26 + $0x8] sm:$0xff] %v1893_v56   ;;  %v2053_v7 = vpop.f32.mrf.mxu0  ;;  %v1509_v26 = vadd.f32 %v1879_v2, %v1485_v28 }
 0x14c   : > { %vm1470_vm5 = vcmp.gt.f32.partialorder %v1462_v57, 0.0  ;;  %v1478_v9 = vmul.f32 0.1, %v1462_v57  ;;  %v1448_v47 = vadd.f32 %v1436_v63, %v1092_v62  ;;  %v2054_v1 = vadd.f32 %v2053_v7, %v2052_v25 }
 0x14e   : > { %v1486_v8 = vsel %vm1470_vm5, %v1462_v57, %v1478_v9  ;;  %v1463_v21 = vadd.f32 %v2786_v14, %v1448_v47  ;;  %v1439_v33 = vadd.f32 %v2138_v3, %v2054_v1 }
 0x14f   : > { %v1510_v36 = vadd.f32 %v1880_v4, %v1486_v8 }
 0x150   : > { %v1479_v11 = vmul.f32 0.1, %v1463_v21  ;;  %v1449_v37 = vadd.f32 %v1439_v33, %v1095_v32  ;;  %vm1471_vm6 = vcmp.gt.f32.partialorder %v1463_v21, 0.0 }
 0x151   : > { %v1898_v51 = vpack.c.bf16 %v1510_v36, %v1509_v26 }
 0x152   : > { %v1464_v10 = vadd.f32 %v2786_v14, %v1449_v37  ;;  %v1487_v13 = vsel %vm1471_vm6, %v1463_v21, %v1479_v11 }
 0x153   : > { %1909 = vst [vmem:[%s2812_s26 + $0x10] sm:$0xff] %v1898_v51   ;;  %v1511_v54 = vadd.f32 %v1883_v12, %v1487_v13 }
 0x154   : > { %vm1472_vm7 = vcmp.gt.f32.partialorder %v1464_v10, 0.0  ;;  %v1480_v6 = vmul.f32 0.1, %v1464_v10 }
 0x156   : > { %v1488_v40 = vsel %vm1472_vm7, %v1464_v10, %v1480_v6 }
 0x157   : > { %v1512_v5 = vadd.f32 %v1884_v16, %v1488_v40 }
 0x159   : > { %v1903_v3 = vpack.c.bf16 %v1512_v5, %v1511_v54 }
 0x15b   : > { %1910 = vst [vmem:[%s2812_s26 + $0x18] sm:$0xff] %v1903_v3  }
 0x15c PF: > { %s14_s17 = sadd.s32 1, %s2277_s17   ;;  %s2853_s15 = smov %s2273_s16 }
 0x15d   : > { %p11_p6 = scmp.ge.s32.totalorder %s14_s17, 4   ;;  %s2854_s16 = smov %s2856_s18 }
 0x15f   :  { %13 = sbr.rel (!%p11_p6) target bundleno = 2 (0x2), region = 72 }

// kernel: darknet_forward.23
= control target key start
LH: loop header
LB: loop body
LE: loop exit
PB: predicated region body
PF: predicated region fallthrough
CT: control target
= control target key end

     0   :  { %s740_s12 = smov 0   ;;  %s742_s13 = smov 0   ;;  %s855_s0 = inlined_call_operand.vmem [shape: bf16[2,16,16,128], index: 0, kind: input, shape index: {}]   ;;  %s856_s1 = inlined_call_operand.vmem [shape: bf16[1,128,128], index: 1, kind: input, shape index: {}]   ;;  %s857_s2 = inlined_call_operand.vmem [shape: f32[1,128], index: 2, kind: input, shape index: {}]   ;;  %s858_s3 = inlined_call_operand.vmem [shape: f32[512,128], index: 3, kind: output, shape index: {}]  }
   0x1   :  { %s744_s14 = smov 0   ;;  %s746_s15 = smov 0  }
   0x2   :  { %s748_s16 = smov 0  }
   0x3 LB: > { %s22_s17 = sadd.s32 1, %s710_s14  ;;  %s25_s18 = sadd.s32 1, %s714_s15  ;;  %s718_s16 = sphi %s748_s16, %s13_s16   ;;  %s714_s15 = sphi %s746_s15, %s862_s15   ;;  %s710_s14 = sphi %s744_s14, %s861_s14   ;;  %s706_s13 = sphi %s742_s13, %s860_s13   ;;  %s702_s12 = sphi %s740_s12, %s859_s12  }
   0x4   : > { %p23_p0 = scmp.ge.s32.totalorder %s22_s17, 2  ;;  %p529_p1 = scmp.ge.s32.totalorder %s718_s16, 1 }
   0x5   : > { %p153_p2 = scmp.lt.s32.totalorder %s718_s16, 5 }
   0x6   : > { %s864_s17 = smov (%p23_p0, %s22_s17), 0  ;;  %s866_s18 = smov (!%p23_p0, %s25_s18), %s714_s15 }
   0x7   : > { %p154_p3 = pnand %p529_p1, %p153_p2  ;;  %p27_p4 = scmp.ge.s32.totalorder %s866_s18, 2 }
   0x8   : > { %p179_p5 = scmp.lt.s32.totalorder (!%p154_p3), %s706_s13, 1  ;;  %s559_s24 = sshll.u32 (!%p154_p3), %s702_s12, 6 }
   0x9   : > { %s868_s18 = smov (%p27_p4, %s866_s18), 0  ;;  %157 = sbr.rel (%p154_p3) target bundleno = 257 (0x101), region = 32 }
   0xa   : > { %s532_s22 = sshll.u32 (!%p154_p3), %s706_s13, 1 }
   0xe   : > { %v664_v0 = vld [vmem:[%s856_s1 + $0x38] sm:$0xff]   ;;  %v665_v1 = vld [vmem:[%s856_s1 + $0x30] sm:$0xff]   ;;  %s180_s23 = scalar_select %p179_p5, %s706_s13, 1  ;;  %v666_v2 = vld [vmem:[%s856_s1 + $0x28] sm:$0xff]  }
   0xf   : > { %576 = vmatprep.subr.bf16.mxu0 %v664_v0  ;;  %608 = vmatprep.subr.bf16.mxu1 %v664_v0  ;;  %v667_v3 = vld [vmem:[%s856_s1 + $0x20] sm:$0xff]   ;;  %v668_v6 = vld [vmem:[%s856_s1 + $0x18] sm:$0xff]   ;;  %v669_v7 = vld [vmem:[%s856_s1 + $0x10] sm:$0xff]  }
  0x10   : > { %577 = vmatpush3.bf16.msra.mxu0 %v664_v0  ;;  %616 = vmatpush3.bf16.msra.mxu1 %v664_v0  ;;  %s557_s27 = sshll.u32 %s180_s23, 7  ;;  %v670_v8 = vld [vmem:[%s856_s1 + $0x8] sm:$0xff]   ;;  %v671_v9 = vld [vmem:[%s856_s1] sm:$0xff]   ;;  %s185_s23 = sadd.s32 %s702_s12, %s532_s22 }
  0x11   : > { %578 = vmatprep.subr.bf16.mxu0 %v665_v1  ;;  %609 = vmatprep.subr.bf16.mxu1 %v665_v1  ;;  %s183_s30 = scalar_lea.vmem %s855_s0, %s557_s27  ;;  %v538_v16 = vld [vmem:[%s857_s2] ss:$0 sm:$0xff] }
  0x12   : > { %s789_s4 = scalar_lea.vmem %s183_s30, %s559_s24  ;;  %s533_s24 = sshll.u32 %s185_s23, 4 }
  0x13   : > { %v672_v4 = vld [vmem:[%s789_s4] sm:$0xff]   ;;  %v674_v10 = vld [vmem:[%s789_s4 + $0x8] sm:$0xff]   ;;  %v676_v12 = vld [vmem:[%s789_s4 + $0x10] sm:$0xff]   ;;  %p187_p6 = scmp.lt.s32.totalorder %s533_s24, 63 }
  0x14   : > { %579 = vmatpush3.bf16.msra.mxu0 %v665_v1  ;;  %617 = vmatpush3.bf16.msra.mxu1 %v665_v1  ;;  %v673_v5 = vld [vmem:[%s789_s4 + $0x20] sm:$0xff]   ;;  %v675_v11 = vld [vmem:[%s789_s4 + $0x28] sm:$0xff]   ;;  %v677_v13 = vld [vmem:[%s789_s4 + $0x30] sm:$0xff]  }
  0x15   : > { %580 = vmatprep.subr.bf16.mxu0 %v666_v2  ;;  %610 = vmatprep.subr.bf16.mxu1 %v666_v2  ;;  %v678_v14 = vld [vmem:[%s789_s4 + $0x18] sm:$0xff]   ;;  %s870_s24 = smov (!%p187_p6, %s533_s24), 63 }
  0x16   : > { %592 = vmatprep.mubr.bf16.mxu0 %v672_v4  ;;  %600 = vmatprep.mubr.bf16.mxu1 %v673_v5  ;;  %v679_v15 = vld [vmem:[%s789_s4 + $0x38] sm:$0xff]   ;;  %s534_s25 = sshll.u32 %s870_s24, 3 }
  0x17   : > { %s822_s30 = scalar_lea.vmem %s858_s3, %s534_s25 }
  0x18   : > { %581 = vmatpush3.bf16.msra.mxu0 %v666_v2  ;;  %618 = vmatpush3.bf16.msra.mxu1 %v666_v2 }
  0x19   : > { %582 = vmatprep.subr.bf16.mxu0 %v667_v3  ;;  %611 = vmatprep.subr.bf16.mxu1 %v667_v3 }
  0x1c   : > { %583 = vmatpush3.bf16.msra.mxu0 %v667_v3  ;;  %619 = vmatpush3.bf16.msra.mxu1 %v667_v3 }
  0x1d   : > { %584 = vmatprep.subr.bf16.mxu0 %v668_v6  ;;  %612 = vmatprep.subr.bf16.mxu1 %v668_v6 }
  0x20   : > { %585 = vmatpush3.bf16.msra.mxu0 %v668_v6  ;;  %620 = vmatpush3.bf16.msra.mxu1 %v668_v6 }
  0x21   : > { %586 = vmatprep.subr.bf16.mxu0 %v669_v7  ;;  %613 = vmatprep.subr.bf16.mxu1 %v669_v7 }
  0x24   : > { %587 = vmatpush3.bf16.msra.mxu0 %v669_v7  ;;  %621 = vmatpush3.bf16.msra.mxu1 %v669_v7 }
  0x25   : > { %588 = vmatprep.subr.bf16.mxu0 %v670_v8  ;;  %614 = vmatprep.subr.bf16.mxu1 %v670_v8 }
  0x28   : > { %589 = vmatpush3.bf16.msra.mxu0 %v670_v8  ;;  %622 = vmatpush3.bf16.msra.mxu1 %v670_v8 }
  0x29   : > { %590 = vmatprep.subr.bf16.mxu0 %v671_v9  ;;  %615 = vmatprep.subr.bf16.mxu1 %v671_v9 }
  0x2c   : > { %591 = vmatpush3.bf16.msra.mxu0 %v671_v9  ;;  %623 = vmatpush3.bf16.msra.mxu1 %v671_v9 }
  0x2f   : > { %593 = vmatmul.mubr.bf16.vlgmr.msra.gmra.mxu0 %v674_v10  ;;  %601 = vmatmul.mubr.bf16.vlgmr.msra.gmra.mxu1 %v675_v11 }
  0x30   : > { %596 = vmatprep.mubr.bf16.mxu0 %v676_v12  ;;  %604 = vmatprep.mubr.bf16.mxu1 %v677_v13 }
  0x37   : > { %597 = vmatmul.mubr.bf16.gmra.mxu0 %v678_v14  ;;  %605 = vmatmul.mubr.bf16.gmra.mxu1 %v679_v15 }
  0xef   : > { %v594_v17 = vpop.f32.mrf.mxu0  ;;  %v602_v18 = vpop.f32.mrf.mxu1 }
  0xf0   : > { %v377_v19 = vadd.f32 %v594_v17, %v538_v16  ;;  %v409_v20 = vadd.f32 %v602_v18, %v538_v16 }
  0xf1   : > { %v368_v21 = vpop.f32.mrf.mxu0  ;;  %v400_v22 = vpop.f32.mrf.mxu1 }
  0xf2   : > { %433 = vst [vmem:[%s822_s30 + $0x10] sm:$0xff] %v377_v19  ;;  %441 = vst [vmem:[%s822_s30 + $0x50] sm:$0xff] %v409_v20  ;;  %v369_v23 = vadd.f32 %v538_v16, %v368_v21  ;;  %v401_v24 = vadd.f32 %v538_v16, %v400_v22 }
  0xf3   : > { %v595_v25 = vpop.f32.mrf.mxu0  ;;  %v603_v26 = vpop.f32.mrf.mxu1 }
  0xf4   : > { %431 = vst [vmem:[%s822_s30] sm:$0xff] %v369_v23  ;;  %439 = vst [vmem:[%s822_s30 + $0x40] sm:$0xff] %v401_v24  ;;  %v380_v27 = vadd.f32 %v595_v25, %v538_v16  ;;  %v412_v28 = vadd.f32 %v603_v26, %v538_v16 }
  0xf5   : > { %v371_v29 = vpop.f32.mrf.mxu0  ;;  %v403_v30 = vpop.f32.mrf.mxu1 }
  0xf6   : > { %434 = vst [vmem:[%s822_s30 + $0x18] sm:$0xff] %v380_v27  ;;  %442 = vst [vmem:[%s822_s30 + $0x58] sm:$0xff] %v412_v28  ;;  %v372_v31 = vadd.f32 %v538_v16, %v371_v29  ;;  %v404_v32 = vadd.f32 %v538_v16, %v403_v30 }
  0xf7   : > { %v598_v33 = vpop.f32.mrf.mxu0  ;;  %v606_v34 = vpop.f32.mrf.mxu1 }
  0xf8   : > { %432 = vst [vmem:[%s822_s30 + $0x8] sm:$0xff] %v372_v31  ;;  %440 = vst [vmem:[%s822_s30 + $0x48] sm:$0xff] %v404_v32  ;;  %v393_v35 = vadd.f32 %v598_v33, %v538_v16  ;;  %v425_v36 = vadd.f32 %v606_v34, %v538_v16 }
  0xf9   : > { %v384_v37 = vpop.f32.mrf.mxu0  ;;  %v416_v38 = vpop.f32.mrf.mxu1 }
  0xfa   : > { %437 = vst [vmem:[%s822_s30 + $0x30] sm:$0xff] %v393_v35  ;;  %445 = vst [vmem:[%s822_s30 + $0x70] sm:$0xff] %v425_v36  ;;  %v385_v39 = vadd.f32 %v538_v16, %v384_v37  ;;  %v417_v40 = vadd.f32 %v538_v16, %v416_v38 }
  0xfb   : > { %v599_v41 = vpop.f32.mrf.mxu0  ;;  %v607_v42 = vpop.f32.mrf.mxu1 }
  0xfc   : > { %435 = vst [vmem:[%s822_s30 + $0x20] sm:$0xff] %v385_v39  ;;  %443 = vst [vmem:[%s822_s30 + $0x60] sm:$0xff] %v417_v40  ;;  %v396_v43 = vadd.f32 %v599_v41, %v538_v16  ;;  %v428_v44 = vadd.f32 %v607_v42, %v538_v16 }
  0xfd   : > { %v387_v45 = vpop.f32.mrf.mxu0  ;;  %v419_v46 = vpop.f32.mrf.mxu1 }
  0xfe   : > { %438 = vst [vmem:[%s822_s30 + $0x38] sm:$0xff] %v396_v43  ;;  %446 = vst [vmem:[%s822_s30 + $0x78] sm:$0xff] %v428_v44  ;;  %v388_v47 = vadd.f32 %v538_v16, %v387_v45  ;;  %v420_v48 = vadd.f32 %v538_v16, %v419_v46 }
 0x100   : > { %436 = vst [vmem:[%s822_s30 + $0x28] sm:$0xff] %v388_v47  ;;  %444 = vst [vmem:[%s822_s30 + $0x68] sm:$0xff] %v420_v48 }
 0x101 PF: > { %s13_s16 = sadd.s32 1, %s718_s16   ;;  %s859_s12 = smov %s710_s14 }
 0x102   : > { %p10_p7 = scmp.ge.s32.totalorder %s13_s16, 6   ;;  %s860_s13 = smov %s714_s15 }
 0x103   : > { %s861_s14 = smov %s864_s17  ;;  %s862_s15 = smov %s868_s18 }
 0x104   :  { %12 = sbr.rel (!%p10_p7) target bundleno = 3 (0x3), region = 63 }

// kernel: darknet_forward.22
= control target key start
LH: loop header
LB: loop body
LE: loop exit
PB: predicated region body
PF: predicated region fallthrough
CT: control target
= control target key end

     0   :  { %s4367_s12 = smov 0   ;;  %s4369_s13 = smov 0   ;;  %s5614_s0 = inlined_call_operand.vmem [shape: bf16[2,18,18,256], index: 0, kind: input, shape index: {}]   ;;  %s5615_s1 = inlined_call_operand.vmem [shape: bf16[3,768,128], index: 1, kind: input, shape index: {}]   ;;  %s5616_s2 = inlined_call_operand.vmem [shape: f32[1,128], index: 2, kind: input, shape index: {}]   ;;  %s5617_s3 = inlined_call_operand.vmem [shape: bf16[512,128], index: 3, kind: output, shape index: {}]  }
   0x1   :  { %s4371_s14 = smov 0   ;;  %s4373_s15 = smov 0  }
   0x2   :  { %s4375_s16 = smov 0  }
   0x3 LB: > { %s22_s17 = sadd.s32 1, %s4337_s14  ;;  %s25_s18 = sadd.s32 1, %s4341_s15  ;;  %s4345_s16 = sphi %s4375_s16, %s13_s16   ;;  %s4341_s15 = sphi %s4373_s15, %s5621_s15   ;;  %s4337_s14 = sphi %s4371_s14, %s5620_s14   ;;  %s4333_s13 = sphi %s4369_s13, %s5619_s13   ;;  %s4329_s12 = sphi %s4367_s12, %s5618_s12  }
   0x4   : > { %p23_p0 = scmp.ge.s32.totalorder %s22_s17, 2  ;;  %p2997_p1 = scmp.ge.s32.totalorder %s4345_s16, 1 }
   0x5   : > { %p153_p2 = scmp.lt.s32.totalorder %s4345_s16, 5 }
   0x6   : > { %s5623_s17 = smov (%p23_p0, %s22_s17), 0  ;;  %s5625_s18 = smov (!%p23_p0, %s25_s18), %s4341_s15 }
   0x7   : > { %p154_p3 = pnand %p2997_p1, %p153_p2  ;;  %p27_p4 = scmp.ge.s32.totalorder %s5625_s18, 2 }
   0x8   : > { %p179_p5 = scmp.lt.s32.totalorder (!%p154_p3), %s4333_s13, 1  ;;  %s3400_s8 = smul.u32 (!%p154_p3), 192, %s4329_s12 }
   0x9   : > { %s5627_s18 = smov (%p27_p4, %s5625_s18), 0  ;;  %157 = sbr.rel (%p154_p3) target bundleno = 542 (0x21e), region = 32 }
   0xe   : > { %v4097_v0 = vld [vmem:[%s5615_s1 + $0x1f8] sm:$0xff]   ;;  %v4099_v2 = vld [vmem:[%s5615_s1 + $0x1f0] sm:$0xff]   ;;  %s180_s25 = scalar_select %p179_p5, %s4333_s13, 1  ;;  %v4101_v4 = vld [vmem:[%s5615_s1 + $0x1e8] sm:$0xff]   ;;  %vm558_vm0 = vcmask 1046528  }
   0xf   : > { %v4098_v1 = vld [vmem:[%s5615_s1 + $0x1b8] sm:$0xff]   ;;  %3464 = vmatprep.subr.bf16.mxu0 %v4097_v0  ;;  %4040 = vmatprep.subr.bf16.mxu1 %v4097_v0  ;;  %v4100_v3 = vld [vmem:[%s5615_s1 + $0x1b0] sm:$0xff]   ;;  %v4102_v5 = vld [vmem:[%s5615_s1 + $0x1a8] sm:$0xff]   ;;  %vm349_vm1 = vsmask.f32 7424 }
  0x10   : > { %3465 = vmatpush3.bf16.msra.mxu0 %v4098_v1  ;;  %4048 = vmatpush3.bf16.msra.mxu1 %v4098_v1  ;;  %s4056_s30 = smul.u32 432, %s180_s25  ;;  %v4103_v6 = vld [vmem:[%s5615_s1 + $0x1e0] sm:$0xff]   ;;  %v4105_v8 = vld [vmem:[%s5615_s1 + $0x1d8] sm:$0xff]   ;;  %v4107_v10 = vld [vmem:[%s5615_s1 + $0x1d0] sm:$0xff]  }
  0x11   : > { %3466 = vmatprep.subr.bf16.mxu0 %v4099_v2  ;;  %4041 = vmatprep.subr.bf16.mxu1 %v4099_v2  ;;  %v4104_v7 = vld [vmem:[%s5615_s1 + $0x1a0] sm:$0xff]   ;;  %v4106_v9 = vld [vmem:[%s5615_s1 + $0x198] sm:$0xff]   ;;  %v4108_v13 = vld [vmem:[%s5615_s1 + $0x190] sm:$0xff]  }
  0x12   : > { %s183_s11 = scalar_lea.vmem %s5614_s0, %s4056_s30  ;;  %v4109_v14 = vld [vmem:[%s5615_s1 + $0x1c8] sm:$0xff]   ;;  %v4111_v16 = vld [vmem:[%s5615_s1 + $0x1c0] sm:$0xff]   ;;  %v4119_v20 = vld [vmem:[%s5615_s1 + $0x278] sm:$0xff]  }
  0x13   : > { %s4434_s23 = scalar_lea.vmem %s183_s11, %s3400_s8  ;;  %v4110_v15 = vld [vmem:[%s5615_s1 + $0x188] sm:$0xff]   ;;  %v4112_v17 = vld [vmem:[%s5615_s1 + $0x180] sm:$0xff]   ;;  %v4120_v21 = vld [vmem:[%s5615_s1 + $0x2f8] sm:$0xff]  }
  0x14   : > { %3467 = vmatpush3.bf16.msra.mxu0 %v4100_v3  ;;  %4049 = vmatpush3.bf16.msra.mxu1 %v4100_v3  ;;  %v4443_v11 = vld [vmem:[%s4434_s23 + $0x1c] ss:$8 sps:$4 sm:$0xff]   ;;  %v4466_v18 = vld [vmem:[%s4434_s23 + $0x18] ss:$8 sps:$4 sm:$0xff]   ;;  %v4123_v24 = vld [vmem:[%s5615_s1 + $0x270] sm:$0xff]  }
  0x15   : > { %3468 = vmatprep.subr.bf16.mxu0 %v4101_v4  ;;  %4042 = vmatprep.subr.bf16.mxu1 %v4101_v4  ;;  %v4446_v12 = vld [vmem:[%s4434_s23 + $0x7c] ss:$8 sps:$4 sm:$0xff]   ;;  %v4469_v19 = vld [vmem:[%s4434_s23 + $0x78] ss:$8 sps:$4 sm:$0xff]   ;;  %v4124_v25 = vld [vmem:[%s5615_s1 + $0x2f0] sm:$0xff]   ;;  %v389_v30 = vshll.u32 %v4443_v11, 16 }
  0x16   : > { %1185 = vmatprep.mubr.bf16.mxu0 %v4443_v11  ;;  %1217 = vmatprep.mubr.bf16.mxu1 %v4446_v12  ;;  %v4121_v22 = vld [vmem:[%s5615_s1 + $0x238] sm:$0xff]   ;;  %v4125_v27 = vld [vmem:[%s5615_s1 + $0x230] sm:$0xff]   ;;  %v4133_v31 = vld [vmem:[%s5615_s1 + $0x268] sm:$0xff]   ;;  %v377_v32 = vshll.u32 %v4466_v18, 16  ;;  %v387_v37 = vshrl.u32 %v4443_v11, 16  ;;  %v568_v39 = vrot.slane %v4443_v11, 1 }
  0x17   : > { %v4122_v23 = vld [vmem:[%s5615_s1 + $0x2b8] sm:$0xff]   ;;  %v4126_v29 = vld [vmem:[%s5615_s1 + $0x2b0] sm:$0xff]   ;;  %v4134_v34 = vld [vmem:[%s5615_s1 + $0x2e8] sm:$0xff]   ;;  %v4523_v38 = vrot.slane %v389_v30, 1  ;;  %v375_v43 = vshrl.u32 %v4466_v18, 16  ;;  %v565_v45 = vrot.slane %v4466_v18, 1 }
  0x18   : > { %3469 = vmatpush3.bf16.msra.mxu0 %v4102_v5  ;;  %4050 = vmatpush3.bf16.msra.mxu1 %v4102_v5  ;;  %v4490_v26 = vld [vmem:[%s4434_s23 + $0x34] ss:$8 sps:$4 sm:$0xff]   ;;  %v4509_v33 = vld [vmem:[%s4434_s23 + $0x30] ss:$8 sps:$4 sm:$0xff]   ;;  %v4135_v36 = vld [vmem:[%s5615_s1 + $0x228] sm:$0xff]   ;;  %v4536_v44 = vrot.slane %v377_v32, 1 }
  0x19   : > { %3470 = vmatprep.subr.bf16.mxu0 %v4103_v6  ;;  %4043 = vmatprep.subr.bf16.mxu1 %v4103_v6  ;;  %v4496_v28 = vld [vmem:[%s4434_s23 + $0x94] ss:$8 sps:$4 sm:$0xff]   ;;  %v4517_v35 = vld [vmem:[%s4434_s23 + $0x90] ss:$8 sps:$4 sm:$0xff]   ;;  %v4136_v40 = vld [vmem:[%s5615_s1 + $0x2a8] sm:$0xff]   ;;  %v483_v50 = vshrl.u32 %v4446_v12, 16 }
  0x1a   : > { %v4137_v41 = vld [vmem:[%s5615_s1 + $0x260] sm:$0xff]   ;;  %v4540_v46 = vld [vmem:[%s4434_s23 + $0x4c] ss:$8 sps:$4 sm:$0xff]   ;;  %v4147_v51 = vld [vmem:[%s5615_s1 + $0x258] sm:$0xff]   ;;  %v485_v52 = vshll.u32 %v4446_v12, 16  ;;  %v592_v56 = vrot.slane %v4446_v12, 1 }
  0x1b   : > { %v4138_v42 = vld [vmem:[%s5615_s1 + $0x2e0] sm:$0xff]   ;;  %v4546_v48 = vld [vmem:[%s4434_s23 + $0xac] ss:$8 sps:$4 sm:$0xff]   ;;  %v4559_v53 = vld [vmem:[%s4434_s23 + $0x48] ss:$8 sps:$4 sm:$0xff]   ;;  %v413_v59 = vshll.u32 %v4490_v26, 16 }
  0x1c   : > { %3471 = vmatpush3.bf16.msra.mxu0 %v4104_v7  ;;  %4051 = vmatpush3.bf16.msra.mxu1 %v4104_v7  ;;  %v4139_v47 = vld [vmem:[%s5615_s1 + $0x220] sm:$0xff]   ;;  %v4562_v54 = vld [vmem:[%s4434_s23 + $0xa8] ss:$8 sps:$4 sm:$0xff]   ;;  %v4148_v55 = vld [vmem:[%s5615_s1 + $0x2d8] sm:$0xff]   ;;  %v401_v61 = vshll.u32 %v4509_v33, 16  ;;  %v471_v63 = vshrl.u32 %v4469_v19, 16 }
  0x1d   : > { %3472 = vmatprep.subr.bf16.mxu0 %v4105_v8  ;;  %4044 = vmatprep.subr.bf16.mxu1 %v4105_v8  ;;  %v4140_v49 = vld [vmem:[%s5615_s1 + $0x2a0] sm:$0xff]   ;;  %v4149_v57 = vld [vmem:[%s5615_s1 + $0x218] sm:$0xff]   ;;  %v4151_v60 = vld [vmem:[%s5615_s1 + $0x250] sm:$0xff]   ;;  %v411_v1 = vshrl.u32 %v4490_v26, 16  ;;  %v574_v2 = vrot.slane %v4490_v26, 1  ;;  %v4593_v4 = vrot.slane %v413_v59, 1 }
  0x1e   : > { %v4150_v58 = vld [vmem:[%s5615_s1 + $0x298] sm:$0xff]   ;;  %v4152_v62 = vld [vmem:[%s5615_s1 + $0x2d0] sm:$0xff]   ;;  %v4586_v0 = vld [vmem:[%s4434_s23 + $0x64] ss:$8 sps:$4 sm:$0xff]   ;;  %v399_v5 = vshrl.u32 %v4509_v33, 16  ;;  %v4604_v8 = vrot.slane %v401_v61, 1 }
  0x1f   : > { %v4591_v3 = vld [vmem:[%s4434_s23 + $0xc4] ss:$8 sps:$4 sm:$0xff]   ;;  %v4153_v6 = vld [vmem:[%s5615_s1 + $0x210] sm:$0xff]   ;;  %v4173_v61 = vld [vmem:[%s5615_s1 + $0xf8] sm:$0xff]  }
  0x20   : > { %3473 = vmatpush3.bf16.msra.mxu0 %v4106_v9  ;;  %4052 = vmatpush3.bf16.msra.mxu1 %v4106_v9  ;;  %v4154_v7 = vld [vmem:[%s5615_s1 + $0x290] sm:$0xff]   ;;  %v571_v9 = vrot.slane %v4509_v33, 1  ;;  %v4167_v32 = vld [vmem:[%s5615_s1 + $0x200] sm:$0xff]   ;;  %v4207_v12 = vld [vmem:[%s5615_s1 + $0x48] sm:$0xff]  }
  0x21   : > { %3474 = vmatprep.subr.bf16.mxu0 %v4107_v10  ;;  %4045 = vmatprep.subr.bf16.mxu1 %v4107_v10  ;;  %v4161_v10 = vld [vmem:[%s5615_s1 + $0x248] sm:$0xff]   ;;  %v207_v11 = vld [vmem:[%s4434_s23 + $0x40] sm:$0x11] }
  0x24   : > { %3475 = vmatpush3.bf16.msra.mxu0 %v4108_v13  ;;  %4053 = vmatpush3.bf16.msra.mxu1 %v4108_v13  ;;  %v4610_v13 = vrot.slane %v485_v52, 1  ;;  %v4171_v52 = vld [vmem:[%s5615_s1 + $0x78] sm:$0xff]  }
  0x25   : > { %3476 = vmatprep.subr.bf16.mxu0 %v4109_v14  ;;  %4046 = vmatprep.subr.bf16.mxu1 %v4109_v14  ;;  %v4613_v14 = vld [vmem:[%s4434_s23 + $0x60] ss:$8 sps:$4 sm:$0xff]  }
  0x28   : > { %3477 = vmatpush3.bf16.msra.mxu0 %v4110_v15  ;;  %4054 = vmatpush3.bf16.msra.mxu1 %v4110_v15  ;;  %v4616_v15 = vld [vmem:[%s4434_s23 + $0xc0] ss:$8 sps:$4 sm:$0xff]  }
  0x29   : > { %3478 = vmatprep.subr.bf16.mxu0 %v4111_v16  ;;  %4047 = vmatprep.subr.bf16.mxu1 %v4111_v16  ;;  %v4162_v16 = vld [vmem:[%s5615_s1 + $0x2c8] sm:$0xff]  }
  0x2c   : > { %3479 = vmatpush3.bf16.msra.mxu0 %v4112_v17  ;;  %4055 = vmatpush3.bf16.msra.mxu1 %v4112_v17  ;;  %v473_v17 = vshll.u32 %v4469_v19, 16 }
  0x2d   : > { %3528 = vmatprep.subr.bf16.mxu1 %v4119_v20  ;;  %3592 = vmatprep.subr.bf16.mxu0 %v4120_v21  ;;  %v4163_v20 = vld [vmem:[%s5615_s1 + $0x208] sm:$0xff]   ;;  %v437_v21 = vshll.u32 %v4540_v46, 16 }
  0x2f   : > { %1186 = vmatmul.mubr.bf16.vlgmr.msra.gmra.mxu0 %v4466_v18  ;;  %1218 = vmatmul.mubr.bf16.vlgmr.msra.gmra.mxu1 %v4469_v19  ;;  %v4640_v30 = vrot.slane %v437_v21, 1  ;;  %v4178_v21 = vld [vmem:[%s5615_s1 + $0x30] sm:$0xff]  }
  0x30   : > { %3529 = vmatpush3.bf16.msra.mxu1 %v4121_v22  ;;  %3593 = vmatpush3.bf16.msra.mxu0 %v4122_v23  ;;  %v4164_v22 = vld [vmem:[%s5615_s1 + $0x288] sm:$0xff]   ;;  %v589_v23 = vrot.slane %v4469_v19, 1 }
  0x31   : > { %3530 = vmatprep.subr.bf16.mxu1 %v4123_v24  ;;  %3594 = vmatprep.subr.bf16.mxu0 %v4124_v25  ;;  %v4165_v24 = vld [vmem:[%s5615_s1 + $0x240] sm:$0xff]   ;;  %v507_v25 = vshrl.u32 %v4496_v28, 16 }
  0x32   : > { %1193 = vmatprep.mubr.bf16.mxu0 %v4490_v26  ;;  %1225 = vmatprep.mubr.bf16.mxu1 %v4496_v28 }
  0x34   : > { %3531 = vmatpush3.bf16.msra.mxu1 %v4125_v27  ;;  %3595 = vmatpush3.bf16.msra.mxu0 %v4126_v29  ;;  %v4166_v27 = vld [vmem:[%s5615_s1 + $0x2c0] sm:$0xff]   ;;  %v435_v29 = vshrl.u32 %v4540_v46, 16 }
  0x35   : > { %3532 = vmatprep.subr.bf16.mxu1 %v4133_v31  ;;  %3596 = vmatprep.subr.bf16.mxu0 %v4134_v34  ;;  %v580_v31 = vrot.slane %v4540_v46, 1  ;;  %v204_v34 = vld [vmem:[%s4434_s23 + $0x28] sm:$0x11] }
  0x37   : > { %1194 = vmatmul.mubr.bf16.gmra.mxu0 %v4509_v33  ;;  %1226 = vmatmul.mubr.bf16.gmra.mxu1 %v4517_v35  ;;  %v4184_v33 = vld [vmem:[%s5615_s1 + $0x28] sm:$0xff]  }
  0x38   : > { %3533 = vmatpush3.bf16.msra.mxu1 %v4135_v36  ;;  %3597 = vmatpush3.bf16.msra.mxu0 %v4136_v40  ;;  %v425_v36 = vshll.u32 %v4559_v53, 16  ;;  %v4168_v40 = vld [vmem:[%s5615_s1 + $0x280] sm:$0xff]  }
  0x39   : > { %3534 = vmatprep.subr.bf16.mxu1 %v4137_v41  ;;  %3598 = vmatprep.subr.bf16.mxu0 %v4138_v42  ;;  %v3023_v41 = vcombine.low %v204_v34, %v204_v34  ;;  %v3024_v42 = vcombine.high %v204_v34, %v204_v34 }
  0x3a   : > { %1201 = vmatprep.mubr.bf16.mxu0 %v4540_v46  ;;  %1233 = vmatprep.mubr.bf16.mxu1 %v4546_v48 }
  0x3b   : > { %v382_v59 = vshll.u32 %v3023_v41, 16 }
  0x3c   : > { %3535 = vmatpush3.bf16.msra.mxu1 %v4139_v47  ;;  %3599 = vmatpush3.bf16.msra.mxu0 %v4140_v49  ;;  %v423_v47 = vshrl.u32 %v4559_v53, 16  ;;  %v392_v49 = vor.u32 %v4523_v38, %v387_v37  ;;  %v4667_v37 = vrot.slane %v425_v36, 1 }
  0x3d   : > { %3536 = vmatprep.subr.bf16.mxu1 %v4147_v51  ;;  %3600 = vmatprep.subr.bf16.mxu0 %v4148_v55  ;;  %v380_v51 = vor.u32 %v4536_v44, %v375_v43  ;;  %v577_v55 = vrot.slane %v4559_v53, 1  ;;  %v384_v44 = vrot.slane %v382_v59, 1 }
  0x3e   : > { %v428_v46 = vor.u32 %v4667_v37, %v423_v47  ;;  %v4191_v47 = vld [vmem:[%s5615_s1 + $0xe0] sm:$0xff]  }
  0x3f   : > { %1202 = vmatmul.mubr.bf16.gmra.mxu0 %v4559_v53  ;;  %1234 = vmatmul.mubr.bf16.gmra.mxu1 %v4562_v54  ;;  %v4691_v18 = vsel %vm349_vm1, %v380_v51, %v384_v44  ;;  %v4192_v37 = vld [vmem:[%s5615_s1 + $0xa0] sm:$0xff]   ;;  %v4195_v53 = vld [vmem:[%s5615_s1 + $0x58] sm:$0xff]  }
  0x40   : > { %3537 = vmatpush3.bf16.msra.mxu1 %v4149_v57  ;;  %3601 = vmatpush3.bf16.msra.mxu0 %v4150_v58  ;;  %v394_v57 = vshll.u32 %v3024_v42, 16  ;;  %v569_v58 = vrot.slane %v3024_v42, 1 }
  0x41   : > { %3538 = vmatprep.subr.bf16.mxu1 %v4151_v60  ;;  %3602 = vmatprep.subr.bf16.mxu0 %v4152_v62  ;;  %v566_v60 = vrot.slane %v3023_v41, 1  ;;  %v4718_v41 = vrot.slane %v473_v17, 1  ;;  %v4183_v17 = vld [vmem:[%s5615_s1 + $0x68] sm:$0xff]  }
  0x42   : > { %1209 = vmatprep.mubr.bf16.mxu0 %v4586_v0  ;;  %1241 = vmatprep.mubr.bf16.mxu1 %v4591_v3  ;;  %v396_v38 = vrot.slane %v394_v57, 1  ;;  %v4672_v43 = vsel %vm558_vm0, %v568_v39, %v569_v58  ;;  %v459_v57 = vshrl.u32 %v4586_v0, 16 }
  0x43   : > { %v4677_v62 = vsel %vm558_vm0, %v565_v45, %v566_v60  ;;  %v3026_v45 = vcombine.high %v207_v11, %v207_v11 }
  0x44   : > { %3539 = vmatpush3.bf16.msra.mxu1 %v4153_v6  ;;  %3603 = vmatpush3.bf16.msra.mxu0 %v4154_v7  ;;  %v4172_v6 = vld [vmem:[%s5615_s1 + $0x38] sm:$0xff]   ;;  %v4688_v39 = vsel %vm349_vm1, %v392_v49, %v396_v38  ;;  %v213_v38 = vld [vmem:[%s4434_s23 + $0x70] sm:$0x11] }
  0x45   : > { %3540 = vmatprep.subr.bf16.mxu1 %v4161_v10  ;;  %3604 = vmatprep.subr.bf16.mxu0 %v4162_v16  ;;  %v4174_v7 = vld [vmem:[%s5615_s1 + $0xb8] sm:$0xff]   ;;  %v3025_v10 = vcombine.low %v207_v11, %v207_v11  ;;  %v4177_v16 = vld [vmem:[%s5615_s1 + $0x70] sm:$0xff]  }
  0x47   : > { %1210 = vmatmul.mubr.bf16.gmra.mxu0 %v4613_v14  ;;  %1242 = vmatmul.mubr.bf16.gmra.mxu1 %v4616_v15  ;;  %v406_v34 = vshll.u32 %v3025_v10, 16  ;;  %v572_v36 = vrot.slane %v3025_v10, 1  ;;  %v4189_v10 = vld [vmem:[%s5615_s1 + $0x60] sm:$0xff]  }
  0x48   : > { %3541 = vmatpush3.bf16.msra.mxu1 %v4163_v20  ;;  %3605 = vmatpush3.bf16.msra.mxu0 %v4164_v22  ;;  %v416_v20 = vor.u32 %v4593_v4, %v411_v1  ;;  %v4179_v22 = vld [vmem:[%s5615_s1 + $0xf0] sm:$0xff]   ;;  %v404_v1 = vor.u32 %v4604_v8, %v399_v5  ;;  %v440_v8 = vor.u32 %v4640_v30, %v435_v29  ;;  %v586_v29 = vrot.slane %v4586_v0, 1 }
  0x49   : > { %3542 = vmatprep.subr.bf16.mxu1 %v4165_v24  ;;  %3606 = vmatprep.subr.bf16.mxu0 %v4166_v27  ;;  %v461_v24 = vshll.u32 %v4586_v0, 16  ;;  %v418_v27 = vshll.u32 %v3026_v45, 16  ;;  %v4180_v4 = vld [vmem:[%s5615_s1 + $0xb0] sm:$0xff]   ;;  %v408_v51 = vrot.slane %v406_v34, 1  ;;  %v4186_v0 = vld [vmem:[%s5615_s1 + $0xa8] sm:$0xff]  }
  0x4a   : > { %1379 = vmatprep.mubr.bf16.mxu0 %v4672_v43  ;;  %1282 = vmatprep.mubr.bf16.mxu1 %v4688_v39  ;;  %v216_v34 = vld [vmem:[%s4434_s23 + $0x88] sm:$0x11] }
  0x4b   : > { %v420_v42 = vrot.slane %v418_v27, 1  ;;  %v463_v58 = vrot.slane %v461_v24, 1  ;;  %v4744_v30 = vsel %vm349_vm1, %v404_v1, %v408_v51 }
  0x4c   : > { %3543 = vmatpush3.bf16.msra.mxu1 %v4167_v32  ;;  %3607 = vmatpush3.bf16.msra.mxu0 %v4168_v40  ;;  %v575_v32 = vrot.slane %v3026_v45, 1  ;;  %v210_v40 = vld [vmem:[%s4434_s23 + $0x58] sm:$0x11]  ;;  %v3030_v45 = vcombine.high %v213_v38, %v213_v38 }
  0x4d   : > { %3656 = vmatprep.subr.bf16.mxu1 %v4171_v52  ;;  %3720 = vmatprep.subr.bf16.mxu0 %v4173_v61  ;;  %v3028_v5 = vcombine.high %v210_v40, %v210_v40  ;;  %v3027_v52 = vcombine.low %v210_v40, %v210_v40  ;;  %v4734_v26 = vsel %vm349_vm1, %v416_v20, %v420_v42 }
  0x4e   : > { %v4723_v49 = vsel %vm558_vm0, %v574_v2, %v575_v32  ;;  %v4739_v2 = vsel %vm558_vm0, %v571_v9, %v572_v36  ;;  %v4185_v9 = vld [vmem:[%s5615_s1 + $0xe8] sm:$0xff]   ;;  %v3029_v20 = vcombine.low %v213_v38, %v213_v38  ;;  %v466_v24 = vshll.u32 %v3030_v45, 16 }
  0x4f   : > { %1380 = vmatmul.mubr.bf16.vlgmr.msra.gmra.mxu0 %v4677_v62  ;;  %1283 = vmatmul.mubr.bf16.vlgmr.msra.gmra.mxu1 %v4691_v18  ;;  %v442_v59 = vshll.u32 %v3028_v5, 16  ;;  %v581_v60 = vrot.slane %v3028_v5, 1  ;;  %v430_v61 = vshll.u32 %v3027_v52, 16  ;;  %v578_v11 = vrot.slane %v3027_v52, 1 }
  0x50   : > { %3721 = vmatpush3.bf16.msra.mxu0 %v4174_v7  ;;  %3657 = vmatpush3.bf16.msra.mxu1 %v4172_v6  ;;  %v449_v7 = vshll.u32 %v4613_v14, 16  ;;  %v587_v27 = vrot.slane %v3030_v45, 1  ;;  %v447_v32 = vshrl.u32 %v4613_v14, 16  ;;  %v468_v1 = vrot.slane %v466_v24, 1 }
  0x51   : > { %3722 = vmatprep.subr.bf16.mxu0 %v4179_v22  ;;  %3658 = vmatprep.subr.bf16.mxu1 %v4177_v16  ;;  %v444_v44 = vrot.slane %v442_v59, 1  ;;  %v4760_v6 = vsel %vm558_vm0, %v580_v31, %v581_v60  ;;  %v432_v31 = vrot.slane %v430_v61, 1  ;;  %v464_v22 = vor.u32 %v463_v58, %v459_v57  ;;  %v4198_v59 = vld [vmem:[%s5615_s1 + $0x98] sm:$0xff]  }
  0x52   : > { %1387 = vmatprep.mubr.bf16.mxu0 %v4723_v49  ;;  %1290 = vmatprep.mubr.bf16.mxu1 %v4734_v26  ;;  %v4789_v36 = vsel %vm558_vm0, %v577_v55, %v578_v11  ;;  %v4795_v42 = vsel %vm558_vm0, %v586_v29, %v587_v27  ;;  %v454_v51 = vshll.u32 %v3029_v20, 16  ;;  %v3032_v5 = vcombine.high %v216_v34, %v216_v34  ;;  %v4197_v29 = vld [vmem:[%s5615_s1 + $0xd8] sm:$0xff]   ;;  %v4201_v11 = vld [vmem:[%s5615_s1 + $0x50] sm:$0xff]  }
  0x53   : > { %v4769_v16 = vsel %vm349_vm1, %v440_v8, %v444_v44  ;;  %v4792_v40 = vsel %vm349_vm1, %v428_v46, %v432_v31  ;;  %v4801_v55 = vsel %vm349_vm1, %v464_v22, %v468_v1  ;;  %v4196_v8 = vld [vmem:[%s5615_s1 + $0x18] sm:$0xff]   ;;  %v509_v52 = vshll.u32 %v4496_v28, 16  ;;  %v4204_v27 = vld [vmem:[%s5615_s1 + $0x90] sm:$0xff]   ;;  %v4208_v1 = vld [vmem:[%s5615_s1 + $0x8] sm:$0xff]  }
  0x54   : > { %3723 = vmatpush3.bf16.msra.mxu0 %v4180_v4  ;;  %3659 = vmatpush3.bf16.msra.mxu1 %v4178_v21  ;;  %v4190_v21 = vld [vmem:[%s5615_s1 + $0x20] sm:$0xff]   ;;  %v451_v4 = vrot.slane %v449_v7, 1  ;;  %v584_v57 = vrot.slane %v3029_v20, 1  ;;  %v490_v58 = vshll.u32 %v3032_v5, 16  ;;  %v598_v60 = vrot.slane %v4496_v28, 1  ;;  %v4203_v20 = vld [vmem:[%s5615_s1 + $0xd0] sm:$0xff]  }
  0x55   : > { %3660 = vmatprep.subr.bf16.mxu1 %v4183_v17  ;;  %3724 = vmatprep.subr.bf16.mxu0 %v4185_v9  ;;  %v583_v17 = vrot.slane %v4613_v14, 1  ;;  %v3031_v61 = vcombine.low %v216_v34, %v216_v34  ;;  %v456_v9 = vrot.slane %v454_v51, 1  ;;  %v488_v38 = vor.u32 %v4610_v13, %v483_v50  ;;  %v4215_v28 = vld [vmem:[%s5615_s1 + $0xc0] sm:$0xff]  }
  0x56   : > { %v452_v14 = vor.u32 %v451_v4, %v447_v32  ;;  %v492_v44 = vrot.slane %v490_v58, 1  ;;  %v495_v45 = vshrl.u32 %v4517_v35, 16  ;;  %v511_v50 = vrot.slane %v509_v52, 1 }
  0x57   : > { %1388 = vmatmul.mubr.bf16.gmra.mxu0 %v4739_v2  ;;  %1291 = vmatmul.mubr.bf16.gmra.mxu1 %v4744_v30  ;;  %v4831_v46 = vsel %vm558_vm0, %v583_v17, %v584_v57  ;;  %v478_v31 = vshll.u32 %v3031_v61, 16  ;;  %v497_v13 = vshll.u32 %v4517_v35, 16  ;;  %v590_v34 = vrot.slane %v3031_v61, 1 }
  0x58   : > { %1395 = vmatprep.mubr.bf16.mxu0 %v4760_v6  ;;  %3661 = vmatpush3.bf16.msra.mxu1 %v4184_v33  ;;  %v219_v33 = vld [vmem:[%s4434_s23 + $0xa0] sm:$0x11]  ;;  %v4849_v32 = vsel %vm349_vm1, %v488_v38, %v492_v44  ;;  %v512_v51 = vor.u32 %v511_v50, %v507_v25  ;;  %v595_v58 = vrot.slane %v4517_v35, 1  ;;  %v531_v25 = vshrl.u32 %v4546_v48, 16 }
  0x59   : > { %3725 = vmatpush3.bf16.msra.mxu0 %v4186_v0  ;;  %1298 = vmatprep.mubr.bf16.mxu1 %v4769_v16  ;;  %v593_v0 = vrot.slane %v3032_v5, 1  ;;  %v3034_v7 = vcombine.high %v219_v33, %v219_v33  ;;  %v480_v4 = vrot.slane %v478_v31, 1  ;;  %v499_v52 = vrot.slane %v497_v13, 1  ;;  %v4214_v35 = vld [vmem:[%s5615_s1] sm:$0xff]  }
  0x5a   : > { %3662 = vmatprep.subr.bf16.mxu1 %v4189_v10  ;;  %3726 = vmatprep.subr.bf16.mxu0 %v4191_v47  ;;  %v4202_v10 = vld [vmem:[%s5615_s1 + $0x10] sm:$0xff]   ;;  %v222_v47 = vld [vmem:[%s4434_s23 + $0xb8] sm:$0x11]  ;;  %v604_v61 = vrot.slane %v4546_v48, 1  ;;  %v749_v44 = vshll.u32 %v4591_v3, 16  ;;  %v601_v31 = vrot.slane %v4562_v54, 1 }
  0x5b   : > { %v4843_v22 = vsel %vm558_vm0, %v592_v56, %v593_v0  ;;  %v514_v24 = vshll.u32 %v3034_v7, 16  ;;  %v476_v56 = vor.u32 %v4718_v41, %v471_v63  ;;  %v599_v5 = vrot.slane %v3034_v7, 1  ;;  %v4210_v63 = vld [vmem:[%s5615_s1 + $0x88] sm:$0xff]   ;;  %v4216_v50 = vld [vmem:[%s5615_s1 + $0x80] sm:$0xff]  }
  0x5c   : > { %3663 = vmatpush3.bf16.msra.mxu1 %v4190_v21  ;;  %v4838_v21 = vsel %vm349_vm1, %v452_v14, %v456_v9  ;;  %v3036_v17 = vcombine.high %v222_v47, %v222_v47  ;;  %v4874_v57 = vcombine.low %v222_v47, %v222_v47  ;;  %v521_v9 = vshll.u32 %v4562_v54, 16 }
  0x5d   : > { %3727 = vmatpush3.bf16.msra.mxu0 %v4192_v37  ;;  %3664 = vmatprep.subr.bf16.mxu1 %v4195_v53  ;;  %v533_v37 = vshll.u32 %v4546_v48, 16  ;;  %v3033_v53 = vcombine.low %v219_v33, %v219_v33  ;;  %v516_v41 = vrot.slane %v514_v24, 1  ;;  %v4213_v33 = vld [vmem:[%s5615_s1 + $0x40] sm:$0xff]   ;;  %v4891_v14 = vsel %vm349_vm1, %v476_v56, %v480_v4 }
  0x5e   : > { %3728 = vmatprep.subr.bf16.mxu0 %v4197_v29  ;;  %v4881_v29 = vsel %vm558_vm0, %v589_v23, %v590_v34  ;;  %v4896_v19 = vsel %vm558_vm0, %v598_v60, %v599_v5  ;;  %v538_v0 = vshll.u32 %v3036_v17, 16  ;;  %v526_v38 = vshll.u32 %v4874_v57, 16  ;;  %v225_v60 = vld [vmem:[%s4434_s23 + $0xd0] sm:$0x11] }
  0x5f   : > { %1396 = vmatmul.mubr.bf16.gmra.mxu0 %v4789_v36  ;;  %1299 = vmatmul.mubr.bf16.gmra.mxu1 %v4792_v40  ;;  %v502_v23 = vshll.u32 %v3033_v53, 16  ;;  %v4900_v48 = vsel %vm349_vm1, %v512_v51, %v516_v41  ;;  %v500_v7 = vor.u32 %v499_v52, %v495_v45  ;;  %v523_v24 = vrot.slane %v521_v9, 1  ;;  %v201_v5 = vld [vmem:[%s4434_s23 + $0x10] sm:$0x11]  ;;  %v4219_v41 = vld [vmem:[%s4434_s23 + $0x4] ss:$8 sps:$4 sm:$0xff]  }
  0x60   : > { %1403 = vmatprep.mubr.bf16.mxu0 %v4795_v42  ;;  %1306 = vmatprep.mubr.bf16.mxu1 %v4801_v55  ;;  %v540_v45 = vrot.slane %v538_v0, 1  ;;  %v602_v56 = vrot.slane %v4874_v57, 1  ;;  %v751_v34 = vrot.slane %v749_v44, 1  ;;  %v735_v51 = vshrl.u32 %v4616_v15, 16  ;;  %v4217_v57 = vld [vmem:[%s4434_s23] ss:$8 sps:$4 sm:$0xff]  }
  0x61   : > { %3665 = vmatpush3.bf16.msra.mxu1 %v4196_v8  ;;  %3729 = vmatpush3.bf16.msra.mxu0 %v4198_v59  ;;  %v4209_v8 = vld [vmem:[%s5615_s1 + $0xc8] sm:$0xff]   ;;  %v535_v59 = vrot.slane %v533_v37, 1  ;;  %v504_v13 = vrot.slane %v502_v23, 1  ;;  %v3040_v37 = vcombine.high %v225_v60, %v225_v60  ;;  %v365_v23 = vshll.u32 %v4219_v41, 16 }
  0x62   : > { %3666 = vmatprep.subr.bf16.mxu1 %v4201_v11  ;;  %3730 = vmatprep.subr.bf16.mxu0 %v4203_v20  ;;  %v596_v11 = vrot.slane %v3033_v53, 1  ;;  %v605_v20 = vrot.slane %v3036_v17, 1  ;;  %v4224_v53 = vld [vmem:[%s5615_s1 + $0x378] sm:$0xff]   ;;  %v737_v17 = vshll.u32 %v4616_v15, 16  ;;  %v559_v44 = vrot.slane %v4217_v57, 1 }
  0x63   : > { %v536_v47 = vor.u32 %v535_v59, %v531_v25  ;;  %v754_v52 = vshll.u32 %v3040_v37, 16  ;;  %v3022_v25 = vcombine.high %v201_v5, %v201_v5 }
  0x64   : > { %v4924_v4 = vsel %vm558_vm0, %v595_v58, %v596_v11  ;;  %v3039_v58 = vcombine.low %v225_v60, %v225_v60 }
  0x65   : > { %3667 = vmatpush3.bf16.msra.mxu1 %v4202_v10  ;;  %3731 = vmatpush3.bf16.msra.mxu0 %v4204_v27  ;;  %v519_v10 = vshrl.u32 %v4562_v54, 16  ;;  %v747_v27 = vshrl.u32 %v4591_v3, 16  ;;  %v4222_v54 = vld [vmem:[%s5615_s1 + $0x178] sm:$0xff]   ;;  %v563_v9 = vrot.slane %v3022_v25, 1 }
  0x66   : > { %3668 = vmatprep.subr.bf16.mxu1 %v4207_v12  ;;  %3732 = vmatprep.subr.bf16.mxu0 %v4209_v8  ;;  %v528_v12 = vrot.slane %v526_v38, 1  ;;  %v4932_v8 = vsel %vm349_vm1, %v500_v7, %v504_v13  ;;  %v756_v38 = vrot.slane %v754_v52, 1  ;;  %v363_v13 = vshrl.u32 %v4219_v41, 16 }
  0x67   : > { %1404 = vmatmul.mubr.bf16.gmra.mxu0 %v4831_v46  ;;  %1307 = vmatmul.mubr.bf16.gmra.mxu1 %v4838_v21  ;;  %v524_v59 = vor.u32 %v523_v24, %v519_v10  ;;  %v752_v0 = vor.u32 %v751_v34, %v747_v27  ;;  %v4954_v10 = vsel %vm558_vm0, %v601_v31, %v602_v56  ;;  %v367_v24 = vrot.slane %v365_v23, 1  ;;  %v4227_v23 = vld [vmem:[%s5615_s1 + $0x130] sm:$0xff]  }
  0x68   : > { %1411 = vmatprep.mubr.bf16.mxu0 %v4843_v22  ;;  %1314 = vmatprep.mubr.bf16.mxu1 %v4849_v32  ;;  %v370_v27 = vshll.u32 %v3022_v25, 16  ;;  %v761_v31 = vrot.slane %v3039_v58, 1 }
  0x69   : > { %3669 = vmatpush3.bf16.msra.mxu1 %v4208_v1  ;;  %3733 = vmatpush3.bf16.msra.mxu0 %v4210_v63  ;;  %v763_v1 = vrot.slane %v4591_v3, 1  ;;  %v4935_v63 = vsel %vm558_vm0, %v604_v61, %v605_v20  ;;  %v4939_v3 = vsel %vm349_vm1, %v536_v47, %v540_v45  ;;  %v764_v61 = vrot.slane %v3040_v37, 1 }
  0x6a   : > { %3670 = vmatprep.subr.bf16.mxu1 %v4213_v33  ;;  %3734 = vmatprep.subr.bf16.mxu0 %v4215_v28  ;;  %v562_v33 = vrot.slane %v4219_v41, 1  ;;  %v742_v28 = vshll.u32 %v3039_v58, 16  ;;  %v4951_v11 = vsel %vm349_vm1, %v524_v59, %v528_v12  ;;  %v4963_v45 = vsel %vm349_vm1, %v752_v0, %v756_v38  ;;  %v4291_v0 = vld [vmem:[%s4434_s23 + $0x1c] ss:$8 sps:$4 sm:$0xff]   ;;  %v4232_v38 = vld [vmem:[%s5615_s1 + $0x368] sm:$0xff]  }
  0x6b   : > { %v4957_v20 = vsel %vm558_vm0, %v763_v1, %v764_v61  ;;  %v760_v37 = vrot.slane %v4616_v15, 1  ;;  %v368_v34 = vor.u32 %v367_v24, %v363_v13  ;;  %v372_v1 = vrot.slane %v370_v27, 1  ;;  %v4225_v61 = vld [vmem:[%s5615_s1 + $0x338] sm:$0xff]   ;;  %v4235_v13 = vld [vmem:[%s5615_s1 + $0x120] sm:$0xff]  }
  0x6c   : > { %v4948_v7 = vsel %vm558_vm0, %v562_v33, %v563_v9  ;;  %v744_v56 = vrot.slane %v742_v28, 1  ;;  %v4223_v33 = vld [vmem:[%s5615_s1 + $0x138] sm:$0xff]   ;;  %v4229_v9 = vld [vmem:[%s5615_s1 + $0x330] sm:$0xff]   ;;  %v4233_v28 = vld [vmem:[%s5615_s1 + $0x328] sm:$0xff]  }
  0x6d   : > { %3671 = vmatpush3.bf16.msra.mxu1 %v4214_v35  ;;  %3735 = vmatpush3.bf16.msra.mxu0 %v4216_v50  ;;  %v3021_v35 = vcombine.low %v201_v5, %v201_v5  ;;  %v739_v50 = vrot.slane %v737_v17, 1  ;;  %v351_v5 = vshrl.u32 %v4217_v57, 16  ;;  %v373_v25 = vsel %vm349_vm1, %v368_v34, %v372_v1  ;;  %v5025_v24 = vld [vmem:[%s4434_s23 + $0x34] ss:$8 sps:$4 sm:$0xff]   ;;  %v5051_v34 = vld [vmem:[%s4434_s23 + $0x30] ss:$8 sps:$4 sm:$0xff]  }
  0x6e   : > { %3784 = vmatprep.subr.bf16.mxu1 %v4222_v54  ;;  %3848 = vmatprep.subr.bf16.mxu0 %v4224_v53  ;;  %v353_v54 = vshll.u32 %v4217_v57, 16  ;;  %v4971_v53 = vsel %vm558_vm0, %v760_v37, %v761_v31  ;;  %v4238_v27 = vld [vmem:[%s5615_s1 + $0x158] sm:$0xff]   ;;  %v4243_v1 = vld [vmem:[%s5615_s1 + $0x110] sm:$0xff]  }
  0x6f   : > { %1412 = vmatmul.mubr.bf16.gmra.mxu0 %v4881_v29  ;;  %1315 = vmatmul.mubr.bf16.gmra.mxu1 %v4891_v14  ;;  %v560_v60 = vrot.slane %v3021_v35, 1  ;;  %v740_v12 = vor.u32 %v739_v50, %v735_v51  ;;  %v358_v17 = vshll.u32 %v3021_v35, 16  ;;  %v4226_v35 = vld [vmem:[%s5615_s1 + $0x170] sm:$0xff]   ;;  %v4292_v50 = vld [vmem:[%s4434_s23 + $0x18] ss:$8 sps:$4 sm:$0xff]  }
  0x70   : > { %1419 = vmatprep.mubr.bf16.mxu0 %v4896_v19  ;;  %1322 = vmatprep.mubr.bf16.mxu1 %v4900_v48  ;;  %v355_v52 = vrot.slane %v353_v54, 1  ;;  %v4240_v37 = vld [vmem:[%s5615_s1 + $0x358] sm:$0xff]  }
  0x71   : > { %v4960_v47 = vsel %vm558_vm0, %v559_v44, %v560_v60  ;;  %v4974_v15 = vsel %vm349_vm1, %v740_v12, %v744_v56  ;;  %v360_v58 = vrot.slane %v358_v17, 1  ;;  %v4231_v44 = vld [vmem:[%s5615_s1 + $0x128] sm:$0xff]   ;;  %v4236_v60 = vld [vmem:[%s5615_s1 + $0x360] sm:$0xff]   ;;  %v4239_v31 = vld [vmem:[%s5615_s1 + $0x118] sm:$0xff]  }
  0x72   : > { %v356_v51 = vor.u32 %v355_v52, %v351_v5  ;;  %v4241_v54 = vld [vmem:[%s5615_s1 + $0x318] sm:$0xff]   ;;  %v4242_v12 = vld [vmem:[%s5615_s1 + $0x150] sm:$0xff]   ;;  %v4246_v17 = vld [vmem:[%s5615_s1 + $0x148] sm:$0xff]  }
  0x73   : > { %v4244_v56 = vld [vmem:[%s5615_s1 + $0x350] sm:$0xff]  }
  0x74   : > { %v361_v59 = vsel %vm349_vm1, %v356_v51, %v360_v58  ;;  %v5059_v5 = vld [vmem:[%s4434_s23 + $0x4c] ss:$8 sps:$4 sm:$0xff]  }
  0x75   : > { %v4245_v52 = vld [vmem:[%s5615_s1 + $0x310] sm:$0xff]   ;;  %v4247_v51 = vld [vmem:[%s5615_s1 + $0x108] sm:$0xff]  }
  0x76   : > { %v4249_v58 = vld [vmem:[%s5615_s1 + $0x308] sm:$0xff]  }
  0x77   : > { %1420 = vmatmul.mubr.bf16.gmra.mxu0 %v4924_v4  ;;  %1323 = vmatmul.mubr.bf16.gmra.mxu1 %v4932_v8 }
  0x78   : > { %1427 = vmatprep.mubr.bf16.mxu0 %v4935_v63  ;;  %1330 = vmatprep.mubr.bf16.mxu1 %v4939_v3 }
  0x7f   : > { %1428 = vmatmul.mubr.bf16.gmra.mxu0 %v4954_v10  ;;  %1331 = vmatmul.mubr.bf16.gmra.mxu1 %v4951_v11 }
  0x80   : > { %1435 = vmatprep.mubr.bf16.mxu0 %v4957_v20  ;;  %1338 = vmatprep.mubr.bf16.mxu1 %v4963_v45 }
  0x87   : > { %1436 = vmatmul.mubr.bf16.gmra.mxu0 %v4971_v53  ;;  %1339 = vmatmul.mubr.bf16.gmra.mxu1 %v4974_v15 }
  0x88   : > { %1861 = vmatprep.mubr.bf16.mxu0 %v373_v25  ;;  %1764 = vmatprep.mubr.bf16.mxu1 %v4219_v41  ;;  %v4228_v41 = vld [vmem:[%s5615_s1 + $0x370] sm:$0xff]   ;;  %v4248_v25 = vld [vmem:[%s5615_s1 + $0x348] sm:$0xff]  }
  0x8f   : > { %1862 = vmatmul.mubr.bf16.vlgmr.msra.gmra.mxu0 %v361_v59  ;;  %1765 = vmatmul.mubr.bf16.vlgmr.msra.gmra.mxu1 %v4217_v57  ;;  %v4230_v57 = vld [vmem:[%s5615_s1 + $0x168] sm:$0xff]   ;;  %v4250_v59 = vld [vmem:[%s5615_s1 + $0x140] sm:$0xff]  }
  0x90   : > { %3849 = vmatpush3.bf16.msra.mxu0 %v4225_v61  ;;  %3785 = vmatpush3.bf16.msra.mxu1 %v4223_v33  ;;  %v4252_v61 = vld [vmem:[%s5615_s1 + $0x340] sm:$0xff]   ;;  %v4296_v33 = vld [vmem:[%s4434_s23 + $0x48] ss:$8 sps:$4 sm:$0xff]  }
  0x91   : > { %1772 = vmatprep.mubr.bf16.mxu1 %v4291_v0  ;;  %1869 = vmatprep.mubr.bf16.mxu0 %v4688_v39  ;;  %v4234_v39 = vld [vmem:[%s5615_s1 + $0x160] sm:$0xff]   ;;  %v4256_v0 = vld [vmem:[%s5615_s1 + $0x478] sm:$0xff]  }
  0x92   : > { %3786 = vmatprep.subr.bf16.mxu1 %v4226_v35  ;;  %3850 = vmatprep.subr.bf16.mxu0 %v4228_v41  ;;  %v4251_v35 = vld [vmem:[%s5615_s1 + $0x100] sm:$0xff]  }
  0x93   : > { %v4253_v41 = vld [vmem:[%s5615_s1 + $0x300] sm:$0xff]  }
  0x94   : > { %3851 = vmatpush3.bf16.msra.mxu0 %v4229_v9  ;;  %3787 = vmatpush3.bf16.msra.mxu1 %v4227_v23  ;;  %v4297_v23 = vld [vmem:[%s4434_s23 + $0x64] ss:$8 sps:$4 sm:$0xff]   ;;  %v4254_v9 = vld [vmem:[%s5615_s1 + $0x3f8] sm:$0xff]  }
  0x95   : > { %3852 = vmatprep.subr.bf16.mxu0 %v4232_v38  ;;  %3788 = vmatprep.subr.bf16.mxu1 %v4230_v57  ;;  %v5101_v38 = vld [vmem:[%s4434_s23 + $0x60] ss:$8 sps:$4 sm:$0xff]   ;;  %v5106_v57 = vld [vmem:[%s4434_s23 + $0x7c] ss:$8 sps:$4 sm:$0xff]  }
  0x97   : > { %1870 = vmatmul.mubr.bf16.gmra.mxu0 %v4691_v18  ;;  %1773 = vmatmul.mubr.bf16.gmra.mxu1 %v4292_v50  ;;  %v4237_v18 = vld [vmem:[%s5615_s1 + $0x320] sm:$0xff]   ;;  %v5131_v50 = vld [vmem:[%s4434_s23 + $0xa8] ss:$8 sps:$4 sm:$0xff]  }
  0x98   : > { %1877 = vmatprep.mubr.bf16.mxu0 %v4734_v26  ;;  %1780 = vmatprep.mubr.bf16.mxu1 %v5025_v24 }
  0x99   : > { %3789 = vmatpush3.bf16.msra.mxu1 %v4231_v44  ;;  %3853 = vmatpush3.bf16.msra.mxu0 %v4233_v28  ;;  %v5111_v44 = vld [vmem:[%s4434_s23 + $0x78] ss:$8 sps:$4 sm:$0xff]   ;;  %v5116_v28 = vld [vmem:[%s4434_s23 + $0x94] ss:$8 sps:$4 sm:$0xff]  }
  0x9a   : > { %3790 = vmatprep.subr.bf16.mxu1 %v4234_v39  ;;  %3854 = vmatprep.subr.bf16.mxu0 %v4236_v60  ;;  %v5121_v39 = vld [vmem:[%s4434_s23 + $0x90] ss:$8 sps:$4 sm:$0xff]   ;;  %v5126_v60 = vld [vmem:[%s4434_s23 + $0xac] ss:$8 sps:$4 sm:$0xff]  }
  0x9d   : > { %3791 = vmatpush3.bf16.msra.mxu1 %v4235_v13  ;;  %3855 = vmatpush3.bf16.msra.mxu0 %v4237_v18  ;;  %v4257_v13 = vld [vmem:[%s5615_s1 + $0x438] sm:$0xff]  }
  0x9e   : > { %3792 = vmatprep.subr.bf16.mxu1 %v4238_v27  ;;  %3856 = vmatprep.subr.bf16.mxu0 %v4240_v37  ;;  %v4255_v18 = vld [vmem:[%s5615_s1 + $0x3b8] sm:$0xff]   ;;  %v4258_v27 = vld [vmem:[%s5615_s1 + $0x3f0] sm:$0xff]  }
  0x9f   : > { %1878 = vmatmul.mubr.bf16.gmra.mxu0 %v4744_v30  ;;  %1781 = vmatmul.mubr.bf16.gmra.mxu1 %v5051_v34  ;;  %v4259_v37 = vld [vmem:[%s5615_s1 + $0x3b0] sm:$0xff]  }
  0xa0   : > { %1885 = vmatprep.mubr.bf16.mxu0 %v4769_v16  ;;  %1788 = vmatprep.mubr.bf16.mxu1 %v5059_v5 }
  0xa1   : > { %3793 = vmatpush3.bf16.msra.mxu1 %v4239_v31  ;;  %3857 = vmatpush3.bf16.msra.mxu0 %v4241_v54  ;;  %v4264_v31 = vld [vmem:[%s5615_s1 + $0x468] sm:$0xff]  }
  0xa2   : > { %3794 = vmatprep.subr.bf16.mxu1 %v4242_v12  ;;  %3858 = vmatprep.subr.bf16.mxu0 %v4244_v56  ;;  %v4265_v54 = vld [vmem:[%s5615_s1 + $0x428] sm:$0xff]   ;;  %v4266_v12 = vld [vmem:[%s5615_s1 + $0x3e0] sm:$0xff]  }
  0xa3   : > { %v4268_v56 = vld [vmem:[%s5615_s1 + $0x460] sm:$0xff]  }
  0xa5   : > { %3795 = vmatpush3.bf16.msra.mxu1 %v4243_v1  ;;  %3859 = vmatpush3.bf16.msra.mxu0 %v4245_v52  ;;  %v4269_v1 = vld [vmem:[%s5615_s1 + $0x420] sm:$0xff]   ;;  %v4271_v52 = vld [vmem:[%s5615_s1 + $0x398] sm:$0xff]  }
  0xa6   : > { %3796 = vmatprep.subr.bf16.mxu1 %v4246_v17  ;;  %3860 = vmatprep.subr.bf16.mxu0 %v4248_v25  ;;  %v4273_v17 = vld [vmem:[%s5615_s1 + $0x418] sm:$0xff]   ;;  %v4274_v25 = vld [vmem:[%s5615_s1 + $0x3d0] sm:$0xff]  }
  0xa7   : > { %1886 = vmatmul.mubr.bf16.gmra.mxu0 %v4792_v40  ;;  %1789 = vmatmul.mubr.bf16.gmra.mxu1 %v4296_v33 }
  0xa8   : > { %1893 = vmatprep.mubr.bf16.mxu0 %v4801_v55  ;;  %1796 = vmatprep.mubr.bf16.mxu1 %v4297_v23 }
  0xa9   : > { %3797 = vmatpush3.bf16.msra.mxu1 %v4247_v51  ;;  %3861 = vmatpush3.bf16.msra.mxu0 %v4249_v58  ;;  %v4276_v51 = vld [vmem:[%s5615_s1 + $0x450] sm:$0xff]  }
  0xaa   : > { %3798 = vmatprep.subr.bf16.mxu1 %v4250_v59  ;;  %3862 = vmatprep.subr.bf16.mxu0 %v4252_v61  ;;  %v4275_v58 = vld [vmem:[%s5615_s1 + $0x390] sm:$0xff]   ;;  %v4278_v61 = vld [vmem:[%s5615_s1 + $0x3c8] sm:$0xff]  }
  0xab   : > { %v4277_v59 = vld [vmem:[%s5615_s1 + $0x410] sm:$0xff]  }
  0xad   : > { %3799 = vmatpush3.bf16.msra.mxu1 %v4251_v35  ;;  %3863 = vmatpush3.bf16.msra.mxu0 %v4253_v41  ;;  %v4279_v35 = vld [vmem:[%s5615_s1 + $0x388] sm:$0xff]   ;;  %v4285_v41 = vld [vmem:[%s5615_s1 + $0x3c0] sm:$0xff]  }
  0xae   : > { %3912 = vmatprep.subr.bf16.mxu1 %v4254_v9  ;;  %3976 = vmatprep.subr.bf16.mxu0 %v4256_v0  ;;  %v4287_v9 = vld [vmem:[%s5615_s1 + $0x440] sm:$0xff]  }
  0xaf   : > { %1894 = vmatmul.mubr.bf16.gmra.mxu0 %v4838_v21  ;;  %1797 = vmatmul.mubr.bf16.gmra.mxu1 %v5101_v38  ;;  %v4286_v0 = vld [vmem:[%s5615_s1 + $0x380] sm:$0xff]  }
  0xb0   : > { %1901 = vmatprep.mubr.bf16.mxu0 %v4849_v32  ;;  %1804 = vmatprep.mubr.bf16.mxu1 %v5106_v57 }
  0xb7   : > { %1902 = vmatmul.mubr.bf16.gmra.mxu0 %v4891_v14  ;;  %1805 = vmatmul.mubr.bf16.gmra.mxu1 %v5111_v44 }
  0xb8   : > { %1909 = vmatprep.mubr.bf16.mxu0 %v4900_v48  ;;  %1812 = vmatprep.mubr.bf16.mxu1 %v5116_v28 }
  0xbf   : > { %1910 = vmatmul.mubr.bf16.gmra.mxu0 %v4932_v8  ;;  %1813 = vmatmul.mubr.bf16.gmra.mxu1 %v5121_v39 }
  0xc0   : > { %1917 = vmatprep.mubr.bf16.mxu0 %v4939_v3  ;;  %1820 = vmatprep.mubr.bf16.mxu1 %v5126_v60 }
  0xc7   : > { %1918 = vmatmul.mubr.bf16.gmra.mxu0 %v4951_v11  ;;  %1821 = vmatmul.mubr.bf16.gmra.mxu1 %v5131_v50 }
  0xc8   : > { %2489 = vmatprep.mubr.bf16.mxu0 %v5025_v24  ;;  %1958 = vmatprep.mubr.bf16.mxu1 %v4948_v7  ;;  %v4260_v24 = vld [vmem:[%s5615_s1 + $0x470] sm:$0xff]  }
  0xc9   : > { %v4261_v7 = vld [vmem:[%s5615_s1 + $0x430] sm:$0xff]  }
  0xcf   : > { %2490 = vmatmul.mubr.bf16.vlgmr.msra.gmra.mxu0 %v5051_v34  ;;  %1959 = vmatmul.mubr.bf16.vlgmr.msra.gmra.mxu1 %v4960_v47  ;;  %v4262_v47 = vld [vmem:[%s5615_s1 + $0x3e8] sm:$0xff]   ;;  %v4267_v34 = vld [vmem:[%s5615_s1 + $0x3a0] sm:$0xff]  }
  0xd0   : > { %3977 = vmatpush3.bf16.msra.mxu0 %v4257_v13  ;;  %3913 = vmatpush3.bf16.msra.mxu1 %v4255_v18 }
  0xd1   : > { %1966 = vmatprep.mubr.bf16.mxu1 %v4672_v43  ;;  %2497 = vmatprep.mubr.bf16.mxu0 %v5059_v5  ;;  %v4263_v43 = vld [vmem:[%s5615_s1 + $0x3a8] sm:$0xff]   ;;  %v4270_v5 = vld [vmem:[%s5615_s1 + $0x3d8] sm:$0xff]  }
  0xd2   : > { %3914 = vmatprep.subr.bf16.mxu1 %v4258_v27  ;;  %3978 = vmatprep.subr.bf16.mxu0 %v4260_v24 }
  0xd4   : > { %3979 = vmatpush3.bf16.msra.mxu0 %v4261_v7  ;;  %3915 = vmatpush3.bf16.msra.mxu1 %v4259_v37 }
  0xd5   : > { %3980 = vmatprep.subr.bf16.mxu0 %v4264_v31  ;;  %3916 = vmatprep.subr.bf16.mxu1 %v4262_v47 }
  0xd7   : > { %2498 = vmatmul.mubr.bf16.gmra.mxu0 %v4296_v33  ;;  %1967 = vmatmul.mubr.bf16.gmra.mxu1 %v4677_v62  ;;  %v4272_v62 = vld [vmem:[%s5615_s1 + $0x458] sm:$0xff]   ;;  %v4280_v33 = vld [vmem:[%s5615_s1 + $0x448] sm:$0xff]  }
  0xd8   : > { %2505 = vmatprep.mubr.bf16.mxu0 %v4297_v23  ;;  %1974 = vmatprep.mubr.bf16.mxu1 %v4723_v49  ;;  %v4281_v23 = vld [vmem:[%s5615_s1 + $0x408] sm:$0xff]  }
  0xd9   : > { %3917 = vmatpush3.bf16.msra.mxu1 %v4263_v43  ;;  %3981 = vmatpush3.bf16.msra.mxu0 %v4265_v54  ;;  %v4305_v54 = vld [vmem:[%s4434_s23 + $0xc4] ss:$8 sps:$4 sm:$0xff]  }
  0xda   : > { %3918 = vmatprep.subr.bf16.mxu1 %v4266_v12  ;;  %3982 = vmatprep.subr.bf16.mxu0 %v4268_v56 }
  0xdd   : > { %3919 = vmatpush3.bf16.msra.mxu1 %v4267_v34  ;;  %3983 = vmatpush3.bf16.msra.mxu0 %v4269_v1 }
  0xde   : > { %3920 = vmatprep.subr.bf16.mxu1 %v4270_v5  ;;  %3984 = vmatprep.subr.bf16.mxu0 %v4272_v62 }
  0xdf   : > { %2506 = vmatmul.mubr.bf16.gmra.mxu0 %v5101_v38  ;;  %1975 = vmatmul.mubr.bf16.gmra.mxu1 %v4739_v2  ;;  %v4288_v38 = vld [vmem:[%s5615_s1 + $0x400] sm:$0xff]  }
  0xe0   : > { %2513 = vmatprep.mubr.bf16.mxu0 %v5106_v57  ;;  %1982 = vmatprep.mubr.bf16.mxu1 %v4760_v6 }
  0xe1   : > { %3921 = vmatpush3.bf16.msra.mxu1 %v4271_v52  ;;  %3985 = vmatpush3.bf16.msra.mxu0 %v4273_v17  ;;  %v5261_v52 = vld [vmem:[%s4434_s23 + $0xdc] ss:$8 sps:$4 sm:$0xff]  }
  0xe2   : > { %3922 = vmatprep.subr.bf16.mxu1 %v4274_v25  ;;  %3986 = vmatprep.subr.bf16.mxu0 %v4276_v51 }
  0xe5   : > { %3923 = vmatpush3.bf16.msra.mxu1 %v4275_v58  ;;  %3987 = vmatpush3.bf16.msra.mxu0 %v4277_v59 }
  0xe6   : > { %3924 = vmatprep.subr.bf16.mxu1 %v4278_v61  ;;  %3988 = vmatprep.subr.bf16.mxu0 %v4280_v33  ;;  %v4306_v61 = vld [vmem:[%s4434_s23 + $0xc0] ss:$8 sps:$4 sm:$0xff]  }
  0xe7   : > { %2514 = vmatmul.mubr.bf16.gmra.mxu0 %v5111_v44  ;;  %1983 = vmatmul.mubr.bf16.gmra.mxu1 %v4789_v36 }
  0xe8   : > { %2521 = vmatprep.mubr.bf16.mxu0 %v5116_v28  ;;  %1990 = vmatprep.mubr.bf16.mxu1 %v4795_v42 }
  0xe9   : > { %3925 = vmatpush3.bf16.msra.mxu1 %v4279_v35  ;;  %3989 = vmatpush3.bf16.msra.mxu0 %v4281_v23 }
  0xea   : > { %3926 = vmatprep.subr.bf16.mxu1 %v4285_v41  ;;  %3990 = vmatprep.subr.bf16.mxu0 %v4287_v9 }
  0xed   : > { %3927 = vmatpush3.bf16.msra.mxu1 %v4286_v0  ;;  %3991 = vmatpush3.bf16.msra.mxu0 %v4288_v38  ;;  %v5276_v38 = vld [vmem:[%s4434_s23 + $0xd8] ss:$8 sps:$4 sm:$0xff]  }
  0xef   : > { %v3480_v57 = vpop.f32.mrf.mxu0  ;;  %v3504_v44 = vpop.f32.mrf.mxu1  ;;  %2522 = vmatmul.mubr.bf16.gmra.mxu0 %v5121_v39  ;;  %1991 = vmatmul.mubr.bf16.gmra.mxu1 %v4831_v46 }
  0xf0   : > { %2529 = vmatprep.mubr.bf16.mxu0 %v5126_v60  ;;  %1998 = vmatprep.mubr.bf16.mxu1 %v4843_v22 }
  0xf1   : > { %v3481_v28 = vpop.f32.mrf.mxu0  ;;  %v3505_v13 = vpop.f32.mrf.mxu1 }
  0xf2   : > { %v5244_v18 = vadd.f32 %v3481_v28, %v3480_v57  ;;  %v5246_v27 = vadd.f32 %v3505_v13, %v3504_v44 }
  0xf3   : > { %v3483_v24 = vpop.f32.mrf.mxu0  ;;  %v3507_v7 = vpop.f32.mrf.mxu1 }
  0xf5   : > { %v3484_v37 = vpop.f32.mrf.mxu0  ;;  %v3508_v31 = vpop.f32.mrf.mxu1 }
  0xf6   : > { %v5248_v47 = vadd.f32 %v3484_v37, %v3483_v24  ;;  %v5250_v39 = vadd.f32 %v3508_v31, %v3507_v7 }
  0xf7   : > { %v3486_v43 = vpop.f32.mrf.mxu0  ;;  %v3510_v60 = vpop.f32.mrf.mxu1  ;;  %2530 = vmatmul.mubr.bf16.gmra.mxu0 %v5131_v50  ;;  %1999 = vmatmul.mubr.bf16.gmra.mxu1 %v4881_v29 }
  0xf8   : > { %2537 = vmatprep.mubr.bf16.mxu0 %v4305_v54  ;;  %2006 = vmatprep.mubr.bf16.mxu1 %v4896_v19 }
  0xf9   : > { %v3487_v12 = vpop.f32.mrf.mxu0  ;;  %v3511_v56 = vpop.f32.mrf.mxu1 }
  0xfa   : > { %v5256_v34 = vadd.f32 %v3487_v12, %v3486_v43  ;;  %v5258_v1 = vadd.f32 %v3511_v56, %v3510_v60 }
  0xfb   : > { %v3489_v5 = vpop.f32.mrf.mxu0  ;;  %v3513_v62 = vpop.f32.mrf.mxu1 }
  0xfd   : > { %v3490_v17 = vpop.f32.mrf.mxu0  ;;  %v3514_v25 = vpop.f32.mrf.mxu1 }
  0xfe   : > { %v5263_v50 = vadd.f32 %v3490_v17, %v3489_v5  ;;  %v5265_v51 = vadd.f32 %v3514_v25, %v3513_v62 }
  0xff   : > { %v3492_v58 = vpop.f32.mrf.mxu0  ;;  %v3516_v59 = vpop.f32.mrf.mxu1  ;;  %2538 = vmatmul.mubr.bf16.gmra.mxu0 %v4306_v61  ;;  %2007 = vmatmul.mubr.bf16.gmra.mxu1 %v4924_v4 }
 0x100   : > { %2545 = vmatprep.mubr.bf16.mxu0 %v5261_v52  ;;  %2014 = vmatprep.mubr.bf16.mxu1 %v4935_v63 }
 0x101   : > { %v3493_v33 = vpop.f32.mrf.mxu0  ;;  %v3517_v35 = vpop.f32.mrf.mxu1 }
 0x102   : > { %v5271_v23 = vadd.f32 %v3493_v33, %v3492_v58  ;;  %v5273_v41 = vadd.f32 %v3517_v35, %v3516_v59 }
 0x103   : > { %v3495_v9 = vpop.f32.mrf.mxu0  ;;  %v3519_v0 = vpop.f32.mrf.mxu1 }
 0x105   : > { %v3496_v57 = vpop.f32.mrf.mxu0  ;;  %v3520_v44 = vpop.f32.mrf.mxu1 }
 0x106   : > { %v5278_v28 = vadd.f32 %v3496_v57, %v3495_v9  ;;  %v5280_v13 = vadd.f32 %v3520_v44, %v3519_v0 }
 0x107   : > { %v3498_v24 = vpop.f32.mrf.mxu0  ;;  %v3522_v7 = vpop.f32.mrf.mxu1  ;;  %2546 = vmatmul.mubr.bf16.gmra.mxu0 %v5276_v38  ;;  %2015 = vmatmul.mubr.bf16.gmra.mxu1 %v4954_v10 }
 0x108   : > { %2683 = vmatprep.mubr.bf16.mxu0 %v4723_v49  ;;  %2586 = vmatprep.mubr.bf16.mxu1 %v4734_v26 }
 0x109   : > { %v3499_v37 = vpop.f32.mrf.mxu0  ;;  %v3523_v31 = vpop.f32.mrf.mxu1 }
 0x10a   : > { %v5286_v43 = vadd.f32 %v3499_v37, %v3498_v24  ;;  %v5288_v60 = vadd.f32 %v3523_v31, %v3522_v7 }
 0x10b   : > { %v3501_v54 = vpop.f32.mrf.mxu0  ;;  %v3525_v12 = vpop.f32.mrf.mxu1 }
 0x10d   : > { %v3502_v56 = vpop.f32.mrf.mxu0  ;;  %v3526_v5 = vpop.f32.mrf.mxu1 }
 0x10e   : > { %v5290_v62 = vadd.f32 %v3502_v56, %v3501_v54  ;;  %v5292_v17 = vadd.f32 %v3526_v5, %v3525_v12 }
 0x10f   : > { %v3608_v25 = vpop.f32.mrf.mxu0  ;;  %2684 = vmatmul.mubr.bf16.vlgmr.msra.gmra.mxu0 %v4739_v2  ;;  %v3544_v49 = vpop.f32.mrf.mxu1  ;;  %2587 = vmatmul.mubr.bf16.vlgmr.msra.gmra.mxu1 %v4744_v30 }
 0x110   : > { %2691 = vmatprep.mubr.bf16.mxu0 %v4760_v6  ;;  %2594 = vmatprep.mubr.bf16.mxu1 %v4769_v16 }
 0x111   : > { %v3609_v26 = vpop.f32.mrf.mxu0  ;;  %v3545_v58 = vpop.f32.mrf.mxu1 }
 0x112   : > { %v3610_v59 = vadd.f32 %v3609_v26, %v3608_v25  ;;  %v3546_v61 = vadd.f32 %v3545_v58, %v3544_v49 }
 0x113   : > { %v3611_v33 = vpop.f32.mrf.mxu0  ;;  %v3547_v35 = vpop.f32.mrf.mxu1 }
 0x114   : > { %v1285_v9 = vadd.f32 %v3546_v61, %v5244_v18 }
 0x115   : > { %v3612_v0 = vpop.f32.mrf.mxu0  ;;  %v3548_v57 = vpop.f32.mrf.mxu1 }
 0x116   : > { %v3613_v44 = vadd.f32 %v3612_v0, %v3611_v33  ;;  %v5299_v24 = vadd.f32 %v3610_v59, %v1285_v9  ;;  %v3549_v2 = vadd.f32 %v3548_v57, %v3547_v35 }
 0x117   : > { %v3614_v7 = vpop.f32.mrf.mxu0  ;;  %2692 = vmatmul.mubr.bf16.gmra.mxu0 %v4789_v36  ;;  %v3550_v30 = vpop.f32.mrf.mxu1  ;;  %2595 = vmatmul.mubr.bf16.gmra.mxu1 %v4792_v40 }
 0x118   : > { %2699 = vmatprep.mubr.bf16.mxu0 %v4795_v42  ;;  %v1288_v6 = vadd.f32 %v3549_v2, %v5248_v47  ;;  %2602 = vmatprep.mubr.bf16.mxu1 %v4801_v55 }
 0x119   : > { %v3615_v16 = vpop.f32.mrf.mxu0  ;;  %v3551_v18 = vpop.f32.mrf.mxu1 }
 0x11a   : > { %v3616_v37 = vadd.f32 %v3615_v16, %v3614_v7  ;;  %v5306_v31 = vadd.f32 %v3613_v44, %v1288_v6  ;;  %v3552_v54 = vadd.f32 %v3551_v18, %v3550_v30 }
 0x11b   : > { %v3617_v12 = vpop.f32.mrf.mxu0  ;;  %v3553_v56 = vpop.f32.mrf.mxu1 }
 0x11c   : > { %v1293_v5 = vadd.f32 %v3552_v54, %v5256_v34 }
 0x11d   : > { %v3618_v36 = vpop.f32.mrf.mxu0  ;;  %v3554_v25 = vpop.f32.mrf.mxu1 }
 0x11e   : > { %v3619_v49 = vadd.f32 %v3618_v36, %v3617_v12  ;;  %v5309_v40 = vadd.f32 %v3616_v37, %v1293_v5  ;;  %v3555_v42 = vadd.f32 %v3554_v25, %v3553_v56  ;;  %v228_v5 = vld [vmem:[%s4434_s23 + $0xe8] sm:$0x11]  ;;  %s2999_s23 = sshll.u32 %s4333_s13, 1 }
 0x11f   : > { %v3620_v26 = vpop.f32.mrf.mxu0  ;;  %2700 = vmatmul.mubr.bf16.gmra.mxu0 %v4831_v46  ;;  %v3556_v47 = vpop.f32.mrf.mxu1  ;;  %2603 = vmatmul.mubr.bf16.gmra.mxu1 %v4838_v21  ;;  %s185_s28 = sadd.s32 %s4329_s12, %s2999_s23 }
 0x120   : > { %2707 = vmatprep.mubr.bf16.mxu0 %v4843_v22  ;;  %v1296_v55 = vadd.f32 %v3555_v42, %v5263_v50  ;;  %2610 = vmatprep.mubr.bf16.mxu1 %v4849_v32  ;;  %v3236_v42 = vcombine.high %v228_v5, %v228_v5  ;;  %s3000_s29 = sshll.u32 %s185_s28, 4 }
 0x121   : > { %v3621_v58 = vpop.f32.mrf.mxu0  ;;  %v3557_v34 = vpop.f32.mrf.mxu1  ;;  %p187_p6 = scmp.lt.s32.totalorder %s3000_s29, 63 }
 0x122   : > { %v3622_v59 = vadd.f32 %v3621_v58, %v3620_v26  ;;  %v5316_v61 = vadd.f32 %v3619_v49, %v1296_v55  ;;  %v3558_v33 = vadd.f32 %v3557_v34, %v3556_v47  ;;  %v2053_v26 = vshll.u32 %v5261_v52, 16 }
 0x123   : > { %v3623_v35 = vpop.f32.mrf.mxu0  ;;  %v3559_v9 = vpop.f32.mrf.mxu1  ;;  %s5629_s29 = smov (!%p187_p6, %s3000_s29), 63 }
 0x124   : > { %v1301_v0 = vadd.f32 %v3558_v33, %v5271_v23  ;;  %v2055_v33 = vrot.slane %v2053_v26, 1  ;;  %s3001_s12 = sshll.u32 %s5629_s29, 2 }
 0x125   : > { %v3624_v46 = vpop.f32.mrf.mxu0  ;;  %v3560_v57 = vpop.f32.mrf.mxu1  ;;  %s5544_s6 = scalar_lea.vmem %s5617_s3, %s3001_s12 }
 0x126   : > { %v3625_v44 = vadd.f32 %v3624_v46, %v3623_v35  ;;  %v5319_v21 = vadd.f32 %v3622_v59, %v1301_v0  ;;  %v3561_v22 = vadd.f32 %v3560_v57, %v3559_v9  ;;  %v2058_v35 = vshll.u32 %v3236_v42, 16 }
 0x127   : > { %v3626_v2 = vpop.f32.mrf.mxu0  ;;  %2708 = vmatmul.mubr.bf16.gmra.mxu0 %v4881_v29  ;;  %v3562_v50 = vpop.f32.mrf.mxu1  ;;  %2611 = vmatmul.mubr.bf16.gmra.mxu1 %v4891_v14  ;;  %v3235_v57 = vcombine.low %v228_v5, %v228_v5 }
 0x128   : > { %2715 = vmatprep.mubr.bf16.mxu0 %v4896_v19  ;;  %v1304_v32 = vadd.f32 %v3561_v22, %v5278_v28  ;;  %2618 = vmatprep.mubr.bf16.mxu1 %v4900_v48  ;;  %v2067_v22 = vrot.slane %v5261_v52, 1 }
 0x129   : > { %v3627_v7 = vpop.f32.mrf.mxu0  ;;  %v3563_v23 = vpop.f32.mrf.mxu1 }
 0x12a   : > { %v3628_v30 = vadd.f32 %v3627_v7, %v3626_v2  ;;  %v5326_v6 = vadd.f32 %v3625_v44, %v1304_v32  ;;  %v3564_v16 = vadd.f32 %v3563_v23, %v3562_v50  ;;  %v2068_v2 = vrot.slane %v3236_v42, 1 }
 0x12b   : > { %v3629_v18 = vpop.f32.mrf.mxu0  ;;  %v3565_v37 = vpop.f32.mrf.mxu1  ;;  %v2041_v50 = vshll.u32 %v5276_v38, 16 }
 0x12c   : > { %v1309_v29 = vadd.f32 %v3564_v16, %v5286_v43 }
 0x12d   : > { %v3630_v54 = vpop.f32.mrf.mxu0  ;;  %v3566_v12 = vpop.f32.mrf.mxu1 }
 0x12e   : > { %v3631_v14 = vadd.f32 %v3630_v54, %v3629_v18  ;;  %v5329_v56 = vadd.f32 %v3628_v30, %v1309_v29  ;;  %v3567_v19 = vadd.f32 %v3566_v12, %v3565_v37  ;;  %v2039_v18 = vshrl.u32 %v5276_v38, 16 }
 0x12f   : > { %v3632_v28 = vpop.f32.mrf.mxu0  ;;  %2716 = vmatmul.mubr.bf16.gmra.mxu0 %v4924_v4  ;;  %v3568_v48 = vpop.f32.mrf.mxu1  ;;  %2619 = vmatmul.mubr.bf16.gmra.mxu1 %v4932_v8  ;;  %v2046_v29 = vshll.u32 %v3235_v57, 16 }
 0x130   : > { %2723 = vmatprep.mubr.bf16.mxu0 %v4935_v63  ;;  %v1312_v36 = vadd.f32 %v3567_v19, %v5290_v62  ;;  %2626 = vmatprep.mubr.bf16.mxu1 %v4939_v3  ;;  %v2051_v62 = vshrl.u32 %v5261_v52, 16  ;;  %v2043_v52 = vrot.slane %v2041_v50, 1 }
 0x131   : > { %v3633_v25 = vpop.f32.mrf.mxu0  ;;  %v3569_v43 = vpop.f32.mrf.mxu1  ;;  %v2048_v42 = vrot.slane %v2046_v29, 1 }
 0x132   : > { %v3634_v49 = vadd.f32 %v3633_v25, %v3632_v28  ;;  %v5338_v47 = vadd.f32 %v3631_v14, %v1312_v36  ;;  %v3570_v55 = vadd.f32 %v3569_v43, %v3568_v48  ;;  %v2056_v23 = vor.u32 %v2055_v33, %v2051_v62 }
 0x133   : > { %v3635_v4 = vpop.f32.mrf.mxu0  ;;  %v3571_v58 = vpop.f32.mrf.mxu1  ;;  %v2065_v36 = vrot.slane %v3235_v57, 1 }
 0x134   : > { %v1317_v34 = vadd.f32 %v3570_v55, %v5246_v27 }
 0x135   : > { %v3636_v8 = vpop.f32.mrf.mxu0  ;;  %v3572_v59 = vpop.f32.mrf.mxu1 }
 0x136   : > { %v3637_v63 = vadd.f32 %v3636_v8, %v3635_v4  ;;  %v5342_v3 = vadd.f32 %v3634_v49, %v1317_v34  ;;  %v3573_v9 = vadd.f32 %v3572_v59, %v3571_v58  ;;  %v2044_v49 = vor.u32 %v2043_v52, %v2039_v18 }
 0x137   : > { %v3638_v0 = vpop.f32.mrf.mxu0  ;;  %2724 = vmatmul.mubr.bf16.gmra.mxu0 %v4954_v10  ;;  %v3574_v46 = vpop.f32.mrf.mxu1  ;;  %2627 = vmatmul.mubr.bf16.gmra.mxu1 %v4951_v11  ;;  %v2060_v10 = vrot.slane %v2058_v35, 1 }
 0x138   : > { %2731 = vmatprep.mubr.bf16.mxu0 %v4957_v20  ;;  %v1320_v27 = vadd.f32 %v3573_v9, %v5250_v39  ;;  %2634 = vmatprep.mubr.bf16.mxu1 %v4963_v45  ;;  %v2069_v45 = vsel %vm558_vm0, %v2067_v22, %v2068_v2 }
 0x139   : > { %v3639_v44 = vpop.f32.mrf.mxu0  ;;  %v3575_v32 = vpop.f32.mrf.mxu1  ;;  %v2061_v14 = vsel %vm349_vm1, %v2056_v23, %v2060_v10 }
 0x13a   : > { %v3640_v7 = vadd.f32 %v3639_v44, %v3638_v0  ;;  %v5351_v30 = vadd.f32 %v3637_v63, %v1320_v27  ;;  %v3576_v11 = vadd.f32 %v3575_v32, %v3574_v46 }
 0x13b   : > { %v3641_v16 = vpop.f32.mrf.mxu0  ;;  %v3577_v20 = vpop.f32.mrf.mxu1 }
 0x13c   : > { %v1325_v39 = vadd.f32 %v3576_v11, %v5258_v1  ;;  %v2064_v1 = vrot.slane %v5276_v38, 1  ;;  %v2049_v38 = vsel %vm349_vm1, %v2044_v49, %v2048_v42 }
 0x13d   : > { %v3642_v37 = vpop.f32.mrf.mxu0  ;;  %v3578_v54 = vpop.f32.mrf.mxu1 }
 0x13e   : > { %v3643_v12 = vadd.f32 %v3642_v37, %v3641_v16  ;;  %v5357_v19 = vadd.f32 %v3640_v7, %v1325_v39  ;;  %v3579_v28 = vadd.f32 %v3578_v54, %v3577_v20  ;;  %v2066_v8 = vsel %vm558_vm0, %v2064_v1, %v2065_v36 }
 0x13f   : > { %v3644_v5 = vpop.f32.mrf.mxu0  ;;  %2732 = vmatmul.mubr.bf16.gmra.mxu0 %v4971_v53  ;;  %v3580_v48 = vpop.f32.mrf.mxu1  ;;  %2635 = vmatmul.mubr.bf16.gmra.mxu1 %v4974_v15 }
 0x140   : > { %2739 = vmatprep.mubr.bf16.mxu0 %v2069_v45  ;;  %v1328_v25 = vadd.f32 %v3579_v28, %v5265_v51  ;;  %2642 = vmatprep.mubr.bf16.mxu1 %v2061_v14 }
 0x141   : > { %v3645_v43 = vpop.f32.mrf.mxu0  ;;  %v3581_v26 = vpop.f32.mrf.mxu1 }
 0x142   : > { %v3646_v55 = vadd.f32 %v3645_v43, %v3644_v5  ;;  %v5363_v4 = vadd.f32 %v3643_v12, %v1328_v25  ;;  %v3582_v58 = vadd.f32 %v3581_v26, %v3580_v48 }
 0x143   : > { %v3647_v34 = vpop.f32.mrf.mxu0  ;;  %v3583_v53 = vpop.f32.mrf.mxu1 }
 0x144   : > { %v1333_v15 = vadd.f32 %v3582_v58, %v5273_v41 }
 0x145   : > { %v3648_v59 = vpop.f32.mrf.mxu0  ;;  %v3584_v63 = vpop.f32.mrf.mxu1 }
 0x146   : > { %v3649_v51 = vadd.f32 %v3648_v59, %v3647_v34  ;;  %v5368_v62 = vadd.f32 %v3646_v55, %v1333_v15  ;;  %v3585_v33 = vadd.f32 %v3584_v63, %v3583_v53 }
 0x147   : > { %v3650_v35 = vpop.f32.mrf.mxu0  ;;  %2740 = vmatmul.mubr.bf16.gmra.mxu0 %v2066_v8  ;;  %v3586_v9 = vpop.f32.mrf.mxu1  ;;  %2643 = vmatmul.mubr.bf16.gmra.mxu1 %v2049_v38 }
 0x148   : > { %v1336_v0 = vadd.f32 %v3585_v33, %v5280_v13 }
 0x149   : > { %v3651_v46 = vpop.f32.mrf.mxu0  ;;  %v3587_v57 = vpop.f32.mrf.mxu1 }
 0x14a   : > { %v3652_v27 = vadd.f32 %v3651_v46, %v3650_v35  ;;  %v5371_v44 = vadd.f32 %v3649_v51, %v1336_v0  ;;  %v3588_v41 = vadd.f32 %v3587_v57, %v3586_v9 }
 0x14b   : > { %v3653_v22 = vpop.f32.mrf.mxu0  ;;  %v3589_v2 = vpop.f32.mrf.mxu1 }
 0x14c   : > { %v1341_v50 = vadd.f32 %v3588_v41, %v5288_v60 }
 0x14d   : > { %v3654_v32 = vpop.f32.mrf.mxu0  ;;  %v3590_v7 = vpop.f32.mrf.mxu1 }
 0x14e   : > { %v3655_v23 = vadd.f32 %v3654_v32, %v3653_v22  ;;  %v5374_v10 = vadd.f32 %v3652_v27, %v1341_v50  ;;  %v3591_v11 = vadd.f32 %v3590_v7, %v3589_v2 }
 0x14f   : > { %v3736_v16 = vpop.f32.mrf.mxu0  ;;  %v3672_v20 = vpop.f32.mrf.mxu1 }
 0x150   : > { %v1344_v13 = vadd.f32 %v3591_v11, %v5292_v17 }
 0x151   : > { %v3737_v18 = vpop.f32.mrf.mxu0  ;;  %v3673_v39 = vpop.f32.mrf.mxu1 }
 0x152   : > { %v3738_v37 = vadd.f32 %v3737_v18, %v3736_v16  ;;  %v5377_v45 = vadd.f32 %v3655_v23, %v1344_v13  ;;  %v3674_v52 = vadd.f32 %v3673_v39, %v3672_v20 }
 0x153   : > { %v3739_v29 = vpop.f32.mrf.mxu0  ;;  %v3675_v54 = vpop.f32.mrf.mxu1 }
 0x154   : > { %v1767_v60 = vadd.f32 %v3674_v52, %v5299_v24 }
 0x155   : > { %v3740_v12 = vpop.f32.mrf.mxu0  ;;  %v3676_v14 = vpop.f32.mrf.mxu1 }
 0x156   : > { %v3741_v28 = vadd.f32 %v3740_v12, %v3739_v29  ;;  %v5380_v5 = vadd.f32 %v3738_v37, %v1767_v60  ;;  %v3677_v48 = vadd.f32 %v3676_v14, %v3675_v54 }
 0x157   : > { %v3742_v1 = vpop.f32.mrf.mxu0  ;;  %v3678_v36 = vpop.f32.mrf.mxu1 }
 0x158   : > { %v1770_v17 = vadd.f32 %v3677_v48, %v5306_v31 }
 0x159   : > { %v3743_v25 = vpop.f32.mrf.mxu0  ;;  %v3679_v43 = vpop.f32.mrf.mxu1 }
 0x15a   : > { %v3744_v49 = vadd.f32 %v3743_v25, %v3742_v1  ;;  %v5383_v42 = vadd.f32 %v3741_v28, %v1770_v17  ;;  %v3680_v26 = vadd.f32 %v3679_v43, %v3678_v36 }
 0x15b   : > { %v3745_v55 = vpop.f32.mrf.mxu0  ;;  %v3681_v58 = vpop.f32.mrf.mxu1 }
 0x15c   : > { %v1775_v24 = vadd.f32 %v3680_v26, %v5309_v40 }
 0x15d   : > { %v3746_v34 = vpop.f32.mrf.mxu0  ;;  %v3682_v53 = vpop.f32.mrf.mxu1 }
 0x15e   : > { %v3747_v8 = vadd.f32 %v3746_v34, %v3745_v55  ;;  %v5386_v15 = vadd.f32 %v3744_v49, %v1775_v24  ;;  %v3683_v59 = vadd.f32 %v3682_v53, %v3681_v58 }
 0x15f   : > { %v3748_v38 = vpop.f32.mrf.mxu0  ;;  %v3684_v63 = vpop.f32.mrf.mxu1 }
 0x160   : > { %v1778_v31 = vadd.f32 %v3683_v59, %v5316_v61 }
 0x161   : > { %v3749_v51 = vpop.f32.mrf.mxu0  ;;  %v3685_v33 = vpop.f32.mrf.mxu1 }
 0x162   : > { %v3750_v35 = vadd.f32 %v3749_v51, %v3748_v38  ;;  %v5389_v9 = vadd.f32 %v3747_v8, %v1778_v31  ;;  %v3686_v0 = vadd.f32 %v3685_v33, %v3684_v63 }
 0x163   : > { %v3751_v46 = vpop.f32.mrf.mxu0  ;;  %v3687_v57 = vpop.f32.mrf.mxu1 }
 0x164   : > { %v1783_v40 = vadd.f32 %v3686_v0, %v5319_v21 }
 0x165   : > { %v3752_v27 = vpop.f32.mrf.mxu0  ;;  %v3688_v41 = vpop.f32.mrf.mxu1 }
 0x166   : > { %v3753_v22 = vadd.f32 %v3752_v27, %v3751_v46  ;;  %v5392_v2 = vadd.f32 %v3750_v35, %v1783_v40  ;;  %v3689_v50 = vadd.f32 %v3688_v41, %v3687_v57 }
 0x167   : > { %v3754_v32 = vpop.f32.mrf.mxu0  ;;  %v3690_v7 = vpop.f32.mrf.mxu1 }
 0x168   : > { %v1786_v61 = vadd.f32 %v3689_v50, %v5326_v6 }
 0x169   : > { %v3755_v23 = vpop.f32.mrf.mxu0  ;;  %v3691_v11 = vpop.f32.mrf.mxu1 }
 0x16a   : > { %v3756_v16 = vadd.f32 %v3755_v23, %v3754_v32  ;;  %v5395_v20 = vadd.f32 %v3753_v22, %v1786_v61  ;;  %v3692_v13 = vadd.f32 %v3691_v11, %v3690_v7 }
 0x16b   : > { %v3757_v18 = vpop.f32.mrf.mxu0  ;;  %v3693_v39 = vpop.f32.mrf.mxu1 }
 0x16c   : > { %v1791_v21 = vadd.f32 %v3692_v13, %v5329_v56 }
 0x16d   : > { %v3758_v37 = vpop.f32.mrf.mxu0  ;;  %v3694_v52 = vpop.f32.mrf.mxu1 }
 0x16e   : > { %v3759_v29 = vadd.f32 %v3758_v37, %v3757_v18  ;;  %v5398_v54 = vadd.f32 %v3756_v16, %v1791_v21  ;;  %v3695_v60 = vadd.f32 %v3694_v52, %v3693_v39 }
 0x16f   : > { %v3760_v12 = vpop.f32.mrf.mxu0  ;;  %v3696_v14 = vpop.f32.mrf.mxu1 }
 0x170   : > { %v1794_v6 = vadd.f32 %v3695_v60, %v5338_v47 }
 0x171   : > { %v3761_v28 = vpop.f32.mrf.mxu0  ;;  %v3697_v48 = vpop.f32.mrf.mxu1 }
 0x172   : > { %v3762_v1 = vadd.f32 %v3761_v28, %v3760_v12  ;;  %v5401_v36 = vadd.f32 %v3759_v29, %v1794_v6  ;;  %v3698_v17 = vadd.f32 %v3697_v48, %v3696_v14 }
 0x173   : > { %v3763_v25 = vpop.f32.mrf.mxu0  ;;  %v3699_v43 = vpop.f32.mrf.mxu1 }
 0x174   : > { %v1799_v56 = vadd.f32 %v3698_v17, %v5342_v3 }
 0x175   : > { %v3764_v49 = vpop.f32.mrf.mxu0  ;;  %v3700_v26 = vpop.f32.mrf.mxu1 }
 0x176   : > { %v3765_v55 = vadd.f32 %v3764_v49, %v3763_v25  ;;  %v5404_v58 = vadd.f32 %v3762_v1, %v1799_v56  ;;  %v3701_v24 = vadd.f32 %v3700_v26, %v3699_v43 }
 0x177   : > { %v3766_v34 = vpop.f32.mrf.mxu0  ;;  %v3702_v53 = vpop.f32.mrf.mxu1 }
 0x178   : > { %v1802_v47 = vadd.f32 %v3701_v24, %v5351_v30 }
 0x179   : > { %v3767_v8 = vpop.f32.mrf.mxu0  ;;  %v3703_v59 = vpop.f32.mrf.mxu1 }
 0x17a   : > { %v3768_v38 = vadd.f32 %v3767_v8, %v3766_v34  ;;  %v5407_v63 = vadd.f32 %v3765_v55, %v1802_v47  ;;  %v3704_v31 = vadd.f32 %v3703_v59, %v3702_v53 }
 0x17b   : > { %v3769_v51 = vpop.f32.mrf.mxu0  ;;  %v3705_v33 = vpop.f32.mrf.mxu1 }
 0x17c   : > { %v1807_v3 = vadd.f32 %v3704_v31, %v5357_v19 }
 0x17d   : > { %v3770_v35 = vpop.f32.mrf.mxu0  ;;  %v3706_v0 = vpop.f32.mrf.mxu1 }
 0x17e   : > { %v3771_v46 = vadd.f32 %v3770_v35, %v3769_v51  ;;  %v5410_v57 = vadd.f32 %v3768_v38, %v1807_v3  ;;  %v3707_v40 = vadd.f32 %v3706_v0, %v3705_v33 }
 0x17f   : > { %v3772_v27 = vpop.f32.mrf.mxu0  ;;  %v3708_v41 = vpop.f32.mrf.mxu1 }
 0x180   : > { %v1810_v30 = vadd.f32 %v3707_v40, %v5363_v4 }
 0x181   : > { %v3773_v22 = vpop.f32.mrf.mxu0  ;;  %v3709_v50 = vpop.f32.mrf.mxu1 }
 0x182   : > { %v3774_v32 = vadd.f32 %v3773_v22, %v3772_v27  ;;  %v5413_v7 = vadd.f32 %v3771_v46, %v1810_v30  ;;  %v3710_v61 = vadd.f32 %v3709_v50, %v3708_v41 }
 0x183   : > { %v3775_v23 = vpop.f32.mrf.mxu0  ;;  %v3711_v11 = vpop.f32.mrf.mxu1 }
 0x184   : > { %v1815_v19 = vadd.f32 %v3710_v61, %v5368_v62 }
 0x185   : > { %v3776_v16 = vpop.f32.mrf.mxu0  ;;  %v3712_v13 = vpop.f32.mrf.mxu1 }
 0x186   : > { %v3777_v18 = vadd.f32 %v3776_v16, %v3775_v23  ;;  %v5416_v39 = vadd.f32 %v3774_v32, %v1815_v19  ;;  %v3713_v21 = vadd.f32 %v3712_v13, %v3711_v11 }
 0x187   : > { %v3778_v37 = vpop.f32.mrf.mxu0  ;;  %v3714_v52 = vpop.f32.mrf.mxu1 }
 0x188   : > { %v1818_v4 = vadd.f32 %v3713_v21, %v5371_v44 }
 0x189   : > { %v3779_v29 = vpop.f32.mrf.mxu0  ;;  %v3715_v60 = vpop.f32.mrf.mxu1 }
 0x18a   : > { %v3780_v12 = vadd.f32 %v3779_v29, %v3778_v37  ;;  %v5419_v14 = vadd.f32 %v3777_v18, %v1818_v4  ;;  %v3716_v6 = vadd.f32 %v3715_v60, %v3714_v52 }
 0x18b   : > { %v3781_v28 = vpop.f32.mrf.mxu0  ;;  %v3717_v48 = vpop.f32.mrf.mxu1 }
 0x18c   : > { %v1823_v62 = vadd.f32 %v3716_v6, %v5374_v10 }
 0x18d   : > { %v3782_v1 = vpop.f32.mrf.mxu0  ;;  %v3718_v17 = vpop.f32.mrf.mxu1 }
 0x18e   : > { %v3783_v25 = vadd.f32 %v3782_v1, %v3781_v28  ;;  %v5422_v43 = vadd.f32 %v3780_v12, %v1823_v62  ;;  %v3719_v56 = vadd.f32 %v3718_v17, %v3717_v48 }
 0x18f   : > { %v3864_v49 = vpop.f32.mrf.mxu0  ;;  %v3800_v26 = vpop.f32.mrf.mxu1 }
 0x190   : > { %v1826_v44 = vadd.f32 %v3719_v56, %v5377_v45 }
 0x191   : > { %v3865_v55 = vpop.f32.mrf.mxu0  ;;  %v3801_v24 = vpop.f32.mrf.mxu1 }
 0x192   : > { %v5425_v34 = vadd.f32 %v3865_v55, %v3864_v49  ;;  %v5427_v53 = vadd.f32 %v3783_v25, %v1826_v44  ;;  %v3802_v47 = vadd.f32 %v3801_v24, %v3800_v26 }
 0x193   : > { %v5429_v8 = vpop.f32.mrf.mxu0  ;;  %v3803_v10 = vpop.f32.mrf.mxu1 }
 0x194   : > { %v5432_v59 = vadd.f32 %v3802_v47, %v5380_v5 }
 0x195   : > { %v5434_v38 = vpop.f32.mrf.mxu0  ;;  %v3804_v31 = vpop.f32.mrf.mxu1 }
 0x196   : > { %v3805_v51 = vadd.f32 %v3804_v31, %v3803_v10 }
 0x197   : > { %v3870_v33 = vpop.f32.mrf.mxu0  ;;  %v3806_v3 = vpop.f32.mrf.mxu1 }
 0x198   : > { %v5437_v45 = vadd.f32 %v3805_v51, %v5383_v42 }
 0x199   : > { %v3871_v35 = vpop.f32.mrf.mxu0  ;;  %v3807_v0 = vpop.f32.mrf.mxu1 }
 0x19a   : > { %v5439_v46 = vadd.f32 %v3871_v35, %v3870_v33  ;;  %v3808_v40 = vadd.f32 %v3807_v0, %v3806_v3 }
 0x19b   : > { %v5441_v27 = vpop.f32.mrf.mxu0  ;;  %v3809_v41 = vpop.f32.mrf.mxu1 }
 0x19c   : > { %v5444_v5 = vadd.f32 %v3808_v40, %v5386_v15 }
 0x19d   : > { %v5446_v30 = vpop.f32.mrf.mxu0  ;;  %v3810_v22 = vpop.f32.mrf.mxu1 }
 0x19e   : > { %v3811_v50 = vadd.f32 %v3810_v22, %v3809_v41 }
 0x19f   : > { %v3876_v32 = vpop.f32.mrf.mxu0  ;;  %v3812_v61 = vpop.f32.mrf.mxu1 }
 0x1a0   : > { %v5449_v42 = vadd.f32 %v3811_v50, %v5389_v9 }
 0x1a1   : > { %v3877_v23 = vpop.f32.mrf.mxu0  ;;  %v3813_v11 = vpop.f32.mrf.mxu1 }
 0x1a2   : > { %v5451_v19 = vadd.f32 %v3877_v23, %v3876_v32  ;;  %v3814_v16 = vadd.f32 %v3813_v11, %v3812_v61 }
 0x1a3   : > { %v5453_v13 = vpop.f32.mrf.mxu0  ;;  %v3815_v18 = vpop.f32.mrf.mxu1 }
 0x1a4   : > { %v5456_v15 = vadd.f32 %v3814_v16, %v5392_v2 }
 0x1a5   : > { %v5458_v21 = vpop.f32.mrf.mxu0  ;;  %v3816_v37 = vpop.f32.mrf.mxu1 }
 0x1a6   : > { %v3817_v52 = vadd.f32 %v3816_v37, %v3815_v18 }
 0x1a7   : > { %v3882_v4 = vpop.f32.mrf.mxu0  ;;  %v3818_v29 = vpop.f32.mrf.mxu1 }
 0x1a8   : > { %v5461_v9 = vadd.f32 %v3817_v52, %v5395_v20 }
 0x1a9   : > { %v3883_v60 = vpop.f32.mrf.mxu0  ;;  %v3819_v12 = vpop.f32.mrf.mxu1 }
 0x1aa   : > { %v5463_v6 = vadd.f32 %v3883_v60, %v3882_v4  ;;  %v3820_v28 = vadd.f32 %v3819_v12, %v3818_v29 }
 0x1ab   : > { %v5465_v48 = vpop.f32.mrf.mxu0  ;;  %v3821_v62 = vpop.f32.mrf.mxu1 }
 0x1ac   : > { %v5468_v2 = vadd.f32 %v3820_v28, %v5398_v54 }
 0x1ad   : > { %v5470_v1 = vpop.f32.mrf.mxu0  ;;  %v3822_v17 = vpop.f32.mrf.mxu1 }
 0x1ae   : > { %v3823_v25 = vadd.f32 %v3822_v17, %v3821_v62 }
 0x1af   : > { %v3888_v56 = vpop.f32.mrf.mxu0  ;;  %v3824_v49 = vpop.f32.mrf.mxu1 }
 0x1b0   : > { %v5473_v20 = vadd.f32 %v3823_v25, %v5401_v36 }
 0x1b1   : > { %v3889_v26 = vpop.f32.mrf.mxu0  ;;  %v3825_v44 = vpop.f32.mrf.mxu1 }
 0x1b2   : > { %v5475_v55 = vadd.f32 %v3889_v26, %v3888_v56  ;;  %v3826_v24 = vadd.f32 %v3825_v44, %v3824_v49 }
 0x1b3   : > { %v5477_v47 = vpop.f32.mrf.mxu0  ;;  %v3827_v10 = vpop.f32.mrf.mxu1 }
 0x1b4   : > { %v5480_v54 = vadd.f32 %v3826_v24, %v5404_v58 }
 0x1b5   : > { %v5482_v31 = vpop.f32.mrf.mxu0  ;;  %v3828_v51 = vpop.f32.mrf.mxu1 }
 0x1b6   : > { %v3829_v33 = vadd.f32 %v3828_v51, %v3827_v10 }
 0x1b7   : > { %v3894_v3 = vpop.f32.mrf.mxu0  ;;  %v3830_v35 = vpop.f32.mrf.mxu1 }
 0x1b8   : > { %v5485_v36 = vadd.f32 %v3829_v33, %v5407_v63 }
 0x1b9   : > { %v3895_v0 = vpop.f32.mrf.mxu0  ;;  %v3831_v40 = vpop.f32.mrf.mxu1 }
 0x1ba   : > { %v5487_v41 = vadd.f32 %v3895_v0, %v3894_v3  ;;  %v3832_v22 = vadd.f32 %v3831_v40, %v3830_v35 }
 0x1bb   : > { %v5489_v50 = vpop.f32.mrf.mxu0  ;;  %v3833_v32 = vpop.f32.mrf.mxu1 }
 0x1bc   : > { %v5492_v58 = vadd.f32 %v3832_v22, %v5410_v57 }
 0x1bd   : > { %v5494_v61 = vpop.f32.mrf.mxu0  ;;  %v3834_v23 = vpop.f32.mrf.mxu1 }
 0x1be   : > { %v3835_v11 = vadd.f32 %v3834_v23, %v3833_v32 }
 0x1bf   : > { %v3900_v16 = vpop.f32.mrf.mxu0  ;;  %v3836_v18 = vpop.f32.mrf.mxu1 }
 0x1c0   : > { %v5497_v63 = vadd.f32 %v3835_v11, %v5413_v7 }
 0x1c1   : > { %v3901_v37 = vpop.f32.mrf.mxu0  ;;  %v3837_v52 = vpop.f32.mrf.mxu1 }
 0x1c2   : > { %v5499_v4 = vadd.f32 %v3901_v37, %v3900_v16  ;;  %v3838_v29 = vadd.f32 %v3837_v52, %v3836_v18 }
 0x1c3   : > { %v5501_v60 = vpop.f32.mrf.mxu0  ;;  %v3839_v12 = vpop.f32.mrf.mxu1 }
 0x1c4   : > { %v5504_v57 = vadd.f32 %v3838_v29, %v5416_v39  ;;  %v3869_v29 = vadd.f32 %v5434_v38, %v5429_v8 }
 0x1c5   : > { %v5506_v28 = vpop.f32.mrf.mxu0  ;;  %v3840_v62 = vpop.f32.mrf.mxu1 }
 0x1c6   : > { %v3841_v17 = vadd.f32 %v3840_v62, %v3839_v12 }
 0x1c7   : > { %v3906_v25 = vpop.f32.mrf.mxu0  ;;  %v3842_v56 = vpop.f32.mrf.mxu1 }
 0x1c8   : > { %v5509_v7 = vadd.f32 %v3841_v17, %v5419_v14 }
 0x1c9   : > { %v3907_v49 = vpop.f32.mrf.mxu0  ;;  %v3843_v26 = vpop.f32.mrf.mxu1 }
 0x1ca   : > { %v5511_v44 = vadd.f32 %v3907_v49, %v3906_v25  ;;  %v3844_v24 = vadd.f32 %v3843_v26, %v3842_v56 }
 0x1cb   : > { %v5513_v10 = vpop.f32.mrf.mxu0  ;;  %v3845_v39 = vpop.f32.mrf.mxu1 }
 0x1cc   : > { %v5516_v51 = vadd.f32 %v3844_v24, %v5422_v43 }
 0x1cd   : > { %v5518_v33 = vpop.f32.mrf.mxu0  ;;  %v3846_v3 = vpop.f32.mrf.mxu1 }
 0x1ce   : > { %v3847_v35 = vadd.f32 %v3846_v3, %v3845_v39 }
 0x1cf   : > { %v3992_v0 = vpop.f32.mrf.mxu0  ;;  %v3928_v14 = vpop.f32.mrf.mxu1 }
 0x1d0   : > { %v5522_v40 = vadd.f32 %v3847_v35, %v5427_v53  ;;  %v5531_v53 = vld [vmem:[%s5616_s2] ss:$0 sm:$0xff] }
 0x1d1   : > { %v3993_v22 = vpop.f32.mrf.mxu0  ;;  %v3929_v32 = vpop.f32.mrf.mxu1 }
 0x1d2   : > { %v3930_v23 = vadd.f32 %v3929_v32, %v3928_v14  ;;  %v3994_v43 = vadd.f32 %v3993_v22, %v3992_v0 }
 0x1d3   : > { %v3995_v11 = vpop.f32.mrf.mxu0  ;;  %v3931_v16 = vpop.f32.mrf.mxu1 }
 0x1d4   : > { %v2589_v18 = vadd.f32 %v3930_v23, %v5425_v34 }
 0x1d5   : > { %v3996_v37 = vpop.f32.mrf.mxu0  ;;  %v3932_v52 = vpop.f32.mrf.mxu1 }
 0x1d6   : > { %v2686_v12 = vadd.f32 %v3994_v43, %v2589_v18  ;;  %v3933_v62 = vadd.f32 %v3932_v52, %v3931_v16  ;;  %v3997_v49 = vadd.f32 %v3996_v37, %v3995_v11 }
 0x1d7   : > { %v3998_v17 = vpop.f32.mrf.mxu0  ;;  %v3934_v25 = vpop.f32.mrf.mxu1 }
 0x1d8   : > { %v2748_v56 = vadd.f32 %v2686_v12, %v5432_v59  ;;  %v2592_v34 = vadd.f32 %v3933_v62, %v3869_v29  ;;  %v3875_v59 = vadd.f32 %v5446_v30, %v5441_v27 }
 0x1d9   : > { %v3999_v26 = vpop.f32.mrf.mxu0  ;;  %v3935_v24 = vpop.f32.mrf.mxu1 }
 0x1da   : > { %v2771_v39 = vadd.f32 %v5531_v53, %v2748_v56  ;;  %v2689_v3 = vadd.f32 %v3997_v49, %v2592_v34  ;;  %v3936_v8 = vadd.f32 %v3935_v24, %v3934_v25  ;;  %v4000_v22 = vadd.f32 %v3999_v26, %v3998_v17 }
 0x1db   : > { %v4001_v38 = vpop.f32.mrf.mxu0  ;;  %v3937_v35 = vpop.f32.mrf.mxu1 }
 0x1dc   : > { %v2749_v0 = vadd.f32 %v2689_v3, %v5437_v45  ;;  %v2597_v14 = vadd.f32 %v3936_v8, %v5439_v46  ;;  %v2803_v23 = vmul.f32 0.1, %v2771_v39  ;;  %vm2787_vm2 = vcmp.gt.f32.partialorder %v2771_v39, 0.0 }
 0x1dd   : > { %v4002_v32 = vpop.f32.mrf.mxu0  ;;  %v3938_v11 = vpop.f32.mrf.mxu1 }
 0x1de   : > { %v2772_v16 = vadd.f32 %v5531_v53, %v2749_v0  ;;  %v2694_v18 = vadd.f32 %v4000_v22, %v2597_v14  ;;  %v3939_v43 = vadd.f32 %v3938_v11, %v3937_v35  ;;  %v4003_v52 = vadd.f32 %v4002_v32, %v4001_v38 }
 0x1df   : > { %v4004_v37 = vpop.f32.mrf.mxu0  ;;  %v3940_v29 = vpop.f32.mrf.mxu1  ;;  %v2819_v17 = vsel %vm2787_vm2, %v2771_v39, %v2803_v23  ;;  %v3881_v38 = vadd.f32 %v5458_v21, %v5453_v13 }
 0x1e0   : > { %vm2788_vm3 = vcmp.gt.f32.partialorder %v2772_v16, 0.0  ;;  %v2804_v45 = vmul.f32 0.1, %v2772_v16  ;;  %v2750_v46 = vadd.f32 %v2694_v18, %v5444_v5  ;;  %v2600_v12 = vadd.f32 %v3939_v43, %v3875_v59 }
 0x1e1   : > { %v4005_v62 = vpop.f32.mrf.mxu0  ;;  %v3941_v25 = vpop.f32.mrf.mxu1 }
 0x1e2   : > { %v2820_v27 = vsel %vm2788_vm3, %v2772_v16, %v2804_v45  ;;  %v2773_v30 = vadd.f32 %v5531_v53, %v2750_v46  ;;  %v2697_v56 = vadd.f32 %v4003_v52, %v2600_v12  ;;  %v3942_v34 = vadd.f32 %v3941_v25, %v3940_v29 }
 0x1e3   : > { %v4007_v49 = vpop.f32.mrf.mxu0  ;;  %v3420_v26 = vpack.c.bf16 %v2820_v27, %v2819_v17  ;;  %v3943_v24 = vpop.f32.mrf.mxu1  ;;  %v4006_v39 = vadd.f32 %v4005_v62, %v4004_v37 }
 0x1e4   : > { %v2751_v5 = vadd.f32 %v2697_v56, %v5449_v42  ;;  %v2605_v3 = vadd.f32 %v3942_v34, %v5451_v19  ;;  %v2805_v35 = vmul.f32 0.1, %v2773_v30  ;;  %vm2789_vm4 = vcmp.gt.f32.partialorder %v2773_v30, 0.0 }
 0x1e5   : > { %v4008_v8 = vpop.f32.mrf.mxu0  ;;  %3421 = vst [vmem:[%s5544_s6] sm:$0xff] %v3420_v26   ;;  %v3944_v0 = vpop.f32.mrf.mxu1 }
 0x1e6   : > { %v2774_v14 = vadd.f32 %v5531_v53, %v2751_v5  ;;  %v2702_v22 = vadd.f32 %v4006_v39, %v2605_v3  ;;  %v3945_v32 = vadd.f32 %v3944_v0, %v3943_v24  ;;  %v4009_v23 = vadd.f32 %v4008_v8, %v4007_v49 }
 0x1e7   : > { %v4010_v59 = vpop.f32.mrf.mxu0  ;;  %v3946_v11 = vpop.f32.mrf.mxu1  ;;  %v2821_v43 = vsel %vm2789_vm4, %v2773_v30, %v2805_v35 }
 0x1e8   : > { %vm2790_vm5 = vcmp.gt.f32.partialorder %v2774_v14, 0.0  ;;  %v2806_v42 = vmul.f32 0.1, %v2774_v14  ;;  %v2752_v19 = vadd.f32 %v2702_v22, %v5456_v15  ;;  %v2608_v16 = vadd.f32 %v3945_v32, %v3881_v38 }
 0x1e9   : > { %v4011_v18 = vpop.f32.mrf.mxu0  ;;  %v3947_v13 = vpop.f32.mrf.mxu1  ;;  %v3887_v15 = vadd.f32 %v5470_v1, %v5465_v48 }
 0x1ea   : > { %v2822_v21 = vsel %vm2790_vm5, %v2774_v14, %v2806_v42  ;;  %v2775_v37 = vadd.f32 %v5531_v53, %v2752_v19  ;;  %v2705_v52 = vadd.f32 %v4009_v23, %v2608_v16  ;;  %v3948_v29 = vadd.f32 %v3947_v13, %v3946_v11 }
 0x1eb   : > { %v4013_v45 = vpop.f32.mrf.mxu0  ;;  %v3425_v46 = vpack.c.bf16 %v2822_v21, %v2821_v43  ;;  %v3949_v12 = vpop.f32.mrf.mxu1  ;;  %v4012_v25 = vadd.f32 %v4011_v18, %v4010_v59 }
 0x1ec   : > { %v2753_v62 = vadd.f32 %v2705_v52, %v5461_v9  ;;  %v2613_v17 = vadd.f32 %v3948_v29, %v5463_v6  ;;  %v2807_v30 = vmul.f32 0.1, %v2775_v37  ;;  %vm2791_vm6 = vcmp.gt.f32.partialorder %v2775_v37, 0.0 }
 0x1ed   : > { %v4014_v27 = vpop.f32.mrf.mxu0  ;;  %3457 = vst [vmem:[%s5544_s6 + $0x8] sm:$0xff] %v3425_v46   ;;  %v3950_v56 = vpop.f32.mrf.mxu1 }
 0x1ee   : > { %v2776_v34 = vadd.f32 %v5531_v53, %v2753_v62  ;;  %v2710_v49 = vadd.f32 %v4012_v25, %v2613_v17  ;;  %v3951_v26 = vadd.f32 %v3950_v56, %v3949_v12  ;;  %v4015_v5 = vadd.f32 %v4014_v27, %v4013_v45 }
 0x1ef   : > { %v4016_v24 = vpop.f32.mrf.mxu0  ;;  %v3952_v3 = vpop.f32.mrf.mxu1  ;;  %v2823_v38 = vsel %vm2791_vm6, %v2775_v37, %v2807_v30 }
 0x1f0   : > { %vm2792_vm7 = vcmp.gt.f32.partialorder %v2776_v34, 0.0  ;;  %v2808_v9 = vmul.f32 0.1, %v2776_v34  ;;  %v2754_v6 = vadd.f32 %v2710_v49, %v5468_v2  ;;  %v2616_v39 = vadd.f32 %v3951_v26, %v3887_v15 }
 0x1f1   : > { %v4017_v8 = vpop.f32.mrf.mxu0  ;;  %v3953_v48 = vpop.f32.mrf.mxu1  ;;  %v3893_v2 = vadd.f32 %v5482_v31, %v5477_v47 }
 0x1f2   : > { %v2824_v1 = vsel %vm2792_vm7, %v2776_v34, %v2808_v9  ;;  %v2777_v35 = vadd.f32 %v5531_v53, %v2754_v6  ;;  %v2713_v0 = vadd.f32 %v4015_v5, %v2616_v39  ;;  %v3954_v14 = vadd.f32 %v3953_v48, %v3952_v3 }
 0x1f3   : > { %v4019_v22 = vpop.f32.mrf.mxu0  ;;  %v3430_v32 = vpack.c.bf16 %v2824_v1, %v2823_v38  ;;  %v3955_v59 = vpop.f32.mrf.mxu1  ;;  %v4018_v42 = vadd.f32 %v4017_v8, %v4016_v24 }
 0x1f4   : > { %v2755_v23 = vadd.f32 %v2713_v0, %v5473_v20  ;;  %v2621_v11 = vadd.f32 %v3954_v14, %v5475_v55  ;;  %v2809_v16 = vmul.f32 0.1, %v2777_v35  ;;  %vm2793_vm8 = vcmp.gt.f32.partialorder %v2777_v35, 0.0 }
 0x1f5   : > { %v4020_v19 = vpop.f32.mrf.mxu0  ;;  %3458 = vst [vmem:[%s5544_s6 + $0x10] sm:$0xff] %v3430_v32   ;;  %v3956_v18 = vpop.f32.mrf.mxu1 }
 0x1f6   : > { %v2778_v43 = vadd.f32 %v5531_v53, %v2755_v23  ;;  %v2718_v13 = vadd.f32 %v4018_v42, %v2621_v11  ;;  %v3957_v21 = vadd.f32 %v3956_v18, %v3955_v59  ;;  %v4021_v52 = vadd.f32 %v4020_v19, %v4019_v22 }
 0x1f7   : > { %v4022_v37 = vpop.f32.mrf.mxu0  ;;  %v3958_v29 = vpop.f32.mrf.mxu1  ;;  %v2825_v12 = vsel %vm2793_vm8, %v2777_v35, %v2809_v16 }
 0x1f8   : > { %vm2794_vm9 = vcmp.gt.f32.partialorder %v2778_v43, 0.0  ;;  %v2810_v20 = vmul.f32 0.1, %v2778_v43  ;;  %v2756_v55 = vadd.f32 %v2718_v13, %v5480_v54  ;;  %v2624_v45 = vadd.f32 %v3957_v21, %v3893_v2 }
 0x1f9   : > { %v4023_v46 = vpop.f32.mrf.mxu0  ;;  %v3959_v47 = vpop.f32.mrf.mxu1  ;;  %v3899_v54 = vadd.f32 %v5494_v61, %v5489_v50 }
 0x1fa   : > { %v2826_v31 = vsel %vm2794_vm9, %v2778_v43, %v2810_v20  ;;  %v2779_v62 = vadd.f32 %v5531_v53, %v2756_v55  ;;  %v2721_v17 = vadd.f32 %v4021_v52, %v2624_v45  ;;  %v3960_v25 = vadd.f32 %v3959_v47, %v3958_v29 }
 0x1fb   : > { %v4025_v27 = vpop.f32.mrf.mxu0  ;;  %v3435_v15 = vpack.c.bf16 %v2826_v31, %v2825_v12  ;;  %v3961_v30 = vpop.f32.mrf.mxu1  ;;  %v4024_v49 = vadd.f32 %v4023_v46, %v4022_v37 }
 0x1fc   : > { %v2757_v56 = vadd.f32 %v2721_v17, %v5485_v36  ;;  %v2629_v34 = vadd.f32 %v3960_v25, %v5487_v41  ;;  %v2811_v24 = vmul.f32 0.1, %v2779_v62  ;;  %vm2795_vm10 = vcmp.gt.f32.partialorder %v2779_v62, 0.0 }
 0x1fd   : > { %v4026_v26 = vpop.f32.mrf.mxu0  ;;  %3459 = vst [vmem:[%s5544_s6 + $0x18] sm:$0xff] %v3435_v15   ;;  %v3962_v5 = vpop.f32.mrf.mxu1 }
 0x1fe   : > { %v2780_v3 = vadd.f32 %v5531_v53, %v2757_v56  ;;  %v2726_v9 = vadd.f32 %v4024_v49, %v2629_v34  ;;  %v3963_v6 = vadd.f32 %v3962_v5, %v3961_v30  ;;  %v4027_v8 = vadd.f32 %v4026_v26, %v4025_v27 }
 0x1ff   : > { %v4028_v39 = vpop.f32.mrf.mxu0  ;;  %v3964_v38 = vpop.f32.mrf.mxu1  ;;  %v2827_v35 = vsel %vm2795_vm10, %v2779_v62, %v2811_v24 }
 0x200   : > { %vm2796_vm11 = vcmp.gt.f32.partialorder %v2780_v3, 0.0  ;;  %v2812_v36 = vmul.f32 0.1, %v2780_v3  ;;  %v2758_v41 = vadd.f32 %v2726_v9, %v5492_v58  ;;  %v2632_v48 = vadd.f32 %v3963_v6, %v3899_v54 }
 0x201   : > { %v4029_v1 = vpop.f32.mrf.mxu0  ;;  %v3965_v50 = vpop.f32.mrf.mxu1  ;;  %v3905_v58 = vadd.f32 %v5506_v28, %v5501_v60 }
 0x202   : > { %v2828_v61 = vsel %vm2796_vm11, %v2780_v3, %v2812_v36  ;;  %v2781_v0 = vadd.f32 %v5531_v53, %v2758_v41  ;;  %v2729_v14 = vadd.f32 %v4027_v8, %v2632_v48  ;;  %v3966_v22 = vadd.f32 %v3965_v50, %v3964_v38 }
 0x203   : > { %v4031_v32 = vpop.f32.mrf.mxu0  ;;  %v3440_v59 = vpack.c.bf16 %v2828_v61, %v2827_v35  ;;  %v3967_v23 = vpop.f32.mrf.mxu1  ;;  %v4030_v19 = vadd.f32 %v4029_v1, %v4028_v39 }
 0x204   : > { %v2759_v11 = vadd.f32 %v2729_v14, %v5497_v63  ;;  %v2637_v42 = vadd.f32 %v3966_v22, %v5499_v4  ;;  %v2813_v16 = vmul.f32 0.1, %v2781_v0  ;;  %vm2797_vm12 = vcmp.gt.f32.partialorder %v2781_v0, 0.0 }
 0x205   : > { %v4032_v2 = vpop.f32.mrf.mxu0  ;;  %3460 = vst [vmem:[%s5544_s6 + $0x20] sm:$0xff] %v3440_v59   ;;  %v3968_v18 = vpop.f32.mrf.mxu1 }
 0x206   : > { %v2782_v43 = vadd.f32 %v5531_v53, %v2759_v11  ;;  %v2734_v13 = vadd.f32 %v4030_v19, %v2637_v42  ;;  %v3969_v21 = vadd.f32 %v3968_v18, %v3967_v23  ;;  %v4033_v52 = vadd.f32 %v4032_v2, %v4031_v32 }
 0x207   : > { %v4034_v37 = vpop.f32.mrf.mxu0  ;;  %v3970_v29 = vpop.f32.mrf.mxu1  ;;  %v2829_v45 = vsel %vm2797_vm12, %v2781_v0, %v2813_v16 }
 0x208   : > { %vm2798_vm13 = vcmp.gt.f32.partialorder %v2782_v43, 0.0  ;;  %v2814_v63 = vmul.f32 0.1, %v2782_v43  ;;  %v2760_v4 = vadd.f32 %v2734_v13, %v5504_v57  ;;  %v2640_v20 = vadd.f32 %v3969_v21, %v3905_v58 }
 0x209   : > { %v4035_v55 = vpop.f32.mrf.mxu0  ;;  %v3971_v60 = vpop.f32.mrf.mxu1  ;;  %v3911_v57 = vadd.f32 %v5518_v33, %v5513_v10 }
 0x20a   : > { %v2830_v28 = vsel %vm2798_vm13, %v2782_v43, %v2814_v63  ;;  %v2783_v46 = vadd.f32 %v5531_v53, %v2760_v4  ;;  %v2737_v12 = vadd.f32 %v4033_v52, %v2640_v20  ;;  %v3972_v47 = vadd.f32 %v3971_v60, %v3970_v29 }
 0x20b   : > { %v4037_v31 = vpop.f32.mrf.mxu0  ;;  %v3445_v62 = vpack.c.bf16 %v2830_v28, %v2829_v45  ;;  %v3973_v17 = vpop.f32.mrf.mxu1  ;;  %v4036_v15 = vadd.f32 %v4035_v55, %v4034_v37 }
 0x20c   : > { %v2761_v25 = vadd.f32 %v2737_v12, %v5509_v7  ;;  %v2645_v27 = vadd.f32 %v3972_v47, %v5511_v44  ;;  %v2815_v34 = vmul.f32 0.1, %v2783_v46  ;;  %vm2799_vm14 = vcmp.gt.f32.partialorder %v2783_v46, 0.0 }
 0x20d   : > { %v4038_v30 = vpop.f32.mrf.mxu0  ;;  %3461 = vst [vmem:[%s5544_s6 + $0x28] sm:$0xff] %v3445_v62   ;;  %v3974_v56 = vpop.f32.mrf.mxu1 }
 0x20e   : > { %v2784_v49 = vadd.f32 %v5531_v53, %v2761_v25  ;;  %v2742_v26 = vadd.f32 %v4036_v15, %v2645_v27  ;;  %v3975_v54 = vadd.f32 %v3974_v56, %v3973_v17  ;;  %v4039_v24 = vadd.f32 %v4038_v30, %v4037_v31 }
 0x20f   : > { %v2831_v3 = vsel %vm2799_vm14, %v2783_v46, %v2815_v34 }
 0x210   : > { %vm2800_vm15 = vcmp.gt.f32.partialorder %v2784_v49, 0.0  ;;  %v2816_v5 = vmul.f32 0.1, %v2784_v49  ;;  %v2762_v7 = vadd.f32 %v2742_v26, %v5516_v51  ;;  %v2648_v44 = vadd.f32 %v3975_v54, %v3911_v57 }
 0x212   : > { %v2832_v9 = vsel %vm2800_vm15, %v2784_v49, %v2816_v5  ;;  %v2785_v10 = vadd.f32 %v5531_v53, %v2762_v7  ;;  %v2745_v33 = vadd.f32 %v4039_v24, %v2648_v44 }
 0x213   : > { %v3450_v6 = vpack.c.bf16 %v2832_v9, %v2831_v3 }
 0x214   : > { %v2763_v39 = vadd.f32 %v2745_v33, %v5522_v40  ;;  %v2817_v8 = vmul.f32 0.1, %v2785_v10  ;;  %vm2801_vm0 = vcmp.gt.f32.partialorder %v2785_v10, 0.0 }
 0x215   : > { %3462 = vst [vmem:[%s5544_s6 + $0x30] sm:$0xff] %v3450_v6  }
 0x216   : > { %v2786_v38 = vadd.f32 %v5531_v53, %v2763_v39  ;;  %v2833_v41 = vsel %vm2801_vm0, %v2785_v10, %v2817_v8 }
 0x218   : > { %vm2802_vm1 = vcmp.gt.f32.partialorder %v2786_v38, 0.0  ;;  %v2818_v36 = vmul.f32 0.1, %v2786_v38 }
 0x21a   : > { %v2834_v48 = vsel %vm2802_vm1, %v2786_v38, %v2818_v36 }
 0x21b   : > { %v3455_v51 = vpack.c.bf16 %v2834_v48, %v2833_v41 }
 0x21d   : > { %3463 = vst [vmem:[%s5544_s6 + $0x38] sm:$0xff] %v3455_v51  }
 0x21e PF: > { %s13_s16 = sadd.s32 1, %s4345_s16   ;;  %s5618_s12 = smov %s4337_s14 }
 0x21f   : > { %p10_p7 = scmp.ge.s32.totalorder %s13_s16, 6   ;;  %s5619_s13 = smov %s4341_s15 }
 0x220   : > { %s5620_s14 = smov %s5623_s17  ;;  %s5621_s15 = smov %s5627_s18 }
 0x221   :  { %12 = sbr.rel (!%p10_p7) target bundleno = 3 (0x3), region = 65 }

</bundles_post_ra>
